<compile_context>
chip_gen: v6e
topology: v6e:2x2x1
jax: 0.10.0
libtpu: 0.0.40
codegen_flags: <defaults>
</compile_context>

<pallas_src>
import numpy as np
import jax
import jax.numpy as jnp
from jax.experimental import pallas as pl
from jax.experimental.pallas import tpu as pltpu

UPDATE_STEP = 5            # self.update_step
BASE_LR = 1e-4             # self.base_lr
N_STEPS = UPDATE_STEP + 1
LANE_PAD = 128             # lane-dense output width (cols >= N_STEPS unused)

_VMEM_LIMIT_BYTES = 32 * 1024 * 1024     # explicit scoped-VMEM limit (v7x-safe)
_VMEM_CHUNK_BUDGET = 12 * 1024 * 1024    # budget used to derive the task chunk
_ABS_MAX_CHUNK = 256


def _round_up(x, m):
    return (x + m - 1) // m * m


def _tile_bytes(rows, cols):
    """f32 VMEM footprint of a (rows, cols) slab padded to (8, 128) tiles."""
    return _round_up(max(rows, 1), 8) * _round_up(max(cols, 1), 128) * 4


def _per_task_vmem_bytes(shot, qsz, d, h):
    """Rough per-task VMEM: double-buffered pipeline blocks + working set."""
    pipe = 2 * (_tile_bytes(shot, d) + _tile_bytes(qsz, d)
                + _tile_bytes(1, shot) + _tile_bytes(1, qsz)
                + _tile_bytes(1, LANE_PAD))
    work = (2 * _tile_bytes(d, h)                    # w1f + dw1
            + 4 * _tile_bytes(1, h)                  # b1f / w2f / db1 / dw2
            + 2 * _tile_bytes(1, 1)                  # b2f / db2
            + 4 * _tile_bytes(max(shot, qsz), h)     # pre / h / dh / hq
            + 2 * _tile_bytes(1, max(shot, qsz)))    # g / residual
    return pipe + work


def _pick_chunking(task_num, shot, qsz, d, h):
    """Task chunk: multiple of 8, VMEM-derived, >=2 chunks when enough work."""
    t8 = _round_up(task_num, 8)
    per_task = _per_task_vmem_bytes(shot, qsz, d, h)
    max_chunk = max(8, min(_ABS_MAX_CHUNK,
                           (_VMEM_CHUNK_BUDGET // per_task) // 8 * 8))
    chunk = min(t8, max_chunk)
    if t8 // chunk < 2 and t8 >= 16:
        # v7x megacore: split the "parallel" grid axis across both TensorCores.
        cand = [_round_up((t8 + 1) // 2, 8), max(8, (t8 // 2) // 8 * 8)]
        chunk = min(cand, key=lambda c: (_round_up(t8, c), -c))
    t_pad = _round_up(t8, chunk)
    return chunk, t_pad


def _maml_kernel(xs_ref, ys_ref, xq_ref, yq_ref, p_ref, loss_ref):
    """One grid step == one chunk of T tasks. Runs the full MAML inner loop for
    the chunk and writes per-task, per-inner-step query losses into
    loss_ref[(T, 1, LANE_PAD)] lanes [0, N_STEPS)."""
    T, S, D = xs_ref.shape
    Q = xq_ref.shape[1]
    H = p_ref.shape[1]
    r1 = _round_up(D, 8)

    xs = xs_ref[...]                        # (T, S, D)
    xq = xq_ref[...]                        # (T, Q, D)
    ys = ys_ref[...]                        # (T, 1, S)   sample axis on lanes
    yq = yq_ref[...]                        # (T, 1, Q)

    p = p_ref[...]                          # packed meta params (single DMA)
    w1 = p[0:D, :]                          # (D, H)
    b1 = p[r1:r1 + 1, :]                    # (1, H)
    w2 = p[r1 + 8:r1 + 9, :]                # (1, H)   nn.Linear(H,1) row layout
    b2 = p[r1 + 16:r1 + 17, 0:1]            # (1, 1)

    inv_q = 1.0 / Q
    two_over_s = 2.0 / S
    flat_ok = (S % 8 == 0) and (Q % 8 == 0)   # tile-aligned flatten of the batch

    def head(hid, w2f, b2f):
        # hid (T, n, H) x w2f (T, 1, H) -> (T, 1, n); sample axis stays on lanes.
        return jnp.einsum('tkh,tnh->tkn', w2f, hid,
                          preferred_element_type=jnp.float32) + b2f

    def qry_loss(hq, w2f, b2f):
        d = head(hq, w2f, b2f) - yq                              # (T, 1, Q)
        return jnp.sum(d * d, axis=2, keepdims=True) * inv_q     # (T, 1, 1)

    # Only lanes [0, N_STEPS) are consumed by the wrapper; zero the block once.
    loss_ref[...] = jnp.zeros((T, 1, LANE_PAD), jnp.float32)

    # Head fast weights: tiny, so broadcast the meta head weight once; the bias
    # stays shared (un-broadcast) until the first update.
    w2f = jnp.broadcast_to(w2.reshape(1, 1, H), (T, 1, H))
    b2f = b2.reshape(1, 1, 1)

    # ---- step-0 query loss + first support forward share the meta W1/b1, so
    #      run their first layer as single flattened (T*Q / T*S)-row matmuls.
    if flat_ok:
        hq0 = jnp.maximum(
            jnp.dot(xq.reshape(T * Q, D), w1,
                    preferred_element_type=jnp.float32) + b1,
            0.0).reshape(T, Q, H)
        pre0 = (jnp.dot(xs.reshape(T * S, D), w1,
                        preferred_element_type=jnp.float32) + b1).reshape(T, S, H)
    else:
        w1b = jnp.broadcast_to(w1.reshape(1, D, H), (T, D, H))
        b1b = b1.reshape(1, 1, H)
        hq0 = jnp.maximum(
            jnp.einsum('tqd,tdh->tqh', xq, w1b,
                       preferred_element_type=jnp.float32) + b1b, 0.0)
        pre0 = jnp.einsum('tsd,tdh->tsh', xs, w1b,
                          preferred_element_type=jnp.float32) + b1b

    loss_ref[:, :, 0:1] = qry_loss(hq0, w2f, b2f)     # loss_list_qry[0]

    # First-layer fast weights stay shared until the first SGD update below;
    # per-task (T, D, H) weights only materialize at "w1f - BASE_LR * dw1".
    w1f = w1.reshape(1, D, H)
    b1f = b1.reshape(1, 1, H)

    pre = pre0
    for step in range(UPDATE_STEP):
        if step > 0:
            pre = jnp.einsum('tsd,tdh->tsh', xs, w1f,
                             preferred_element_type=jnp.float32) + b1f
        h = jnp.maximum(pre, 0.0)                                   # (T, S, H)

        # ---- analytic backprop of the support-set MSE ----
        g = two_over_s * (head(h, w2f, b2f) - ys)                   # (T, 1, S)
        dw2 = jnp.einsum('tks,tsh->tkh', g, h,
                         preferred_element_type=jnp.float32)        # (T, 1, H)
        db2 = jnp.sum(g, axis=2, keepdims=True)                     # (T, 1, 1)
        dh = jnp.where(pre > 0.0,
                       jnp.einsum('tks,tkh->tsh', g, w2f,
                                  preferred_element_type=jnp.float32),
                       0.0)                                         # (T, S, H)
        dw1 = jnp.einsum('tsd,tsh->tdh', xs, dh,
                         preferred_element_type=jnp.float32)        # (T, D, H)
        db1 = jnp.sum(dh, axis=1, keepdims=True)                    # (T, 1, H)

        # ---- fast-weight SGD: w <- w - base_lr * grad ----
        w1f = w1f - BASE_LR * dw1
        b1f = b1f - BASE_LR * db1
        w2f = w2f - BASE_LR * dw2
        b2f = b2f - BASE_LR * db2

        hq = jnp.maximum(
            jnp.einsum('tqd,tdh->tqh', xq, w1f,
                       preferred_element_type=jnp.float32) + b1f, 0.0)
        loss_ref[:, :, step + 1:step + 2] = qry_loss(hq, w2f, b2f)  # [step+1]


def metalearner_reg_forward(x_spt, y_spt, x_qry, y_qry, params):
    """Pallas equivalent of MetaLearnerReg.forward: per-step query loss averaged
    over tasks, shape (update_step + 1,)."""
    w1, b1, w2, b2 = params
    task_num, shot, d = x_spt.shape
    qsz = x_qry.shape[1]
    hdim = w1.shape[1]

    t_chunk, t_pad = _pick_chunking(task_num, shot, qsz, d, hdim)
    n_chunks = t_pad // t_chunk

    xs = x_spt.astype(jnp.float32)
    xq = x_qry.astype(jnp.float32)
    # y_spt.view(task_num, shot).float() semantics; sample axis on the lane dim.
    ys = y_spt.reshape(task_num, 1, shot).astype(jnp.float32)
    yq = y_qry.reshape(task_num, 1, qsz).astype(jnp.float32)

    pad_t = t_pad - task_num
    if pad_t:
        xs = jnp.pad(xs, ((0, pad_t), (0, 0), (0, 0)))
        xq = jnp.pad(xq, ((0, pad_t), (0, 0), (0, 0)))
        ys = jnp.pad(ys, ((0, pad_t), (0, 0), (0, 0)))
        yq = jnp.pad(yq, ((0, pad_t), (0, 0), (0, 0)))

    # Pack all meta parameters into one array -> one resident constant-index
    # DMA; each parameter starts on an 8-row (sublane-tile) boundary.
    r1 = _round_up(d, 8)
    pack = jnp.zeros((r1 + 24, hdim), jnp.float32)
    pack = pack.at[0:d, :].set(w1.astype(jnp.float32))
    pack = pack.at[r1, :].set(b1.astype(jnp.float32).reshape(hdim))
    pack = pack.at[r1 + 8, :].set(w2.astype(jnp.float32).reshape(hdim))
    pack = pack.at[r1 + 16, 0].set(b2.astype(jnp.float32).reshape(()))

    grid_spec = pltpu.PrefetchScalarGridSpec(
        num_scalar_prefetch=0,
        grid=(n_chunks,),
        in_specs=[
            pl.BlockSpec((t_chunk, shot, d), lambda c: (c, 0, 0)),
            pl.BlockSpec((t_chunk, 1, shot), lambda c: (c, 0, 0)),
            pl.BlockSpec((t_chunk, qsz, d), lambda c: (c, 0, 0)),
            pl.BlockSpec((t_chunk, 1, qsz), lambda c: (c, 0, 0)),
            # Packed meta params: constant index map -> resident, no re-fetch.
            pl.BlockSpec((r1 + 24, hdim), lambda c: (0, 0)),
        ],
        out_specs=pl.BlockSpec((t_chunk, 1, LANE_PAD), lambda c: (c, 0, 0)),
    )

    out = pl.pallas_call(
        _maml_kernel,
        out_shape=jax.ShapeDtypeStruct((t_pad, 1, LANE_PAD), jnp.float32),
        grid_spec=grid_spec,
        compiler_params=pltpu.CompilerParams(
            dimension_semantics=("parallel",),        # chunks are independent
            vmem_limit_bytes=_VMEM_LIMIT_BYTES),
    )(xs, ys, xq, yq, pack)

    per_task = out[:task_num, 0, :N_STEPS]            # padded tasks masked out
    return jnp.sum(per_task, axis=0) / task_num


def _ref_forward(x_spt, y_spt, x_qry, y_qry, params):
    """Pure-JAX reference (jax.grad-based) of the same meta inner loop."""
    def net(p, x):
        w1, b1, w2, b2 = p
        h = jnp.maximum(x @ w1 + b1, 0.0)
        return h @ w2.T + b2

    def mse(p, x, y):
        return jnp.mean((net(p, x) - y) ** 2)

    task_num = x_spt.shape[0]
    losses = jnp.zeros(UPDATE_STEP + 1, jnp.float32)
    for i in range(task_num):
        xs, ys = x_spt[i], y_spt[i].reshape(-1, 1)
        xq, yq = x_qry[i], y_qry[i].reshape(-1, 1)
        fw = params
        losses = losses.at[0].add(mse(fw, xq, yq))
        for k in range(UPDATE_STEP):
            g = jax.grad(mse)(fw, xs, ys)
            fw = tuple(w - BASE_LR * gw for w, gw in zip(fw, g))
            losses = losses.at[k + 1].add(mse(fw, xq, yq))
    return losses / task_num


if __name__ == "__main__":
    key = jax.random.PRNGKey(0)
    task_num, shot, query_size, D, H = 2, 8, 8, 16, 32
    ks = jax.random.split(key, 6)

    x_spt = jax.random.normal(ks[0], (task_num, shot, D), jnp.float32)
    y_spt = jax.random.normal(ks[1], (task_num, shot), jnp.float32)
    x_qry = jax.random.normal(ks[2], (task_num, query_size, D), jnp.float32)
    y_qry = jax.random.normal(ks[3], (task_num, query_size), jnp.float32)

    # Deterministic synthetic base-net parameters (D -> H -> 1 MLP).
    w1 = 0.1 * jax.random.normal(ks[4], (D, H), jnp.float32)
    b1 = jnp.zeros((1, H), jnp.float32)
    w2 = 0.1 * jax.random.normal(ks[5], (1, H), jnp.float32)
    b2 = jnp.zeros((1, 1), jnp.float32)
    params = (w1, b1, w2, b2)

    loss = metalearner_reg_forward(x_spt, y_spt, x_qry, y_qry, params)
    loss = jax.block_until_ready(loss)

    ref = _ref_forward(x_spt, y_spt, x_qry, y_qry, params)
    np.testing.assert_allclose(np.asarray(loss), np.asarray(ref),
                               rtol=1e-4, atol=1e-5)
    print("KERNEL_OK")
</pallas_src>

<mosaic_0001>
module attributes {stable_mosaic.version = 11 : i64} {
  func.func @_maml_kernel(%arg0: i32, %arg1: memref<8x8x16xf32, #tpu.memory_space<vmem>>, %arg2: memref<8x1x8xf32, #tpu.memory_space<vmem>>, %arg3: memref<8x8x16xf32, #tpu.memory_space<vmem>>, %arg4: memref<8x1x8xf32, #tpu.memory_space<vmem>>, %arg5: memref<40x32xf32, #tpu.memory_space<vmem>>, %arg6: memref<8x1x128xf32, #tpu.memory_space<vmem>>) attributes {dimension_semantics = [#tpu.dimension_semantics<parallel>], iteration_bounds = array<i64: 1>, scalar_prefetch = 0 : i64, scratch_operands = 0 : i64, tpu.core_type = #tpu.core_type<tc>, window_params = [{transform_indices = @transform_0, window_bounds = array<i64: 8, 8, 16>}, {transform_indices = @transform_1, window_bounds = array<i64: 8, 1, 8>}, {transform_indices = @transform_2, window_bounds = array<i64: 8, 8, 16>}, {transform_indices = @transform_3, window_bounds = array<i64: 8, 1, 8>}, {pipeline_mode = #tpu.pipeline_mode<synchronous>, transform_indices = @transform_4, window_bounds = array<i64: 40, 32>}, {transform_indices = @transform_5, window_bounds = array<i64: 8, 1, 128>}]} {
    %c0 = arith.constant 0 : index
    %c0_0 = arith.constant 0 : index
    %c0_1 = arith.constant 0 : index
    %0 = vector.load %arg1[%c0, %c0_0, %c0_1] : memref<8x8x16xf32, #tpu.memory_space<vmem>>, vector<8x8x16xf32>
    %c0_2 = arith.constant 0 : index
    %c0_3 = arith.constant 0 : index
    %c0_4 = arith.constant 0 : index
    %1 = vector.load %arg3[%c0_2, %c0_3, %c0_4] : memref<8x8x16xf32, #tpu.memory_space<vmem>>, vector<8x8x16xf32>
    %c0_5 = arith.constant 0 : index
    %c0_6 = arith.constant 0 : index
    %c0_7 = arith.constant 0 : index
    %2 = vector.load %arg2[%c0_5, %c0_6, %c0_7] : memref<8x1x8xf32, #tpu.memory_space<vmem>>, vector<8x1x8xf32>
    %c0_8 = arith.constant 0 : index
    %c0_9 = arith.constant 0 : index
    %c0_10 = arith.constant 0 : index
    %3 = vector.load %arg4[%c0_8, %c0_9, %c0_10] : memref<8x1x8xf32, #tpu.memory_space<vmem>>, vector<8x1x8xf32>
    %c0_11 = arith.constant 0 : index
    %c0_12 = arith.constant 0 : index
    %4 = vector.load %arg5[%c0_11, %c0_12] : memref<40x32xf32, #tpu.memory_space<vmem>>, vector<40x32xf32>
    %5 = vector.extract_strided_slice %4 {offsets = [0, 0], sizes = [16, 32], strides = [1, 1]} : vector<40x32xf32> to vector<16x32xf32>
    %6 = vector.extract_strided_slice %4 {offsets = [16, 0], sizes = [1, 32], strides = [1, 1]} : vector<40x32xf32> to vector<1x32xf32>
    %7 = vector.extract_strided_slice %4 {offsets = [24, 0], sizes = [1, 32], strides = [1, 1]} : vector<40x32xf32> to vector<1x32xf32>
    %8 = vector.extract_strided_slice %4 {offsets = [32, 0], sizes = [1, 1], strides = [1, 1]} : vector<40x32xf32> to vector<1x1xf32>
    %cst = arith.constant 0.000000e+00 : f32
    %9 = vector.broadcast %cst : f32 to vector<8x1x128xf32>
    %c0_13 = arith.constant 0 : index
    %c0_14 = arith.constant 0 : index
    %c0_15 = arith.constant 0 : index
    %10 = vector.load %arg6[%c0_13, %c0_14, %c0_15] : memref<8x1x128xf32, #tpu.memory_space<vmem>>, vector<8x1x128xf32>
    tpu.vector_store %arg6[%c0_13, %c0_14, %c0_15], %9 {strides = array<i32>} : memref<8x1x128xf32, #tpu.memory_space<vmem>>, vector<8x1x128xf32>,
    %11 = vector.shape_cast %7 : vector<1x32xf32> to vector<1x1x32xf32>
    %12 = vector.shape_cast %11 : vector<1x1x32xf32> to vector<1x1x32xf32>
    %13 = vector.broadcast %12 : vector<1x1x32xf32> to vector<8x1x32xf32>
    %14 = vector.shape_cast %8 : vector<1x1xf32> to vector<1x1x1xf32>
    %15 = vector.shape_cast %1 : vector<8x8x16xf32> to vector<64x16xf32>
    %cst_16 = arith.constant dense<0.000000e+00> : vector<64x32xf32>
    %16 = tpu.matmul %15, %5, %cst_16 {dimension_numbers = #tpu.dot_dimension_numbers<[1], [0], [0], [1], [0, 0, 1, 1], [], []>} : vector<64x16xf32>, vector<16x32xf32>, vector<64x32xf32> -> vector<64x32xf32>
    %17 = vector.broadcast %6 : vector<1x32xf32> to vector<64x32xf32>
    %18 = arith.addf %16, %17 : vector<64x32xf32>
    %cst_17 = arith.constant 0.000000e+00 : f32
    %19 = vector.broadcast %cst_17 : f32 to vector<64x32xf32>
    %20 = arith.maximumf %18, %19 : vector<64x32xf32>
    %21 = vector.shape_cast %20 : vector<64x32xf32> to vector<8x8x32xf32>
    %22 = vector.shape_cast %0 : vector<8x8x16xf32> to vector<64x16xf32>
    %cst_18 = arith.constant dense<0.000000e+00> : vector<64x32xf32>
    %23 = tpu.matmul %22, %5, %cst_18 {dimension_numbers = #tpu.dot_dimension_numbers<[1], [0], [0], [1], [0, 0, 1, 1], [], []>} : vector<64x16xf32>, vector<16x32xf32>, vector<64x32xf32> -> vector<64x32xf32>
    %24 = vector.broadcast %6 : vector<1x32xf32> to vector<64x32xf32>
    %25 = arith.addf %23, %24 : vector<64x32xf32>
    %26 = vector.shape_cast %25 : vector<64x32xf32> to vector<8x8x32xf32>
    "tpu.trace_start"() <{level = 10 : i32, message = "tkh,tnh->tkn"}> : () -> ()
    %cst_19 = arith.constant dense<0.000000e+00> : vector<8x1x8xf32>
    %27 = tpu.matmul %13, %21, %cst_19 {dimension_numbers = #tpu.dot_dimension_numbers<[2], [2], [1], [1], [0, 0, 0, 1, 1, 1], [0], [0]>} : vector<8x1x32xf32>, vector<8x8x32xf32>, vector<8x1x8xf32> -> vector<8x1x8xf32>
    "tpu.trace_stop"() : () -> ()
    %28 = vector.broadcast %14 : vector<1x1x1xf32> to vector<8x1x8xf32>
    %29 = arith.addf %27, %28 : vector<8x1x8xf32>
    %30 = arith.subf %29, %3 : vector<8x1x8xf32>
    %31 = arith.mulf %30, %30 : vector<8x1x8xf32>
    %cst_20 = arith.constant dense<0.000000e+00> : vector<8x1xf32>
    %32 = vector.multi_reduction <add>, %31, %cst_20 [2] : vector<8x1x8xf32> to vector<8x1xf32>
    %33 = vector.shape_cast %32 : vector<8x1xf32> to vector<8x1x1xf32>
    %cst_21 = arith.constant 1.250000e-01 : f32
    %34 = vector.broadcast %cst_21 : f32 to vector<8x1x1xf32>
    %35 = arith.mulf %33, %34 : vector<8x1x1xf32>
    %c0_22 = arith.constant 0 : index
    %c0_23 = arith.constant 0 : index
    %c0_24 = arith.constant 0 : index
    %36 = vector.load %arg6[%c0_22, %c0_23, %c0_24] : memref<8x1x128xf32, #tpu.memory_space<vmem>>, vector<8x1x1xf32>
    tpu.vector_store %arg6[%c0_22, %c0_23, %c0_24], %35 {strides = array<i32>} : memref<8x1x128xf32, #tpu.memory_space<vmem>>, vector<8x1x1xf32>,
    %37 = vector.shape_cast %5 : vector<16x32xf32> to vector<1x16x32xf32>
    %38 = vector.shape_cast %6 : vector<1x32xf32> to vector<1x1x32xf32>
    %cst_25 = arith.constant 0.000000e+00 : f32
    %39 = vector.broadcast %cst_25 : f32 to vector<8x8x32xf32>
    %40 = arith.maximumf %26, %39 : vector<8x8x32xf32>
    "tpu.trace_start"() <{level = 10 : i32, message = "tkh,tnh->tkn"}> : () -> ()
    %cst_26 = arith.constant dense<0.000000e+00> : vector<8x1x8xf32>
    %41 = tpu.matmul %13, %40, %cst_26 {dimension_numbers = #tpu.dot_dimension_numbers<[2], [2], [1], [1], [0, 0, 0, 1, 1, 1], [0], [0]>} : vector<8x1x32xf32>, vector<8x8x32xf32>, vector<8x1x8xf32> -> vector<8x1x8xf32>
    "tpu.trace_stop"() : () -> ()
    %42 = vector.broadcast %14 : vector<1x1x1xf32> to vector<8x1x8xf32>
    %43 = arith.addf %41, %42 : vector<8x1x8xf32>
    %44 = arith.subf %43, %2 : vector<8x1x8xf32>
    %cst_27 = arith.constant 2.500000e-01 : f32
    %45 = vector.broadcast %cst_27 : f32 to vector<8x1x8xf32>
    %46 = arith.mulf %45, %44 : vector<8x1x8xf32>
    "tpu.trace_start"() <{level = 10 : i32, message = "tks,tsh->tkh"}> : () -> ()
    %cst_28 = arith.constant dense<0.000000e+00> : vector<8x1x32xf32>
    %47 = tpu.matmul %46, %40, %cst_28 {dimension_numbers = #tpu.dot_dimension_numbers<[2], [1], [1], [2], [0, 0, 0, 1, 1, 2], [0], [0]>} : vector<8x1x8xf32>, vector<8x8x32xf32>, vector<8x1x32xf32> -> vector<8x1x32xf32>
    "tpu.trace_stop"() : () -> ()
    %cst_29 = arith.constant dense<0.000000e+00> : vector<8x1xf32>
    %48 = vector.multi_reduction <add>, %46, %cst_29 [2] : vector<8x1x8xf32> to vector<8x1xf32>
    %49 = vector.shape_cast %48 : vector<8x1xf32> to vector<8x1x1xf32>
    %cst_30 = arith.constant 0.000000e+00 : f32
    %50 = vector.broadcast %cst_30 : f32 to vector<8x8x32xf32>
    %51 = arith.cmpf ogt, %26, %50 : vector<8x8x32xf32>
    "tpu.trace_start"() <{level = 10 : i32, message = "tks,tkh->tsh"}> : () -> ()
    %cst_31 = arith.constant dense<0.000000e+00> : vector<8x8x32xf32>
    %52 = tpu.matmul %46, %13, %cst_31 {dimension_numbers = #tpu.dot_dimension_numbers<[1], [1], [2], [2], [0, 0, 0, 2, 1, 2], [0], [0]>} : vector<8x1x8xf32>, vector<8x1x32xf32>, vector<8x8x32xf32> -> vector<8x8x32xf32>
    %cst_32 = arith.constant 0.000000e+00 : f32
    "tpu.trace_stop"() : () -> ()
    %53 = vector.broadcast %cst_32 : f32 to vector<8x8x32xf32>
    %54 = arith.select %51, %52, %53 : vector<8x8x32xi1>, vector<8x8x32xf32>
    "tpu.trace_start"() <{level = 10 : i32, message = "tsd,tsh->tdh"}> : () -> ()
    %cst_33 = arith.constant dense<0.000000e+00> : vector<8x16x32xf32>
    %55 = tpu.matmul %0, %54, %cst_33 {dimension_numbers = #tpu.dot_dimension_numbers<[1], [1], [2], [2], [0, 0, 0, 2, 1, 2], [0], [0]>} : vector<8x8x16xf32>, vector<8x8x32xf32>, vector<8x16x32xf32> -> vector<8x16x32xf32>
    "tpu.trace_stop"() : () -> ()
    %cst_34 = arith.constant dense<0.000000e+00> : vector<8x32xf32>
    %56 = vector.multi_reduction <add>, %54, %cst_34 [1] : vector<8x8x32xf32> to vector<8x32xf32>
    %57 = vector.shape_cast %56 : vector<8x32xf32> to vector<8x1x32xf32>
    %cst_35 = arith.constant 9.99999974E-5 : f32
    %58 = vector.broadcast %cst_35 : f32 to vector<8x16x32xf32>
    %59 = arith.mulf %58, %55 : vector<8x16x32xf32>
    %60 = vector.broadcast %37 : vector<1x16x32xf32> to vector<8x16x32xf32>
    %61 = arith.subf %60, %59 : vector<8x16x32xf32>
    %cst_36 = arith.constant 9.99999974E-5 : f32
    %62 = vector.broadcast %cst_36 : f32 to vector<8x1x32xf32>
    %63 = arith.mulf %62, %57 : vector<8x1x32xf32>
    %64 = vector.broadcast %38 : vector<1x1x32xf32> to vector<8x1x32xf32>
    %65 = arith.subf %64, %63 : vector<8x1x32xf32>
    %cst_37 = arith.constant 9.99999974E-5 : f32
    %66 = vector.broadcast %cst_37 : f32 to vector<8x1x32xf32>
    %67 = arith.mulf %66, %47 : vector<8x1x32xf32>
    %68 = arith.subf %13, %67 : vector<8x1x32xf32>
    %cst_38 = arith.constant 9.99999974E-5 : f32
    %69 = vector.broadcast %cst_38 : f32 to vector<8x1x1xf32>
    %70 = arith.mulf %69, %49 : vector<8x1x1xf32>
    %71 = vector.broadcast %14 : vector<1x1x1xf32> to vector<8x1x1xf32>
    %72 = arith.subf %71, %70 : vector<8x1x1xf32>
    "tpu.trace_start"() <{level = 10 : i32, message = "tqd,tdh->tqh"}> : () -> ()
    %cst_39 = arith.constant dense<0.000000e+00> : vector<8x8x32xf32>
    %73 = tpu.matmul %1, %61, %cst_39 {dimension_numbers = #tpu.dot_dimension_numbers<[2], [1], [1], [2], [0, 0, 0, 1, 1, 2], [0], [0]>} : vector<8x8x16xf32>, vector<8x16x32xf32>, vector<8x8x32xf32> -> vector<8x8x32xf32>
    "tpu.trace_stop"() : () -> ()
    %74 = vector.broadcast %65 : vector<8x1x32xf32> to vector<8x8x32xf32>
    %75 = arith.addf %73, %74 : vector<8x8x32xf32>
    %cst_40 = arith.constant 0.000000e+00 : f32
    %76 = vector.broadcast %cst_40 : f32 to vector<8x8x32xf32>
    %77 = arith.maximumf %75, %76 : vector<8x8x32xf32>
    "tpu.trace_start"() <{level = 10 : i32, message = "tkh,tnh->tkn"}> : () -> ()
    %cst_41 = arith.constant dense<0.000000e+00> : vector<8x1x8xf32>
    %78 = tpu.matmul %68, %77, %cst_41 {dimension_numbers = #tpu.dot_dimension_numbers<[2], [2], [1], [1], [0, 0, 0, 1, 1, 1], [0], [0]>} : vector<8x1x32xf32>, vector<8x8x32xf32>, vector<8x1x8xf32> -> vector<8x1x8xf32>
    "tpu.trace_stop"() : () -> ()
    %79 = vector.broadcast %72 : vector<8x1x1xf32> to vector<8x1x8xf32>
    %80 = arith.addf %78, %79 : vector<8x1x8xf32>
    %81 = arith.subf %80, %3 : vector<8x1x8xf32>
    %82 = arith.mulf %81, %81 : vector<8x1x8xf32>
    %cst_42 = arith.constant dense<0.000000e+00> : vector<8x1xf32>
    %83 = vector.multi_reduction <add>, %82, %cst_42 [2] : vector<8x1x8xf32> to vector<8x1xf32>
    %84 = vector.shape_cast %83 : vector<8x1xf32> to vector<8x1x1xf32>
    %cst_43 = arith.constant 1.250000e-01 : f32
    %85 = vector.broadcast %cst_43 : f32 to vector<8x1x1xf32>
    %86 = arith.mulf %84, %85 : vector<8x1x1xf32>
    %c0_44 = arith.constant 0 : index
    %c0_45 = arith.constant 0 : index
    %c1 = arith.constant 1 : index
    %87 = vector.load %arg6[%c0_44, %c0_45, %c1] : memref<8x1x128xf32, #tpu.memory_space<vmem>>, vector<8x1x1xf32>
    tpu.vector_store %arg6[%c0_44, %c0_45, %c1], %86 {strides = array<i32>} : memref<8x1x128xf32, #tpu.memory_space<vmem>>, vector<8x1x1xf32>,
    "tpu.trace_start"() <{level = 10 : i32, message = "tsd,tdh->tsh"}> : () -> ()
    %cst_46 = arith.constant dense<0.000000e+00> : vector<8x8x32xf32>
    %88 = tpu.matmul %0, %61, %cst_46 {dimension_numbers = #tpu.dot_dimension_numbers<[2], [1], [1], [2], [0, 0, 0, 1, 1, 2], [0], [0]>} : vector<8x8x16xf32>, vector<8x16x32xf32>, vector<8x8x32xf32> -> vector<8x8x32xf32>
    "tpu.trace_stop"() : () -> ()
    %89 = vector.broadcast %65 : vector<8x1x32xf32> to vector<8x8x32xf32>
    %90 = arith.addf %88, %89 : vector<8x8x32xf32>
    %cst_47 = arith.constant 0.000000e+00 : f32
    %91 = vector.broadcast %cst_47 : f32 to vector<8x8x32xf32>
    %92 = arith.maximumf %90, %91 : vector<8x8x32xf32>
    "tpu.trace_start"() <{level = 10 : i32, message = "tkh,tnh->tkn"}> : () -> ()
    %cst_48 = arith.constant dense<0.000000e+00> : vector<8x1x8xf32>
    %93 = tpu.matmul %68, %92, %cst_48 {dimension_numbers = #tpu.dot_dimension_numbers<[2], [2], [1], [1], [0, 0, 0, 1, 1, 1], [0], [0]>} : vector<8x1x32xf32>, vector<8x8x32xf32>, vector<8x1x8xf32> -> vector<8x1x8xf32>
    "tpu.trace_stop"() : () -> ()
    %94 = vector.broadcast %72 : vector<8x1x1xf32> to vector<8x1x8xf32>
    %95 = arith.addf %93, %94 : vector<8x1x8xf32>
    %96 = arith.subf %95, %2 : vector<8x1x8xf32>
    %cst_49 = arith.constant 2.500000e-01 : f32
    %97 = vector.broadcast %cst_49 : f32 to vector<8x1x8xf32>
    %98 = arith.mulf %97, %96 : vector<8x1x8xf32>
    "tpu.trace_start"() <{level = 10 : i32, message = "tks,tsh->tkh"}> : () -> ()
    %cst_50 = arith.constant dense<0.000000e+00> : vector<8x1x32xf32>
    %99 = tpu.matmul %98, %92, %cst_50 {dimension_numbers = #tpu.dot_dimension_numbers<[2], [1], [1], [2], [0, 0, 0, 1, 1, 2], [0], [0]>} : vector<8x1x8xf32>, vector<8x8x32xf32>, vector<8x1x32xf32> -> vector<8x1x32xf32>
    "tpu.trace_stop"() : () -> ()
    %cst_51 = arith.constant dense<0.000000e+00> : vector<8x1xf32>
    %100 = vector.multi_reduction <add>, %98, %cst_51 [2] : vector<8x1x8xf32> to vector<8x1xf32>
    %101 = vector.shape_cast %100 : vector<8x1xf32> to vector<8x1x1xf32>
    %cst_52 = arith.constant 0.000000e+00 : f32
    %102 = vector.broadcast %cst_52 : f32 to vector<8x8x32xf32>
    %103 = arith.cmpf ogt, %90, %102 : vector<8x8x32xf32>
    "tpu.trace_start"() <{level = 10 : i32, message = "tks,tkh->tsh"}> : () -> ()
    %cst_53 = arith.constant dense<0.000000e+00> : vector<8x8x32xf32>
    %104 = tpu.matmul %98, %68, %cst_53 {dimension_numbers = #tpu.dot_dimension_numbers<[1], [1], [2], [2], [0, 0, 0, 2, 1, 2], [0], [0]>} : vector<8x1x8xf32>, vector<8x1x32xf32>, vector<8x8x32xf32> -> vector<8x8x32xf32>
    %cst_54 = arith.constant 0.000000e+00 : f32
    "tpu.trace_stop"() : () -> ()
    %105 = vector.broadcast %cst_54 : f32 to vector<8x8x32xf32>
    %106 = arith.select %103, %104, %105 : vector<8x8x32xi1>, vector<8x8x32xf32>
    "tpu.trace_start"() <{level = 10 : i32, message = "tsd,tsh->tdh"}> : () -> ()
    %cst_55 = arith.constant dense<0.000000e+00> : vector<8x16x32xf32>
    %107 = tpu.matmul %0, %106, %cst_55 {dimension_numbers = #tpu.dot_dimension_numbers<[1], [1], [2], [2], [0, 0, 0, 2, 1, 2], [0], [0]>} : vector<8x8x16xf32>, vector<8x8x32xf32>, vector<8x16x32xf32> -> vector<8x16x32xf32>
    "tpu.trace_stop"() : () -> ()
    %cst_56 = arith.constant dense<0.000000e+00> : vector<8x32xf32>
    %108 = vector.multi_reduction <add>, %106, %cst_56 [1] : vector<8x8x32xf32> to vector<8x32xf32>
    %109 = vector.shape_cast %108 : vector<8x32xf32> to vector<8x1x32xf32>
    %cst_57 = arith.constant 9.99999974E-5 : f32
    %110 = vector.broadcast %cst_57 : f32 to vector<8x16x32xf32>
    %111 = arith.mulf %110, %107 : vector<8x16x32xf32>
    %112 = arith.subf %61, %111 : vector<8x16x32xf32>
    %cst_58 = arith.constant 9.99999974E-5 : f32
    %113 = vector.broadcast %cst_58 : f32 to vector<8x1x32xf32>
    %114 = arith.mulf %113, %109 : vector<8x1x32xf32>
    %115 = arith.subf %65, %114 : vector<8x1x32xf32>
    %cst_59 = arith.constant 9.99999974E-5 : f32
    %116 = vector.broadcast %cst_59 : f32 to vector<8x1x32xf32>
    %117 = arith.mulf %116, %99 : vector<8x1x32xf32>
    %118 = arith.subf %68, %117 : vector<8x1x32xf32>
    %cst_60 = arith.constant 9.99999974E-5 : f32
    %119 = vector.broadcast %cst_60 : f32 to vector<8x1x1xf32>
    %120 = arith.mulf %119, %101 : vector<8x1x1xf32>
    %121 = arith.subf %72, %120 : vector<8x1x1xf32>
    "tpu.trace_start"() <{level = 10 : i32, message = "tqd,tdh->tqh"}> : () -> ()
    %cst_61 = arith.constant dense<0.000000e+00> : vector<8x8x32xf32>
    %122 = tpu.matmul %1, %112, %cst_61 {dimension_numbers = #tpu.dot_dimension_numbers<[2], [1], [1], [2], [0, 0, 0, 1, 1, 2], [0], [0]>} : vector<8x8x16xf32>, vector<8x16x32xf32>, vector<8x8x32xf32> -> vector<8x8x32xf32>
    "tpu.trace_stop"() : () -> ()
    %123 = vector.broadcast %115 : vector<8x1x32xf32> to vector<8x8x32xf32>
    %124 = arith.addf %122, %123 : vector<8x8x32xf32>
    %cst_62 = arith.constant 0.000000e+00 : f32
    %125 = vector.broadcast %cst_62 : f32 to vector<8x8x32xf32>
    %126 = arith.maximumf %124, %125 : vector<8x8x32xf32>
    "tpu.trace_start"() <{level = 10 : i32, message = "tkh,tnh->tkn"}> : () -> ()
    %cst_63 = arith.constant dense<0.000000e+00> : vector<8x1x8xf32>
    %127 = tpu.matmul %118, %126, %cst_63 {dimension_numbers = #tpu.dot_dimension_numbers<[2], [2], [1], [1], [0, 0, 0, 1, 1, 1], [0], [0]>} : vector<8x1x32xf32>, vector<8x8x32xf32>, vector<8x1x8xf32> -> vector<8x1x8xf32>
    "tpu.trace_stop"() : () -> ()
    %128 = vector.broadcast %121 : vector<8x1x1xf32> to vector<8x1x8xf32>
    %129 = arith.addf %127, %128 : vector<8x1x8xf32>
    %130 = arith.subf %129, %3 : vector<8x1x8xf32>
    %131 = arith.mulf %130, %130 : vector<8x1x8xf32>
    %cst_64 = arith.constant dense<0.000000e+00> : vector<8x1xf32>
    %132 = vector.multi_reduction <add>, %131, %cst_64 [2] : vector<8x1x8xf32> to vector<8x1xf32>
    %133 = vector.shape_cast %132 : vector<8x1xf32> to vector<8x1x1xf32>
    %cst_65 = arith.constant 1.250000e-01 : f32
    %134 = vector.broadcast %cst_65 : f32 to vector<8x1x1xf32>
    %135 = arith.mulf %133, %134 : vector<8x1x1xf32>
    %c0_66 = arith.constant 0 : index
    %c0_67 = arith.constant 0 : index
    %c2 = arith.constant 2 : index
    %136 = vector.load %arg6[%c0_66, %c0_67, %c2] : memref<8x1x128xf32, #tpu.memory_space<vmem>>, vector<8x1x1xf32>
    tpu.vector_store %arg6[%c0_66, %c0_67, %c2], %135 {strides = array<i32>} : memref<8x1x128xf32, #tpu.memory_space<vmem>>, vector<8x1x1xf32>,
    "tpu.trace_start"() <{level = 10 : i32, message = "tsd,tdh->tsh"}> : () -> ()
    %cst_68 = arith.constant dense<0.000000e+00> : vector<8x8x32xf32>
    %137 = tpu.matmul %0, %112, %cst_68 {dimension_numbers = #tpu.dot_dimension_numbers<[2], [1], [1], [2], [0, 0, 0, 1, 1, 2], [0], [0]>} : vector<8x8x16xf32>, vector<8x16x32xf32>, vector<8x8x32xf32> -> vector<8x8x32xf32>
    "tpu.trace_stop"() : () -> ()
    %138 = vector.broadcast %115 : vector<8x1x32xf32> to vector<8x8x32xf32>
    %139 = arith.addf %137, %138 : vector<8x8x32xf32>
    %cst_69 = arith.constant 0.000000e+00 : f32
    %140 = vector.broadcast %cst_69 : f32 to vector<8x8x32xf32>
    %141 = arith.maximumf %139, %140 : vector<8x8x32xf32>
    "tpu.trace_start"() <{level = 10 : i32, message = "tkh,tnh->tkn"}> : () -> ()
    %cst_70 = arith.constant dense<0.000000e+00> : vector<8x1x8xf32>
    %142 = tpu.matmul %118, %141, %cst_70 {dimension_numbers = #tpu.dot_dimension_numbers<[2], [2], [1], [1], [0, 0, 0, 1, 1, 1], [0], [0]>} : vector<8x1x32xf32>, vector<8x8x32xf32>, vector<8x1x8xf32> -> vector<8x1x8xf32>
    "tpu.trace_stop"() : () -> ()
    %143 = vector.broadcast %121 : vector<8x1x1xf32> to vector<8x1x8xf32>
    %144 = arith.addf %142, %143 : vector<8x1x8xf32>
    %145 = arith.subf %144, %2 : vector<8x1x8xf32>
    %cst_71 = arith.constant 2.500000e-01 : f32
    %146 = vector.broadcast %cst_71 : f32 to vector<8x1x8xf32>
    %147 = arith.mulf %146, %145 : vector<8x1x8xf32>
    "tpu.trace_start"() <{level = 10 : i32, message = "tks,tsh->tkh"}> : () -> ()
    %cst_72 = arith.constant dense<0.000000e+00> : vector<8x1x32xf32>
    %148 = tpu.matmul %147, %141, %cst_72 {dimension_numbers = #tpu.dot_dimension_numbers<[2], [1], [1], [2], [0, 0, 0, 1, 1, 2], [0], [0]>} : vector<8x1x8xf32>, vector<8x8x32xf32>, vector<8x1x32xf32> -> vector<8x1x32xf32>
    "tpu.trace_stop"() : () -> ()
    %cst_73 = arith.constant dense<0.000000e+00> : vector<8x1xf32>
    %149 = vector.multi_reduction <add>, %147, %cst_73 [2] : vector<8x1x8xf32> to vector<8x1xf32>
    %150 = vector.shape_cast %149 : vector<8x1xf32> to vector<8x1x1xf32>
    %cst_74 = arith.constant 0.000000e+00 : f32
    %151 = vector.broadcast %cst_74 : f32 to vector<8x8x32xf32>
    %152 = arith.cmpf ogt, %139, %151 : vector<8x8x32xf32>
    "tpu.trace_start"() <{level = 10 : i32, message = "tks,tkh->tsh"}> : () -> ()
    %cst_75 = arith.constant dense<0.000000e+00> : vector<8x8x32xf32>
    %153 = tpu.matmul %147, %118, %cst_75 {dimension_numbers = #tpu.dot_dimension_numbers<[1], [1], [2], [2], [0, 0, 0, 2, 1, 2], [0], [0]>} : vector<8x1x8xf32>, vector<8x1x32xf32>, vector<8x8x32xf32> -> vector<8x8x32xf32>
    %cst_76 = arith.constant 0.000000e+00 : f32
    "tpu.trace_stop"() : () -> ()
    %154 = vector.broadcast %cst_76 : f32 to vector<8x8x32xf32>
    %155 = arith.select %152, %153, %154 : vector<8x8x32xi1>, vector<8x8x32xf32>
    "tpu.trace_start"() <{level = 10 : i32, message = "tsd,tsh->tdh"}> : () -> ()
    %cst_77 = arith.constant dense<0.000000e+00> : vector<8x16x32xf32>
    %156 = tpu.matmul %0, %155, %cst_77 {dimension_numbers = #tpu.dot_dimension_numbers<[1], [1], [2], [2], [0, 0, 0, 2, 1, 2], [0], [0]>} : vector<8x8x16xf32>, vector<8x8x32xf32>, vector<8x16x32xf32> -> vector<8x16x32xf32>
    "tpu.trace_stop"() : () -> ()
    %cst_78 = arith.constant dense<0.000000e+00> : vector<8x32xf32>
    %157 = vector.multi_reduction <add>, %155, %cst_78 [1] : vector<8x8x32xf32> to vector<8x32xf32>
    %158 = vector.shape_cast %157 : vector<8x32xf32> to vector<8x1x32xf32>
    %cst_79 = arith.constant 9.99999974E-5 : f32
    %159 = vector.broadcast %cst_79 : f32 to vector<8x16x32xf32>
    %160 = arith.mulf %159, %156 : vector<8x16x32xf32>
    %161 = arith.subf %112, %160 : vector<8x16x32xf32>
    %cst_80 = arith.constant 9.99999974E-5 : f32
    %162 = vector.broadcast %cst_80 : f32 to vector<8x1x32xf32>
    %163 = arith.mulf %162, %158 : vector<8x1x32xf32>
    %164 = arith.subf %115, %163 : vector<8x1x32xf32>
    %cst_81 = arith.constant 9.99999974E-5 : f32
    %165 = vector.broadcast %cst_81 : f32 to vector<8x1x32xf32>
    %166 = arith.mulf %165, %148 : vector<8x1x32xf32>
    %167 = arith.subf %118, %166 : vector<8x1x32xf32>
    %cst_82 = arith.constant 9.99999974E-5 : f32
    %168 = vector.broadcast %cst_82 : f32 to vector<8x1x1xf32>
    %169 = arith.mulf %168, %150 : vector<8x1x1xf32>
    %170 = arith.subf %121, %169 : vector<8x1x1xf32>
    "tpu.trace_start"() <{level = 10 : i32, message = "tqd,tdh->tqh"}> : () -> ()
    %cst_83 = arith.constant dense<0.000000e+00> : vector<8x8x32xf32>
    %171 = tpu.matmul %1, %161, %cst_83 {dimension_numbers = #tpu.dot_dimension_numbers<[2], [1], [1], [2], [0, 0, 0, 1, 1, 2], [0], [0]>} : vector<8x8x16xf32>, vector<8x16x32xf32>, vector<8x8x32xf32> -> vector<8x8x32xf32>
    "tpu.trace_stop"() : () -> ()
    %172 = vector.broadcast %164 : vector<8x1x32xf32> to vector<8x8x32xf32>
    %173 = arith.addf %171, %172 : vector<8x8x32xf32>
    %cst_84 = arith.constant 0.000000e+00 : f32
    %174 = vector.broadcast %cst_84 : f32 to vector<8x8x32xf32>
    %175 = arith.maximumf %173, %174 : vector<8x8x32xf32>
    "tpu.trace_start"() <{level = 10 : i32, message = "tkh,tnh->tkn"}> : () -> ()
    %cst_85 = arith.constant dense<0.000000e+00> : vector<8x1x8xf32>
    %176 = tpu.matmul %167, %175, %cst_85 {dimension_numbers = #tpu.dot_dimension_numbers<[2], [2], [1], [1], [0, 0, 0, 1, 1, 1], [0], [0]>} : vector<8x1x32xf32>, vector<8x8x32xf32>, vector<8x1x8xf32> -> vector<8x1x8xf32>
    "tpu.trace_stop"() : () -> ()
    %177 = vector.broadcast %170 : vector<8x1x1xf32> to vector<8x1x8xf32>
    %178 = arith.addf %176, %177 : vector<8x1x8xf32>
    %179 = arith.subf %178, %3 : vector<8x1x8xf32>
    %180 = arith.mulf %179, %179 : vector<8x1x8xf32>
    %cst_86 = arith.constant dense<0.000000e+00> : vector<8x1xf32>
    %181 = vector.multi_reduction <add>, %180, %cst_86 [2] : vector<8x1x8xf32> to vector<8x1xf32>
    %182 = vector.shape_cast %181 : vector<8x1xf32> to vector<8x1x1xf32>
    %cst_87 = arith.constant 1.250000e-01 : f32
    %183 = vector.broadcast %cst_87 : f32 to vector<8x1x1xf32>
    %184 = arith.mulf %182, %183 : vector<8x1x1xf32>
    %c0_88 = arith.constant 0 : index
    %c0_89 = arith.constant 0 : index
    %c3 = arith.constant 3 : index
    %185 = vector.load %arg6[%c0_88, %c0_89, %c3] : memref<8x1x128xf32, #tpu.memory_space<vmem>>, vector<8x1x1xf32>
    tpu.vector_store %arg6[%c0_88, %c0_89, %c3], %184 {strides = array<i32>} : memref<8x1x128xf32, #tpu.memory_space<vmem>>, vector<8x1x1xf32>,
    "tpu.trace_start"() <{level = 10 : i32, message = "tsd,tdh->tsh"}> : () -> ()
    %cst_90 = arith.constant dense<0.000000e+00> : vector<8x8x32xf32>
    %186 = tpu.matmul %0, %161, %cst_90 {dimension_numbers = #tpu.dot_dimension_numbers<[2], [1], [1], [2], [0, 0, 0, 1, 1, 2], [0], [0]>} : vector<8x8x16xf32>, vector<8x16x32xf32>, vector<8x8x32xf32> -> vector<8x8x32xf32>
    "tpu.trace_stop"() : () -> ()
    %187 = vector.broadcast %164 : vector<8x1x32xf32> to vector<8x8x32xf32>
    %188 = arith.addf %186, %187 : vector<8x8x32xf32>
    %cst_91 = arith.constant 0.000000e+00 : f32
    %189 = vector.broadcast %cst_91 : f32 to vector<8x8x32xf32>
    %190 = arith.maximumf %188, %189 : vector<8x8x32xf32>
    "tpu.trace_start"() <{level = 10 : i32, message = "tkh,tnh->tkn"}> : () -> ()
    %cst_92 = arith.constant dense<0.000000e+00> : vector<8x1x8xf32>
    %191 = tpu.matmul %167, %190, %cst_92 {dimension_numbers = #tpu.dot_dimension_numbers<[2], [2], [1], [1], [0, 0, 0, 1, 1, 1], [0], [0]>} : vector<8x1x32xf32>, vector<8x8x32xf32>, vector<8x1x8xf32> -> vector<8x1x8xf32>
    "tpu.trace_stop"() : () -> ()
    %192 = vector.broadcast %170 : vector<8x1x1xf32> to vector<8x1x8xf32>
    %193 = arith.addf %191, %192 : vector<8x1x8xf32>
    %194 = arith.subf %193, %2 : vector<8x1x8xf32>
    %cst_93 = arith.constant 2.500000e-01 : f32
    %195 = vector.broadcast %cst_93 : f32 to vector<8x1x8xf32>
    %196 = arith.mulf %195, %194 : vector<8x1x8xf32>
    "tpu.trace_start"() <{level = 10 : i32, message = "tks,tsh->tkh"}> : () -> ()
    %cst_94 = arith.constant dense<0.000000e+00> : vector<8x1x32xf32>
    %197 = tpu.matmul %196, %190, %cst_94 {dimension_numbers = #tpu.dot_dimension_numbers<[2], [1], [1], [2], [0, 0, 0, 1, 1, 2], [0], [0]>} : vector<8x1x8xf32>, vector<8x8x32xf32>, vector<8x1x32xf32> -> vector<8x1x32xf32>
    "tpu.trace_stop"() : () -> ()
    %cst_95 = arith.constant dense<0.000000e+00> : vector<8x1xf32>
    %198 = vector.multi_reduction <add>, %196, %cst_95 [2] : vector<8x1x8xf32> to vector<8x1xf32>
    %199 = vector.shape_cast %198 : vector<8x1xf32> to vector<8x1x1xf32>
    %cst_96 = arith.constant 0.000000e+00 : f32
    %200 = vector.broadcast %cst_96 : f32 to vector<8x8x32xf32>
    %201 = arith.cmpf ogt, %188, %200 : vector<8x8x32xf32>
    "tpu.trace_start"() <{level = 10 : i32, message = "tks,tkh->tsh"}> : () -> ()
    %cst_97 = arith.constant dense<0.000000e+00> : vector<8x8x32xf32>
    %202 = tpu.matmul %196, %167, %cst_97 {dimension_numbers = #tpu.dot_dimension_numbers<[1], [1], [2], [2], [0, 0, 0, 2, 1, 2], [0], [0]>} : vector<8x1x8xf32>, vector<8x1x32xf32>, vector<8x8x32xf32> -> vector<8x8x32xf32>
    %cst_98 = arith.constant 0.000000e+00 : f32
    "tpu.trace_stop"() : () -> ()
    %203 = vector.broadcast %cst_98 : f32 to vector<8x8x32xf32>
    %204 = arith.select %201, %202, %203 : vector<8x8x32xi1>, vector<8x8x32xf32>
    "tpu.trace_start"() <{level = 10 : i32, message = "tsd,tsh->tdh"}> : () -> ()
    %cst_99 = arith.constant dense<0.000000e+00> : vector<8x16x32xf32>
    %205 = tpu.matmul %0, %204, %cst_99 {dimension_numbers = #tpu.dot_dimension_numbers<[1], [1], [2], [2], [0, 0, 0, 2, 1, 2], [0], [0]>} : vector<8x8x16xf32>, vector<8x8x32xf32>, vector<8x16x32xf32> -> vector<8x16x32xf32>
    "tpu.trace_stop"() : () -> ()
    %cst_100 = arith.constant dense<0.000000e+00> : vector<8x32xf32>
    %206 = vector.multi_reduction <add>, %204, %cst_100 [1] : vector<8x8x32xf32> to vector<8x32xf32>
    %207 = vector.shape_cast %206 : vector<8x32xf32> to vector<8x1x32xf32>
    %cst_101 = arith.constant 9.99999974E-5 : f32
    %208 = vector.broadcast %cst_101 : f32 to vector<8x16x32xf32>
    %209 = arith.mulf %208, %205 : vector<8x16x32xf32>
    %210 = arith.subf %161, %209 : vector<8x16x32xf32>
    %cst_102 = arith.constant 9.99999974E-5 : f32
    %211 = vector.broadcast %cst_102 : f32 to vector<8x1x32xf32>
    %212 = arith.mulf %211, %207 : vector<8x1x32xf32>
    %213 = arith.subf %164, %212 : vector<8x1x32xf32>
    %cst_103 = arith.constant 9.99999974E-5 : f32
    %214 = vector.broadcast %cst_103 : f32 to vector<8x1x32xf32>
    %215 = arith.mulf %214, %197 : vector<8x1x32xf32>
    %216 = arith.subf %167, %215 : vector<8x1x32xf32>
    %cst_104 = arith.constant 9.99999974E-5 : f32
    %217 = vector.broadcast %cst_104 : f32 to vector<8x1x1xf32>
    %218 = arith.mulf %217, %199 : vector<8x1x1xf32>
    %219 = arith.subf %170, %218 : vector<8x1x1xf32>
    "tpu.trace_start"() <{level = 10 : i32, message = "tqd,tdh->tqh"}> : () -> ()
    %cst_105 = arith.constant dense<0.000000e+00> : vector<8x8x32xf32>
    %220 = tpu.matmul %1, %210, %cst_105 {dimension_numbers = #tpu.dot_dimension_numbers<[2], [1], [1], [2], [0, 0, 0, 1, 1, 2], [0], [0]>} : vector<8x8x16xf32>, vector<8x16x32xf32>, vector<8x8x32xf32> -> vector<8x8x32xf32>
    "tpu.trace_stop"() : () -> ()
    %221 = vector.broadcast %213 : vector<8x1x32xf32> to vector<8x8x32xf32>
    %222 = arith.addf %220, %221 : vector<8x8x32xf32>
    %cst_106 = arith.constant 0.000000e+00 : f32
    %223 = vector.broadcast %cst_106 : f32 to vector<8x8x32xf32>
    %224 = arith.maximumf %222, %223 : vector<8x8x32xf32>
    "tpu.trace_start"() <{level = 10 : i32, message = "tkh,tnh->tkn"}> : () -> ()
    %cst_107 = arith.constant dense<0.000000e+00> : vector<8x1x8xf32>
    %225 = tpu.matmul %216, %224, %cst_107 {dimension_numbers = #tpu.dot_dimension_numbers<[2], [2], [1], [1], [0, 0, 0, 1, 1, 1], [0], [0]>} : vector<8x1x32xf32>, vector<8x8x32xf32>, vector<8x1x8xf32> -> vector<8x1x8xf32>
    "tpu.trace_stop"() : () -> ()
    %226 = vector.broadcast %219 : vector<8x1x1xf32> to vector<8x1x8xf32>
    %227 = arith.addf %225, %226 : vector<8x1x8xf32>
    %228 = arith.subf %227, %3 : vector<8x1x8xf32>
    %229 = arith.mulf %228, %228 : vector<8x1x8xf32>
    %cst_108 = arith.constant dense<0.000000e+00> : vector<8x1xf32>
    %230 = vector.multi_reduction <add>, %229, %cst_108 [2] : vector<8x1x8xf32> to vector<8x1xf32>
    %231 = vector.shape_cast %230 : vector<8x1xf32> to vector<8x1x1xf32>
    %cst_109 = arith.constant 1.250000e-01 : f32
    %232 = vector.broadcast %cst_109 : f32 to vector<8x1x1xf32>
    %233 = arith.mulf %231, %232 : vector<8x1x1xf32>
    %c0_110 = arith.constant 0 : index
    %c0_111 = arith.constant 0 : index
    %c4 = arith.constant 4 : index
    %234 = vector.load %arg6[%c0_110, %c0_111, %c4] : memref<8x1x128xf32, #tpu.memory_space<vmem>>, vector<8x1x1xf32>
    tpu.vector_store %arg6[%c0_110, %c0_111, %c4], %233 {strides = array<i32>} : memref<8x1x128xf32, #tpu.memory_space<vmem>>, vector<8x1x1xf32>,
    "tpu.trace_start"() <{level = 10 : i32, message = "tsd,tdh->tsh"}> : () -> ()
    %cst_112 = arith.constant dense<0.000000e+00> : vector<8x8x32xf32>
    %235 = tpu.matmul %0, %210, %cst_112 {dimension_numbers = #tpu.dot_dimension_numbers<[2], [1], [1], [2], [0, 0, 0, 1, 1, 2], [0], [0]>} : vector<8x8x16xf32>, vector<8x16x32xf32>, vector<8x8x32xf32> -> vector<8x8x32xf32>
    "tpu.trace_stop"() : () -> ()
    %236 = vector.broadcast %213 : vector<8x1x32xf32> to vector<8x8x32xf32>
    %237 = arith.addf %235, %236 : vector<8x8x32xf32>
    %cst_113 = arith.constant 0.000000e+00 : f32
    %238 = vector.broadcast %cst_113 : f32 to vector<8x8x32xf32>
    %239 = arith.maximumf %237, %238 : vector<8x8x32xf32>
    "tpu.trace_start"() <{level = 10 : i32, message = "tkh,tnh->tkn"}> : () -> ()
    %cst_114 = arith.constant dense<0.000000e+00> : vector<8x1x8xf32>
    %240 = tpu.matmul %216, %239, %cst_114 {dimension_numbers = #tpu.dot_dimension_numbers<[2], [2], [1], [1], [0, 0, 0, 1, 1, 1], [0], [0]>} : vector<8x1x32xf32>, vector<8x8x32xf32>, vector<8x1x8xf32> -> vector<8x1x8xf32>
    "tpu.trace_stop"() : () -> ()
    %241 = vector.broadcast %219 : vector<8x1x1xf32> to vector<8x1x8xf32>
    %242 = arith.addf %240, %241 : vector<8x1x8xf32>
    %243 = arith.subf %242, %2 : vector<8x1x8xf32>
    %cst_115 = arith.constant 2.500000e-01 : f32
    %244 = vector.broadcast %cst_115 : f32 to vector<8x1x8xf32>
    %245 = arith.mulf %244, %243 : vector<8x1x8xf32>
    "tpu.trace_start"() <{level = 10 : i32, message = "tks,tsh->tkh"}> : () -> ()
    %cst_116 = arith.constant dense<0.000000e+00> : vector<8x1x32xf32>
    %246 = tpu.matmul %245, %239, %cst_116 {dimension_numbers = #tpu.dot_dimension_numbers<[2], [1], [1], [2], [0, 0, 0, 1, 1, 2], [0], [0]>} : vector<8x1x8xf32>, vector<8x8x32xf32>, vector<8x1x32xf32> -> vector<8x1x32xf32>
    "tpu.trace_stop"() : () -> ()
    %cst_117 = arith.constant dense<0.000000e+00> : vector<8x1xf32>
    %247 = vector.multi_reduction <add>, %245, %cst_117 [2] : vector<8x1x8xf32> to vector<8x1xf32>
    %248 = vector.shape_cast %247 : vector<8x1xf32> to vector<8x1x1xf32>
    %cst_118 = arith.constant 0.000000e+00 : f32
    %249 = vector.broadcast %cst_118 : f32 to vector<8x8x32xf32>
    %250 = arith.cmpf ogt, %237, %249 : vector<8x8x32xf32>
    "tpu.trace_start"() <{level = 10 : i32, message = "tks,tkh->tsh"}> : () -> ()
    %cst_119 = arith.constant dense<0.000000e+00> : vector<8x8x32xf32>
    %251 = tpu.matmul %245, %216, %cst_119 {dimension_numbers = #tpu.dot_dimension_numbers<[1], [1], [2], [2], [0, 0, 0, 2, 1, 2], [0], [0]>} : vector<8x1x8xf32>, vector<8x1x32xf32>, vector<8x8x32xf32> -> vector<8x8x32xf32>
    %cst_120 = arith.constant 0.000000e+00 : f32
    "tpu.trace_stop"() : () -> ()
    %252 = vector.broadcast %cst_120 : f32 to vector<8x8x32xf32>
    %253 = arith.select %250, %251, %252 : vector<8x8x32xi1>, vector<8x8x32xf32>
    "tpu.trace_start"() <{level = 10 : i32, message = "tsd,tsh->tdh"}> : () -> ()
    %cst_121 = arith.constant dense<0.000000e+00> : vector<8x16x32xf32>
    %254 = tpu.matmul %0, %253, %cst_121 {dimension_numbers = #tpu.dot_dimension_numbers<[1], [1], [2], [2], [0, 0, 0, 2, 1, 2], [0], [0]>} : vector<8x8x16xf32>, vector<8x8x32xf32>, vector<8x16x32xf32> -> vector<8x16x32xf32>
    "tpu.trace_stop"() : () -> ()
    %cst_122 = arith.constant dense<0.000000e+00> : vector<8x32xf32>
    %255 = vector.multi_reduction <add>, %253, %cst_122 [1] : vector<8x8x32xf32> to vector<8x32xf32>
    %256 = vector.shape_cast %255 : vector<8x32xf32> to vector<8x1x32xf32>
    %cst_123 = arith.constant 9.99999974E-5 : f32
    %257 = vector.broadcast %cst_123 : f32 to vector<8x16x32xf32>
    %258 = arith.mulf %257, %254 : vector<8x16x32xf32>
    %259 = arith.subf %210, %258 : vector<8x16x32xf32>
    %cst_124 = arith.constant 9.99999974E-5 : f32
    %260 = vector.broadcast %cst_124 : f32 to vector<8x1x32xf32>
    %261 = arith.mulf %260, %256 : vector<8x1x32xf32>
    %262 = arith.subf %213, %261 : vector<8x1x32xf32>
    %cst_125 = arith.constant 9.99999974E-5 : f32
    %263 = vector.broadcast %cst_125 : f32 to vector<8x1x32xf32>
    %264 = arith.mulf %263, %246 : vector<8x1x32xf32>
    %265 = arith.subf %216, %264 : vector<8x1x32xf32>
    %cst_126 = arith.constant 9.99999974E-5 : f32
    %266 = vector.broadcast %cst_126 : f32 to vector<8x1x1xf32>
    %267 = arith.mulf %266, %248 : vector<8x1x1xf32>
    %268 = arith.subf %219, %267 : vector<8x1x1xf32>
    "tpu.trace_start"() <{level = 10 : i32, message = "tqd,tdh->tqh"}> : () -> ()
    %cst_127 = arith.constant dense<0.000000e+00> : vector<8x8x32xf32>
    %269 = tpu.matmul %1, %259, %cst_127 {dimension_numbers = #tpu.dot_dimension_numbers<[2], [1], [1], [2], [0, 0, 0, 1, 1, 2], [0], [0]>} : vector<8x8x16xf32>, vector<8x16x32xf32>, vector<8x8x32xf32> -> vector<8x8x32xf32>
    "tpu.trace_stop"() : () -> ()
    %270 = vector.broadcast %262 : vector<8x1x32xf32> to vector<8x8x32xf32>
    %271 = arith.addf %269, %270 : vector<8x8x32xf32>
    %cst_128 = arith.constant 0.000000e+00 : f32
    %272 = vector.broadcast %cst_128 : f32 to vector<8x8x32xf32>
    %273 = arith.maximumf %271, %272 : vector<8x8x32xf32>
    "tpu.trace_start"() <{level = 10 : i32, message = "tkh,tnh->tkn"}> : () -> ()
    %cst_129 = arith.constant dense<0.000000e+00> : vector<8x1x8xf32>
    %274 = tpu.matmul %265, %273, %cst_129 {dimension_numbers = #tpu.dot_dimension_numbers<[2], [2], [1], [1], [0, 0, 0, 1, 1, 1], [0], [0]>} : vector<8x1x32xf32>, vector<8x8x32xf32>, vector<8x1x8xf32> -> vector<8x1x8xf32>
    "tpu.trace_stop"() : () -> ()
    %275 = vector.broadcast %268 : vector<8x1x1xf32> to vector<8x1x8xf32>
    %276 = arith.addf %274, %275 : vector<8x1x8xf32>
    %277 = arith.subf %276, %3 : vector<8x1x8xf32>
    %278 = arith.mulf %277, %277 : vector<8x1x8xf32>
    %cst_130 = arith.constant dense<0.000000e+00> : vector<8x1xf32>
    %279 = vector.multi_reduction <add>, %278, %cst_130 [2] : vector<8x1x8xf32> to vector<8x1xf32>
    %280 = vector.shape_cast %279 : vector<8x1xf32> to vector<8x1x1xf32>
    %cst_131 = arith.constant 1.250000e-01 : f32
    %281 = vector.broadcast %cst_131 : f32 to vector<8x1x1xf32>
    %282 = arith.mulf %280, %281 : vector<8x1x1xf32>
    %c0_132 = arith.constant 0 : index
    %c0_133 = arith.constant 0 : index
    %c5 = arith.constant 5 : index
    %283 = vector.load %arg6[%c0_132, %c0_133, %c5] : memref<8x1x128xf32, #tpu.memory_space<vmem>>, vector<8x1x1xf32>
    tpu.vector_store %arg6[%c0_132, %c0_133, %c5], %282 {strides = array<i32>} : memref<8x1x128xf32, #tpu.memory_space<vmem>>, vector<8x1x1xf32>,
    return
  }
  func.func @transform_0(%arg0: i32) -> (i32, i32, i32) {
    %c0_i32 = arith.constant 0 : i32
    %c0_i32_0 = arith.constant 0 : i32
    %c0_i32_1 = arith.constant 0 : i32
    return %arg0, %c0_i32, %c0_i32_0 : i32, i32, i32
  }
  func.func @transform_1(%arg0: i32) -> (i32, i32, i32) {
    %c0_i32 = arith.constant 0 : i32
    %c0_i32_0 = arith.constant 0 : i32
    %c0_i32_1 = arith.constant 0 : i32
    return %arg0, %c0_i32, %c0_i32_0 : i32, i32, i32
  }
  func.func @transform_2(%arg0: i32) -> (i32, i32, i32) {
    %c0_i32 = arith.constant 0 : i32
    %c0_i32_0 = arith.constant 0 : i32
    %c0_i32_1 = arith.constant 0 : i32
    return %arg0, %c0_i32, %c0_i32_0 : i32, i32, i32
  }
  func.func @transform_3(%arg0: i32) -> (i32, i32, i32) {
    %c0_i32 = arith.constant 0 : i32
    %c0_i32_0 = arith.constant 0 : i32
    %c0_i32_1 = arith.constant 0 : i32
    return %arg0, %c0_i32, %c0_i32_0 : i32, i32, i32
  }
  func.func @transform_4(%arg0: i32) -> (i32, i32) {
    %c0_i32 = arith.constant 0 : i32
    %c0_i32_0 = arith.constant 0 : i32
    %c0_i32_1 = arith.constant 0 : i32
    return %c0_i32, %c0_i32_0 : i32, i32
  }
  func.func @transform_5(%arg0: i32) -> (i32, i32, i32) {
    %c0_i32 = arith.constant 0 : i32
    %c0_i32_0 = arith.constant 0 : i32
    %c0_i32_1 = arith.constant 0 : i32
    return %arg0, %c0_i32, %c0_i32_0 : i32, i32, i32
  }
}

</mosaic_0001>

<bundles_post_ra>
// kernel: tpu_custom_call.1
= control target key start
LH: loop header
LB: loop body
LE: loop exit
PB: predicated region body
PF: predicated region fallthrough
CT: control target
= control target key end

     0   :  { %10 = vsyncpa [#allocation3], 0  ;;  %s31083_s0 = inlined_call_operand.vmem [shape: f32[8,8,16], index: 0, kind: input, shape index: {}]   ;;  %s31084_s1 = inlined_call_operand.vmem [shape: f32[8,1,8], index: 1, kind: input, shape index: {}]   ;;  %s31085_s2 = inlined_call_operand.hbm [shape: f32[8,8,16], index: 2, kind: input, shape index: {}]   ;;  %s31086_s3 = inlined_call_operand.hbm [shape: f32[8,1,8], index: 3, kind: input, shape index: {}]   ;;  %s31087_s4 = inlined_call_operand.vmem [shape: f32[40,32], index: 4, kind: input, shape index: {}]   ;;  %s31088_s5 = inlined_call_operand.hbm [shape: f32[8,1,128], index: 5, kind: output, shape index: {}]  }
   0x1   :  { %11 = vsyncpa [#allocation6], 0 }
   0x2   :  { %12 = vsyncpa [#allocation4], 0  ;;  %s27175_s18 = smov [#allocation2]  }
   0x3   :  { %s22_s19 = sshll.u32 %s27175_s18, 4  ;;  %s23_s19 = int_to_ptr.vmem [resolvable:$true] %s22_s19 }
   0x4   :  { %s27117_s20 = scalar_lea.vmem %s23_s19, 1024  ;;  %p27122_p1 = scmp.lt.s32.totalorder %s23_s19, %s23_s19 }
   0x5   :  { %p27118_p0 = scmp.ne.s32.totalorder %s23_s19, %s27117_s20  ;;  %p27123_p2 = scmp.lt.s32.totalorder %s27117_s20, %s27117_s20 }
   0x7   :  { %p27124_p3 = por %p27123_p2, %p27122_p1 }
   0x9   :  { %p27125_p4 = pnand %p27124_p3, %p27118_p0 }
   0xb   :  { %27128 = shalt.err (!%p27125_p4)
}
   0xc   :  { %s27176_s21 = smov 128   ;;  %s27177_s22 = smov 8  }
   0xd   :  { %28 = dma.hbm_to_vmem [thread:$0]  %s31085_s2, 1024, %s23_s19, [#allocation3], %s27176_s21, %s27176_s21, %s27177_s22  }
   0xe   :  { %s27178_s25 = smov [#allocation5]  }
   0xf   :  { %s34_s26 = sshll.u32 %s27178_s25, 4  ;;  %s35_s26 = int_to_ptr.vmem [resolvable:$true] %s34_s26 }
  0x10   :  { %s27137_s27 = scalar_lea.vmem %s35_s26, 128  ;;  %p27142_p6 = scmp.lt.s32.totalorder %s35_s26, %s35_s26 }
  0x11   :  { %p27138_p5 = scmp.ne.s32.totalorder %s35_s26, %s27137_s27  ;;  %p27143_p7 = scmp.lt.s32.totalorder %s27137_s27, %s27137_s27 }
  0x13   :  { %p27144_p8 = por %p27143_p7, %p27142_p6 }
  0x15   :  { %p27145_p9 = pnand %p27144_p8, %p27138_p5 }
  0x17   :  { %27148 = shalt.err (!%p27145_p9)
}
  0x18   :  { %s27179_s28 = smov 16   ;;  %s27180_s29 = smov 1  }
  0x19   :  { %40 = dma.hbm_to_vmem [thread:$0]  %s31086_s3, 128, %s35_s26, [#allocation6], %s27179_s28, %s27179_s28, %s27180_s29  }
  0x1a   :  { %27169 = dma.done.wait [#allocation3], 1024  }
  0x1b   :  { %27170 = vsyncadd [#allocation3], 4294966272 }
  0x1c   :  { %27171 = dma.done.wait [#allocation6], 128  }
  0x1d   :  { %27172 = vsyncadd [#allocation6], 4294967168  ;;  %vm98_vm0 = vcmask 130048   ;;  %v27227_v0 = vld [vmem:[%s31087_s4 + $0x8] sm:$0xff]  ;;  %v27232_v1 = vld [vmem:[%s31087_s4] sm:$0xff]  ;;  %v31101_v18 = vmov 0.0   ;;  %v94_v21 = vlaneseq }
  0x1e   :  { %v27234_v2 = vld [vmem:[#allocation2] sm:$0xff]  ;;  %25408 = vmatprep.subr.mxu0 %v27227_v0  ;;  %v27240_v3 = vld [vmem:[#allocation2 + $0x8] sm:$0xff]  ;;  %25424 = vmatprep.subr.mxu1 %v27227_v0  ;;  %v59_v4 = vld [vmem:[#allocation2 + $0x10] sm:$0xff]  ;;  %86 = vst [vmem:[#allocation7] sm:$0x1] %v31101_v18  ;;  %vm27182_vm1 = vmmov 0  }
  0x1f   :  { %25412 = vmatprep.mubr.msk.f32.mxu0 %vm98_vm0, %v27234_v2  ;;  %25409 = vmatpush3.msra.mxu0 %v27227_v0  ;;  %v27248_v5 = vld [vmem:[%s31083_s0] sm:$0xff]  ;;  %v27255_v6 = vld [vmem:[%s31083_s0 + $0x8] sm:$0xff]  ;;  %v27263_v7 = vld [vmem:[%s31083_s0 + $0x10] sm:$0xff]  ;;  %87 = vst [vmem:[#allocation7 + $0x1] sm:$0x1] %v31101_v18  ;;  %v27183_v20 = vmov 0  }
  0x20   :  { %25410 = vmatprep.subr.mxu0 %v27232_v1  ;;  %25425 = vmatpush3.msra.mxu1 %v27227_v0  ;;  %v27266_v8 = vld [vmem:[#allocation2 + $0x18] sm:$0xff]  ;;  %v61_v9 = vld [vmem:[#allocation2 + $0x20] sm:$0xff]  ;;  %v62_v12 = vld [vmem:[#allocation2 + $0x28] sm:$0xff]  ;;  %88 = vst [vmem:[#allocation7 + $0x2] sm:$0x1] %v31101_v18  ;;  %v95_v22 = vshrl.u32 %v94_v21, 7 }
  0x21   :  { %25411 = vmatpush3.msra.mxu0 %v27232_v1  ;;  %25426 = vmatprep.subr.mxu1 %v27232_v1  ;;  %v27277_v10 = vld [vmem:[%s31083_s0 + $0x18] sm:$0xff]  ;;  %v27284_v11 = vld [vmem:[%s31083_s0 + $0x20] sm:$0xff]  ;;  %v63_v13 = vld [vmem:[#allocation2 + $0x30] sm:$0xff]  ;;  %89 = vst [vmem:[#allocation7 + $0x3] sm:$0x1] %v31101_v18  ;;  %vm370_vm2 = vcmask 261120  }
  0x22   :  { %25413 = vmatmul.mubr.msk.f32.vlgmr.msra.gmra.mxu0 %vm98_vm0, %v27240_v3  ;;  %25427 = vmatpush3.msra.mxu1 %v27232_v1  ;;  %v27294_v14 = vld [vmem:[%s31083_s0 + $0x28] sm:$0xff]  ;;  %v27300_v15 = vld [vmem:[%s31083_s0 + $0x30] sm:$0xff]  ;;  %v64_v16 = vld [vmem:[#allocation2 + $0x38] sm:$0xff]  ;;  %90 = vst [vmem:[#allocation7 + $0x4] sm:$0x1] %v31101_v18  ;;  %v27336_v23 = vsub.s32 0, %v95_v22 }
  0x23   :  { %25415 = vmatprep.mubr.msk.f32.mxu0 %vm98_vm0, %v59_v4  ;;  %25428 = vmatprep.mubr.msk.f32.mxu1 %vm98_vm0, %v27248_v5  ;;  %v27310_v17 = vld [vmem:[%s31083_s0 + $0x38] sm:$0xff]  ;;  %91 = vst [vmem:[#allocation7 + $0x5] sm:$0x1] %v31101_v18  ;;  %92 = vst [vmem:[#allocation7 + $0x6] sm:$0x1] %v31101_v18  ;;  %v27332_v19 = vld [vmem:[%s31087_s4 + $0x20] sm:$0xff] }
  0x24   :  { %25429 = vmatmul.mubr.msk.f32.vlgmr.msra.gmra.mxu1 %vm98_vm0, %v27255_v6  ;;  %25445 = vmatprep.subr.mxu1 %v31101_v18  ;;  %93 = vst [vmem:[#allocation7 + $0x7] sm:$0x1] %v31101_v18  ;;  %31246 = vst [vmem:[#allocation11_spill] sm:$0xff] %v27336_v23  ;;  %v83_v24 = vld [vmem:[%s31087_s4 + $0x10] sm:$0xff]  ;;  %v27351_v36 = vld [vmem:[%s31087_s4 + $0x18] sm:$0xff]  ;;  %vm1624_vm3 = vcmask 64512  }
  0x25   :  { %25431 = vmatprep.mubr.msk.f32.mxu1 %vm98_vm0, %v27263_v7  ;;  %25440 = vmatprep.subr.mxu0 %v31101_v18  ;;  %v27342_v25 = vrot.slane %v83_v24, %v27336_v23  ;;  %vm2277_vm4 = vcmask 1040384   ;;  %vm974_vm5 = vcmask 57344   ;;  %vm2273_vm6 = vcmask 7168  }
  0x26   :  { %25416 = vmatmul.mubr.msk.f32.gmra.mxu0 %vm98_vm0, %v27266_v8  ;;  %26994 = vset.pattern.permute.xlu0 %v27183_v20 }
  0x27   :  { %25418 = vmatprep.mubr.msk.f32.mxu0 %vm98_vm0, %v61_v9  ;;  %367 = vperm.xlu0 %26994, %v27332_v19  }
  0x28   :  { %25432 = vmatmul.mubr.msk.f32.gmra.mxu1 %vm98_vm0, %v27277_v10 }
  0x29   :  { %25434 = vmatprep.mubr.msk.f32.mxu1 %vm98_vm0, %v27284_v11 }
  0x2a   :  { %25419 = vmatmul.mubr.msk.f32.gmra.mxu0 %vm98_vm0, %v62_v12 }
  0x2b   :  { %25421 = vmatprep.mubr.msk.f32.mxu0 %vm98_vm0, %v63_v13 }
  0x2c   :  { %25435 = vmatmul.mubr.msk.f32.gmra.mxu1 %vm98_vm0, %v27294_v14 }
  0x2d   :  { %25437 = vmatprep.mubr.msk.f32.mxu1 %vm98_vm0, %v27300_v15 }
  0x2e   :  { %25422 = vmatmul.mubr.msk.f32.gmra.mxu0 %vm98_vm0, %v64_v16 }
  0x2f   :  { %25442 = vmatprep.mubr.msk.f32.mxu0 %vm27182_vm1, %v31101_v18 }
  0x30   :  { %25438 = vmatmul.mubr.msk.f32.gmra.mxu1 %vm98_vm0, %v27310_v17 }
  0x31   :  { %25447 = vmatprep.mubr.msk.f32.mxu1 %vm27182_vm1, %v31101_v18 }
  0xe2   :  { %v25414_v26 = vpop.f32.mrf.mxu0 }
  0xe3   :  { %v195_v27 = vadd.f32 %v25414_v26, %v27342_v25 }
  0xe4   :  { %v189_v28 = vpop.f32.mrf.mxu0  ;;  %v25430_v29 = vpop.f32.mrf.mxu1 }
  0xe5   :  { %v229_v30 = vmax.f32 %v195_v27, 0.0  ;;  %v190_v31 = vadd.f32 %v189_v28, %v27342_v25  ;;  %v27378_v52 = vadd.f32 %v25430_v29, %v27342_v25 }
  0xe6   :  { %v25417_v32 = vpop.f32.mrf.mxu0  ;;  %v326_v33 = vpop.f32.mrf.mxu1 }
  0xe7   :  { %v228_v34 = vmax.f32 %v190_v31, 0.0  ;;  %v205_v35 = vadd.f32 %v25417_v32, %v27342_v25  ;;  %25446 = vmatpush3.xpose.msk.msra.mxu1 %vm370_vm2, %v229_v30  ;;  %v1017_v58 = vmax.f32 %v27378_v52, 0.0  ;;  %v27393_v59 = vadd.f32 %v326_v33, %v27342_v25 }
  0xe8   :  { %v199_v37 = vpop.f32.mrf.mxu0  ;;  %25455 = vmatprep.subr.mxu1 %v31101_v18  ;;  %v25433_v38 = vpop.f32.mrf.mxu1  ;;  %vm2234_vm7 = vcmp.gt.f32.partialorder %v27378_v52, 0.0 }
  0xe9   :  { %v231_v39 = vmax.f32 %v205_v35, 0.0  ;;  %v200_v40 = vadd.f32 %v199_v37, %v27342_v25  ;;  %25441 = vmatpush3.xpose.msk.msra.mxu0 %vm370_vm2, %v228_v34  ;;  %v27398_v60 = vadd.f32 %v25433_v38, %v27342_v25  ;;  %v1016_v62 = vmax.f32 %v27393_v59, 0.0 }
  0xea   :  { %v25420_v41 = vpop.f32.mrf.mxu0  ;;  %25448 = vmatmul.mubr.msk.f32.vlgmr.msra.gmra.mxu1 %vm370_vm2, %v27351_v36  ;;  %25450 = vmatprep.subr.mxu0 %v31101_v18  ;;  %v336_v45 = vpop.f32.mrf.mxu1  ;;  %vm2233_vm8 = vcmp.gt.f32.partialorder %v27393_v59, 0.0 }
  0xeb   :  { %v230_v42 = vmax.f32 %v200_v40, 0.0  ;;  %v215_v43 = vadd.f32 %v25420_v41, %v27342_v25  ;;  %25456 = vmatpush3.xpose.msk.msra.mxu1 %vm370_vm2, %v231_v39  ;;  %25457 = vmatprep.mubr.msk.f32.mxu1 %vm27182_vm1, %v31101_v18  ;;  %v1019_v63 = vmax.f32 %v27398_v60, 0.0  ;;  %v27413_v4 = vadd.f32 %v336_v45, %v27342_v25 }
  0xec   :  { %v209_v44 = vpop.f32.mrf.mxu0  ;;  %25443 = vmatmul.mubr.msk.f32.vlgmr.msra.gmra.mxu0 %vm370_vm2, %v27351_v36  ;;  %25465 = vmatprep.subr.mxu1 %v31101_v18  ;;  %v25436_v49 = vpop.f32.mrf.mxu1  ;;  %vm2236_vm9 = vcmp.gt.f32.partialorder %v27398_v60, 0.0 }
  0xed   :  { %v233_v46 = vmax.f32 %v215_v43, 0.0  ;;  %v210_v47 = vadd.f32 %v209_v44, %v27342_v25  ;;  %25451 = vmatpush3.xpose.msk.msra.mxu0 %vm370_vm2, %v230_v42  ;;  %25452 = vmatprep.mubr.msk.f32.mxu0 %vm27182_vm1, %v31101_v18  ;;  %v27418_v9 = vadd.f32 %v25436_v49, %v27342_v25  ;;  %v1018_v16 = vmax.f32 %v27413_v4, 0.0  ;;  %v27515_v44 = vpop.permute.xlu0 %367  ;;  %v65_v49 = vld [vmem:[%s31084_s1] sm:$0x1] }
  0xee   :  { %v25423_v48 = vpop.f32.mrf.mxu0  ;;  %25458 = vmatmul.mubr.msk.f32.vlgmr.msra.gmra.mxu1 %vm370_vm2, %v27351_v36  ;;  %25460 = vmatprep.subr.mxu0 %v31101_v18  ;;  %v346_v56 = vpop.f32.mrf.mxu1  ;;  %31255 = vst [vmem:[#allocation20_spill] sm:$0xff] %v27515_v44  ;;  %vm2235_vm10 = vcmp.gt.f32.partialorder %v27413_v4, 0.0 }
  0xef   :  { %v232_v50 = vmax.f32 %v210_v47, 0.0  ;;  %v225_v51 = vadd.f32 %v25423_v48, %v27342_v25  ;;  %25466 = vmatpush3.xpose.msk.msra.mxu1 %vm370_vm2, %v233_v46  ;;  %25467 = vmatprep.mubr.msk.f32.mxu1 %vm27182_vm1, %v31101_v18  ;;  %v27427_v12 = vadd.f32 %v346_v56, %v27342_v25  ;;  %v1021_v21 = vmax.f32 %v27418_v9, 0.0  ;;  %v66_v46 = vld [vmem:[%s31084_s1 + $0x1] sm:$0x1]  ;;  %v68_v56 = vld [vmem:[%s31084_s1 + $0x3] sm:$0x1] }
  0xf0   :  { %v219_v53 = vpop.f32.mrf.mxu0  ;;  %25453 = vmatmul.mubr.msk.f32.vlgmr.msra.gmra.mxu0 %vm370_vm2, %v27351_v36  ;;  %25475 = vmatprep.subr.mxu1 %v31101_v18  ;;  %v25439_v61 = vpop.f32.mrf.mxu1  ;;  %vm2238_vm11 = vcmp.gt.f32.partialorder %v27418_v9, 0.0 }
  0xf1   :  { %v235_v54 = vmax.f32 %v225_v51, 0.0  ;;  %v220_v55 = vadd.f32 %v219_v53, %v27342_v25  ;;  %25461 = vmatpush3.xpose.msk.msra.mxu0 %vm370_vm2, %v232_v50  ;;  %25462 = vmatprep.mubr.msk.f32.mxu0 %vm27182_vm1, %v31101_v18  ;;  %v27440_v22 = vadd.f32 %v25439_v61, %v27342_v25  ;;  %v1020_v24 = vmax.f32 %v27427_v12, 0.0 }
  0xf2   :  { %25468 = vmatmul.mubr.msk.f32.vlgmr.msra.gmra.mxu1 %vm370_vm2, %v27351_v36  ;;  %25470 = vmatprep.subr.mxu0 %v31101_v18  ;;  %v356_v13 = vpop.f32.mrf.mxu1  ;;  %vm2237_vm12 = vcmp.gt.f32.partialorder %v27427_v12, 0.0 }
  0xf3   :  { %v234_v57 = vmax.f32 %v220_v55, 0.0  ;;  %25476 = vmatpush3.xpose.msk.msra.mxu1 %vm370_vm2, %v235_v54  ;;  %25477 = vmatprep.mubr.msk.f32.mxu1 %vm27182_vm1, %v31101_v18  ;;  %v27452_v26 = vadd.f32 %v356_v13, %v27342_v25  ;;  %v1023_v27 = vmax.f32 %v27440_v22, 0.0  ;;  %v67_v13 = vld [vmem:[%s31084_s1 + $0x2] sm:$0x1]  ;;  %vm2240_vm14 = vcmp.gt.f32.partialorder %v27440_v22, 0.0 }
  0xf4   :  { %25463 = vmatmul.mubr.msk.f32.vlgmr.msra.gmra.mxu0 %vm370_vm2, %v27351_v36  ;;  %25485 = vmatprep.subr.mxu1 %v31101_v18 }
  0xf5   :  { %25471 = vmatpush3.xpose.msk.msra.mxu0 %vm370_vm2, %v234_v57  ;;  %25472 = vmatprep.mubr.msk.f32.mxu0 %vm27182_vm1, %v31101_v18  ;;  %v1022_v25 = vmax.f32 %v27452_v26, 0.0  ;;  %vm2239_vm13 = vcmp.gt.f32.partialorder %v27452_v26, 0.0 }
  0xf6   :  { %25478 = vmatmul.mubr.msk.f32.vlgmr.msra.gmra.mxu1 %vm370_vm2, %v27351_v36  ;;  %25480 = vmatprep.subr.mxu0 %v31101_v18 }
  0xf7   :  { %25486 = vmatpush3.xpose.msk.msra.mxu1 %vm370_vm2, %v1017_v58  ;;  %25487 = vmatprep.mubr.msk.f32.mxu1 %vm27182_vm1, %v31101_v18 }
  0xf8   :  { %25473 = vmatmul.mubr.msk.f32.vlgmr.msra.gmra.mxu0 %vm370_vm2, %v27351_v36  ;;  %25495 = vmatprep.subr.mxu1 %v31101_v18 }
  0xf9   :  { %25481 = vmatpush3.xpose.msk.msra.mxu0 %vm370_vm2, %v1016_v62  ;;  %25482 = vmatprep.mubr.msk.f32.mxu0 %vm27182_vm1, %v31101_v18 }
  0xfa   :  { %25488 = vmatmul.mubr.msk.f32.vlgmr.msra.gmra.mxu1 %vm370_vm2, %v27351_v36  ;;  %25490 = vmatprep.subr.mxu0 %v31101_v18 }
  0xfb   :  { %25496 = vmatpush3.xpose.msk.msra.mxu1 %vm370_vm2, %v1019_v63  ;;  %25497 = vmatprep.mubr.msk.f32.mxu1 %vm27182_vm1, %v31101_v18 }
  0xfc   :  { %25483 = vmatmul.mubr.msk.f32.vlgmr.msra.gmra.mxu0 %vm370_vm2, %v27351_v36  ;;  %25505 = vmatprep.subr.mxu1 %v31101_v18 }
  0xfd   :  { %25491 = vmatpush3.xpose.msk.msra.mxu0 %vm370_vm2, %v1018_v16  ;;  %25492 = vmatprep.mubr.msk.f32.mxu0 %vm27182_vm1, %v31101_v18 }
  0xfe   :  { %25498 = vmatmul.mubr.msk.f32.vlgmr.msra.gmra.mxu1 %vm370_vm2, %v27351_v36  ;;  %25500 = vmatprep.subr.mxu0 %v31101_v18 }
  0xff   :  { %25506 = vmatpush3.xpose.msk.msra.mxu1 %vm370_vm2, %v1021_v21  ;;  %25507 = vmatprep.mubr.msk.f32.mxu1 %vm27182_vm1, %v31101_v18 }
 0x100   :  { %25493 = vmatmul.mubr.msk.f32.vlgmr.msra.gmra.mxu0 %vm370_vm2, %v27351_v36  ;;  %25515 = vmatprep.subr.mxu1 %v31101_v18 }
 0x101   :  { %25501 = vmatpush3.xpose.msk.msra.mxu0 %vm370_vm2, %v1020_v24  ;;  %25502 = vmatprep.mubr.msk.f32.mxu0 %vm27182_vm1, %v31101_v18 }
 0x102   :  { %25508 = vmatmul.mubr.msk.f32.vlgmr.msra.gmra.mxu1 %vm370_vm2, %v27351_v36  ;;  %25510 = vmatprep.subr.mxu0 %v31101_v18 }
 0x103   :  { %25516 = vmatpush3.xpose.msk.msra.mxu1 %vm370_vm2, %v1023_v27  ;;  %25517 = vmatprep.mubr.msk.f32.mxu1 %vm27182_vm1, %v31101_v18 }
 0x104   :  { %25503 = vmatmul.mubr.msk.f32.vlgmr.msra.gmra.mxu0 %vm370_vm2, %v27351_v36  ;;  %25525 = vmatprep.subr.mxu1 %v31101_v18 }
 0x105   :  { %25511 = vmatpush3.xpose.msk.msra.mxu0 %vm370_vm2, %v1022_v25  ;;  %25512 = vmatprep.mubr.msk.f32.mxu0 %vm27182_vm1, %v31101_v18 }
 0x106   :  { %25518 = vmatmul.mubr.msk.f32.vlgmr.msra.gmra.mxu1 %vm370_vm2, %v27351_v36  ;;  %25520 = vmatprep.subr.mxu0 %v31101_v18 }
 0x107   :  { %25526 = vmatpush3.msra.mxu1 %v1017_v58  ;;  %25527 = vmatprep.mubr.msk.f32.mxu1 %vm27182_vm1, %v31101_v18 }
 0x108   :  { %25513 = vmatmul.mubr.msk.f32.vlgmr.msra.gmra.mxu0 %vm370_vm2, %v27351_v36  ;;  %25535 = vmatprep.subr.mxu1 %v31101_v18 }
 0x109   :  { %25521 = vmatpush3.msra.mxu0 %v1016_v62  ;;  %25522 = vmatprep.mubr.msk.f32.mxu0 %vm27182_vm1, %v31101_v18 }
 0x10a   :  { %25530 = vmatprep.subr.mxu0 %v31101_v18 }
 0x1aa   :  { %v27499_v28 = vpop.f32.mrf.mxu1 }
 0x1ab   :  { %31247 = vst [vmem:[#allocation12_spill] sm:$0xff] %v27499_v28 }
 0x1ac   :  { %v27501_v29 = vpop.f32.mrf.mxu0  ;;  %v25449_v30 = vpop.f32.mrf.mxu1 }
 0x1ad   :  { %31248 = vst [vmem:[#allocation13_spill] sm:$0xff] %v27501_v29 }
 0x1ae   :  { %v25444_v31 = vpop.f32.mrf.mxu0  ;;  %v27503_v32 = vpop.f32.mrf.mxu1 }
 0x1af   :  { %31249 = vst [vmem:[#allocation14_spill] sm:$0xff] %v27503_v32 }
 0x1b0   :  { %v27505_v33 = vpop.f32.mrf.mxu0  ;;  %v25459_v34 = vpop.f32.mrf.mxu1 }
 0x1b1   :  { %31250 = vst [vmem:[#allocation15_spill] sm:$0xff] %v27505_v33  ;;  %v26999_v33 = vld [vmem:[#allocation2 + $0x28] sm:$0xff] }
 0x1b2   :  { %v25454_v35 = vpop.f32.mrf.mxu0  ;;  %v27507_v37 = vpop.f32.mrf.mxu1 }
 0x1b3   :  { %31251 = vst [vmem:[#allocation16_spill] sm:$0xff] %v27507_v37 }
 0x1b4   :  { %v27509_v38 = vpop.f32.mrf.mxu0  ;;  %v25469_v39 = vpop.f32.mrf.mxu1 }
 0x1b5   :  { %31252 = vst [vmem:[#allocation17_spill] sm:$0xff] %v27509_v38 }
 0x1b6   :  { %v25464_v40 = vpop.f32.mrf.mxu0  ;;  %v27511_v41 = vpop.f32.mrf.mxu1 }
 0x1b7   :  { %31253 = vst [vmem:[#allocation18_spill] sm:$0xff] %v27511_v41 }
 0x1b8   :  { %v27513_v42 = vpop.f32.mrf.mxu0  ;;  %v25479_v43 = vpop.f32.mrf.mxu1 }
 0x1b9   :  { %31254 = vst [vmem:[#allocation19_spill] sm:$0xff] %v27513_v42  ;;  %v70_v43 = vld [vmem:[%s31084_s1 + $0x5] sm:$0x1] }
 0x1ba   :  { %v25474_v45 = vpop.f32.mrf.mxu0  ;;  %v1166_v47 = vpop.f32.mrf.mxu1 }
 0x1bb   :  { %v1167_v48 = vadd.f32 %v1166_v47, %v27515_v44 }
 0x1bc   :  { %v1093_v50 = vpop.f32.mrf.mxu0  ;;  %v25489_v51 = vpop.f32.mrf.mxu1 }
 0x1bd   :  { %v1609_v53 = vsub.f32 %v1167_v48, %v66_v46  ;;  %v1094_v54 = vadd.f32 %v1093_v50, %v27515_v44 }
 0x1be   :  { %v25484_v55 = vpop.f32.mrf.mxu0  ;;  %v1312_v57 = vpop.f32.mrf.mxu1 }
 0x1bf   :  { %v27528_v58 = vmul.f32 0.25, %v1609_v53  ;;  %v1608_v61 = vsub.f32 %v1094_v54, %v65_v49  ;;  %v1313_v62 = vadd.f32 %v1312_v57, %v27515_v44  ;;  %v72_v55 = vld [vmem:[%s31084_s1 + $0x7] sm:$0x1] }
 0x1c0   :  { %v1239_v30 = vpop.f32.mrf.mxu0  ;;  %v25499_v31 = vpop.f32.mrf.mxu1 }
 0x1c1   :  { %v27534_v34 = vmul.f32 0.25, %v1608_v61  ;;  %v1611_v35 = vsub.f32 %v1313_v62, %v68_v56  ;;  %v1240_v39 = vadd.f32 %v1239_v30, %v27515_v44  ;;  %2350 = vxpose.xlu1.b32.start.end [1/1] (short) (narrow) %v27528_v58, 8  ;;  %25528 = vmatmul.mubr.msk.f32.vlgmr.msra.gmra.mxu1 %vm1624_vm3, %v27528_v58 }
 0x1c2   :  { %25536 = vmatpush3.msra.mxu1 %v1019_v63  ;;  %v25494_v40 = vpop.f32.mrf.mxu0  ;;  %v1458_v45 = vpop.f32.mrf.mxu1  ;;  %25537 = vmatprep.mubr.msk.f32.mxu1 %vm27182_vm1, %v31101_v18  ;;  %v69_v63 = vld [vmem:[%s31084_s1 + $0x4] sm:$0x1] }
 0x1c3   :  { %v27547_v46 = vmul.f32 0.25, %v1611_v35  ;;  %v1610_v47 = vsub.f32 %v1240_v39, %v67_v13  ;;  %v1459_v48 = vadd.f32 %v1458_v45, %v27515_v44  ;;  %2241 = vxpose.xlu0.b32.start.end [1/1] (short) (narrow) %v27534_v34, 8  ;;  %25523 = vmatmul.mubr.msk.f32.vlgmr.msra.gmra.mxu0 %vm1624_vm3, %v27534_v34 }
 0x1c4   :  { %25531 = vmatpush3.msra.mxu0 %v1018_v16  ;;  %v1385_v49 = vpop.f32.mrf.mxu0  ;;  %v25509_v50 = vpop.f32.mrf.mxu1  ;;  %25545 = vmatprep.subr.mxu1 %v31101_v18 }
 0x1c5   :  { %v27559_v51 = vmul.f32 0.25, %v1610_v47  ;;  %v1613_v53 = vsub.f32 %v1459_v48, %v70_v43  ;;  %v1386_v54 = vadd.f32 %v1385_v49, %v27515_v44  ;;  %2560 = vxpose.xlu1.b32.start.end [1/1] (short) (narrow) %v27547_v46, 8  ;;  %25538 = vmatmul.mubr.msk.f32.vlgmr.msra.gmra.mxu1 %vm1624_vm3, %v27547_v46 }
 0x1c6   :  { %25546 = vmatpush3.msra.mxu1 %v1021_v21  ;;  %v25504_v16 = vpop.f32.mrf.mxu0  ;;  %v1604_v56 = vpop.f32.mrf.mxu1  ;;  %25532 = vmatprep.mubr.msk.f32.mxu0 %vm27182_vm1, %v31101_v18  ;;  %v71_v21 = vld [vmem:[%s31084_s1 + $0x6] sm:$0x1] }
 0x1c7   :  { %v1621_v57 = vmul.f32 0.25, %v1613_v53  ;;  %v1612_v61 = vsub.f32 %v1386_v54, %v69_v63  ;;  %v1605_v62 = vadd.f32 %v1604_v56, %v27515_v44  ;;  %25540 = vmatprep.subr.mxu0 %v31101_v18  ;;  %3319 = vxpose.xlu0.b32.start.end [1/1] (short) (narrow) %v27263_v7, 16 }
 0x1c8   :  { %25533 = vmatmul.mubr.msk.f32.vlgmr.msra.gmra.mxu0 %vm1624_vm3, %v27559_v51  ;;  %v1531_v13 = vpop.f32.mrf.mxu0  ;;  %25547 = vmatprep.mubr.msk.f32.mxu1 %vm27182_vm1, %v31101_v18  ;;  %v25519_v30 = vpop.f32.mrf.mxu1 }
 0x1c9   :  { %v1620_v31 = vmul.f32 0.25, %v1612_v61  ;;  %v1615_v35 = vsub.f32 %v1605_v62, %v72_v55  ;;  %25541 = vmatpush3.msra.mxu0 %v1020_v24  ;;  %v1532_v39 = vadd.f32 %v1531_v13, %v27515_v44  ;;  %25555 = vmatprep.subr.mxu1 %v31101_v18 }
 0x1ca   :  { %25548 = vmatmul.mubr.msk.f32.vlgmr.msra.gmra.mxu1 %vm1624_vm3, %v1621_v57  ;;  %2455 = vxpose.xlu1.b32.start.end [1/1] (short) (narrow) %v27559_v51, 8  ;;  %v25514_v7 = vpop.f32.mrf.mxu0 }
 0x1cb   :  { %v1623_v40 = vmul.f32 0.25, %v1615_v35  ;;  %v1614_v43 = vsub.f32 %v1532_v39, %v71_v21  ;;  %25556 = vmatpush3.msra.mxu1 %v1023_v27  ;;  %25542 = vmatprep.mubr.msk.f32.mxu0 %vm27182_vm1, %v31101_v18  ;;  %v2224_v27 = vsel %vm974_vm5, %v1621_v57, 0.0 }
 0x1cc   :  { %25550 = vmatprep.subr.mxu0 %v31101_v18  ;;  %25543 = vmatmul.mubr.msk.f32.vlgmr.msra.gmra.mxu0 %vm1624_vm3, %v1620_v31 }
 0x1cd   :  { %v1622_v24 = vmul.f32 0.25, %v1614_v43  ;;  %25551 = vmatpush3.msra.mxu0 %v1022_v25  ;;  %25557 = vmatprep.mubr.msk.f32.mxu1 %vm27182_vm1, %v31101_v18 }
 0x1ce   :  { %3545 = vxpose.xlu0.b32.start.end [1/1] (short) (narrow) %v27284_v11, 16  ;;  %25558 = vmatmul.mubr.msk.f32.vlgmr.msra.gmra.mxu1 %vm1624_vm3, %v1623_v40  ;;  %v2209_v11 = vsel %vm974_vm5, %v27534_v34, 0.0 }
 0x1cf   :  { %2770 = vxpose.xlu1.b32.start.end [1/1] (short) (narrow) %v1621_v57, 8  ;;  %25552 = vmatprep.mubr.msk.f32.mxu0 %vm27182_vm1, %v31101_v18 }
 0x1d0   :  { %25553 = vmatmul.mubr.msk.f32.vlgmr.msra.gmra.mxu0 %vm1624_vm3, %v1622_v24  ;;  %25565 = vmatprep.subr.mxu1 %v31101_v18 }
 0x1d1   :  { %25566 = vmatpush3.msk.msra.mxu1 %vm2277_vm4, %v27351_v36  ;;  %25567 = vmatprep.mubr.msk.f32.mxu1 %vm27182_vm1, %v31101_v18 }
 0x1d2   :  { %25560 = vmatprep.subr.mxu0 %v31101_v18  ;;  %25562 = vmatprep.mubr.msk.f32.mxu0 %vm27182_vm1, %v31101_v18 }
 0x1d3   :  { %3771 = vxpose.xlu0.b32.start.end [1/1] (short) (narrow) %v27300_v15, 16  ;;  %2665 = vxpose.xlu1.b32.start.end [1/1] (short) (narrow) %v1620_v31, 8  ;;  %v2218_v15 = vsel %vm974_vm5, %v27547_v46, 0.0 }
 0x1d4   :  { %25561 = vmatpush3.msk.msra.mxu0 %vm2277_vm4, %v27351_v36  ;;  %25575 = vmatprep.subr.mxu1 %v31101_v18 }
 0x1d5   :  { %25570 = vmatprep.subr.mxu0 %v31101_v18 }
 0x1d7   :  { %2875 = vxpose.xlu1.b32.start.end [1/1] (short) (narrow) %v1622_v24, 8 }
 0x1db   :  { %2980 = vxpose.xlu1.b32.start.end [1/1] (short) (narrow) %v1623_v40, 8 }
 0x1df   :  { %3093 = vxpose.xlu1.b32.start.end [1/1] (short) (narrow) %v27248_v5, 16  ;;  %v2230_v5 = vsel %vm974_vm5, %v1623_v40, 0.0 }
 0x1e4   :  { %3206 = vxpose.xlu1.b32.start.end [1/1] (short) (narrow) %v27255_v6, 16  ;;  %v2212_v6 = vsel %vm974_vm5, %v27528_v58, 0.0 }
 0x1e9   :  { %3432 = vxpose.xlu1.b32.start.end [1/1] (short) (narrow) %v27277_v10, 16  ;;  %v2215_v10 = vsel %vm974_vm5, %v27559_v51, 0.0 }
 0x1ee   :  { %3658 = vxpose.xlu1.b32.start.end [1/1] (short) (narrow) %v27294_v14, 16  ;;  %v2221_v14 = vsel %vm974_vm5, %v1620_v31, 0.0 }
 0x1f3   :  { %3884 = vxpose.xlu1.b32.start.end [1/1] (short) (narrow) %v27310_v17, 16  ;;  %v2227_v17 = vsel %vm974_vm5, %v1622_v24, 0.0 }
 0x204   :  { %2210 = vadd.xlane.f32.xlu0 %v2209_v11 }
 0x208   :  { %2219 = vadd.xlane.f32.xlu0 %v2218_v15 }
 0x20c   :  { %2225 = vadd.xlane.f32.xlu0 %v2224_v27 }
 0x210   :  { %2231 = vadd.xlane.f32.xlu0 %v2230_v5 }
 0x211   :  { %26995 = vset.pattern.permute.xlu1 %v27183_v20 }
 0x21e   :  { %2213 = vadd.xlane.f32.xlu1 %v2212_v6 }
 0x222   :  { %2216 = vadd.xlane.f32.xlu1 %v2215_v10 }
 0x226   :  { %2222 = vadd.xlane.f32.xlu1 %v2221_v14 }
 0x22a   :  { %2228 = vadd.xlane.f32.xlu1 %v2227_v17 }
 0x23d   :  { %v2366_v25 = vpop.trf.xlu1 }
 0x23e   :  { %25568 = vmatmul.mubr.msk.f32.vlgmr.msra.gmra.mxu1 %vm2273_vm6, %v2366_v25 }
 0x23f   :  { %v2257_v34 = vpop.trf.xlu0  ;;  %25576 = vmatpush3.msk.msra.mxu1 %vm2277_vm4, %v27351_v36  ;;  %25577 = vmatprep.mubr.msk.f32.mxu1 %vm27182_vm1, %v31101_v18 }
 0x240   :  { %25563 = vmatmul.mubr.msk.f32.vlgmr.msra.gmra.mxu0 %vm2273_vm6, %v2257_v34  ;;  %25585 = vmatprep.subr.mxu1 %v31101_v18 }
 0x241   :  { %v2576_v20 = vpop.trf.xlu1  ;;  %25571 = vmatpush3.msk.msra.mxu0 %vm2277_vm4, %v27351_v36  ;;  %25572 = vmatprep.mubr.msk.f32.mxu0 %vm27182_vm1, %v31101_v18 }
 0x242   :  { %25578 = vmatmul.mubr.msk.f32.vlgmr.msra.gmra.mxu1 %vm2273_vm6, %v2576_v20  ;;  %25580 = vmatprep.subr.mxu0 %v31101_v18 }
 0x243   :  { %25586 = vmatpush3.msk.msra.mxu1 %vm2277_vm4, %v27351_v36  ;;  %25587 = vmatprep.mubr.msk.f32.mxu1 %vm27182_vm1, %v31101_v18 }
 0x244   :  { %25595 = vmatprep.subr.mxu1 %v31101_v18 }
 0x246   :  { %v2471_v58 = vpop.trf.xlu1 }
 0x247   :  { %25573 = vmatmul.mubr.msk.f32.vlgmr.msra.gmra.mxu0 %vm2273_vm6, %v2471_v58 }
 0x248   :  { %25581 = vmatpush3.msk.msra.mxu0 %vm2277_vm4, %v27351_v36  ;;  %25582 = vmatprep.mubr.msk.f32.mxu0 %vm27182_vm1, %v31101_v18 }
 0x249   :  { %25590 = vmatprep.subr.mxu0 %v31101_v18 }
 0x24b   :  { %v2786_v45 = vpop.trf.xlu1 }
 0x24c   :  { %25588 = vmatmul.mubr.msk.f32.vlgmr.msra.gmra.mxu1 %vm2273_vm6, %v2786_v45 }
 0x24d   :  { %25596 = vmatpush3.msk.msra.mxu1 %vm2277_vm4, %v27351_v36  ;;  %25597 = vmatprep.mubr.msk.f32.mxu1 %vm27182_vm1, %v31101_v18 }
 0x24f   :  { %v2681_v46 = vpop.trf.xlu1 }
 0x250   :  { %25583 = vmatmul.mubr.msk.f32.vlgmr.msra.gmra.mxu0 %vm2273_vm6, %v2681_v46 }
 0x251   :  { %25591 = vmatpush3.msk.msra.mxu0 %vm2277_vm4, %v27351_v36  ;;  %25592 = vmatprep.mubr.msk.f32.mxu0 %vm27182_vm1, %v31101_v18  ;;  %v27680_v36 = vpop.trf.xlu0 }
 0x252   :  { %31259 = vst [vmem:[#allocation24_spill] sm:$0xff] %v27680_v36 }
 0x253   :  { %v2891_v47 = vpop.trf.xlu1 }
 0x254   :  { %25593 = vmatmul.mubr.msk.f32.vlgmr.msra.gmra.mxu0 %vm2273_vm6, %v2891_v47 }
 0x255   :  { %v27682_v51 = vpop.trf.xlu0 }
 0x256   :  { %31260 = vst [vmem:[#allocation25_spill] sm:$0xff] %v27682_v51 }
 0x257   :  { %v2996_v48 = vpop.trf.xlu1 }
 0x258   :  { %25598 = vmatmul.mubr.msk.f32.vlgmr.msra.gmra.mxu1 %vm2273_vm6, %v2996_v48 }
 0x259   :  { %v27684_v53 = vpop.trf.xlu0 }
 0x25a   :  { %31261 = vst [vmem:[#allocation26_spill] sm:$0xff] %v27684_v53 }
 0x25b   :  { %v27670_v63 = vpop.trf.xlu1 }
 0x25c   :  { %31256 = vst [vmem:[#allocation21_spill] sm:$0xff] %v27670_v63  ;;  %25602 = vmatprep.mubr.msk.f32.mxu0 %vm1624_vm3, %v27670_v63 }
 0x25d   :  { %v27686_v54 = vpop.trf.xlu0 }
 0x25e   :  { %31262 = vst [vmem:[#allocation27_spill] sm:$0xff] %v27686_v54 }
 0x25f   :  { %v27674_v49 = vpop.trf.xlu1 }
 0x260   :  { %31257 = vst [vmem:[#allocation22_spill] sm:$0xff] %v27674_v49 }
 0x261   :  { %v27692_v56 = vpop.trf.xlu0 }
 0x262   :  { %31264 = vst [vmem:[#allocation29_spill] sm:$0xff] %v27692_v56 }
 0x263   :  { %v27676_v50 = vpop.trf.xlu1 }
 0x264   :  { %31258 = vst [vmem:[#allocation23_spill] sm:$0xff] %v27676_v50  ;;  %25607 = vmatprep.mubr.msk.f32.mxu1 %vm1624_vm3, %v27676_v50 }
 0x265   :  { %v27700_v31 = vpop.trf.xlu0 }
 0x266   :  { %31266 = vst [vmem:[#allocation31_spill] sm:$0xff] %v27700_v31 }
 0x267   :  { %v27688_v16 = vpop.trf.xlu1 }
 0x268   :  { %31263 = vst [vmem:[#allocation28_spill] sm:$0xff] %v27688_v16 }
 0x26b   :  { %v27694_v57 = vpop.trf.xlu1 }
 0x26c   :  { %31265 = vst [vmem:[#allocation30_spill] sm:$0xff] %v27694_v57 }
 0x26f   :  { %v27704_v39 = vpop.trf.xlu1 }
 0x270   :  { %31267 = vst [vmem:[#allocation32_spill] sm:$0xff] %v27704_v39 }
 0x273   :  { %v27712_v6 = vpop.trf.xlu1 }
 0x274   :  { %31268 = vst [vmem:[#allocation33_spill] sm:$0xff] %v27712_v6 }
 0x277   :  { %v27723_v45 = vpop.trf.xlu1 }
 0x278   :  { %31269 = vst [vmem:[#allocation34_spill] sm:$0xff] %v27723_v45 }
 0x27b   :  { %v27726_v46 = vpop.trf.xlu1 }
 0x27c   :  { %31270 = vst [vmem:[#allocation35_spill] sm:$0xff] %v27726_v46 }
 0x27f   :  { %v27728_v47 = vpop.trf.xlu1 }
 0x280   :  { %31271 = vst [vmem:[#allocation36_spill] sm:$0xff] %v27728_v47 }
 0x281   :  { %v27690_v55 = vpop.f32.mrf.mxu1 }
 0x283   :  { %v25529_v61 = vpop.f32.mrf.mxu1  ;;  %v27696_v62 = vpop.f32.mrf.mxu0 }
 0x285   :  { %v27698_v21 = vpop.f32.mrf.mxu1  ;;  %v25524_v13 = vpop.f32.mrf.mxu0 }
 0x287   :  { %v25539_v30 = vpop.f32.mrf.mxu1 }
 0x288   :  { %v27702_v35 = vpop.f32.mrf.mxu0 }
 0x28a   :  { %v27706_v7 = vpop.f32.mrf.mxu1  ;;  %v25534_v40 = vpop.f32.mrf.mxu0 }
 0x28c   :  { %v25549_v43 = vpop.f32.mrf.mxu1  ;;  %v27708_v24 = vpop.f32.mrf.mxu0 }
 0x28d   :  { %v2211_v11 = vpop.xlane.xlu0 %2210 }
 0x28e   :  { %v4117_v15 = vmul.f32 0.0001, %v2211_v11  ;;  %v27710_v27 = vpop.f32.mrf.mxu1  ;;  %v25544_v5 = vpop.f32.mrf.mxu0 }
 0x290   :  { %v27715_v10 = vsub.f32 %v27332_v19, %v4117_v15  ;;  %v25559_v14 = vpop.f32.mrf.mxu1  ;;  %v27717_v17 = vpop.f32.mrf.mxu0 }
 0x291   :  { %v2220_v25 = vpop.xlane.xlu0 %2219 }
 0x292   :  { %v4120_v34 = vmul.f32 0.0001, %v2220_v25  ;;  %4735 = vperm.xlu1 %26995, %v27715_v10   ;;  %v25554_v20 = vpop.f32.mrf.mxu0 }
 0x294   :  { %v27721_v58 = vsub.f32 %v27332_v19, %v4120_v34 }
 0x295   :  { %v2226_v13 = vpop.xlane.xlu0 %2225 }
 0x296   :  { %4750 = vperm.xlu1 %26995, %v27721_v58   ;;  %v4122_v11 = vmul.f32 0.0001, %v2226_v13 }
 0x298   :  { %v27739_v34 = vsub.f32 %v27332_v19, %v4122_v11 }
 0x299   :  { %v2232_v5 = vpop.xlane.xlu0 %2231 }
 0x29a   :  { %v4124_v20 = vmul.f32 0.0001, %v2232_v5 }
 0x29c   :  { %v27747_v13 = vsub.f32 %v27332_v19, %v4124_v20 }
 0x2a7   :  { %v2214_v48 = vpop.xlane.xlu1 %2213 }
 0x2a8   :  { %v4118_v61 = vmul.f32 0.0001, %v2214_v48 }
 0x2aa   :  { %v27731_v30 = vsub.f32 %v27332_v19, %v4118_v61 }
 0x2ab   :  { %v2217_v40 = vpop.xlane.xlu1 %2216 }
 0x2ac   :  { %v4119_v43 = vmul.f32 0.0001, %v2217_v40  ;;  %4740 = vperm.xlu0 %26994, %v27731_v30  }
 0x2ae   :  { %v27735_v15 = vsub.f32 %v27332_v19, %v4119_v43 }
 0x2af   :  { %v2223_v14 = vpop.xlane.xlu1 %2222 }
 0x2b0   :  { %v4121_v25 = vmul.f32 0.0001, %v2223_v14  ;;  %4745 = vperm.xlu1 %26995, %v27735_v15  }
 0x2b2   :  { %v27742_v48 = vsub.f32 %v27332_v19, %v4121_v25 }
 0x2b3   :  { %v2229_v61 = vpop.xlane.xlu1 %2228 }
 0x2b4   :  { %v4123_v40 = vmul.f32 0.0001, %v2229_v61  ;;  %4755 = vperm.xlu0 %26994, %v27742_v48   ;;  %4760 = vperm.xlu1 %26995, %v27739_v34  }
 0x2b6   :  { %v27750_v43 = vsub.f32 %v27332_v19, %v4123_v40 }
 0x2b8   :  { %4770 = vperm.xlu1 %26995, %v27747_v13   ;;  %4765 = vperm.xlu0 %26994, %v27750_v43  }
 0x2fe   :  { %v2451_v11 = vpop.f32.mrf.mxu1 }
 0x2ff   :  { %v27755_v5 = vsel %vm2234_vm7, %v2451_v11, 0.0  ;;  %25605 = vmatprep.subr.msk.mxu1 %vm2234_vm7, %v2451_v11 }
 0x300   :  { %v2346_v14 = vpop.f32.mrf.mxu0  ;;  %v25569_v25 = vpop.f32.mrf.mxu1  ;;  %25606 = vmatpush3.msk.msra.mxu1 %vm2234_vm7, %v2451_v11 }
 0x301   :  { %v27758_v20 = vsel %vm2233_vm8, %v2346_v14, 0.0  ;;  %25600 = vmatprep.subr.msk.mxu0 %vm2233_vm8, %v2346_v14  ;;  %25608 = vmatmul.mubr.msk.f32.vlgmr.msra.gmra.mxu1 %vm1624_vm3, %v27688_v16 }
 0x302   :  { %v2661_v19 = vpop.f32.mrf.mxu1  ;;  %25601 = vmatpush3.msk.msra.mxu0 %vm2233_vm8, %v2346_v14  ;;  %v25564_v52 = vpop.f32.mrf.mxu0  ;;  %25617 = vmatprep.mubr.msk.f32.mxu1 %vm1624_vm3, %v27694_v57 }
 0x303   :  { %v27765_v61 = vsel %vm2236_vm9, %v2661_v19, 0.0  ;;  %25603 = vmatmul.mubr.msk.f32.vlgmr.msra.gmra.mxu0 %vm1624_vm3, %v27674_v49  ;;  %25615 = vmatprep.subr.msk.mxu1 %vm2236_vm9, %v2661_v19 }
 0x304   :  { %25616 = vmatpush3.msk.msra.mxu1 %vm2236_vm9, %v2661_v19  ;;  %v25579_v59 = vpop.f32.mrf.mxu1  ;;  %25612 = vmatprep.mubr.msk.f32.mxu0 %vm1624_vm3, %v27680_v36 }
 0x305   :  { %25618 = vmatmul.mubr.msk.f32.vlgmr.msra.gmra.mxu1 %vm1624_vm3, %v27704_v39 }
 0x306   :  { %25627 = vmatprep.mubr.msk.f32.mxu1 %vm1624_vm3, %v27712_v6 }
 0x307   :  { %v2556_v60 = vpop.f32.mrf.mxu0 }
 0x308   :  { %v27776_v40 = vsel %vm2235_vm10, %v2556_v60, 0.0  ;;  %25610 = vmatprep.subr.msk.mxu0 %vm2235_vm10, %v2556_v60 }
 0x309   :  { %25611 = vmatpush3.msk.msra.mxu0 %vm2235_vm10, %v2556_v60  ;;  %v25574_v11 = vpop.f32.mrf.mxu0 }
 0x30a   :  { %25613 = vmatmul.mubr.msk.f32.vlgmr.msra.gmra.mxu0 %vm1624_vm3, %v27682_v51 }
 0x30b   :  { %25622 = vmatprep.mubr.msk.f32.mxu0 %vm1624_vm3, %v27684_v53 }
 0x30c   :  { %v2871_v14 = vpop.f32.mrf.mxu1 }
 0x30d   :  { %v27783_v25 = vsel %vm2238_vm11, %v2871_v14, 0.0  ;;  %25625 = vmatprep.subr.msk.mxu1 %vm2238_vm11, %v2871_v14 }
 0x30e   :  { %25626 = vmatpush3.msk.msra.mxu1 %vm2238_vm11, %v2871_v14  ;;  %v25589_v4 = vpop.f32.mrf.mxu1 }
 0x30f   :  { %25628 = vmatmul.mubr.msk.f32.vlgmr.msra.gmra.mxu1 %vm1624_vm3, %v27723_v45 }
 0x310   :  { %v2766_v19 = vpop.f32.mrf.mxu0  ;;  %25637 = vmatprep.mubr.msk.f32.mxu1 %vm1624_vm3, %v27726_v46 }
 0x311   :  { %v27790_v52 = vsel %vm2237_vm12, %v2766_v19, 0.0  ;;  %25620 = vmatprep.subr.msk.mxu0 %vm2237_vm12, %v2766_v19 }
 0x312   :  { %v25584_v59 = vpop.f32.mrf.mxu0  ;;  %25621 = vmatpush3.msk.msra.mxu0 %vm2237_vm12, %v2766_v19 }
 0x313   :  { %25623 = vmatmul.mubr.msk.f32.vlgmr.msra.gmra.mxu0 %vm1624_vm3, %v27686_v54 }
 0x314   :  { %v2976_v9 = vpop.f32.mrf.mxu0  ;;  %25632 = vmatprep.mubr.msk.f32.mxu0 %vm1624_vm3, %v27692_v56 }
 0x315   :  { %v27797_v60 = vsel %vm2239_vm13, %v2976_v9, 0.0  ;;  %25630 = vmatprep.subr.msk.mxu0 %vm2239_vm13, %v2976_v9 }
 0x316   :  { %25631 = vmatpush3.msk.msra.mxu0 %vm2239_vm13, %v2976_v9  ;;  %v25594_v12 = vpop.f32.mrf.mxu0 }
 0x317   :  { %25633 = vmatmul.mubr.msk.f32.vlgmr.msra.gmra.mxu0 %vm1624_vm3, %v27700_v31  ;;  %25640 = vmatprep.subr.mxu0 %v31101_v18 }
 0x318   :  { %v3081_v11 = vpop.f32.mrf.mxu1  ;;  %25644 = vmatprep.mubr.msk.f32.mxu0 %vm27182_vm1, %v31101_v18 }
 0x319   :  { %v27805_v26 = vsel %vm2240_vm14, %v3081_v11, 0.0  ;;  %25635 = vmatprep.subr.msk.mxu1 %vm2240_vm14, %v3081_v11 }
 0x31a   :  { %25636 = vmatpush3.msk.msra.mxu1 %vm2240_vm14, %v3081_v11  ;;  %v25599_v14 = vpop.f32.mrf.mxu1 }
 0x31b   :  { %25638 = vmatmul.mubr.msk.f32.vlgmr.msra.gmra.mxu1 %vm1624_vm3, %v27728_v47  ;;  %25647 = vmatprep.subr.mxu1 %v31101_v18  ;;  %v27001_v47 = vld [vmem:[#allocation2 + $0x30] sm:$0xff] }
 0x31c   :  { %25651 = vmatprep.mubr.msk.f32.mxu1 %vm27182_vm1, %v31101_v18 }
 0x3c1   :  { %v25609_v4 = vpop.f32.mrf.mxu1 }
 0x3c2   :  { %v4056_v19 = vmul.f32 0.0001, %v25609_v4 }
 0x3c3   :  { %v25604_v22 = vpop.f32.mrf.mxu0  ;;  %v3310_v59 = vpop.f32.mrf.mxu1 }
 0x3c4   :  { %v27813_v9 = vsub.f32 %v27227_v0, %v4056_v19  ;;  %v4054_v12 = vmul.f32 0.0001, %v25604_v22  ;;  %v4055_v41 = vmul.f32 0.0001, %v3310_v59 }
 0x3c5   :  { %v3197_v42 = vpop.f32.mrf.mxu0  ;;  %v25619_v11 = vpop.f32.mrf.mxu1 }
 0x3c6   :  { %v27816_v14 = vsub.f32 %v27227_v0, %v4054_v12  ;;  %v27819_v37 = vsub.f32 %v27232_v1, %v4055_v41  ;;  %v4053_v32 = vmul.f32 0.0001, %v3197_v42  ;;  %v4060_v38 = vmul.f32 0.0001, %v25619_v11  ;;  %25648 = vmatpush3.msra.mxu1 %v27813_v9 }
 0x3c7   :  { %v3536_v4 = vpop.f32.mrf.mxu1  ;;  %25649 = vmatprep.subr.mxu1 %v31101_v18 }
 0x3c8   :  { %v27824_v19 = vsub.f32 %v27232_v1, %v4053_v32  ;;  %v27827_v22 = vsub.f32 %v27227_v0, %v4060_v38  ;;  %v4059_v59 = vmul.f32 0.0001, %v3536_v4  ;;  %25641 = vmatpush3.msra.mxu0 %v27816_v14  ;;  %25650 = vmatpush3.msra.mxu1 %v27819_v37 }
 0x3c9   :  { %25642 = vmatprep.subr.mxu0 %v31101_v18  ;;  %25652 = vmatmul.mubr.msk.f32.vlgmr.msra.gmra.mxu1 %vm98_vm0, %v27240_v3 }
 0x3ca   :  { %v27835_v41 = vsub.f32 %v27232_v1, %v4059_v59  ;;  %v25614_v42 = vpop.f32.mrf.mxu0  ;;  %25661 = vmatprep.subr.mxu1 %v31101_v18  ;;  %25643 = vmatpush3.msra.mxu0 %v27824_v19  ;;  %v26996_v1 = vld [vmem:[%s31087_s4 + $0x8] sm:$0xff] }
 0x3cb   :  { %v4058_v0 = vmul.f32 0.0001, %v25614_v42  ;;  %25662 = vmatpush3.msra.mxu1 %v27827_v22  ;;  %25645 = vmatmul.mubr.msk.f32.vlgmr.msra.gmra.mxu0 %vm98_vm0, %v27234_v2  ;;  %v26997_v2 = vld [vmem:[%s31087_s4] sm:$0xff] }
 0x3cc   :  { %v3423_v32 = vpop.f32.mrf.mxu0  ;;  %25663 = vmatprep.subr.mxu1 %v31101_v18  ;;  %25665 = vmatprep.mubr.msk.f32.mxu1 %vm27182_vm1, %v31101_v18 }
 0x3cd   :  { %v27848_v3 = vsub.f32 %v26996_v1, %v4058_v0  ;;  %v4057_v38 = vmul.f32 0.0001, %v3423_v32  ;;  %25664 = vmatpush3.msra.mxu1 %v27835_v41  ;;  %25654 = vmatprep.subr.mxu0 %v31101_v18  ;;  %v26998_v0 = vld [vmem:[#allocation2 + $0x10] sm:$0xff] }
 0x3ce   :  { %25666 = vmatmul.mubr.msk.f32.vlgmr.msra.gmra.mxu1 %vm98_vm0, %v27266_v8  ;;  %25658 = vmatprep.mubr.msk.f32.mxu0 %vm27182_vm1, %v31101_v18 }
 0x3cf   :  { %v27859_v12 = vsub.f32 %v26997_v2, %v4057_v38  ;;  %v25629_v11 = vpop.f32.mrf.mxu1  ;;  %25655 = vmatpush3.msra.mxu0 %v27848_v3  ;;  %25675 = vmatprep.subr.mxu1 %v31101_v18 }
 0x3d0   :  { %v4064_v4 = vmul.f32 0.0001, %v25629_v11  ;;  %25656 = vmatprep.subr.mxu0 %v31101_v18  ;;  %25679 = vmatprep.mubr.msk.f32.mxu1 %vm27182_vm1, %v31101_v18 }
 0x3d1   :  { %v3762_v8 = vpop.f32.mrf.mxu1  ;;  %25657 = vmatpush3.msra.mxu0 %v27859_v12 }
 0x3d2   :  { %v27867_v59 = vsub.f32 %v26996_v1, %v4064_v4  ;;  %v4063_v42 = vmul.f32 0.0001, %v3762_v8  ;;  %25659 = vmatmul.mubr.msk.f32.vlgmr.msra.gmra.mxu0 %vm98_vm0, %v26998_v0  ;;  %25668 = vmatprep.subr.mxu0 %v31101_v18 }
 0x3d3   :  { %v25624_v32 = vpop.f32.mrf.mxu0  ;;  %25672 = vmatprep.mubr.msk.f32.mxu0 %vm27182_vm1, %v31101_v18 }
 0x3d4   :  { %v27873_v38 = vsub.f32 %v26997_v2, %v4063_v42  ;;  %v4062_v11 = vmul.f32 0.0001, %v25624_v32  ;;  %25676 = vmatpush3.msra.mxu1 %v27867_v59 }
 0x3d5   :  { %v3649_v28 = vpop.f32.mrf.mxu0  ;;  %25677 = vmatprep.subr.mxu1 %v31101_v18 }
 0x3d6   :  { %v27877_v4 = vsub.f32 %v26996_v1, %v4062_v11  ;;  %v4061_v8 = vmul.f32 0.0001, %v3649_v28  ;;  %25678 = vmatpush3.msra.mxu1 %v27873_v38 }
 0x3d7   :  { %v25634_v0 = vpop.f32.mrf.mxu0  ;;  %25680 = vmatmul.mubr.msk.f32.vlgmr.msra.gmra.mxu1 %vm98_vm0, %v26999_v33  ;;  %25689 = vmatprep.subr.mxu1 %v31101_v18  ;;  %v27000_v33 = vld [vmem:[#allocation2 + $0x20] sm:$0xff] }
 0x3d8   :  { %v27882_v29 = vsub.f32 %v26997_v2, %v4061_v8  ;;  %v4066_v42 = vmul.f32 0.0001, %v25634_v0  ;;  %25669 = vmatpush3.msra.mxu0 %v27877_v4  ;;  %25693 = vmatprep.mubr.msk.f32.mxu1 %vm27182_vm1, %v31101_v18 }
 0x3d9   :  { %v3875_v32 = vpop.f32.mrf.mxu0  ;;  %25670 = vmatprep.subr.mxu0 %v31101_v18 }
 0x3da   :  { %v27888_v28 = vsub.f32 %v26996_v1, %v4066_v42  ;;  %v4065_v11 = vmul.f32 0.0001, %v3875_v32  ;;  %25671 = vmatpush3.msra.mxu0 %v27882_v29 }
 0x3db   :  { %v25639_v44 = vpop.f32.mrf.mxu1  ;;  %25673 = vmatmul.mubr.msk.f32.vlgmr.msra.gmra.mxu0 %vm98_vm0, %v27000_v33  ;;  %25682 = vmatprep.subr.mxu0 %v31101_v18  ;;  %v4018_v33 = vsel %vm370_vm2, %v27765_v61, 0.0  ;;  %v4025_v61 = vsel %vm370_vm2, %v27790_v52, 0.0 }
 0x3dc   :  { %v27893_v8 = vsub.f32 %v26997_v2, %v4065_v11  ;;  %v4068_v0 = vmul.f32 0.0001, %v25639_v44  ;;  %25683 = vmatpush3.msra.mxu0 %v27888_v28  ;;  %25686 = vmatprep.mubr.msk.f32.mxu0 %vm27182_vm1, %v31101_v18  ;;  %v27002_v44 = vld [vmem:[#allocation2 + $0x38] sm:$0xff]  ;;  %v4019_v56 = vrot.slane %v4018_v33, 4  ;;  %v4026_v57 = vrot.slane %v4025_v61, 4 }
 0x3dd   :  { %v3988_v31 = vpop.f32.mrf.mxu1  ;;  %25684 = vmatprep.subr.mxu0 %v31101_v18 }
 0x3de   :  { %v27899_v42 = vsub.f32 %v26996_v1, %v4068_v0  ;;  %v4067_v32 = vmul.f32 0.0001, %v3988_v31  ;;  %25685 = vmatpush3.msra.mxu0 %v27893_v8  ;;  %v4004_v31 = vsel %vm370_vm2, %v27755_v5, 0.0  ;;  %v4032_v5 = vsel %vm370_vm2, %v27783_v25, 0.0 }
 0x3df   :  { %25687 = vmatmul.mubr.msk.f32.vlgmr.msra.gmra.mxu0 %vm98_vm0, %v27001_v47  ;;  %25696 = vmatprep.subr.mxu0 %v31101_v18  ;;  %v3997_v47 = vsel %vm370_vm2, %v27758_v20, 0.0  ;;  %v4005_v1 = vrot.slane %v4004_v31, 4  ;;  %v4033_v39 = vrot.slane %v4032_v5, 4 }
 0x3e0   :  { %v27904_v11 = vsub.f32 %v26997_v2, %v4067_v32  ;;  %25690 = vmatpush3.msra.mxu1 %v27899_v42  ;;  %25698 = vmatprep.mubr.msk.f32.mxu0 %vm27182_vm1, %v31101_v18  ;;  %v3998_v2 = vrot.slane %v3997_v47, 4 }
 0x3e1   :  { %25691 = vmatprep.subr.mxu1 %v31101_v18  ;;  %v4006_v0 = vadd.f32 %v4005_v1, %v4004_v31 }
 0x3e2   :  { %25692 = vmatpush3.msra.mxu1 %v27904_v11  ;;  %v3999_v32 = vadd.f32 %v3998_v2, %v3997_v47  ;;  %v4034_v2 = vadd.f32 %v4033_v39, %v4032_v5 }
 0x3e3   :  { %25694 = vmatmul.mubr.msk.f32.vlgmr.msra.gmra.mxu1 %vm98_vm0, %v27002_v44  ;;  %25701 = vmatprep.subr.mxu1 %v31101_v18  ;;  %v4011_v44 = vsel %vm370_vm2, %v27776_v40, 0.0  ;;  %v4007_v54 = vrot.slane %v4006_v0, 2 }
 0x3e4   :  { %25703 = vmatprep.mubr.msk.f32.mxu1 %vm27182_vm1, %v31101_v18  ;;  %v4000_v46 = vrot.slane %v3999_v32, 2  ;;  %v4020_v18 = vadd.f32 %v4019_v56, %v4018_v33  ;;  %v4012_v45 = vrot.slane %v4011_v44, 4  ;;  %v4039_v56 = vsel %vm370_vm2, %v27797_v60, 0.0 }
 0x3e5   :  { %v4008_v53 = vadd.f32 %v4007_v54, %v4006_v0  ;;  %v4035_v25 = vrot.slane %v4034_v2, 2  ;;  %v4027_v0 = vadd.f32 %v4026_v57, %v4025_v61 }
 0x3e6   :  { %v4001_v20 = vadd.f32 %v4000_v46, %v3999_v32  ;;  %v4021_v51 = vrot.slane %v4020_v18, 2  ;;  %v4013_v6 = vadd.f32 %v4012_v45, %v4011_v44  ;;  %v4040_v45 = vrot.slane %v4039_v56, 4 }
 0x3e7   :  { %v4009_v31 = vrot.slane %v4008_v53, 1  ;;  %v4046_v32 = vsel %vm370_vm2, %v27805_v26, 0.0  ;;  %v4036_v44 = vadd.f32 %v4035_v25, %v4034_v2  ;;  %v4028_v5 = vrot.slane %v4027_v0, 2 }
 0x3e8   :  { %v4022_v47 = vadd.f32 %v4021_v51, %v4020_v18  ;;  %v4014_v1 = vrot.slane %v4013_v6, 2  ;;  %v4002_v40 = vrot.slane %v4001_v20, 1  ;;  %v4041_v36 = vadd.f32 %v4040_v45, %v4039_v56 }
 0x3e9   :  { %v4010_v33 = vadd.f32 %v4009_v31, %v4008_v53  ;;  %v4047_v49 = vrot.slane %v4046_v32, 4  ;;  %v27934_v53 = vld [vmem:[%s31087_s4 + $0x10] sm:$0xff]  ;;  %v4029_v61 = vadd.f32 %v4028_v5, %v4027_v0 }
 0x3ea   :  { %v4015_v16 = vadd.f32 %v4014_v1, %v4013_v6  ;;  %v4003_v54 = vadd.f32 %v4002_v40, %v4001_v20  ;;  %v4023_v46 = vrot.slane %v4022_v47, 1  ;;  %v4037_v20 = vrot.slane %v4036_v44, 1 }
 0x3eb   :  { %v4086_v52 = vmul.f32 0.0001, %v4010_v33  ;;  %v4042_v31 = vrot.slane %v4041_v36, 2  ;;  %v4030_v0 = vrot.slane %v4029_v61, 1 }
 0x3ec   :  { %v4085_v18 = vmul.f32 0.0001, %v4003_v54  ;;  %v4024_v51 = vadd.f32 %v4023_v46, %v4022_v47  ;;  %v4016_v39 = vrot.slane %v4015_v16, 1  ;;  %v4048_v47 = vadd.f32 %v4047_v49, %v4046_v32 }
 0x3ed   :  { %v27937_v6 = vsub.f32 %v27934_v53, %v4086_v52  ;;  %v4038_v25 = vadd.f32 %v4037_v20, %v4036_v44  ;;  %v4043_v54 = vadd.f32 %v4042_v31, %v4041_v36  ;;  %v4102_v49 = vmul.f32 0.0001, %v27690_v55 }
 0x3ee   :  { %v27940_v57 = vsub.f32 %v27934_v53, %v4085_v18  ;;  %v4088_v60 = vmul.f32 0.0001, %v4024_v51  ;;  %v4017_v26 = vadd.f32 %v4016_v39, %v4015_v16  ;;  %v4049_v16 = vrot.slane %v4048_v47, 2 }
 0x3ef   :  { %v27944_v1 = vrot.slane %v27937_v6, %v27336_v23  ;;  %v4101_v51 = vmul.f32 0.0001, %v27696_v62  ;;  %v4090_v44 = vmul.f32 0.0001, %v4038_v25  ;;  %v4031_v55 = vadd.f32 %v4030_v0, %v4029_v61  ;;  %v27968_v62 = vld [vmem:[%s31087_s4 + $0x18] sm:$0xff] }
 0x3f0   :  { %v27948_v40 = vrot.slane %v27940_v57, %v27336_v23  ;;  %v27951_v56 = vsub.f32 %v27934_v53, %v4088_v60  ;;  %v4087_v33 = vmul.f32 0.0001, %v4017_v26  ;;  %v4050_v60 = vadd.f32 %v4049_v16, %v4048_v47 }
 0x3f1   :  { %v4044_v31 = vrot.slane %v4043_v54, 1  ;;  %v4104_v47 = vmul.f32 0.0001, %v27698_v21  ;;  %v27978_v61 = vsub.f32 %v27968_v62, %v4101_v51  ;;  %v27990_v21 = vsub.f32 %v27934_v53, %v4090_v44 }
 0x3f2   :  { %v27959_v39 = vrot.slane %v27951_v56, %v27336_v23  ;;  %v27962_v36 = vsub.f32 %v27934_v53, %v4087_v33  ;;  %v31272_v33 = vmov 0.0  }
 0x3f3   :  { %31273 = vst [vmem:[#allocation37_spill] sm:$0xff] %v27990_v21  ;;  %v27997_v51 = vsub.f32 %v27968_v62, %v4104_v47  ;;  %v28005_v44 = vrot.slane %v27990_v21, %v27336_v23 }
 0x3f4   :  { %v27982_v0 = vrot.slane %v27962_v36, %v27336_v23 }
 0x489   :  { %v4301_v2 = vpop.f32.mrf.mxu1 }
 0x48a   :  { %v4302_v46 = vadd.f32 %v4301_v2, %v27944_v1  ;;  %v27971_v2 = vsub.f32 %v27968_v62, %v4102_v49 }
 0x48b   :  { %v4231_v45 = vpop.f32.mrf.mxu0  ;;  %v25653_v32 = vpop.f32.mrf.mxu1 }
 0x48c   :  { %v4726_v52 = vmax.f32 %v4302_v46, 0.0  ;;  %v4232_v18 = vadd.f32 %v4231_v45, %v27948_v40  ;;  %v4089_v45 = vmul.f32 0.0001, %v4031_v55  ;;  %v4045_v32 = vadd.f32 %v4044_v31, %v4043_v54 }
 0x48d   :  { %v25646_v5 = vpop.f32.mrf.mxu0 }
 0x48e   :  { %v4725_v26 = vmax.f32 %v4232_v18, 0.0  ;;  %v4441_v20 = vpop.f32.mrf.mxu1  ;;  %25702 = vmatpush3.xpose.msk.msra.mxu1 %vm370_vm2, %v4726_v52  ;;  %v4051_v52 = vrot.slane %v4050_v60, 1  ;;  %v4103_v5 = vmul.f32 0.0001, %v27702_v35  ;;  %v4091_v55 = vmul.f32 0.0001, %v4045_v32 }
 0x48f   :  { %v4442_v46 = vadd.f32 %v4441_v20, %v27959_v39  ;;  %25711 = vmatprep.subr.mxu1 %v31272_v33  ;;  %v28010_v20 = vsub.f32 %v27934_v53, %v4089_v45 }
 0x490   :  { %25697 = vmatpush3.xpose.msk.msra.mxu0 %vm370_vm2, %v4725_v26  ;;  %v25667_v25 = vpop.f32.mrf.mxu1  ;;  %v4052_v31 = vadd.f32 %v4051_v52, %v4050_v60  ;;  %v28028_v45 = vsub.f32 %v27934_v53, %v4091_v55 }
 0x491   :  { %v4728_v16 = vmax.f32 %v4442_v46, 0.0  ;;  %25704 = vmatmul.mubr.msk.f32.vlgmr.msra.gmra.mxu1 %vm370_vm2, %v27971_v2  ;;  %25706 = vmatprep.subr.mxu0 %v31272_v33  ;;  %31274 = vst [vmem:[#allocation38_spill] sm:$0xff] %v28010_v20  ;;  %v28016_v46 = vsub.f32 %v27968_v62, %v4103_v5  ;;  %v4106_v25 = vmul.f32 0.0001, %v27706_v7  ;;  %v28023_v60 = vrot.slane %v28010_v20, %v27336_v23 }
 0x492   :  { %v4371_v49 = vpop.f32.mrf.mxu0  ;;  %25713 = vmatprep.mubr.msk.f32.mxu1 %vm27182_vm1, %v31272_v33  ;;  %31275 = vst [vmem:[#allocation39_spill] sm:$0xff] %v28028_v45  ;;  %v4092_v32 = vmul.f32 0.0001, %v4052_v31  ;;  %v4105_v5 = vmul.f32 0.0001, %v27708_v24  ;;  %v28041_v55 = vrot.slane %v28028_v45, %v27336_v23 }
 0x493   :  { %v4372_v18 = vadd.f32 %v4371_v49, %v27982_v0  ;;  %25712 = vmatpush3.xpose.msk.msra.mxu1 %vm370_vm2, %v4728_v16  ;;  %25699 = vmatmul.mubr.msk.f32.vlgmr.msra.gmra.mxu0 %vm370_vm2, %v27978_v61  ;;  %v28035_v7 = vsub.f32 %v27968_v62, %v4106_v25  ;;  %v4107_v25 = vmul.f32 0.0001, %v27717_v17  ;;  %v4108_v17 = vmul.f32 0.0001, %v27710_v27  ;;  %v27005_v27 = vld [vmem:[%s31083_s0] sm:$0xff] }
 0x494   :  { %v25660_v26 = vpop.f32.mrf.mxu0  ;;  %25708 = vmatprep.mubr.msk.f32.mxu0 %vm27182_vm1, %v31272_v33  ;;  %25721 = vmatprep.subr.mxu1 %v31272_v33  ;;  %v28044_v31 = vsub.f32 %v27934_v53, %v4092_v32  ;;  %v28053_v24 = vsub.f32 %v27968_v62, %v4105_v5 }
 0x495   :  { %v4727_v54 = vmax.f32 %v4372_v18, 0.0 }
 0x496   :  { %25714 = vmatmul.mubr.msk.f32.vlgmr.msra.gmra.mxu1 %vm370_vm2, %v27997_v51  ;;  %31276 = vst [vmem:[#allocation40_spill] sm:$0xff] %v28044_v31 }
 0x497   :  { %v4581_v35 = vpop.f32.mrf.mxu1  ;;  %25707 = vmatpush3.xpose.msk.msra.mxu0 %vm370_vm2, %v4727_v54  ;;  %25723 = vmatprep.mubr.msk.f32.mxu1 %vm27182_vm1, %v31272_v33 }
 0x498   :  { %v4582_v47 = vadd.f32 %v4581_v35, %v28005_v44  ;;  %25716 = vmatprep.subr.mxu0 %v31272_v33 }
 0x499   :  { %v25681_v16 = vpop.f32.mrf.mxu1 }
 0x49a   :  { %v4730_v49 = vmax.f32 %v4582_v47, 0.0  ;;  %25709 = vmatmul.mubr.msk.f32.vlgmr.msra.gmra.mxu0 %vm370_vm2, %v28016_v46 }
 0x49b   :  { %v4511_v52 = vpop.f32.mrf.mxu0  ;;  %25718 = vmatprep.mubr.msk.f32.mxu0 %vm27182_vm1, %v31272_v33 }
 0x49c   :  { %v4512_v18 = vadd.f32 %v4511_v52, %v28023_v60  ;;  %25722 = vmatpush3.xpose.msk.msra.mxu1 %vm370_vm2, %v4730_v49  ;;  %v28059_v49 = vrot.slane %v28044_v31, %v27336_v23 }
 0x49d   :  { %v25674_v26 = vpop.f32.mrf.mxu0  ;;  %25731 = vmatprep.subr.mxu1 %v31272_v33 }
 0x49e   :  { %v4729_v54 = vmax.f32 %v4512_v18, 0.0  ;;  %v28069_v18 = vsub.f32 %v27968_v62, %v4107_v25  ;;  %v27009_v25 = vld [vmem:[%s31083_s0 + $0x20] sm:$0xff] }
 0x49f   :  { %v4651_v35 = vpop.f32.mrf.mxu0  ;;  %25724 = vmatmul.mubr.msk.f32.vlgmr.msra.gmra.mxu1 %vm370_vm2, %v28035_v7 }
 0x4a0   :  { %v4652_v47 = vadd.f32 %v4651_v35, %v28041_v55  ;;  %25717 = vmatpush3.xpose.msk.msra.mxu0 %vm370_vm2, %v4729_v54  ;;  %25733 = vmatprep.mubr.msk.f32.mxu1 %vm27182_vm1, %v31272_v33  ;;  %v28077_v54 = vsub.f32 %v27968_v62, %v4108_v17  ;;  %v27006_v62 = vld [vmem:[%s31083_s0 + $0x8] sm:$0xff]  ;;  %v27007_v35 = vld [vmem:[%s31083_s0 + $0x10] sm:$0xff] }
 0x4a1   :  { %25726 = vmatprep.subr.mxu0 %v31272_v33  ;;  %v25688_v53 = vpop.f32.mrf.mxu0 }
 0x4a2   :  { %v4731_v16 = vmax.f32 %v4652_v47, 0.0  ;;  %v27008_v47 = vld [vmem:[%s31083_s0 + $0x18] sm:$0xff]  ;;  %v27010_v53 = vld [vmem:[%s31083_s0 + $0x28] sm:$0xff] }
 0x4a3   :  { %v4721_v32 = vpop.f32.mrf.mxu1  ;;  %25719 = vmatmul.mubr.msk.f32.vlgmr.msra.gmra.mxu0 %vm370_vm2, %v28053_v24 }
 0x4a4   :  { %v4722_v52 = vadd.f32 %v4721_v32, %v28059_v49  ;;  %25727 = vmatpush3.xpose.msk.msra.mxu0 %vm370_vm2, %v4731_v16  ;;  %25728 = vmatprep.mubr.msk.f32.mxu0 %vm27182_vm1, %v31272_v33  ;;  %v27011_v16 = vld [vmem:[%s31083_s0 + $0x30] sm:$0xff]  ;;  %v27012_v32 = vld [vmem:[%s31083_s0 + $0x38] sm:$0xff] }
 0x4a5   :  { %25736 = vmatprep.subr.mxu0 %v31272_v33  ;;  %v25695_v5 = vpop.f32.mrf.mxu1 }
 0x4a6   :  { %v4732_v26 = vmax.f32 %v4722_v52, 0.0 }
 0x4a7   :  { %25729 = vmatmul.mubr.msk.f32.vlgmr.msra.gmra.mxu0 %vm370_vm2, %v28069_v18 }
 0x4a8   :  { %25732 = vmatpush3.xpose.msk.msra.mxu1 %vm370_vm2, %v4732_v26  ;;  %25737 = vmatpush3.msra.mxu0 %v27816_v14 }
 0x4a9   :  { %25738 = vmatprep.subr.mxu0 %v31272_v33  ;;  %25740 = vmatprep.mubr.msk.f32.mxu0 %vm27182_vm1, %v31272_v33 }
 0x4aa   :  { %25739 = vmatpush3.msra.mxu0 %v27824_v19  ;;  %25743 = vmatprep.subr.mxu1 %v31272_v33 }
 0x4ab   :  { %25734 = vmatmul.mubr.msk.f32.vlgmr.msra.gmra.mxu1 %vm370_vm2, %v28077_v54  ;;  %25741 = vmatmul.mubr.msk.f32.vlgmr.msra.gmra.mxu0 %vm98_vm0, %v27005_v27 }
 0x4ac   :  { %25750 = vmatprep.subr.mxu0 %v31272_v33  ;;  %25744 = vmatpush3.msra.mxu1 %v27813_v9 }
 0x4ad   :  { %25751 = vmatpush3.msra.mxu0 %v27848_v3  ;;  %25745 = vmatprep.subr.mxu1 %v31272_v33 }
 0x4ae   :  { %25752 = vmatprep.subr.mxu0 %v31272_v33  ;;  %25746 = vmatpush3.msra.mxu1 %v27819_v37 }
 0x4af   :  { %25747 = vmatprep.mubr.msk.f32.mxu1 %vm27182_vm1, %v31272_v33  ;;  %25753 = vmatpush3.msra.mxu0 %v27859_v12 }
 0x4b0   :  { %25754 = vmatprep.mubr.msk.f32.mxu0 %vm27182_vm1, %v31272_v33  ;;  %25748 = vmatmul.mubr.msk.f32.vlgmr.msra.gmra.mxu1 %vm98_vm0, %v27006_v62 }
 0x4b1   :  { %25755 = vmatmul.mubr.msk.f32.vlgmr.msra.gmra.mxu0 %vm98_vm0, %v27007_v35  ;;  %25757 = vmatprep.subr.mxu1 %v31272_v33 }
 0x4b2   :  { %25764 = vmatprep.subr.mxu0 %v31272_v33  ;;  %25758 = vmatpush3.msra.mxu1 %v27827_v22 }
 0x4b3   :  { %25765 = vmatpush3.msra.mxu0 %v27877_v4  ;;  %25759 = vmatprep.subr.mxu1 %v31272_v33 }
 0x4b4   :  { %25766 = vmatprep.subr.mxu0 %v31272_v33  ;;  %25760 = vmatpush3.msra.mxu1 %v27835_v41 }
 0x4b5   :  { %25761 = vmatprep.mubr.msk.f32.mxu1 %vm27182_vm1, %v31272_v33  ;;  %25767 = vmatpush3.msra.mxu0 %v27882_v29 }
 0x4b6   :  { %25768 = vmatprep.mubr.msk.f32.mxu0 %vm27182_vm1, %v31272_v33  ;;  %25762 = vmatmul.mubr.msk.f32.vlgmr.msra.gmra.mxu1 %vm98_vm0, %v27008_v47 }
 0x4b7   :  { %25769 = vmatmul.mubr.msk.f32.vlgmr.msra.gmra.mxu0 %vm98_vm0, %v27009_v25  ;;  %25771 = vmatprep.subr.mxu1 %v31272_v33 }
 0x4b8   :  { %25778 = vmatprep.subr.mxu0 %v31272_v33  ;;  %25772 = vmatpush3.msra.mxu1 %v27867_v59 }
 0x4b9   :  { %25779 = vmatpush3.msra.mxu0 %v27888_v28  ;;  %25773 = vmatprep.subr.mxu1 %v31272_v33 }
 0x4ba   :  { %25780 = vmatprep.subr.mxu0 %v31272_v33  ;;  %25774 = vmatpush3.msra.mxu1 %v27873_v38 }
 0x4bb   :  { %25775 = vmatprep.mubr.msk.f32.mxu1 %vm27182_vm1, %v31272_v33  ;;  %25781 = vmatpush3.msra.mxu0 %v27893_v8 }
 0x4bc   :  { %25782 = vmatprep.mubr.msk.f32.mxu0 %vm27182_vm1, %v31272_v33  ;;  %25776 = vmatmul.mubr.msk.f32.vlgmr.msra.gmra.mxu1 %vm98_vm0, %v27010_v53 }
 0x4bd   :  { %25783 = vmatmul.mubr.msk.f32.vlgmr.msra.gmra.mxu0 %vm98_vm0, %v27011_v16  ;;  %25785 = vmatprep.subr.mxu1 %v31272_v33 }
 0x4be   :  { %25786 = vmatpush3.msra.mxu1 %v27899_v42  ;;  %25789 = vmatprep.mubr.msk.f32.mxu1 %vm27182_vm1, %v31272_v33 }
 0x4bf   :  { %25787 = vmatprep.subr.mxu1 %v31272_v33  ;;  %25792 = vmatprep.subr.mxu0 %v31272_v33 }
 0x4c0   :  { %25788 = vmatpush3.msra.mxu1 %v27904_v11  ;;  %25794 = vmatprep.mubr.msk.f32.mxu0 %vm27182_vm1, %v31272_v33 }
 0x4c1   :  { %25790 = vmatmul.mubr.msk.f32.vlgmr.msra.gmra.mxu1 %vm98_vm0, %v27012_v32  ;;  %25797 = vmatprep.subr.mxu1 %v31272_v33 }
 0x4c2   :  { %25799 = vmatprep.mubr.msk.f32.mxu1 %vm27182_vm1, %v31272_v33 }
 0x551   :  { %v28165_v52 = vpop.f32.mrf.mxu1 }
 0x552   :  { %31277 = vst [vmem:[#allocation41_spill] sm:$0xff] %v28165_v52 }
 0x553   :  { %v28167_v17 = vpop.f32.mrf.mxu0  ;;  %v25705_v5 = vpop.f32.mrf.mxu1 }
 0x554   :  { %31278 = vst [vmem:[#allocation42_spill] sm:$0xff] %v28167_v17 }
 0x555   :  { %v25700_v26 = vpop.f32.mrf.mxu0 }
 0x556   :  { %v28169_v27 = vpop.f32.mrf.mxu1 }
 0x557   :  { %31279 = vst [vmem:[#allocation43_spill] sm:$0xff] %v28169_v27 }
 0x558   :  { %v25715_v62 = vpop.f32.mrf.mxu1 }
 0x55a   :  { %v28171_v35 = vpop.f32.mrf.mxu0 }
 0x55b   :  { %31280 = vst [vmem:[#allocation44_spill] sm:$0xff] %v28171_v35 }
 0x55c   :  { %v25710_v47 = vpop.f32.mrf.mxu0 }
 0x55f   :  { %v28173_v25 = vpop.f32.mrf.mxu1 }
 0x560   :  { %31281 = vst [vmem:[#allocation45_spill] sm:$0xff] %v28173_v25 }
 0x561   :  { %v25725_v53 = vpop.f32.mrf.mxu1 }
 0x563   :  { %v28175_v16 = vpop.f32.mrf.mxu0 }
 0x564   :  { %31282 = vst [vmem:[#allocation46_spill] sm:$0xff] %v28175_v16 }
 0x565   :  { %v25720_v32 = vpop.f32.mrf.mxu0 }
 0x567   :  { %v28177_v45 = vpop.f32.mrf.mxu0 }
 0x568   :  { %31283 = vst [vmem:[#allocation47_spill] sm:$0xff] %v28177_v45 }
 0x569   :  { %v25730_v31 = vpop.f32.mrf.mxu0 }
 0x56b   :  { %v28179_v52 = vpop.f32.mrf.mxu1  ;;  %v5504_v17 = vpop.f32.mrf.mxu0 }
 0x56c   :  { %31284 = vst [vmem:[#allocation48_spill] sm:$0xff] %v28179_v52  ;;  %v28182_v5 = vadd.f32 %v5504_v17, %v27948_v40 }
 0x56d   :  { %v25735_v26 = vpop.f32.mrf.mxu1  ;;  %v25742_v62 = vpop.f32.mrf.mxu0 }
 0x56e   :  { %v5998_v27 = vmax.f32 %v28182_v5, 0.0  ;;  %vm7214_vm15 = vcmp.gt.f32.partialorder %v28182_v5, 0.0  ;;  %v31309_v5 = vld [vmem:[#allocation28_spill] sm:$0xff] }
 0x570   :  { %v5574_v47 = vpop.f32.mrf.mxu1  ;;  %25793 = vmatpush3.xpose.msk.msra.mxu0 %vm370_vm2, %v5998_v27 }
 0x571   :  { %v28187_v53 = vadd.f32 %v5574_v47, %v27944_v1  ;;  %v5644_v32 = vpop.f32.mrf.mxu0  ;;  %25802 = vmatprep.subr.mxu0 %v31272_v33 }
 0x572   :  { %v28191_v31 = vadd.f32 %v5644_v32, %v27982_v0  ;;  %v25749_v52 = vpop.f32.mrf.mxu1 }
 0x573   :  { %v5999_v40 = vmax.f32 %v28187_v53, 0.0  ;;  %v25756_v17 = vpop.f32.mrf.mxu0  ;;  %25795 = vmatmul.mubr.msk.f32.vlgmr.msra.gmra.mxu0 %vm370_vm2, %v27978_v61  ;;  %vm7215_vm7 = vcmp.gt.f32.partialorder %v28187_v53, 0.0 }
 0x574   :  { %v31128_v26 = vmax.f32 %v28191_v31, 0.0  ;;  %25804 = vmatprep.mubr.msk.f32.mxu0 %vm27182_vm1, %v31272_v33  ;;  %vm7216_vm9 = vcmp.gt.f32.partialorder %v28191_v31, 0.0 }
 0x575   :  { %25798 = vmatpush3.xpose.msk.msra.mxu1 %vm370_vm2, %v5999_v40 }
 0x576   :  { %v5714_v1 = vpop.f32.mrf.mxu1  ;;  %25803 = vmatpush3.xpose.msk.msra.mxu0 %vm370_vm2, %v31128_v26  ;;  %25807 = vmatprep.subr.mxu1 %v31272_v33 }
 0x577   :  { %v28205_v0 = vadd.f32 %v5714_v1, %v27959_v39  ;;  %v5784_v52 = vpop.f32.mrf.mxu0  ;;  %25812 = vmatprep.subr.mxu0 %v31272_v33 }
 0x578   :  { %v28209_v62 = vadd.f32 %v5784_v52, %v28023_v60  ;;  %v25763_v47 = vpop.f32.mrf.mxu1  ;;  %25800 = vmatmul.mubr.msk.f32.vlgmr.msra.gmra.mxu1 %vm370_vm2, %v27971_v2 }
 0x579   :  { %v31123_v32 = vmax.f32 %v28205_v0, 0.0  ;;  %v25770_v17 = vpop.f32.mrf.mxu0  ;;  %25805 = vmatmul.mubr.msk.f32.vlgmr.msra.gmra.mxu0 %vm370_vm2, %v28016_v46  ;;  %25809 = vmatprep.mubr.msk.f32.mxu1 %vm27182_vm1, %v31272_v33  ;;  %vm7217_vm8 = vcmp.gt.f32.partialorder %v28205_v0, 0.0 }
 0x57a   :  { %v31127_v39 = vmax.f32 %v28209_v62, 0.0  ;;  %25814 = vmatprep.mubr.msk.f32.mxu0 %vm27182_vm1, %v31272_v33  ;;  %vm7218_vm11 = vcmp.gt.f32.partialorder %v28209_v62, 0.0 }
 0x57b   :  { %25808 = vmatpush3.xpose.msk.msra.mxu1 %vm370_vm2, %v31123_v32 }
 0x57c   :  { %v5854_v60 = vpop.f32.mrf.mxu1  ;;  %25813 = vmatpush3.xpose.msk.msra.mxu0 %vm370_vm2, %v31127_v39  ;;  %25817 = vmatprep.subr.mxu1 %v31272_v33  ;;  %v28283_v39 = vpop.permute.xlu0 %4740 }
 0x57d   :  { %v28229_v1 = vadd.f32 %v5854_v60, %v28005_v44  ;;  %v5924_v52 = vpop.f32.mrf.mxu0  ;;  %25822 = vmatprep.subr.mxu0 %v31272_v33  ;;  %31287 = vst [vmem:[#allocation51_spill] sm:$0xff] %v28283_v39 }
 0x57e   :  { %v28233_v47 = vadd.f32 %v5924_v52, %v28041_v55  ;;  %v25777_v17 = vpop.f32.mrf.mxu1  ;;  %25810 = vmatmul.mubr.msk.f32.vlgmr.msra.gmra.mxu1 %vm370_vm2, %v27997_v51 }
 0x57f   :  { %v31126_v32 = vmax.f32 %v28229_v1, 0.0  ;;  %25815 = vmatmul.mubr.msk.f32.vlgmr.msra.gmra.mxu0 %vm370_vm2, %v28053_v24  ;;  %25819 = vmatprep.mubr.msk.f32.mxu1 %vm27182_vm1, %v31272_v33  ;;  %v25784_v44 = vpop.f32.mrf.mxu0  ;;  %v31295_v20 = vmax.f32 %v28229_v1, 0.0  ;;  %vm7219_vm10 = vcmp.gt.f32.partialorder %v28229_v1, 0.0 }
 0x580   :  { %v31125_v60 = vmax.f32 %v28233_v47, 0.0  ;;  %25824 = vmatprep.mubr.msk.f32.mxu0 %vm27182_vm1, %v31272_v33  ;;  %vm7220_vm13 = vcmp.gt.f32.partialorder %v28233_v47, 0.0 }
 0x581   :  { %v5994_v55 = vpop.f32.mrf.mxu1  ;;  %25818 = vmatpush3.xpose.msk.msra.mxu1 %vm370_vm2, %v31126_v32 }
 0x582   :  { %v28249_v52 = vadd.f32 %v5994_v55, %v28059_v49  ;;  %25823 = vmatpush3.xpose.msk.msra.mxu0 %vm370_vm2, %v31125_v60  ;;  %25827 = vmatprep.subr.mxu1 %v31272_v33  ;;  %v28275_v49 = vpop.permute.xlu1 %4735  ;;  %v27013_v60 = vld [vmem:[%s31084_s1] sm:$0x1] }
 0x583   :  { %25832 = vmatprep.subr.mxu0 %v31272_v33  ;;  %v25791_v17 = vpop.f32.mrf.mxu1  ;;  %31285 = vst [vmem:[#allocation49_spill] sm:$0xff] %v28275_v49 }
 0x584   :  { %v31124_v44 = vmax.f32 %v28249_v52, 0.0  ;;  %25820 = vmatmul.mubr.msk.f32.vlgmr.msra.gmra.mxu1 %vm370_vm2, %v28035_v7  ;;  %vm7221_vm12 = vcmp.gt.f32.partialorder %v28249_v52, 0.0 }
 0x585   :  { %25825 = vmatmul.mubr.msk.f32.vlgmr.msra.gmra.mxu0 %vm370_vm2, %v28069_v18  ;;  %25829 = vmatprep.mubr.msk.f32.mxu1 %vm27182_vm1, %v31272_v33 }
 0x586   :  { %25828 = vmatpush3.xpose.msk.msra.mxu1 %vm370_vm2, %v31124_v44  ;;  %25833 = vmatpush3.msra.mxu0 %v5998_v27  ;;  %v28278_v17 = vpop.permute.xlu1 %4750 }
 0x587   :  { %25837 = vmatprep.subr.mxu1 %v31272_v33  ;;  %25834 = vmatprep.mubr.msk.f32.mxu0 %vm27182_vm1, %v31272_v33  ;;  %31286 = vst [vmem:[#allocation50_spill] sm:$0xff] %v28278_v17 }
 0x588   :  { %25842 = vmatprep.subr.mxu0 %v31272_v33 }
 0x589   :  { %25830 = vmatmul.mubr.msk.f32.vlgmr.msra.gmra.mxu1 %vm370_vm2, %v28077_v54 }
 0x58a   :  { %25838 = vmatpush3.msra.mxu1 %v5999_v40  ;;  %25839 = vmatprep.mubr.msk.f32.mxu1 %vm27182_vm1, %v31272_v33  ;;  %v28287_v45 = vpop.permute.xlu1 %4745 }
 0x58b   :  { %25847 = vmatprep.subr.mxu1 %v31272_v33  ;;  %31288 = vst [vmem:[#allocation52_spill] sm:$0xff] %v28287_v45 }
 0x633   :  { %v6075_v55 = vpop.f32.mrf.mxu0 }
 0x634   :  { %v6076_v27 = vadd.f32 %v6075_v55, %v28275_v49 }
 0x635   :  { %v25796_v44 = vpop.f32.mrf.mxu0 }
 0x636   :  { %v6590_v32 = vsub.f32 %v6076_v27, %v27013_v60  ;;  %v27014_v60 = vld [vmem:[%s31084_s1 + $0x1] sm:$0x1]  ;;  %v31289_v27 = vmax.f32 %v28191_v31, 0.0 }
 0x638   :  { %v28285_v40 = vmul.f32 0.25, %v6590_v32  ;;  %v6148_v26 = vpop.f32.mrf.mxu1 }
 0x639   :  { %v6149_v25 = vadd.f32 %v6148_v26, %v28283_v39  ;;  %v6221_v16 = vpop.f32.mrf.mxu0 }
 0x63a   :  { %v6222_v55 = vadd.f32 %v6221_v16, %v28287_v45  ;;  %v25801_v35 = vpop.f32.mrf.mxu1  ;;  %7222 = vxpose.xlu0.b32.start.end [1/1] (short) (narrow) %v28285_v40, 8  ;;  %25835 = vmatmul.mubr.msk.f32.vlgmr.msra.gmra.mxu0 %vm1624_vm3, %v28285_v40 }
 0x63b   :  { %v6591_v32 = vsub.f32 %v6149_v25, %v27014_v60  ;;  %v25806_v44 = vpop.f32.mrf.mxu0  ;;  %25843 = vmatpush3.msra.mxu0 %v31289_v27  ;;  %25844 = vmatprep.mubr.msk.f32.mxu0 %vm27182_vm1, %v31272_v33  ;;  %v27015_v35 = vld [vmem:[%s31084_s1 + $0x2] sm:$0x1]  ;;  %v28309_v25 = vpop.permute.xlu0 %4755 }
 0x63c   :  { %v6592_v16 = vsub.f32 %v6222_v55, %v27015_v35  ;;  %25852 = vmatprep.subr.mxu0 %v31272_v33  ;;  %31290 = vst [vmem:[#allocation53_spill] sm:$0xff] %v28309_v25  ;;  %v31291_v35 = vmax.f32 %v28205_v0, 0.0 }
 0x63d   :  { %v28305_v26 = vmul.f32 0.25, %v6591_v32  ;;  %v27016_v32 = vld [vmem:[%s31084_s1 + $0x3] sm:$0x1] }
 0x63e   :  { %v28307_v45 = vmul.f32 0.25, %v6592_v16  ;;  %v6294_v39 = vpop.f32.mrf.mxu1 }
 0x63f   :  { %v6295_v60 = vadd.f32 %v6294_v39, %v28278_v17  ;;  %v6367_v44 = vpop.f32.mrf.mxu0  ;;  %25840 = vmatmul.mubr.msk.f32.vlgmr.msra.gmra.mxu1 %vm1624_vm3, %v28305_v26  ;;  %7329 = vxpose.xlu1.b32.start.end [1/1] (short) (narrow) %v28305_v26, 8  ;;  %v31292_v17 = vmax.f32 %v28209_v62, 0.0 }
 0x640   :  { %v6368_v27 = vadd.f32 %v6367_v44, %v28309_v25  ;;  %v25811_v55 = vpop.f32.mrf.mxu1  ;;  %25848 = vmatpush3.msra.mxu1 %v31291_v35  ;;  %25845 = vmatmul.mubr.msk.f32.vlgmr.msra.gmra.mxu0 %vm1624_vm3, %v28307_v45  ;;  %v27017_v44 = vld [vmem:[%s31084_s1 + $0x4] sm:$0x1]  ;;  %v28333_v35 = vpop.permute.xlu1 %4760 }
 0x641   :  { %v6593_v39 = vsub.f32 %v6295_v60, %v27016_v32  ;;  %v25816_v16 = vpop.f32.mrf.mxu0  ;;  %25853 = vmatpush3.msra.mxu0 %v31292_v17  ;;  %25849 = vmatprep.mubr.msk.f32.mxu1 %vm27182_vm1, %v31272_v33  ;;  %31293 = vst [vmem:[#allocation54_spill] sm:$0xff] %v28333_v35 }
 0x642   :  { %v6594_v55 = vsub.f32 %v6368_v27, %v27017_v44  ;;  %25854 = vmatprep.mubr.msk.f32.mxu0 %vm27182_vm1, %v31272_v33  ;;  %25857 = vmatprep.subr.mxu1 %v31272_v33  ;;  %v28336_v16 = vpop.permute.xlu0 %4765 }
 0x643   :  { %v6601_v60 = vmul.f32 0.25, %v6593_v39  ;;  %25862 = vmatprep.subr.mxu0 %v31272_v33  ;;  %31294 = vst [vmem:[#allocation55_spill] sm:$0xff] %v28336_v16  ;;  %v27018_v39 = vld [vmem:[%s31084_s1 + $0x5] sm:$0x1] }
 0x644   :  { %v6602_v32 = vmul.f32 0.25, %v6594_v55  ;;  %v6440_v17 = vpop.f32.mrf.mxu1 }
 0x645   :  { %v6441_v25 = vadd.f32 %v6440_v17, %v28333_v35  ;;  %v6513_v49 = vpop.f32.mrf.mxu0  ;;  %25850 = vmatmul.mubr.msk.f32.vlgmr.msra.gmra.mxu1 %vm1624_vm3, %v6601_v60  ;;  %7543 = vxpose.xlu0.b32.start.end [1/1] (short) (narrow) %v6601_v60, 8  ;;  %v31296_v17 = vmax.f32 %v28233_v47, 0.0  ;;  %v31298_v35 = vmax.f32 %v28249_v52, 0.0 }
 0x646   :  { %v6514_v27 = vadd.f32 %v6513_v49, %v28336_v16  ;;  %v25821_v44 = vpop.f32.mrf.mxu1  ;;  %25858 = vmatpush3.msra.mxu1 %v31295_v20  ;;  %25855 = vmatmul.mubr.msk.f32.vlgmr.msra.gmra.mxu0 %vm1624_vm3, %v6602_v32  ;;  %v27019_v49 = vld [vmem:[%s31084_s1 + $0x6] sm:$0x1]  ;;  %v28357_v20 = vpop.permute.xlu1 %4770 }
 0x647   :  { %v6595_v55 = vsub.f32 %v6441_v25, %v27018_v39  ;;  %v25826_v21 = vpop.f32.mrf.mxu0  ;;  %25863 = vmatpush3.msra.mxu0 %v31296_v17  ;;  %25859 = vmatprep.mubr.msk.f32.mxu1 %vm27182_vm1, %v31272_v33  ;;  %31297 = vst [vmem:[#allocation56_spill] sm:$0xff] %v28357_v20 }
 0x648   :  { %v6596_v44 = vsub.f32 %v6514_v27, %v27019_v49  ;;  %25864 = vmatprep.mubr.msk.f32.mxu0 %vm27182_vm1, %v31272_v33  ;;  %25867 = vmatprep.subr.mxu1 %v31272_v33  ;;  %v27020_v27 = vld [vmem:[%s31084_s1 + $0x7] sm:$0x1] }
 0x649   :  { %v6603_v25 = vmul.f32 0.25, %v6595_v55  ;;  %v6586_v21 = vpop.f32.mrf.mxu1  ;;  %25872 = vmatprep.subr.mxu0 %v31272_v33  ;;  %7436 = vxpose.xlu0.b32.start.end [1/1] (short) (narrow) %v28307_v45, 8 }
 0x64a   :  { %v6604_v39 = vmul.f32 0.25, %v6596_v44  ;;  %v6587_v17 = vadd.f32 %v6586_v21, %v28357_v20  ;;  %v7199_v44 = vsel %vm974_vm5, %v6601_v60, 0.0  ;;  %v7202_v21 = vsel %vm974_vm5, %v6602_v32, 0.0 }
 0x64b   :  { %v25831_v16 = vpop.f32.mrf.mxu1  ;;  %25860 = vmatmul.mubr.msk.f32.vlgmr.msra.gmra.mxu1 %vm1624_vm3, %v6603_v25 }
 0x64c   :  { %v6597_v49 = vsub.f32 %v6587_v17, %v27020_v27  ;;  %25868 = vmatpush3.msra.mxu1 %v31298_v35  ;;  %7864 = vxpose.xlu1.b32.start.end [1/1] (short) (narrow) %v6604_v39, 8  ;;  %v7190_v35 = vsel %vm974_vm5, %v28285_v40, 0.0  ;;  %v7196_v16 = vsel %vm974_vm5, %v28307_v45, 0.0  ;;  %v7208_v17 = vsel %vm974_vm5, %v6604_v39, 0.0 }
 0x64d   :  { %25865 = vmatmul.mubr.msk.f32.vlgmr.msra.gmra.mxu0 %vm1624_vm3, %v6604_v39  ;;  %25869 = vmatprep.mubr.msk.f32.mxu1 %vm27182_vm1, %v31272_v33  ;;  %v7193_v27 = vsel %vm974_vm5, %v28305_v26, 0.0  ;;  %v7205_v40 = vsel %vm974_vm5, %v6603_v25, 0.0 }
 0x64e   :  { %v6605_v55 = vmul.f32 0.25, %v6597_v49  ;;  %25873 = vmatpush3.msk.msra.mxu0 %vm2277_vm4, %v27978_v61  ;;  %25877 = vmatprep.subr.mxu1 %v31272_v33 }
 0x64f   :  { %7757 = vxpose.xlu0.b32.start.end [1/1] (short) (narrow) %v6603_v25, 8  ;;  %25874 = vmatprep.mubr.msk.f32.mxu0 %vm27182_vm1, %v31272_v33 }
 0x650   :  { %25870 = vmatmul.mubr.msk.f32.vlgmr.msra.gmra.mxu1 %vm1624_vm3, %v6605_v55  ;;  %25882 = vmatprep.subr.mxu0 %v31272_v33  ;;  %v7211_v49 = vsel %vm974_vm5, %v6605_v55, 0.0 }
 0x651   :  { %25878 = vmatpush3.msk.msra.mxu1 %vm2277_vm4, %v27971_v2  ;;  %25879 = vmatprep.mubr.msk.f32.mxu1 %vm27182_vm1, %v31272_v33 }
 0x652   :  { %25887 = vmatprep.subr.mxu1 %v31272_v33 }
 0x653   :  { %7650 = vxpose.xlu0.b32.start.end [1/1] (short) (narrow) %v6602_v32, 8 }
 0x657   :  { %7971 = vxpose.xlu0.b32.start.end [1/1] (short) (narrow) %v6605_v55, 8 }
 0x673   :  { %7191 = vadd.xlane.f32.xlu1 %v7190_v35 }
 0x677   :  { %7197 = vadd.xlane.f32.xlu1 %v7196_v16 }
 0x67b   :  { %7200 = vadd.xlane.f32.xlu1 %v7199_v44 }
 0x67f   :  { %7203 = vadd.xlane.f32.xlu1 %v7202_v21 }
 0x683   :  { %7209 = vadd.xlane.f32.xlu1 %v7208_v17 }
 0x684   :  { %7194 = vadd.xlane.f32.xlu0 %v7193_v27 }
 0x688   :  { %7206 = vadd.xlane.f32.xlu0 %v7205_v40 }
 0x68c   :  { %7212 = vadd.xlane.f32.xlu0 %v7211_v49 }
 0x6b6   :  { %v7238_v45 = vpop.trf.xlu0 }
 0x6b7   :  { %25875 = vmatmul.mubr.msk.f32.vlgmr.msra.gmra.mxu0 %vm2273_vm6, %v7238_v45 }
 0x6b8   :  { %25883 = vmatpush3.msk.msra.mxu0 %vm2277_vm4, %v28016_v46  ;;  %25884 = vmatprep.mubr.msk.f32.mxu0 %vm27182_vm1, %v31272_v33 }
 0x6b9   :  { %25892 = vmatprep.subr.mxu0 %v31272_v33 }
 0x6bb   :  { %v7345_v60 = vpop.trf.xlu1 }
 0x6bc   :  { %25880 = vmatmul.mubr.msk.f32.vlgmr.msra.gmra.mxu1 %vm2273_vm6, %v7345_v60 }
 0x6bd   :  { %25888 = vmatpush3.msk.msra.mxu1 %vm2277_vm4, %v27997_v51  ;;  %25889 = vmatprep.mubr.msk.f32.mxu1 %vm27182_vm1, %v31272_v33 }
 0x6be   :  { %25897 = vmatprep.subr.mxu1 %v31272_v33 }
 0x6c1   :  { %v7559_v26 = vpop.trf.xlu0 }
 0x6c2   :  { %25890 = vmatmul.mubr.msk.f32.vlgmr.msra.gmra.mxu1 %vm2273_vm6, %v7559_v26 }
 0x6c3   :  { %25898 = vmatpush3.msk.msra.mxu1 %vm2277_vm4, %v28035_v7  ;;  %25899 = vmatprep.mubr.msk.f32.mxu1 %vm27182_vm1, %v31272_v33 }
 0x6c4   :  { %25907 = vmatprep.subr.mxu1 %v31272_v33 }
 0x6c5   :  { %v7452_v32 = vpop.trf.xlu0 }
 0x6c6   :  { %25885 = vmatmul.mubr.msk.f32.vlgmr.msra.gmra.mxu0 %vm2273_vm6, %v7452_v32 }
 0x6c7   :  { %25893 = vmatpush3.msk.msra.mxu0 %vm2277_vm4, %v28053_v24  ;;  %25894 = vmatprep.mubr.msk.f32.mxu0 %vm27182_vm1, %v31272_v33 }
 0x6c8   :  { %25902 = vmatprep.subr.mxu0 %v31272_v33  ;;  %v7880_v55 = vpop.trf.xlu1 }
 0x6cb   :  { %v7773_v25 = vpop.trf.xlu0 }
 0x6cc   :  { %25900 = vmatmul.mubr.msk.f32.vlgmr.msra.gmra.mxu1 %vm2273_vm6, %v7773_v25 }
 0x6cd   :  { %25908 = vmatpush3.msk.msra.mxu1 %vm2277_vm4, %v28077_v54  ;;  %25909 = vmatprep.mubr.msk.f32.mxu1 %vm27182_vm1, %v31272_v33 }
 0x6cf   :  { %v7666_v39 = vpop.trf.xlu0 }
 0x6d0   :  { %25895 = vmatmul.mubr.msk.f32.vlgmr.msra.gmra.mxu0 %vm2273_vm6, %v7666_v39 }
 0x6d1   :  { %25903 = vmatpush3.msk.msra.mxu0 %vm2277_vm4, %v28069_v18  ;;  %25904 = vmatprep.mubr.msk.f32.mxu0 %vm27182_vm1, %v31272_v33 }
 0x6d3   :  { %v7987_v35 = vpop.trf.xlu0 }
 0x6d4   :  { %25905 = vmatmul.mubr.msk.f32.vlgmr.msra.gmra.mxu0 %vm2273_vm6, %v7880_v55  ;;  %25910 = vmatmul.mubr.msk.f32.vlgmr.msra.gmra.mxu1 %vm2273_vm6, %v7987_v35 }
 0x6d5   :  { %25914 = vmatprep.mubr.msk.f32.mxu0 %vm1624_vm3, %v27670_v63  ;;  %25919 = vmatprep.mubr.msk.f32.mxu1 %vm1624_vm3, %v27676_v50 }
 0x6fa   :  { %v28434_v16 = vpop.f32.mrf.mxu0 }
 0x6fc   :  { %v7192_v44 = vpop.xlane.xlu1 %7191  ;;  %v25836_v21 = vpop.f32.mrf.mxu0 }
 0x6fd   :  { %v8806_v17 = vmul.f32 0.0001, %v7192_v44 }
 0x6ff   :  { %v28437_v27 = vsub.f32 %v27715_v10, %v8806_v17  ;;  %v28439_v40 = vpop.f32.mrf.mxu1 }
 0x700   :  { %v7198_v49 = vpop.xlane.xlu1 %7197  ;;  %v28441_v45 = vpop.f32.mrf.mxu0 }
 0x701   :  { %31299 = vst [vmem:[#allocation57_spill] sm:$0xff] %v28437_v27  ;;  %9424 = vperm.xlu1 %26995, %v28437_v27   ;;  %v25841_v60 = vpop.f32.mrf.mxu1  ;;  %v8808_v35 = vmul.f32 0.0001, %v7198_v49 }
 0x702   :  { %v25846_v26 = vpop.f32.mrf.mxu0 }
 0x703   :  { %v28453_v17 = vsub.f32 %v27735_v15, %v8808_v35 }
 0x704   :  { %v7201_v32 = vpop.xlane.xlu1 %7200 }
 0x705   :  { %v8809_v25 = vmul.f32 0.0001, %v7201_v32  ;;  %v28444_v39 = vpop.f32.mrf.mxu1  ;;  %31301 = vst [vmem:[#allocation59_spill] sm:$0xff] %v28453_v17 }
 0x706   :  { %v28446_v55 = vpop.f32.mrf.mxu0 }
 0x707   :  { %v28449_v44 = vsub.f32 %v27721_v58, %v8809_v25  ;;  %v25851_v10 = vpop.f32.mrf.mxu1 }
 0x708   :  { %v25856_v21 = vpop.f32.mrf.mxu0  ;;  %v7204_v20 = vpop.xlane.xlu1 %7203 }
 0x709   :  { %31300 = vst [vmem:[#allocation58_spill] sm:$0xff] %v28449_v44  ;;  %9439 = vperm.xlu1 %26995, %v28449_v44   ;;  %v8810_v25 = vmul.f32 0.0001, %v7204_v20 }
 0x70b   :  { %v28455_v60 = vpop.f32.mrf.mxu1  ;;  %v28467_v63 = vsub.f32 %v27742_v48, %v8810_v25 }
 0x70c   :  { %v7210_v10 = vpop.xlane.xlu1 %7209 }
 0x70d   :  { %v28457_v26 = vpop.f32.mrf.mxu0  ;;  %9434 = vperm.xlu1 %26995, %v28453_v17   ;;  %v25861_v32 = vpop.f32.mrf.mxu1  ;;  %31303 = vst [vmem:[#allocation61_spill] sm:$0xff] %v28467_v63  ;;  %v8812_v17 = vmul.f32 0.0001, %v7210_v10  ;;  %v31310_v10 = vld [vmem:[#allocation30_spill] sm:$0xff] }
 0x70e   :  { %v7195_v27 = vpop.xlane.xlu0 %7194 }
 0x70f   :  { %v8807_v49 = vmul.f32 0.0001, %v7195_v27  ;;  %v25866_v50 = vpop.f32.mrf.mxu0 }
 0x710   :  { %v28460_v58 = vpop.f32.mrf.mxu1 }
 0x711   :  { %v28463_v21 = vsub.f32 %v27731_v30, %v8807_v49  ;;  %v28475_v30 = vsub.f32 %v27750_v43, %v8812_v17  ;;  %v31307_v49 = vld [vmem:[#allocation22_spill] sm:$0xff]  ;;  %v31308_v43 = vld [vmem:[#allocation24_spill] sm:$0xff] }
 0x712   :  { %v25871_v15 = vpop.f32.mrf.mxu1  ;;  %v7207_v35 = vpop.xlane.xlu0 %7206 }
 0x713   :  { %31302 = vst [vmem:[#allocation60_spill] sm:$0xff] %v28463_v21  ;;  %v8811_v44 = vmul.f32 0.0001, %v7207_v35  ;;  %9429 = vperm.xlu0 %26994, %v28463_v21   ;;  %31305 = vst [vmem:[#allocation63_spill] sm:$0xff] %v28475_v30 }
 0x715   :  { %v28470_v32 = vsub.f32 %v27739_v34, %v8811_v44 }
 0x716   :  { %v7213_v50 = vpop.xlane.xlu0 %7212 }
 0x717   :  { %31304 = vst [vmem:[#allocation62_spill] sm:$0xff] %v28470_v32  ;;  %v8813_v27 = vmul.f32 0.0001, %v7213_v50  ;;  %9444 = vperm.xlu0 %26994, %v28467_v63   ;;  %9449 = vperm.xlu1 %26995, %v28470_v32   ;;  %v31311_v50 = vld [vmem:[#allocation32_spill] sm:$0xff] }
 0x719   :  { %v28478_v20 = vsub.f32 %v27747_v13, %v8813_v27 }
 0x71b   :  { %31306 = vst [vmem:[#allocation64_spill] sm:$0xff] %v28478_v20  ;;  %9459 = vperm.xlu1 %26995, %v28478_v20   ;;  %9454 = vperm.xlu0 %26994, %v28475_v30  }
 0x777   :  { %v7325_v34 = vpop.f32.mrf.mxu0 }
 0x778   :  { %v28483_v48 = vsel %vm7214_vm15, %v7325_v34, 0.0  ;;  %25912 = vmatprep.subr.msk.mxu0 %vm7214_vm15, %v7325_v34 }
 0x779   :  { %25913 = vmatpush3.msk.msra.mxu0 %vm7214_vm15, %v7325_v34  ;;  %v25876_v44 = vpop.f32.mrf.mxu0  ;;  %v31312_v34 = vld [vmem:[#allocation33_spill] sm:$0xff] }
 0x77a   :  { %25915 = vmatmul.mubr.msk.f32.vlgmr.msra.gmra.mxu0 %vm1624_vm3, %v31307_v49 }
 0x77b   :  { %25924 = vmatprep.mubr.msk.f32.mxu0 %vm1624_vm3, %v31308_v43  ;;  %v27021_v43 = vld [vmem:[#allocation2] sm:$0xff] }
 0x77c   :  { %v7432_v13 = vpop.f32.mrf.mxu1 }
 0x77d   :  { %v28490_v17 = vsel %vm7215_vm7, %v7432_v13, 0.0  ;;  %25917 = vmatprep.subr.msk.mxu1 %vm7215_vm7, %v7432_v13 }
 0x77e   :  { %v25881_v25 = vpop.f32.mrf.mxu1  ;;  %25918 = vmatpush3.msk.msra.mxu1 %vm7215_vm7, %v7432_v13  ;;  %v31313_v13 = vld [vmem:[#allocation25_spill] sm:$0xff] }
 0x77f   :  { %25920 = vmatmul.mubr.msk.f32.vlgmr.msra.gmra.mxu1 %vm1624_vm3, %v31309_v5  ;;  %v31314_v25 = vld [vmem:[#allocation26_spill] sm:$0xff] }
 0x780   :  { %25929 = vmatprep.mubr.msk.f32.mxu1 %vm1624_vm3, %v31310_v10 }
 0x782   :  { %v7646_v15 = vpop.f32.mrf.mxu1 }
 0x783   :  { %v28497_v35 = vsel %vm7217_vm8, %v7646_v15, 0.0  ;;  %25927 = vmatprep.subr.msk.mxu1 %vm7217_vm8, %v7646_v15 }
 0x784   :  { %25928 = vmatpush3.msk.msra.mxu1 %vm7217_vm8, %v7646_v15  ;;  %v25891_v53 = vpop.f32.mrf.mxu1 }
 0x785   :  { %25930 = vmatmul.mubr.msk.f32.vlgmr.msra.gmra.mxu1 %vm1624_vm3, %v31311_v50 }
 0x786   :  { %v7539_v27 = vpop.f32.mrf.mxu0  ;;  %25939 = vmatprep.mubr.msk.f32.mxu1 %vm1624_vm3, %v31312_v34  ;;  %v31315_v34 = vld [vmem:[#allocation34_spill] sm:$0xff] }
 0x787   :  { %v28504_v44 = vsel %vm7216_vm9, %v7539_v27, 0.0  ;;  %25922 = vmatprep.subr.msk.mxu0 %vm7216_vm9, %v7539_v27 }
 0x788   :  { %25923 = vmatpush3.msk.msra.mxu0 %vm7216_vm9, %v7539_v27  ;;  %v25886_v0 = vpop.f32.mrf.mxu0 }
 0x789   :  { %25925 = vmatmul.mubr.msk.f32.vlgmr.msra.gmra.mxu0 %vm1624_vm3, %v31313_v13  ;;  %v31316_v0 = vld [vmem:[#allocation35_spill] sm:$0xff] }
 0x78a   :  { %25934 = vmatprep.mubr.msk.f32.mxu0 %vm1624_vm3, %v31314_v25  ;;  %v31317_v25 = vld [vmem:[#allocation27_spill] sm:$0xff] }
 0x78c   :  { %v7860_v15 = vpop.f32.mrf.mxu1 }
 0x78d   :  { %v28511_v53 = vsel %vm7219_vm10, %v7860_v15, 0.0  ;;  %25937 = vmatprep.subr.msk.mxu1 %vm7219_vm10, %v7860_v15 }
 0x78e   :  { %25938 = vmatpush3.msk.msra.mxu1 %vm7219_vm10, %v7860_v15  ;;  %v25901_v31 = vpop.f32.mrf.mxu1 }
 0x78f   :  { %25940 = vmatmul.mubr.msk.f32.vlgmr.msra.gmra.mxu1 %vm1624_vm3, %v31315_v34  ;;  %v31318_v31 = vld [vmem:[#allocation29_spill] sm:$0xff] }
 0x790   :  { %v7753_v27 = vpop.f32.mrf.mxu0  ;;  %25949 = vmatprep.mubr.msk.f32.mxu1 %vm1624_vm3, %v31316_v0 }
 0x791   :  { %v28518_v13 = vsel %vm7218_vm11, %v7753_v27, 0.0  ;;  %25932 = vmatprep.subr.msk.mxu0 %vm7218_vm11, %v7753_v27 }
 0x792   :  { %25933 = vmatpush3.msk.msra.mxu0 %vm7218_vm11, %v7753_v27  ;;  %v25896_v1 = vpop.f32.mrf.mxu0  ;;  %v31319_v27 = vld [vmem:[#allocation36_spill] sm:$0xff] }
 0x793   :  { %25935 = vmatmul.mubr.msk.f32.vlgmr.msra.gmra.mxu0 %vm1624_vm3, %v31317_v25  ;;  %v31320_v25 = vld [vmem:[#allocation31_spill] sm:$0xff] }
 0x794   :  { %v8074_v15 = vpop.f32.mrf.mxu1  ;;  %25944 = vmatprep.mubr.msk.f32.mxu0 %vm1624_vm3, %v31318_v31  ;;  %v7967_v62 = vpop.f32.mrf.mxu0 }
 0x795   :  { %v28526_v34 = vsel %vm7221_vm12, %v8074_v15, 0.0  ;;  %25947 = vmatprep.subr.msk.mxu1 %vm7221_vm12, %v8074_v15  ;;  %v28528_v0 = vsel %vm7220_vm13, %v7967_v62, 0.0  ;;  %25942 = vmatprep.subr.msk.mxu0 %vm7220_vm13, %v7967_v62 }
 0x796   :  { %25948 = vmatpush3.msk.msra.mxu1 %vm7221_vm12, %v8074_v15  ;;  %25943 = vmatpush3.msk.msra.mxu0 %vm7220_vm13, %v7967_v62  ;;  %v25906_v1 = vpop.f32.mrf.mxu0  ;;  %v25911_v52 = vpop.f32.mrf.mxu1 }
 0x797   :  { %25950 = vmatmul.mubr.msk.f32.vlgmr.msra.gmra.mxu1 %vm1624_vm3, %v31319_v27  ;;  %25945 = vmatmul.mubr.msk.f32.vlgmr.msra.gmra.mxu0 %vm1624_vm3, %v31320_v25 }
 0x798   :  { %25952 = vmatprep.subr.mxu0 %v31272_v33  ;;  %25956 = vmatprep.mubr.msk.f32.mxu0 %vm27182_vm1, %v31272_v33 }
 0x799   :  { %25959 = vmatprep.subr.mxu1 %v31272_v33  ;;  %25963 = vmatprep.mubr.msk.f32.mxu1 %vm27182_vm1, %v31272_v33 }
 0x83a   :  { %v25916_v47 = vpop.f32.mrf.mxu0 }
 0x83b   :  { %v8743_v15 = vmul.f32 0.0001, %v25916_v47 }
 0x83c   :  { %v8152_v62 = vpop.f32.mrf.mxu0 }
 0x83d   :  { %v28541_v27 = vsub.f32 %v27816_v14, %v8743_v15  ;;  %v8742_v1 = vmul.f32 0.0001, %v8152_v62 }
 0x83f   :  { %v28544_v52 = vsub.f32 %v27824_v19, %v8742_v1  ;;  %v25921_v25 = vpop.f32.mrf.mxu1  ;;  %25953 = vmatpush3.msra.mxu0 %v28541_v27 }
 0x840   :  { %v8745_v31 = vmul.f32 0.0001, %v25921_v25  ;;  %25954 = vmatprep.subr.mxu0 %v31272_v33 }
 0x841   :  { %v8227_v50 = vpop.f32.mrf.mxu1  ;;  %25955 = vmatpush3.msra.mxu0 %v28544_v52 }
 0x842   :  { %v28550_v10 = vsub.f32 %v27813_v9, %v8745_v31  ;;  %v8744_v47 = vmul.f32 0.0001, %v8227_v50  ;;  %25957 = vmatmul.mubr.msk.f32.vlgmr.msra.gmra.mxu0 %vm98_vm0, %v27021_v43  ;;  %25966 = vmatprep.subr.mxu0 %v31272_v33  ;;  %v27022_v50 = vld [vmem:[#allocation2 + $0x8] sm:$0xff] }
 0x843   :  { %25970 = vmatprep.mubr.msk.f32.mxu0 %vm27182_vm1, %v31272_v33 }
 0x844   :  { %v28557_v14 = vsub.f32 %v27819_v37, %v8744_v47  ;;  %25960 = vmatpush3.msra.mxu1 %v28550_v10 }
 0x845   :  { %v25931_v19 = vpop.f32.mrf.mxu1  ;;  %25961 = vmatprep.subr.mxu1 %v31272_v33 }
 0x846   :  { %v8749_v25 = vmul.f32 0.0001, %v25931_v19  ;;  %25962 = vmatpush3.msra.mxu1 %v28557_v14 }
 0x847   :  { %v8377_v9 = vpop.f32.mrf.mxu1  ;;  %25964 = vmatmul.mubr.msk.f32.vlgmr.msra.gmra.mxu1 %vm98_vm0, %v27022_v50  ;;  %25973 = vmatprep.subr.mxu1 %v31272_v33  ;;  %v27024_v50 = vld [vmem:[#allocation2 + $0x10] sm:$0xff] }
 0x848   :  { %v28565_v43 = vsub.f32 %v27827_v22, %v8749_v25  ;;  %v8748_v31 = vmul.f32 0.0001, %v8377_v9  ;;  %25977 = vmatprep.mubr.msk.f32.mxu1 %vm27182_vm1, %v31272_v33  ;;  %v27023_v22 = vld [vmem:[#allocation2 + $0x18] sm:$0xff] }
 0x849   :  { %v25926_v37 = vpop.f32.mrf.mxu0 }
 0x84a   :  { %v28570_v15 = vsub.f32 %v27835_v41, %v8748_v31  ;;  %v8747_v62 = vmul.f32 0.0001, %v25926_v37  ;;  %25974 = vmatpush3.msra.mxu1 %v28565_v43 }
 0x84b   :  { %v8302_v1 = vpop.f32.mrf.mxu0  ;;  %25975 = vmatprep.subr.mxu1 %v31272_v33 }
 0x84c   :  { %v28575_v47 = vsub.f32 %v27848_v3, %v8747_v62  ;;  %v8746_v19 = vmul.f32 0.0001, %v8302_v1  ;;  %25976 = vmatpush3.msra.mxu1 %v28570_v15 }
 0x84d   :  { %25978 = vmatmul.mubr.msk.f32.vlgmr.msra.gmra.mxu1 %vm98_vm0, %v27023_v22  ;;  %25987 = vmatprep.subr.mxu1 %v31272_v33 }
 0x84e   :  { %v28581_v41 = vsub.f32 %v27859_v12, %v8746_v19  ;;  %25967 = vmatpush3.msra.mxu0 %v28575_v47  ;;  %25991 = vmatprep.mubr.msk.f32.mxu1 %vm27182_vm1, %v31272_v33 }
 0x84f   :  { %v25941_v25 = vpop.f32.mrf.mxu1  ;;  %25968 = vmatprep.subr.mxu0 %v31272_v33 }
 0x850   :  { %v8753_v3 = vmul.f32 0.0001, %v25941_v25  ;;  %25969 = vmatpush3.msra.mxu0 %v28581_v41 }
 0x851   :  { %v8527_v9 = vpop.f32.mrf.mxu1  ;;  %25971 = vmatmul.mubr.msk.f32.vlgmr.msra.gmra.mxu0 %vm98_vm0, %v27024_v50  ;;  %25980 = vmatprep.subr.mxu0 %v31272_v33 }
 0x852   :  { %v28591_v12 = vsub.f32 %v27867_v59, %v8753_v3  ;;  %v8752_v31 = vmul.f32 0.0001, %v8527_v9  ;;  %25984 = vmatprep.mubr.msk.f32.mxu0 %vm27182_vm1, %v31272_v33  ;;  %v27025_v3 = vld [vmem:[#allocation2 + $0x28] sm:$0xff] }
 0x853   :  { %v25936_v37 = vpop.f32.mrf.mxu0 }
 0x854   :  { %v28596_v62 = vsub.f32 %v27873_v38, %v8752_v31  ;;  %v8751_v1 = vmul.f32 0.0001, %v25936_v37  ;;  %25988 = vmatpush3.msra.mxu1 %v28591_v12 }
 0x855   :  { %v8452_v19 = vpop.f32.mrf.mxu0  ;;  %25989 = vmatprep.subr.mxu1 %v31272_v33 }
 0x856   :  { %v28601_v22 = vsub.f32 %v27877_v4, %v8751_v1  ;;  %v8750_v25 = vmul.f32 0.0001, %v8452_v19  ;;  %25990 = vmatpush3.msra.mxu1 %v28596_v62 }
 0x857   :  { %v25951_v59 = vpop.f32.mrf.mxu1  ;;  %25992 = vmatmul.mubr.msk.f32.vlgmr.msra.gmra.mxu1 %vm98_vm0, %v27025_v3  ;;  %26001 = vmatprep.subr.mxu1 %v31272_v33  ;;  %v25946_v9 = vpop.f32.mrf.mxu0 }
 0x858   :  { %v28607_v38 = vsub.f32 %v27882_v29, %v8750_v25  ;;  %v8757_v50 = vmul.f32 0.0001, %v25951_v59  ;;  %25981 = vmatpush3.msra.mxu0 %v28601_v22  ;;  %26005 = vmatprep.mubr.msk.f32.mxu1 %vm27182_vm1, %v31272_v33  ;;  %v8755_v4 = vmul.f32 0.0001, %v25946_v9  ;;  %v27026_v59 = vld [vmem:[#allocation2 + $0x20] sm:$0xff] }
 0x859   :  { %v8677_v31 = vpop.f32.mrf.mxu1  ;;  %25982 = vmatprep.subr.mxu0 %v31272_v33  ;;  %v8602_v1 = vpop.f32.mrf.mxu0 }
 0x85a   :  { %v28614_v37 = vsub.f32 %v27899_v42, %v8757_v50  ;;  %v8756_v19 = vmul.f32 0.0001, %v8677_v31  ;;  %25983 = vmatpush3.msra.mxu0 %v28607_v38  ;;  %v28618_v29 = vsub.f32 %v27888_v28, %v8755_v4  ;;  %v8754_v25 = vmul.f32 0.0001, %v8602_v1  ;;  %v27027_v28 = vld [vmem:[#allocation2 + $0x38] sm:$0xff] }
 0x85b   :  { %25985 = vmatmul.mubr.msk.f32.vlgmr.msra.gmra.mxu0 %vm98_vm0, %v27026_v59  ;;  %25994 = vmatprep.subr.mxu0 %v31272_v33  ;;  %v8693_v50 = vsel %vm370_vm2, %v28490_v17, 0.0  ;;  %v8721_v17 = vsel %vm370_vm2, %v28511_v53, 0.0  ;;  %v8728_v53 = vsel %vm370_vm2, %v28528_v0, 0.0 }
 0x85c   :  { %v28623_v3 = vsub.f32 %v27904_v11, %v8756_v19  ;;  %26002 = vmatpush3.msra.mxu1 %v28614_v37  ;;  %25998 = vmatprep.mubr.msk.f32.mxu0 %vm27182_vm1, %v31272_v33  ;;  %v28629_v42 = vsub.f32 %v27893_v8, %v8754_v25  ;;  %v27028_v11 = vld [vmem:[#allocation2 + $0x30] sm:$0xff]  ;;  %v8686_v8 = vsel %vm370_vm2, %v28483_v48, 0.0  ;;  %v8694_v31 = vrot.slane %v8693_v50, 4 }
 0x85d   :  { %25995 = vmatpush3.msra.mxu0 %v28618_v29  ;;  %26003 = vmatprep.subr.mxu1 %v31272_v33  ;;  %v8687_v9 = vrot.slane %v8686_v8, 4  ;;  %v8707_v19 = vsel %vm370_vm2, %v28497_v35, 0.0  ;;  %v8722_v63 = vrot.slane %v8721_v17, 4  ;;  %v8714_v35 = vsel %vm370_vm2, %v28518_v13, 0.0 }
 0x85e   :  { %25996 = vmatprep.subr.mxu0 %v31272_v33  ;;  %26004 = vmatpush3.msra.mxu1 %v28623_v3  ;;  %v8695_v25 = vadd.f32 %v8694_v31, %v8693_v50  ;;  %v8708_v59 = vrot.slane %v8707_v19, 4 }
 0x85f   :  { %25997 = vmatpush3.msra.mxu0 %v28629_v42  ;;  %26006 = vmatmul.mubr.msk.f32.vlgmr.msra.gmra.mxu1 %vm98_vm0, %v27027_v28  ;;  %v8688_v4 = vadd.f32 %v8687_v9, %v8686_v8 }
 0x860   :  { %25999 = vmatmul.mubr.msk.f32.vlgmr.msra.gmra.mxu0 %vm98_vm0, %v27028_v11  ;;  %26008 = vmatprep.subr.mxu0 %v31272_v33  ;;  %v8700_v11 = vsel %vm370_vm2, %v28504_v44, 0.0  ;;  %v8696_v5 = vrot.slane %v8695_v25, 2  ;;  %v8709_v49 = vadd.f32 %v8708_v59, %v8707_v19  ;;  %v8723_v44 = vadd.f32 %v8722_v63, %v8721_v17 }
 0x861   :  { %26010 = vmatprep.mubr.msk.f32.mxu0 %vm27182_vm1, %v31272_v33  ;;  %26013 = vmatprep.subr.mxu1 %v31272_v33  ;;  %v8689_v1 = vrot.slane %v8688_v4, 2  ;;  %v8701_v20 = vrot.slane %v8700_v11, 4 }
 0x862   :  { %26015 = vmatprep.mubr.msk.f32.mxu1 %vm27182_vm1, %v31272_v33  ;;  %v8697_v30 = vadd.f32 %v8696_v5, %v8695_v25  ;;  %v8710_v8 = vrot.slane %v8709_v49, 2  ;;  %v8735_v5 = vsel %vm370_vm2, %v28526_v34, 0.0 }
 0x863   :  { %v8690_v28 = vadd.f32 %v8689_v1, %v8688_v4  ;;  %v8702_v9 = vadd.f32 %v8701_v20, %v8700_v11  ;;  %v8715_v1 = vrot.slane %v8714_v35, 4  ;;  %v8736_v13 = vrot.slane %v8735_v5, 4 }
 0x864   :  { %v8698_v21 = vrot.slane %v8697_v30, 1  ;;  %v8711_v50 = vadd.f32 %v8710_v8, %v8709_v49 }
 0x865   :  { %v8691_v48 = vrot.slane %v8690_v28, 1  ;;  %v8703_v4 = vrot.slane %v8702_v9, 2  ;;  %v8716_v11 = vadd.f32 %v8715_v1, %v8714_v35  ;;  %v8737_v17 = vadd.f32 %v8736_v13, %v8735_v5 }
 0x866   :  { %v8699_v19 = vadd.f32 %v8698_v21, %v8697_v30  ;;  %v8712_v20 = vrot.slane %v8711_v50, 1  ;;  %v8790_v35 = vmul.f32 0.0001, %v28434_v16 }
 0x867   :  { %v8692_v32 = vadd.f32 %v8691_v48, %v8690_v28  ;;  %v8704_v25 = vadd.f32 %v8703_v4, %v8702_v9  ;;  %v8724_v28 = vrot.slane %v8723_v44, 2  ;;  %v8729_v48 = vrot.slane %v8728_v53, 4 }
 0x868   :  { %v8775_v49 = vmul.f32 0.0001, %v8699_v19  ;;  %v8717_v34 = vrot.slane %v8716_v11, 2 }
 0x869   :  { %v8774_v31 = vmul.f32 0.0001, %v8692_v32  ;;  %v8713_v32 = vadd.f32 %v8712_v20, %v8711_v50  ;;  %v8705_v63 = vrot.slane %v8704_v25, 1  ;;  %v8725_v30 = vadd.f32 %v8724_v28, %v8723_v44 }
 0x86a   :  { %v28668_v0 = vsub.f32 %v27937_v6, %v8775_v49  ;;  %v8718_v19 = vadd.f32 %v8717_v34, %v8716_v11  ;;  %v8738_v20 = vrot.slane %v8737_v17, 2  ;;  %v28678_v6 = vsub.f32 %v27978_v61, %v8790_v35 }
 0x86b   :  { %v28661_v59 = vsub.f32 %v27940_v57, %v8774_v31  ;;  %v8730_v57 = vadd.f32 %v8729_v48, %v8728_v53  ;;  %v8777_v4 = vmul.f32 0.0001, %v8713_v32  ;;  %v8706_v50 = vadd.f32 %v8705_v63, %v8704_v25 }
 0x86c   :  { %v28674_v44 = vrot.slane %v28668_v0, %v27336_v23  ;;  %v8726_v5 = vrot.slane %v8725_v30, 1  ;;  %v8791_v11 = vmul.f32 0.0001, %v28439_v40  ;;  %v8739_v48 = vadd.f32 %v8738_v20, %v8737_v17 }
 0x86d   :  { %v28665_v21 = vrot.slane %v28661_v59, %v27336_v23  ;;  %v8731_v28 = vrot.slane %v8730_v57, 2  ;;  %v28682_v53 = vsub.f32 %v27951_v56, %v8777_v4  ;;  %v8776_v25 = vmul.f32 0.0001, %v8706_v50 }
 0x86e   :  { %v8727_v63 = vadd.f32 %v8726_v5, %v8725_v30  ;;  %v8719_v34 = vrot.slane %v8718_v19, 1  ;;  %v28699_v17 = vsub.f32 %v27971_v2, %v8791_v11  ;;  %v8740_v35 = vrot.slane %v8739_v48, 1 }
 0x86f   :  { %v8732_v61 = vadd.f32 %v8731_v28, %v8730_v57  ;;  %v28692_v56 = vrot.slane %v28682_v53, %v27336_v23  ;;  %v28696_v40 = vsub.f32 %v27962_v36, %v8776_v25  ;;  %v8793_v4 = vmul.f32 0.0001, %v28444_v39 }
 0x870   :  { %v8779_v57 = vmul.f32 0.0001, %v8727_v63  ;;  %v8741_v28 = vadd.f32 %v8740_v35, %v8739_v48  ;;  %v31322_v48 = vld [vmem:[#allocation38_spill] sm:$0xff] }
 0x871   :  { %v8733_v50 = vrot.slane %v8732_v61, 1  ;;  %v28708_v2 = vrot.slane %v28696_v40, %v27336_v23 }
 0x873   :  { %v8734_v11 = vadd.f32 %v8733_v50, %v8732_v61  ;;  %v31324_v50 = vld [vmem:[#allocation39_spill] sm:$0xff] }
 0x875   :  { %v8780_v61 = vmul.f32 0.0001, %v8734_v11 }
 0x902   :  { %v8920_v8 = vpop.f32.mrf.mxu0 }
 0x903   :  { %v8921_v9 = vadd.f32 %v8920_v8, %v28665_v21 }
 0x904   :  { %v25958_v31 = vpop.f32.mrf.mxu0 }
 0x905   :  { %v9414_v1 = vmax.f32 %v8921_v9, 0.0  ;;  %v8720_v9 = vadd.f32 %v8719_v34, %v8718_v19  ;;  %v31321_v19 = vld [vmem:[#allocation37_spill] sm:$0xff] }
 0x906   :  { %v28715_v39 = vsub.f32 %v31321_v19, %v8779_v57 }
 0x907   :  { %v8990_v13 = vpop.f32.mrf.mxu1  ;;  %26009 = vmatpush3.xpose.msk.msra.mxu0 %vm370_vm2, %v9414_v1  ;;  %v8778_v5 = vmul.f32 0.0001, %v8720_v9 }
 0x908   :  { %v8991_v16 = vadd.f32 %v8990_v13, %v28674_v44  ;;  %26018 = vmatprep.subr.mxu0 %v31272_v33  ;;  %v8792_v13 = vmul.f32 0.0001, %v28441_v45 }
 0x909   :  { %v25965_v49 = vpop.f32.mrf.mxu1  ;;  %v28730_v63 = vsub.f32 %v31322_v48, %v8778_v5 }
 0x90a   :  { %v9415_v32 = vmax.f32 %v8991_v16, 0.0  ;;  %26011 = vmatmul.mubr.msk.f32.vlgmr.msra.gmra.mxu0 %vm370_vm2, %v28678_v6  ;;  %v28719_v16 = vsub.f32 %v27997_v51, %v8793_v4  ;;  %v8781_v51 = vmul.f32 0.0001, %v8741_v28  ;;  %v28735_v45 = vsub.f32 %v28016_v46, %v8792_v13  ;;  %v31323_v4 = vld [vmem:[#allocation40_spill] sm:$0xff] }
 0x90b   :  { %26020 = vmatprep.mubr.msk.f32.mxu0 %vm27182_vm1, %v31272_v33  ;;  %v28744_v35 = vrot.slane %v28730_v63, %v27336_v23 }
 0x90c   :  { %26014 = vmatpush3.xpose.msk.msra.mxu1 %vm370_vm2, %v9415_v32  ;;  %v28726_v32 = vrot.slane %v28715_v39, %v27336_v23  ;;  %v28747_v46 = vsub.f32 %v31323_v4, %v8781_v51  ;;  %v27034_v4 = vld [vmem:[%s31083_s0 + $0x28] sm:$0xff] }
 0x90d   :  { %v9130_v8 = vpop.f32.mrf.mxu1  ;;  %26023 = vmatprep.subr.mxu1 %v31272_v33 }
 0x90e   :  { %v9131_v30 = vadd.f32 %v9130_v8, %v28692_v56  ;;  %v28763_v28 = vrot.slane %v28747_v46, %v27336_v23 }
 0x90f   :  { %26016 = vmatmul.mubr.msk.f32.vlgmr.msra.gmra.mxu1 %vm370_vm2, %v28699_v17  ;;  %v25979_v31 = vpop.f32.mrf.mxu1 }
 0x910   :  { %v9417_v36 = vmax.f32 %v9131_v30, 0.0  ;;  %26025 = vmatprep.mubr.msk.f32.mxu1 %vm27182_vm1, %v31272_v33  ;;  %v8795_v30 = vmul.f32 0.0001, %v28455_v60 }
 0x911   :  { %v9060_v1 = vpop.f32.mrf.mxu0 }
 0x912   :  { %v9061_v20 = vadd.f32 %v9060_v1, %v28708_v2  ;;  %26024 = vmatpush3.xpose.msk.msra.mxu1 %vm370_vm2, %v9417_v36  ;;  %v28752_v36 = vsub.f32 %v31324_v50, %v8780_v61  ;;  %v8794_v1 = vmul.f32 0.0001, %v28446_v55  ;;  %v27036_v50 = vld [vmem:[%s31083_s0 + $0x38] sm:$0xff] }
 0x913   :  { %v25972_v25 = vpop.f32.mrf.mxu0  ;;  %26033 = vmatprep.subr.mxu1 %v31272_v33 }
 0x914   :  { %v9416_v49 = vmax.f32 %v9061_v20, 0.0  ;;  %v28758_v20 = vsub.f32 %v28035_v7, %v8795_v30  ;;  %v28767_v13 = vrot.slane %v28752_v36, %v27336_v23  ;;  %v28776_v11 = vsub.f32 %v28053_v24, %v8794_v1 }
 0x915   :  { %26026 = vmatmul.mubr.msk.f32.vlgmr.msra.gmra.mxu1 %vm370_vm2, %v28719_v16 }
 0x916   :  { %26019 = vmatpush3.xpose.msk.msra.mxu0 %vm370_vm2, %v9416_v49  ;;  %26035 = vmatprep.mubr.msk.f32.mxu1 %vm27182_vm1, %v31272_v33  ;;  %v8797_v49 = vmul.f32 0.0001, %v28460_v58  ;;  %v27031_v58 = vld [vmem:[%s31083_s0 + $0x10] sm:$0xff] }
 0x917   :  { %v9270_v34 = vpop.f32.mrf.mxu1  ;;  %26028 = vmatprep.subr.mxu0 %v31272_v33 }
 0x918   :  { %v9271_v8 = vadd.f32 %v9270_v34, %v28726_v32  ;;  %v8796_v34 = vmul.f32 0.0001, %v28457_v26  ;;  %v28788_v24 = vsub.f32 %v28077_v54, %v8797_v49  ;;  %v27030_v54 = vld [vmem:[%s31083_s0 + $0x8] sm:$0xff] }
 0x919   :  { %26021 = vmatmul.mubr.msk.f32.vlgmr.msra.gmra.mxu0 %vm370_vm2, %v28735_v45  ;;  %v25993_v57 = vpop.f32.mrf.mxu1 }
 0x91a   :  { %v9419_v9 = vmax.f32 %v9271_v8, 0.0  ;;  %26030 = vmatprep.mubr.msk.f32.mxu0 %vm27182_vm1, %v31272_v33  ;;  %31325 = vst [vmem:[#allocation37_spill] sm:$0xff] %v28788_v24  ;;  %v28793_v26 = vsub.f32 %v28069_v18, %v8796_v34  ;;  %v27029_v18 = vld [vmem:[%s31083_s0] sm:$0xff]  ;;  %v27032_v57 = vld [vmem:[%s31083_s0 + $0x18] sm:$0xff] }
 0x91b   :  { %v9200_v31 = vpop.f32.mrf.mxu0 }
 0x91c   :  { %v9201_v60 = vadd.f32 %v9200_v31, %v28744_v35  ;;  %26034 = vmatpush3.xpose.msk.msra.mxu1 %vm370_vm2, %v9419_v9  ;;  %31326 = vst [vmem:[#allocation38_spill] sm:$0xff] %v28793_v26  ;;  %v27033_v9 = vld [vmem:[%s31083_s0 + $0x20] sm:$0xff]  ;;  %v27035_v31 = vld [vmem:[%s31083_s0 + $0x30] sm:$0xff] }
 0x91d   :  { %v25986_v19 = vpop.f32.mrf.mxu0  ;;  %26043 = vmatprep.subr.mxu1 %v31272_v33 }
 0x91e   :  { %v9418_v5 = vmax.f32 %v9201_v60, 0.0 }
 0x91f   :  { %v9410_v25 = vpop.f32.mrf.mxu1  ;;  %26036 = vmatmul.mubr.msk.f32.vlgmr.msra.gmra.mxu1 %vm370_vm2, %v28758_v20 }
 0x920   :  { %v9340_v55 = vpop.f32.mrf.mxu0  ;;  %v9411_v7 = vadd.f32 %v9410_v25, %v28763_v28  ;;  %26029 = vmatpush3.xpose.msk.msra.mxu0 %vm370_vm2, %v9418_v5  ;;  %26045 = vmatprep.mubr.msk.f32.mxu1 %vm27182_vm1, %v31272_v33 }
 0x921   :  { %v9341_v48 = vadd.f32 %v9340_v55, %v28767_v13  ;;  %26038 = vmatprep.subr.mxu0 %v31272_v33  ;;  %v26007_v51 = vpop.f32.mrf.mxu1 }
 0x922   :  { %v9421_v61 = vmax.f32 %v9411_v7, 0.0  ;;  %v26000_v8 = vpop.f32.mrf.mxu0 }
 0x923   :  { %v9420_v30 = vmax.f32 %v9341_v48, 0.0  ;;  %26031 = vmatmul.mubr.msk.f32.vlgmr.msra.gmra.mxu0 %vm370_vm2, %v28776_v11 }
 0x924   :  { %26044 = vmatpush3.xpose.msk.msra.mxu1 %vm370_vm2, %v9421_v61  ;;  %26040 = vmatprep.mubr.msk.f32.mxu0 %vm27182_vm1, %v31272_v33 }
 0x925   :  { %26039 = vmatpush3.xpose.msk.msra.mxu0 %vm370_vm2, %v9420_v30  ;;  %26055 = vmatprep.subr.mxu1 %v31272_v33 }
 0x926   :  { %26048 = vmatprep.subr.mxu0 %v31272_v33 }
 0x927   :  { %26046 = vmatmul.mubr.msk.f32.vlgmr.msra.gmra.mxu1 %vm370_vm2, %v28788_v24 }
 0x928   :  { %26041 = vmatmul.mubr.msk.f32.vlgmr.msra.gmra.mxu0 %vm370_vm2, %v28793_v26  ;;  %26056 = vmatpush3.msra.mxu1 %v28550_v10 }
 0x929   :  { %26049 = vmatpush3.msra.mxu0 %v28541_v27  ;;  %26057 = vmatprep.subr.mxu1 %v31272_v33 }
 0x92a   :  { %26050 = vmatprep.subr.mxu0 %v31272_v33  ;;  %26052 = vmatprep.mubr.msk.f32.mxu0 %vm27182_vm1, %v31272_v33 }
 0x92b   :  { %26051 = vmatpush3.msra.mxu0 %v28544_v52  ;;  %26058 = vmatpush3.msra.mxu1 %v28557_v14 }
 0x92c   :  { %26059 = vmatprep.mubr.msk.f32.mxu1 %vm27182_vm1, %v31272_v33  ;;  %26053 = vmatmul.mubr.msk.f32.vlgmr.msra.gmra.mxu0 %vm98_vm0, %v27029_v18 }
 0x92d   :  { %26060 = vmatmul.mubr.msk.f32.vlgmr.msra.gmra.mxu1 %vm98_vm0, %v27030_v54  ;;  %26062 = vmatprep.subr.mxu0 %v31272_v33 }
 0x92e   :  { %26069 = vmatprep.subr.mxu1 %v31272_v33  ;;  %26063 = vmatpush3.msra.mxu0 %v28575_v47 }
 0x92f   :  { %26070 = vmatpush3.msra.mxu1 %v28565_v43  ;;  %26064 = vmatprep.subr.mxu0 %v31272_v33 }
 0x930   :  { %26071 = vmatprep.subr.mxu1 %v31272_v33  ;;  %26065 = vmatpush3.msra.mxu0 %v28581_v41 }
 0x931   :  { %26066 = vmatprep.mubr.msk.f32.mxu0 %vm27182_vm1, %v31272_v33  ;;  %26072 = vmatpush3.msra.mxu1 %v28570_v15 }
 0x932   :  { %26073 = vmatprep.mubr.msk.f32.mxu1 %vm27182_vm1, %v31272_v33  ;;  %26067 = vmatmul.mubr.msk.f32.vlgmr.msra.gmra.mxu0 %vm98_vm0, %v27031_v58 }
 0x933   :  { %26074 = vmatmul.mubr.msk.f32.vlgmr.msra.gmra.mxu1 %vm98_vm0, %v27032_v57  ;;  %26076 = vmatprep.subr.mxu0 %v31272_v33 }
 0x934   :  { %26083 = vmatprep.subr.mxu1 %v31272_v33  ;;  %26077 = vmatpush3.msra.mxu0 %v28601_v22 }
 0x935   :  { %26084 = vmatpush3.msra.mxu1 %v28591_v12  ;;  %26078 = vmatprep.subr.mxu0 %v31272_v33 }
 0x936   :  { %26085 = vmatprep.subr.mxu1 %v31272_v33  ;;  %26079 = vmatpush3.msra.mxu0 %v28607_v38 }
 0x937   :  { %26080 = vmatprep.mubr.msk.f32.mxu0 %vm27182_vm1, %v31272_v33  ;;  %26086 = vmatpush3.msra.mxu1 %v28596_v62 }
 0x938   :  { %26087 = vmatprep.mubr.msk.f32.mxu1 %vm27182_vm1, %v31272_v33  ;;  %26081 = vmatmul.mubr.msk.f32.vlgmr.msra.gmra.mxu0 %vm98_vm0, %v27033_v9 }
 0x939   :  { %26088 = vmatmul.mubr.msk.f32.vlgmr.msra.gmra.mxu1 %vm98_vm0, %v27034_v4  ;;  %26090 = vmatprep.subr.mxu0 %v31272_v33 }
 0x93a   :  { %26097 = vmatprep.subr.mxu1 %v31272_v33  ;;  %26091 = vmatpush3.msra.mxu0 %v28618_v29 }
 0x93b   :  { %26098 = vmatpush3.msra.mxu1 %v28614_v37  ;;  %26092 = vmatprep.subr.mxu0 %v31272_v33 }
 0x93c   :  { %26099 = vmatprep.subr.mxu1 %v31272_v33  ;;  %26093 = vmatpush3.msra.mxu0 %v28629_v42 }
 0x93d   :  { %26094 = vmatprep.mubr.msk.f32.mxu0 %vm27182_vm1, %v31272_v33  ;;  %26100 = vmatpush3.msra.mxu1 %v28623_v3 }
 0x93e   :  { %26101 = vmatprep.mubr.msk.f32.mxu1 %vm27182_vm1, %v31272_v33  ;;  %26095 = vmatmul.mubr.msk.f32.vlgmr.msra.gmra.mxu0 %vm98_vm0, %v27035_v31 }
 0x93f   :  { %26102 = vmatmul.mubr.msk.f32.vlgmr.msra.gmra.mxu1 %vm98_vm0, %v27036_v50  ;;  %26104 = vmatprep.subr.mxu0 %v31272_v33 }
 0x940   :  { %26109 = vmatprep.subr.mxu1 %v31272_v33  ;;  %26106 = vmatprep.mubr.msk.f32.mxu0 %vm27182_vm1, %v31272_v33 }
 0x941   :  { %26111 = vmatprep.mubr.msk.f32.mxu1 %vm27182_vm1, %v31272_v33 }
 0x9ca   :  { %v28884_v60 = vpop.f32.mrf.mxu0 }
 0x9cb   :  { %31327 = vst [vmem:[#allocation40_spill] sm:$0xff] %v28884_v60 }
 0x9cc   :  { %v26012_v1 = vpop.f32.mrf.mxu0 }
 0x9cf   :  { %v28886_v19 = vpop.f32.mrf.mxu1 }
 0x9d0   :  { %31328 = vst [vmem:[#allocation39_spill] sm:$0xff] %v28886_v19 }
 0x9d1   :  { %v26017_v5 = vpop.f32.mrf.mxu1 }
 0x9d5   :  { %v28888_v25 = vpop.f32.mrf.mxu1 }
 0x9d6   :  { %31329 = vst [vmem:[#allocation65_spill] sm:$0xff] %v28888_v25 }
 0x9d7   :  { %v26027_v55 = vpop.f32.mrf.mxu1 }
 0x9d9   :  { %v28890_v7 = vpop.f32.mrf.mxu0 }
 0x9da   :  { %31330 = vst [vmem:[#allocation66_spill] sm:$0xff] %v28890_v7  ;;  %v27041_v7 = vld [vmem:[%s31084_s1 + $0x4] sm:$0x1] }
 0x9db   :  { %v26022_v49 = vpop.f32.mrf.mxu0 }
 0x9df   :  { %v28892_v48 = vpop.f32.mrf.mxu1 }
 0x9e0   :  { %31331 = vst [vmem:[#allocation67_spill] sm:$0xff] %v28892_v48 }
 0x9e1   :  { %v26037_v51 = vpop.f32.mrf.mxu1 }
 0x9e3   :  { %v28894_v34 = vpop.f32.mrf.mxu0 }
 0x9e4   :  { %31332 = vst [vmem:[#allocation68_spill] sm:$0xff] %v28894_v34 }
 0x9e5   :  { %v26032_v61 = vpop.f32.mrf.mxu0 }
 0x9e7   :  { %v28896_v8 = vpop.f32.mrf.mxu1 }
 0x9e8   :  { %31333 = vst [vmem:[#allocation69_spill] sm:$0xff] %v28896_v8  ;;  %v28898_v30 = vpop.f32.mrf.mxu0 }
 0x9e9   :  { %31334 = vst [vmem:[#allocation70_spill] sm:$0xff] %v28898_v30  ;;  %v26047_v18 = vpop.f32.mrf.mxu1 }
 0x9ea   :  { %v26042_v54 = vpop.f32.mrf.mxu0 }
 0x9ec   :  { %v10193_v58 = vpop.f32.mrf.mxu0 }
 0x9ed   :  { %v28901_v57 = vadd.f32 %v10193_v58, %v28665_v21  ;;  %v10263_v9 = vpop.f32.mrf.mxu1 }
 0x9ee   :  { %v28904_v4 = vadd.f32 %v10263_v9, %v28674_v44  ;;  %v26054_v31 = vpop.f32.mrf.mxu0 }
 0x9ef   :  { %v10687_v50 = vmax.f32 %v28901_v57, 0.0  ;;  %v26061_v1 = vpop.f32.mrf.mxu1  ;;  %vm11903_vm14 = vcmp.gt.f32.partialorder %v28901_v57, 0.0  ;;  %v31369_v57 = vld [vmem:[#allocation24_spill] sm:$0xff] }
 0x9f0   :  { %v10688_v5 = vmax.f32 %v28904_v4, 0.0  ;;  %vm11904_vm15 = vcmp.gt.f32.partialorder %v28904_v4, 0.0  ;;  %v31370_v4 = vld [vmem:[#allocation30_spill] sm:$0xff] }
 0x9f1   :  { %26105 = vmatpush3.xpose.msk.msra.mxu0 %vm370_vm2, %v10687_v50 }
 0x9f2   :  { %v10333_v55 = vpop.f32.mrf.mxu0  ;;  %26110 = vmatpush3.xpose.msk.msra.mxu1 %vm370_vm2, %v10688_v5  ;;  %26114 = vmatprep.subr.mxu0 %v31272_v33 }
 0x9f3   :  { %v28912_v21 = vadd.f32 %v10333_v55, %v28708_v2  ;;  %v10403_v49 = vpop.f32.mrf.mxu1  ;;  %26119 = vmatprep.subr.mxu1 %v31272_v33 }
 0x9f4   :  { %v28916_v44 = vadd.f32 %v10403_v49, %v28692_v56  ;;  %v26068_v51 = vpop.f32.mrf.mxu0  ;;  %26107 = vmatmul.mubr.msk.f32.vlgmr.msra.gmra.mxu0 %vm370_vm2, %v28678_v6 }
 0x9f5   :  { %v31155_v61 = vmax.f32 %v28912_v21, 0.0  ;;  %v26075_v18 = vpop.f32.mrf.mxu1  ;;  %26112 = vmatmul.mubr.msk.f32.vlgmr.msra.gmra.mxu1 %vm370_vm2, %v28699_v17  ;;  %26116 = vmatprep.mubr.msk.f32.mxu0 %vm27182_vm1, %v31272_v33  ;;  %vm11905_vm8 = vcmp.gt.f32.partialorder %v28912_v21, 0.0 }
 0x9f6   :  { %v31156_v2 = vmax.f32 %v28916_v44, 0.0  ;;  %26121 = vmatprep.mubr.msk.f32.mxu1 %vm27182_vm1, %v31272_v33  ;;  %vm11906_vm7 = vcmp.gt.f32.partialorder %v28916_v44, 0.0 }
 0x9f7   :  { %26115 = vmatpush3.xpose.msk.msra.mxu0 %vm370_vm2, %v31155_v61 }
 0x9f8   :  { %v10473_v56 = vpop.f32.mrf.mxu0  ;;  %26120 = vmatpush3.xpose.msk.msra.mxu1 %vm370_vm2, %v31156_v2  ;;  %26124 = vmatprep.subr.mxu0 %v31272_v33 }
 0x9f9   :  { %v28936_v54 = vadd.f32 %v10473_v56, %v28744_v35  ;;  %v10543_v58 = vpop.f32.mrf.mxu1  ;;  %26129 = vmatprep.subr.mxu1 %v31272_v33 }
 0x9fa   :  { %v28940_v9 = vadd.f32 %v10543_v58, %v28726_v32  ;;  %v26082_v31 = vpop.f32.mrf.mxu0  ;;  %26117 = vmatmul.mubr.msk.f32.vlgmr.msra.gmra.mxu0 %vm370_vm2, %v28735_v45 }
 0x9fb   :  { %v31153_v1 = vmax.f32 %v28936_v54, 0.0  ;;  %v26089_v55 = vpop.f32.mrf.mxu1  ;;  %26122 = vmatmul.mubr.msk.f32.vlgmr.msra.gmra.mxu1 %vm370_vm2, %v28719_v16  ;;  %26126 = vmatprep.mubr.msk.f32.mxu0 %vm27182_vm1, %v31272_v33  ;;  %vm11907_vm10 = vcmp.gt.f32.partialorder %v28936_v54, 0.0 }
 0x9fc   :  { %v31154_v35 = vmax.f32 %v28940_v9, 0.0  ;;  %26131 = vmatprep.mubr.msk.f32.mxu1 %vm27182_vm1, %v31272_v33  ;;  %v31343_v8 = vmax.f32 %v28940_v9, 0.0  ;;  %vm11908_vm9 = vcmp.gt.f32.partialorder %v28940_v9, 0.0  ;;  %v31377_v9 = vld [vmem:[#allocation27_spill] sm:$0xff] }
 0x9fd   :  { %26125 = vmatpush3.xpose.msk.msra.mxu0 %vm370_vm2, %v31153_v1 }
 0x9fe   :  { %v10613_v32 = vpop.f32.mrf.mxu0  ;;  %26130 = vmatpush3.xpose.msk.msra.mxu1 %vm370_vm2, %v31154_v35  ;;  %26134 = vmatprep.subr.mxu0 %v31272_v33  ;;  %v27038_v35 = vld [vmem:[%s31084_s1 + $0x1] sm:$0x1] }
 0x9ff   :  { %v28960_v49 = vadd.f32 %v10613_v32, %v28767_v13  ;;  %v10683_v51 = vpop.f32.mrf.mxu1  ;;  %26139 = vmatprep.subr.mxu1 %v31272_v33 }
 0xa00   :  { %v28964_v18 = vadd.f32 %v10683_v51, %v28763_v28  ;;  %26127 = vmatmul.mubr.msk.f32.vlgmr.msra.gmra.mxu0 %vm370_vm2, %v28776_v11  ;;  %v26096_v56 = vpop.f32.mrf.mxu0  ;;  %v28994_v28 = vpop.permute.xlu1 %9424 }
 0xa01   :  { %v31152_v58 = vmax.f32 %v28960_v49, 0.0  ;;  %26132 = vmatmul.mubr.msk.f32.vlgmr.msra.gmra.mxu1 %vm370_vm2, %v28758_v20  ;;  %26136 = vmatprep.mubr.msk.f32.mxu0 %vm27182_vm1, %v31272_v33  ;;  %v26103_v13 = vpop.f32.mrf.mxu1  ;;  %31335 = vst [vmem:[#allocation71_spill] sm:$0xff] %v28994_v28  ;;  %v28998_v51 = vpop.permute.xlu0 %9429  ;;  %v31347_v48 = vmax.f32 %v28960_v49, 0.0  ;;  %vm11909_vm11 = vcmp.gt.f32.partialorder %v28960_v49, 0.0  ;;  %v31380_v49 = vld [vmem:[#allocation36_spill] sm:$0xff] }
 0xa02   :  { %v31151_v31 = vmax.f32 %v28964_v18, 0.0  ;;  %26141 = vmatprep.mubr.msk.f32.mxu1 %vm27182_vm1, %v31272_v33  ;;  %31337 = vst [vmem:[#allocation73_spill] sm:$0xff] %v28998_v51  ;;  %vm11910_vm12 = vcmp.gt.f32.partialorder %v28964_v18, 0.0 }
 0xa03   :  { %26135 = vmatpush3.xpose.msk.msra.mxu0 %vm370_vm2, %v31152_v58 }
 0xa04   :  { %26140 = vmatpush3.xpose.msk.msra.mxu1 %vm370_vm2, %v31151_v31  ;;  %26144 = vmatprep.subr.mxu0 %v31272_v33  ;;  %v28996_v55 = vpop.permute.xlu1 %9439  ;;  %v27037_v31 = vld [vmem:[%s31084_s1] sm:$0x1] }
 0xa05   :  { %26149 = vmatprep.subr.mxu1 %v31272_v33  ;;  %31336 = vst [vmem:[#allocation72_spill] sm:$0xff] %v28996_v55 }
 0xa06   :  { %26137 = vmatmul.mubr.msk.f32.vlgmr.msra.gmra.mxu0 %vm370_vm2, %v28793_v26 }
 0xa07   :  { %26142 = vmatmul.mubr.msk.f32.vlgmr.msra.gmra.mxu1 %vm370_vm2, %v28788_v24  ;;  %26145 = vmatpush3.msra.mxu0 %v10687_v50 }
 0xa08   :  { %26150 = vmatpush3.msra.mxu1 %v10688_v5  ;;  %26146 = vmatprep.mubr.msk.f32.mxu0 %vm27182_vm1, %v31272_v33  ;;  %v29010_v30 = vpop.permute.xlu1 %9434 }
 0xa09   :  { %26151 = vmatprep.mubr.msk.f32.mxu1 %vm27182_vm1, %v31272_v33  ;;  %26154 = vmatprep.subr.mxu0 %v31272_v33  ;;  %31338 = vst [vmem:[#allocation74_spill] sm:$0xff] %v29010_v30 }
 0xa0a   :  { %26159 = vmatprep.subr.mxu1 %v31272_v33 }
 0xab4   :  { %v10764_v32 = vpop.f32.mrf.mxu0 }
 0xab5   :  { %v10765_v50 = vadd.f32 %v10764_v32, %v28994_v28  ;;  %v10837_v5 = vpop.f32.mrf.mxu1 }
 0xab6   :  { %v10838_v56 = vadd.f32 %v10837_v5, %v28998_v51  ;;  %v26108_v13 = vpop.f32.mrf.mxu0 }
 0xab7   :  { %v11279_v58 = vsub.f32 %v10765_v50, %v27037_v31  ;;  %v26113_v1 = vpop.f32.mrf.mxu1  ;;  %v31340_v50 = vmax.f32 %v28912_v21, 0.0 }
 0xab8   :  { %v11280_v61 = vsub.f32 %v10838_v56, %v27038_v35  ;;  %v27040_v56 = vld [vmem:[%s31084_s1 + $0x3] sm:$0x1] }
 0xab9   :  { %v29008_v2 = vmul.f32 0.25, %v11279_v58  ;;  %v31339_v58 = vmax.f32 %v28916_v44, 0.0 }
 0xaba   :  { %v29012_v32 = vmul.f32 0.25, %v11280_v61  ;;  %v10910_v34 = vpop.f32.mrf.mxu0  ;;  %v27039_v61 = vld [vmem:[%s31084_s1 + $0x2] sm:$0x1] }
 0xabb   :  { %v10911_v5 = vadd.f32 %v10910_v34, %v29010_v30  ;;  %v10983_v13 = vpop.f32.mrf.mxu1  ;;  %11911 = vxpose.xlu0.b32.start.end [1/1] (short) (narrow) %v29008_v2, 8  ;;  %26147 = vmatmul.mubr.msk.f32.vlgmr.msra.gmra.mxu0 %vm1624_vm3, %v29008_v2 }
 0xabc   :  { %v10984_v1 = vadd.f32 %v10983_v13, %v28996_v55  ;;  %v26118_v31 = vpop.f32.mrf.mxu0  ;;  %26152 = vmatmul.mubr.msk.f32.vlgmr.msra.gmra.mxu1 %vm1624_vm3, %v29012_v32  ;;  %12018 = vxpose.xlu1.b32.start.end [1/1] (short) (narrow) %v29012_v32, 8  ;;  %v31348_v55 = vmax.f32 %v28964_v18, 0.0 }
 0xabd   :  { %v11281_v35 = vsub.f32 %v10911_v5, %v27039_v61  ;;  %v26123_v34 = vpop.f32.mrf.mxu1  ;;  %26160 = vmatpush3.msra.mxu1 %v31339_v58  ;;  %26155 = vmatpush3.msra.mxu0 %v31340_v50  ;;  %v29040_v5 = vpop.permute.xlu0 %9444 }
 0xabe   :  { %v11282_v13 = vsub.f32 %v10984_v1, %v27040_v56  ;;  %26156 = vmatprep.mubr.msk.f32.mxu0 %vm27182_vm1, %v31272_v33  ;;  %26161 = vmatprep.mubr.msk.f32.mxu1 %vm27182_vm1, %v31272_v33  ;;  %31341 = vst [vmem:[#allocation75_spill] sm:$0xff] %v29040_v5  ;;  %v29042_v58 = vpop.permute.xlu1 %9449 }
 0xabf   :  { %v29036_v31 = vmul.f32 0.25, %v11281_v35  ;;  %26164 = vmatprep.subr.mxu0 %v31272_v33  ;;  %26169 = vmatprep.subr.mxu1 %v31272_v33  ;;  %31342 = vst [vmem:[#allocation76_spill] sm:$0xff] %v29042_v58 }
 0xac0   :  { %v11290_v61 = vmul.f32 0.25, %v11282_v13  ;;  %v11056_v34 = vpop.f32.mrf.mxu0 }
 0xac1   :  { %v11057_v1 = vadd.f32 %v11056_v34, %v29040_v5  ;;  %v11129_v50 = vpop.f32.mrf.mxu1  ;;  %26157 = vmatmul.mubr.msk.f32.vlgmr.msra.gmra.mxu0 %vm1624_vm3, %v29036_v31  ;;  %v31344_v34 = vmax.f32 %v28936_v54, 0.0 }
 0xac2   :  { %v11130_v56 = vadd.f32 %v11129_v50, %v29042_v58  ;;  %v26128_v35 = vpop.f32.mrf.mxu0  ;;  %26162 = vmatmul.mubr.msk.f32.vlgmr.msra.gmra.mxu1 %vm1624_vm3, %v11290_v61  ;;  %12232 = vxpose.xlu0.b32.start.end [1/1] (short) (narrow) %v11290_v61, 8  ;;  %v27042_v50 = vld [vmem:[%s31084_s1 + $0x5] sm:$0x1] }
 0xac3   :  { %v11283_v13 = vsub.f32 %v11057_v1, %v27041_v7  ;;  %v26133_v30 = vpop.f32.mrf.mxu1  ;;  %26170 = vmatpush3.msra.mxu1 %v31343_v8  ;;  %26165 = vmatpush3.msra.mxu0 %v31344_v34  ;;  %v29065_v7 = vpop.permute.xlu0 %9454 }
 0xac4   :  { %v11284_v35 = vsub.f32 %v11130_v56, %v27042_v50  ;;  %26166 = vmatprep.mubr.msk.f32.mxu0 %vm27182_vm1, %v31272_v33  ;;  %26171 = vmatprep.mubr.msk.f32.mxu1 %vm27182_vm1, %v31272_v33  ;;  %31345 = vst [vmem:[#allocation77_spill] sm:$0xff] %v29065_v7  ;;  %v29068_v1 = vpop.permute.xlu1 %9459 }
 0xac5   :  { %v11291_v5 = vmul.f32 0.25, %v11283_v13  ;;  %26174 = vmatprep.subr.mxu0 %v31272_v33  ;;  %26179 = vmatprep.subr.mxu1 %v31272_v33  ;;  %31346 = vst [vmem:[#allocation78_spill] sm:$0xff] %v29068_v1 }
 0xac6   :  { %v11292_v8 = vmul.f32 0.25, %v11284_v35  ;;  %v11202_v30 = vpop.f32.mrf.mxu0  ;;  %12125 = vxpose.xlu0.b32.start.end [1/1] (short) (narrow) %v29036_v31, 8  ;;  %v27043_v35 = vld [vmem:[%s31084_s1 + $0x6] sm:$0x1] }
 0xac7   :  { %v11203_v56 = vadd.f32 %v11202_v30, %v29065_v7  ;;  %v11275_v34 = vpop.f32.mrf.mxu1  ;;  %26167 = vmatmul.mubr.msk.f32.vlgmr.msra.gmra.mxu0 %vm1624_vm3, %v11291_v5  ;;  %v27044_v30 = vld [vmem:[%s31084_s1 + $0x7] sm:$0x1] }
 0xac8   :  { %v11276_v50 = vadd.f32 %v11275_v34, %v29068_v1  ;;  %v26138_v13 = vpop.f32.mrf.mxu0  ;;  %26172 = vmatmul.mubr.msk.f32.vlgmr.msra.gmra.mxu1 %vm1624_vm3, %v11292_v8  ;;  %26175 = vmatpush3.msra.mxu0 %v31347_v48 }
 0xac9   :  { %v11285_v58 = vsub.f32 %v11203_v56, %v27043_v35  ;;  %v26143_v25 = vpop.f32.mrf.mxu1  ;;  %26180 = vmatpush3.msra.mxu1 %v31348_v55  ;;  %26176 = vmatprep.mubr.msk.f32.mxu0 %vm27182_vm1, %v31272_v33  ;;  %v11879_v55 = vsel %vm974_vm5, %v29008_v2, 0.0  ;;  %v11888_v56 = vsel %vm974_vm5, %v11290_v61, 0.0  ;;  %v11882_v13 = vsel %vm974_vm5, %v29012_v32, 0.0 }
 0xaca   :  { %v11286_v34 = vsub.f32 %v11276_v50, %v27044_v30  ;;  %26181 = vmatprep.mubr.msk.f32.mxu1 %vm27182_vm1, %v31272_v33  ;;  %26184 = vmatprep.subr.mxu0 %v31272_v33  ;;  %v11891_v50 = vsel %vm974_vm5, %v11291_v5, 0.0  ;;  %v11894_v30 = vsel %vm974_vm5, %v11292_v8, 0.0 }
 0xacb   :  { %v11293_v48 = vmul.f32 0.25, %v11285_v58  ;;  %26189 = vmatprep.subr.mxu1 %v31272_v33  ;;  %12446 = vxpose.xlu0.b32.start.end [1/1] (short) (narrow) %v11292_v8, 8  ;;  %v11885_v58 = vsel %vm974_vm5, %v29036_v31, 0.0 }
 0xacc   :  { %v11294_v25 = vmul.f32 0.25, %v11286_v34 }
 0xacd   :  { %12553 = vxpose.xlu1.b32.start.end [1/1] (short) (narrow) %v11293_v48, 8  ;;  %26177 = vmatmul.mubr.msk.f32.vlgmr.msra.gmra.mxu0 %vm1624_vm3, %v11293_v48  ;;  %v11897_v35 = vsel %vm974_vm5, %v11293_v48, 0.0 }
 0xace   :  { %26182 = vmatmul.mubr.msk.f32.vlgmr.msra.gmra.mxu1 %vm1624_vm3, %v11294_v25  ;;  %26185 = vmatpush3.msk.msra.mxu0 %vm2277_vm4, %v28678_v6  ;;  %v11900_v2 = vsel %vm974_vm5, %v11294_v25, 0.0 }
 0xacf   :  { %26190 = vmatpush3.msk.msra.mxu1 %vm2277_vm4, %v28699_v17  ;;  %12339 = vxpose.xlu0.b32.start.end [1/1] (short) (narrow) %v11291_v5, 8 }
 0xad0   :  { %26191 = vmatprep.mubr.msk.f32.mxu1 %vm27182_vm1, %v31272_v33  ;;  %26199 = vmatprep.subr.mxu1 %v31272_v33 }
 0xad1   :  { %26186 = vmatprep.mubr.msk.f32.mxu0 %vm27182_vm1, %v31272_v33  ;;  %26194 = vmatprep.subr.mxu0 %v31272_v33 }
 0xad3   :  { %12660 = vxpose.xlu0.b32.start.end [1/1] (short) (narrow) %v11294_v25, 8 }
 0xaf4   :  { %11880 = vadd.xlane.f32.xlu1 %v11879_v55  ;;  %v31349_v55 = vld [vmem:[#allocation21_spill] sm:$0xff] }
 0xaf8   :  { %11886 = vadd.xlane.f32.xlu1 %v11885_v58  ;;  %v31350_v58 = vld [vmem:[#allocation23_spill] sm:$0xff] }
 0xafc   :  { %11889 = vadd.xlane.f32.xlu1 %v11888_v56 }
 0xb00   :  { %11892 = vadd.xlane.f32.xlu1 %v11891_v50  ;;  %11883 = vadd.xlane.f32.xlu0 %v11882_v13 }
 0xb04   :  { %11898 = vadd.xlane.f32.xlu1 %v11897_v35  ;;  %11895 = vadd.xlane.f32.xlu0 %v11894_v30 }
 0xb08   :  { %11901 = vadd.xlane.f32.xlu0 %v11900_v2 }
 0xb37   :  { %v11927_v31 = vpop.trf.xlu0 }
 0xb38   :  { %v12034_v34 = vpop.trf.xlu1  ;;  %26187 = vmatmul.mubr.msk.f32.vlgmr.msra.gmra.mxu0 %vm2273_vm6, %v11927_v31  ;;  %v31351_v31 = vld [vmem:[#allocation57_spill] sm:$0xff] }
 0xb39   :  { %26192 = vmatmul.mubr.msk.f32.vlgmr.msra.gmra.mxu1 %vm2273_vm6, %v12034_v34  ;;  %26195 = vmatpush3.msk.msra.mxu0 %vm2277_vm4, %v28735_v45 }
 0xb3a   :  { %26200 = vmatpush3.msk.msra.mxu1 %vm2277_vm4, %v28719_v16  ;;  %26201 = vmatprep.mubr.msk.f32.mxu1 %vm27182_vm1, %v31272_v33 }
 0xb3b   :  { %26209 = vmatprep.subr.mxu1 %v31272_v33  ;;  %26196 = vmatprep.mubr.msk.f32.mxu0 %vm27182_vm1, %v31272_v33 }
 0xb3c   :  { %26204 = vmatprep.subr.mxu0 %v31272_v33 }
 0xb3e   :  { %v12248_v32 = vpop.trf.xlu0 }
 0xb3f   :  { %26202 = vmatmul.mubr.msk.f32.vlgmr.msra.gmra.mxu1 %vm2273_vm6, %v12248_v32 }
 0xb40   :  { %26210 = vmatpush3.msk.msra.mxu1 %vm2277_vm4, %v28758_v20  ;;  %26211 = vmatprep.mubr.msk.f32.mxu1 %vm27182_vm1, %v31272_v33 }
 0xb41   :  { %26219 = vmatprep.subr.mxu1 %v31272_v33 }
 0xb42   :  { %v12141_v5 = vpop.trf.xlu0 }
 0xb43   :  { %26197 = vmatmul.mubr.msk.f32.vlgmr.msra.gmra.mxu0 %vm2273_vm6, %v12141_v5 }
 0xb44   :  { %26205 = vmatpush3.msk.msra.mxu0 %vm2277_vm4, %v28776_v11  ;;  %26206 = vmatprep.mubr.msk.f32.mxu0 %vm27182_vm1, %v31272_v33 }
 0xb45   :  { %26214 = vmatprep.subr.mxu0 %v31272_v33 }
 0xb47   :  { %v12462_v61 = vpop.trf.xlu0 }
 0xb48   :  { %26212 = vmatmul.mubr.msk.f32.vlgmr.msra.gmra.mxu1 %vm2273_vm6, %v12462_v61 }
 0xb49   :  { %26220 = vmatpush3.msk.msra.mxu1 %vm2277_vm4, %v28788_v24  ;;  %26221 = vmatprep.mubr.msk.f32.mxu1 %vm27182_vm1, %v31272_v33  ;;  %v12569_v48 = vpop.trf.xlu1 }
 0xb4b   :  { %v12355_v8 = vpop.trf.xlu0 }
 0xb4c   :  { %26207 = vmatmul.mubr.msk.f32.vlgmr.msra.gmra.mxu0 %vm2273_vm6, %v12355_v8 }
 0xb4d   :  { %26215 = vmatpush3.msk.msra.mxu0 %vm2277_vm4, %v28793_v26  ;;  %26216 = vmatprep.mubr.msk.f32.mxu0 %vm27182_vm1, %v31272_v33 }
 0xb4f   :  { %v12676_v25 = vpop.trf.xlu0 }
 0xb50   :  { %26217 = vmatmul.mubr.msk.f32.vlgmr.msra.gmra.mxu0 %vm2273_vm6, %v12569_v48  ;;  %26222 = vmatmul.mubr.msk.f32.vlgmr.msra.gmra.mxu1 %vm2273_vm6, %v12676_v25 }
 0xb51   :  { %26226 = vmatprep.mubr.msk.f32.mxu0 %vm1624_vm3, %v31349_v55  ;;  %26231 = vmatprep.mubr.msk.f32.mxu1 %vm1624_vm3, %v31350_v58 }
 0xb7b   :  { %v29153_v56 = vpop.f32.mrf.mxu0 }
 0xb7c   :  { %v29155_v50 = vpop.f32.mrf.mxu1 }
 0xb7d   :  { %v11881_v13 = vpop.xlane.xlu1 %11880  ;;  %v26148_v35 = vpop.f32.mrf.mxu0 }
 0xb7e   :  { %v13495_v30 = vmul.f32 0.0001, %v11881_v13  ;;  %v26153_v2 = vpop.f32.mrf.mxu1  ;;  %v31353_v35 = vld [vmem:[#allocation58_spill] sm:$0xff] }
 0xb80   :  { %v29158_v34 = vsub.f32 %v31351_v31, %v13495_v30 }
 0xb81   :  { %v11887_v32 = vpop.xlane.xlu1 %11886  ;;  %v29160_v5 = vpop.f32.mrf.mxu0 }
 0xb82   :  { %31352 = vst [vmem:[#allocation57_spill] sm:$0xff] %v29158_v34  ;;  %14113 = vperm.xlu1 %26995, %v29158_v34   ;;  %v29163_v61 = vpop.f32.mrf.mxu1  ;;  %v13497_v19 = vmul.f32 0.0001, %v11887_v32  ;;  %v31355_v34 = vld [vmem:[#allocation59_spill] sm:$0xff] }
 0xb83   :  { %v26158_v8 = vpop.f32.mrf.mxu0 }
 0xb84   :  { %v26163_v48 = vpop.f32.mrf.mxu1  ;;  %v29174_v8 = vsub.f32 %v31355_v34, %v13497_v19 }
 0xb85   :  { %v11890_v25 = vpop.xlane.xlu1 %11889 }
 0xb86   :  { %v13498_v7 = vmul.f32 0.0001, %v11890_v25  ;;  %31356 = vst [vmem:[#allocation59_spill] sm:$0xff] %v29174_v8  ;;  %v31357_v25 = vld [vmem:[#allocation60_spill] sm:$0xff] }
 0xb87   :  { %v29165_v1 = vpop.f32.mrf.mxu0 }
 0xb88   :  { %v29168_v13 = vsub.f32 %v31353_v35, %v13498_v7  ;;  %v29170_v2 = vpop.f32.mrf.mxu1 }
 0xb89   :  { %v11893_v30 = vpop.xlane.xlu1 %11892  ;;  %v11884_v31 = vpop.xlane.xlu0 %11883 }
 0xb8a   :  { %31354 = vst [vmem:[#allocation58_spill] sm:$0xff] %v29168_v13  ;;  %14128 = vperm.xlu1 %26995, %v29168_v13   ;;  %v26173_v51 = vpop.f32.mrf.mxu1  ;;  %v13496_v60 = vmul.f32 0.0001, %v11884_v31  ;;  %v26168_v28 = vpop.f32.mrf.mxu0  ;;  %v13499_v48 = vmul.f32 0.0001, %v11893_v30  ;;  %v31361_v30 = vld [vmem:[#allocation62_spill] sm:$0xff] }
 0xb8b   :  { %v31359_v28 = vld [vmem:[#allocation61_spill] sm:$0xff] }
 0xb8c   :  { %v29177_v58 = vsub.f32 %v31357_v25, %v13496_v60  ;;  %v29186_v13 = vsub.f32 %v31359_v28, %v13499_v48  ;;  %v31368_v28 = vld [vmem:[#allocation28_spill] sm:$0xff] }
 0xb8d   :  { %v11899_v32 = vpop.xlane.xlu1 %11898  ;;  %v29179_v55 = vpop.f32.mrf.mxu0 }
 0xb8e   :  { %31358 = vst [vmem:[#allocation60_spill] sm:$0xff] %v29177_v58  ;;  %v29181_v7 = vpop.f32.mrf.mxu1  ;;  %14123 = vperm.xlu1 %26995, %v29174_v8   ;;  %v11896_v35 = vpop.xlane.xlu0 %11895  ;;  %14118 = vperm.xlu0 %26994, %v29177_v58   ;;  %31360 = vst [vmem:[#allocation61_spill] sm:$0xff] %v29186_v13  ;;  %v13501_v19 = vmul.f32 0.0001, %v11899_v32  ;;  %v31363_v8 = vld [vmem:[#allocation63_spill] sm:$0xff]  ;;  %v31365_v58 = vld [vmem:[#allocation64_spill] sm:$0xff] }
 0xb8f   :  { %v13500_v51 = vmul.f32 0.0001, %v11896_v35  ;;  %v26178_v31 = vpop.f32.mrf.mxu0 }
 0xb90   :  { %v26183_v34 = vpop.f32.mrf.mxu1  ;;  %v29194_v26 = vsub.f32 %v31363_v8, %v13501_v19 }
 0xb91   :  { %v29189_v60 = vsub.f32 %v31361_v30, %v13500_v51 }
 0xb92   :  { %v11902_v25 = vpop.xlane.xlu0 %11901  ;;  %14133 = vperm.xlu0 %26994, %v29186_v13   ;;  %31364 = vst [vmem:[#allocation63_spill] sm:$0xff] %v29194_v26 }
 0xb93   :  { %31362 = vst [vmem:[#allocation62_spill] sm:$0xff] %v29189_v60  ;;  %v13502_v24 = vmul.f32 0.0001, %v11902_v25  ;;  %14138 = vperm.xlu1 %26995, %v29189_v60   ;;  %v31371_v25 = vld [vmem:[#allocation32_spill] sm:$0xff] }
 0xb95   :  { %v29197_v35 = vsub.f32 %v31365_v58, %v13502_v24  ;;  %v31367_v58 = vld [vmem:[#allocation22_spill] sm:$0xff] }
 0xb96   :  { %14143 = vperm.xlu0 %26994, %v29194_v26  }
 0xb97   :  { %31366 = vst [vmem:[#allocation64_spill] sm:$0xff] %v29197_v35  ;;  %14148 = vperm.xlu1 %26995, %v29197_v35  }
 0xbf8   :  { %v12014_v48 = vpop.f32.mrf.mxu0 }
 0xbf9   :  { %v29203_v32 = vsel %vm11903_vm14, %v12014_v48, 0.0  ;;  %v12121_v51 = vpop.f32.mrf.mxu1  ;;  %26224 = vmatprep.subr.msk.mxu0 %vm11903_vm14, %v12014_v48 }
 0xbfa   :  { %v29205_v31 = vsel %vm11904_vm15, %v12121_v51, 0.0  ;;  %26229 = vmatprep.subr.msk.mxu1 %vm11904_vm15, %v12121_v51  ;;  %26225 = vmatpush3.msk.msra.mxu0 %vm11903_vm14, %v12014_v48  ;;  %v26188_v8 = vpop.f32.mrf.mxu0 }
 0xbfb   :  { %v26193_v24 = vpop.f32.mrf.mxu1  ;;  %26230 = vmatpush3.msk.msra.mxu1 %vm11904_vm15, %v12121_v51  ;;  %26227 = vmatmul.mubr.msk.f32.vlgmr.msra.gmra.mxu0 %vm1624_vm3, %v31367_v58  ;;  %v31372_v51 = vld [vmem:[#allocation33_spill] sm:$0xff] }
 0xbfc   :  { %26232 = vmatmul.mubr.msk.f32.vlgmr.msra.gmra.mxu1 %vm1624_vm3, %v31368_v28  ;;  %26236 = vmatprep.mubr.msk.f32.mxu0 %vm1624_vm3, %v31369_v57  ;;  %v31373_v24 = vld [vmem:[#allocation25_spill] sm:$0xff] }
 0xbfd   :  { %26241 = vmatprep.mubr.msk.f32.mxu1 %vm1624_vm3, %v31370_v4  ;;  %v31374_v4 = vld [vmem:[#allocation26_spill] sm:$0xff] }
 0xbff   :  { %v12335_v19 = vpop.f32.mrf.mxu1 }
 0xc00   :  { %v29216_v34 = vsel %vm11906_vm7, %v12335_v19, 0.0  ;;  %26239 = vmatprep.subr.msk.mxu1 %vm11906_vm7, %v12335_v19 }
 0xc01   :  { %26240 = vmatpush3.msk.msra.mxu1 %vm11906_vm7, %v12335_v19  ;;  %v26203_v30 = vpop.f32.mrf.mxu1 }
 0xc02   :  { %26242 = vmatmul.mubr.msk.f32.vlgmr.msra.gmra.mxu1 %vm1624_vm3, %v31371_v25 }
 0xc03   :  { %v12228_v48 = vpop.f32.mrf.mxu0  ;;  %26251 = vmatprep.mubr.msk.f32.mxu1 %vm1624_vm3, %v31372_v51  ;;  %v31375_v51 = vld [vmem:[#allocation34_spill] sm:$0xff] }
 0xc04   :  { %v29223_v8 = vsel %vm11905_vm8, %v12228_v48, 0.0  ;;  %26234 = vmatprep.subr.msk.mxu0 %vm11905_vm8, %v12228_v48 }
 0xc05   :  { %26235 = vmatpush3.msk.msra.mxu0 %vm11905_vm8, %v12228_v48  ;;  %v26198_v44 = vpop.f32.mrf.mxu0 }
 0xc06   :  { %26237 = vmatmul.mubr.msk.f32.vlgmr.msra.gmra.mxu0 %vm1624_vm3, %v31373_v24  ;;  %v31376_v44 = vld [vmem:[#allocation35_spill] sm:$0xff] }
 0xc07   :  { %26246 = vmatprep.mubr.msk.f32.mxu0 %vm1624_vm3, %v31374_v4 }
 0xc08   :  { %v12549_v19 = vpop.f32.mrf.mxu1 }
 0xc09   :  { %v29230_v30 = vsel %vm11908_vm9, %v12549_v19, 0.0  ;;  %26249 = vmatprep.subr.msk.mxu1 %vm11908_vm9, %v12549_v19 }
 0xc0a   :  { %26250 = vmatpush3.msk.msra.mxu1 %vm11908_vm9, %v12549_v19  ;;  %v26213_v21 = vpop.f32.mrf.mxu1 }
 0xc0b   :  { %26252 = vmatmul.mubr.msk.f32.vlgmr.msra.gmra.mxu1 %vm1624_vm3, %v31375_v51  ;;  %v31378_v51 = vld [vmem:[#allocation29_spill] sm:$0xff] }
 0xc0c   :  { %v12442_v48 = vpop.f32.mrf.mxu0  ;;  %26261 = vmatprep.mubr.msk.f32.mxu1 %vm1624_vm3, %v31376_v44 }
 0xc0d   :  { %v29237_v24 = vsel %vm11907_vm10, %v12442_v48, 0.0  ;;  %26244 = vmatprep.subr.msk.mxu0 %vm11907_vm10, %v12442_v48 }
 0xc0e   :  { %v26208_v4 = vpop.f32.mrf.mxu0  ;;  %26245 = vmatpush3.msk.msra.mxu0 %vm11907_vm10, %v12442_v48  ;;  %v31379_v48 = vld [vmem:[#allocation31_spill] sm:$0xff] }
 0xc0f   :  { %26247 = vmatmul.mubr.msk.f32.vlgmr.msra.gmra.mxu0 %vm1624_vm3, %v31377_v9 }
 0xc10   :  { %v12656_v19 = vpop.f32.mrf.mxu0  ;;  %v12763_v21 = vpop.f32.mrf.mxu1  ;;  %26256 = vmatprep.mubr.msk.f32.mxu0 %vm1624_vm3, %v31378_v51 }
 0xc11   :  { %v29245_v54 = vsel %vm11909_vm11, %v12656_v19, 0.0  ;;  %v29247_v44 = vsel %vm11910_vm12, %v12763_v21, 0.0  ;;  %26259 = vmatprep.subr.msk.mxu1 %vm11910_vm12, %v12763_v21  ;;  %26254 = vmatprep.subr.msk.mxu0 %vm11909_vm11, %v12656_v19 }
 0xc12   :  { %26255 = vmatpush3.msk.msra.mxu0 %vm11909_vm11, %v12656_v19  ;;  %26260 = vmatpush3.msk.msra.mxu1 %vm11910_vm12, %v12763_v21  ;;  %v26218_v4 = vpop.f32.mrf.mxu0  ;;  %v26223_v18 = vpop.f32.mrf.mxu1  ;;  %vm10118_vm12 = vcmask 16400  }
 0xc13   :  { %26257 = vmatmul.mubr.msk.f32.vlgmr.msra.gmra.mxu0 %vm1624_vm3, %v31379_v48  ;;  %26262 = vmatmul.mubr.msk.f32.vlgmr.msra.gmra.mxu1 %vm1624_vm3, %v31380_v49 }
 0xc14   :  { %26264 = vmatprep.subr.mxu0 %v31272_v33  ;;  %26271 = vmatprep.subr.mxu1 %v31272_v33 }
 0xc15   :  { %26268 = vmatprep.mubr.msk.f32.mxu0 %vm27182_vm1, %v31272_v33  ;;  %26275 = vmatprep.mubr.msk.f32.mxu1 %vm27182_vm1, %v31272_v33 }
 0xcbb   :  { %v26228_v19 = vpop.f32.mrf.mxu0 }
 0xcbc   :  { %v13432_v21 = vmul.f32 0.0001, %v26228_v19  ;;  %v26233_v4 = vpop.f32.mrf.mxu1 }
 0xcbd   :  { %v13434_v51 = vmul.f32 0.0001, %v26233_v4  ;;  %v12841_v9 = vpop.f32.mrf.mxu0 }
 0xcbe   :  { %v29260_v48 = vsub.f32 %v28541_v27, %v13432_v21  ;;  %v13431_v49 = vmul.f32 0.0001, %v12841_v9  ;;  %v12916_v18 = vpop.f32.mrf.mxu1  ;;  %v27046_v9 = vld [vmem:[#allocation2 + $0x8] sm:$0xff] }
 0xcbf   :  { %v29263_v25 = vsub.f32 %v28550_v10, %v13434_v51  ;;  %v13433_v57 = vmul.f32 0.0001, %v12916_v18  ;;  %v27045_v51 = vld [vmem:[#allocation2] sm:$0xff] }
 0xcc0   :  { %v29266_v28 = vsub.f32 %v28544_v52, %v13431_v49  ;;  %26265 = vmatpush3.msra.mxu0 %v29260_v48 }
 0xcc1   :  { %v29270_v58 = vsub.f32 %v28557_v14, %v13433_v57  ;;  %26272 = vmatpush3.msra.mxu1 %v29263_v25  ;;  %26266 = vmatprep.subr.mxu0 %v31272_v33 }
 0xcc2   :  { %v26243_v27 = vpop.f32.mrf.mxu1  ;;  %26273 = vmatprep.subr.mxu1 %v31272_v33  ;;  %26267 = vmatpush3.msra.mxu0 %v29266_v28 }
 0xcc3   :  { %v13438_v10 = vmul.f32 0.0001, %v26243_v27  ;;  %26274 = vmatpush3.msra.mxu1 %v29270_v58  ;;  %26269 = vmatmul.mubr.msk.f32.vlgmr.msra.gmra.mxu0 %vm98_vm0, %v27045_v51  ;;  %v27047_v27 = vld [vmem:[#allocation2 + $0x18] sm:$0xff] }
 0xcc4   :  { %v13066_v52 = vpop.f32.mrf.mxu1  ;;  %26276 = vmatmul.mubr.msk.f32.vlgmr.msra.gmra.mxu1 %vm98_vm0, %v27046_v9  ;;  %26285 = vmatprep.subr.mxu1 %v31272_v33 }
 0xcc5   :  { %v29281_v14 = vsub.f32 %v28565_v43, %v13438_v10  ;;  %v13437_v57 = vmul.f32 0.0001, %v13066_v52  ;;  %26289 = vmatprep.mubr.msk.f32.mxu1 %vm27182_vm1, %v31272_v33  ;;  %26278 = vmatprep.subr.mxu0 %v31272_v33 }
 0xcc6   :  { %v26238_v49 = vpop.f32.mrf.mxu0  ;;  %26282 = vmatprep.mubr.msk.f32.mxu0 %vm27182_vm1, %v31272_v33 }
 0xcc7   :  { %v29289_v19 = vsub.f32 %v28570_v15, %v13437_v57  ;;  %v13436_v21 = vmul.f32 0.0001, %v26238_v49  ;;  %26286 = vmatpush3.msra.mxu1 %v29281_v14  ;;  %v27048_v57 = vld [vmem:[#allocation2 + $0x10] sm:$0xff] }
 0xcc8   :  { %v12991_v4 = vpop.f32.mrf.mxu0  ;;  %26287 = vmatprep.subr.mxu1 %v31272_v33 }
 0xcc9   :  { %v29294_v43 = vsub.f32 %v28575_v47, %v13436_v21  ;;  %v13435_v18 = vmul.f32 0.0001, %v12991_v4  ;;  %26288 = vmatpush3.msra.mxu1 %v29289_v19 }
 0xcca   :  { %26290 = vmatmul.mubr.msk.f32.vlgmr.msra.gmra.mxu1 %vm98_vm0, %v27047_v27  ;;  %26299 = vmatprep.subr.mxu1 %v31272_v33 }
 0xccb   :  { %v29300_v15 = vsub.f32 %v28581_v41, %v13435_v18  ;;  %v26253_v10 = vpop.f32.mrf.mxu1  ;;  %26279 = vmatpush3.msra.mxu0 %v29294_v43  ;;  %26303 = vmatprep.mubr.msk.f32.mxu1 %vm27182_vm1, %v31272_v33 }
 0xccc   :  { %v13442_v51 = vmul.f32 0.0001, %v26253_v10  ;;  %26280 = vmatprep.subr.mxu0 %v31272_v33 }
 0xccd   :  { %v13216_v47 = vpop.f32.mrf.mxu1  ;;  %26281 = vmatpush3.msra.mxu0 %v29300_v15 }
 0xcce   :  { %v29308_v52 = vsub.f32 %v28591_v12, %v13442_v51  ;;  %v13441_v9 = vmul.f32 0.0001, %v13216_v47  ;;  %26283 = vmatmul.mubr.msk.f32.vlgmr.msra.gmra.mxu0 %vm98_vm0, %v27048_v57  ;;  %26292 = vmatprep.subr.mxu0 %v31272_v33  ;;  %v27049_v51 = vld [vmem:[#allocation2 + $0x28] sm:$0xff] }
 0xccf   :  { %v26248_v41 = vpop.f32.mrf.mxu0  ;;  %26296 = vmatprep.mubr.msk.f32.mxu0 %vm27182_vm1, %v31272_v33 }
 0xcd0   :  { %v29315_v49 = vsub.f32 %v28596_v62, %v13441_v9  ;;  %v13440_v21 = vmul.f32 0.0001, %v26248_v41  ;;  %26300 = vmatpush3.msra.mxu1 %v29308_v52 }
 0xcd1   :  { %v13141_v4 = vpop.f32.mrf.mxu0  ;;  %26301 = vmatprep.subr.mxu1 %v31272_v33 }
 0xcd2   :  { %v29320_v12 = vsub.f32 %v28601_v22, %v13440_v21  ;;  %v13439_v18 = vmul.f32 0.0001, %v13141_v4  ;;  %26302 = vmatpush3.msra.mxu1 %v29315_v49 }
 0xcd3   :  { %v26258_v27 = vpop.f32.mrf.mxu0  ;;  %v26263_v10 = vpop.f32.mrf.mxu1  ;;  %26304 = vmatmul.mubr.msk.f32.vlgmr.msra.gmra.mxu1 %vm98_vm0, %v27049_v51  ;;  %26313 = vmatprep.subr.mxu1 %v31272_v33 }
 0xcd4   :  { %v29326_v62 = vsub.f32 %v28607_v38, %v13439_v18  ;;  %v13444_v47 = vmul.f32 0.0001, %v26258_v27  ;;  %v13446_v9 = vmul.f32 0.0001, %v26263_v10  ;;  %26293 = vmatpush3.msra.mxu0 %v29320_v12  ;;  %26317 = vmatprep.mubr.msk.f32.mxu1 %vm27182_vm1, %v31272_v33  ;;  %v27050_v18 = vld [vmem:[#allocation2 + $0x20] sm:$0xff] }
 0xcd5   :  { %v13291_v22 = vpop.f32.mrf.mxu0  ;;  %v13366_v57 = vpop.f32.mrf.mxu1  ;;  %26294 = vmatprep.subr.mxu0 %v31272_v33 }
 0xcd6   :  { %v29333_v41 = vsub.f32 %v28618_v29, %v13444_v47  ;;  %v29336_v21 = vsub.f32 %v28614_v37, %v13446_v9  ;;  %v13443_v4 = vmul.f32 0.0001, %v13291_v22  ;;  %v13445_v38 = vmul.f32 0.0001, %v13366_v57  ;;  %26295 = vmatpush3.msra.mxu0 %v29326_v62  ;;  %v27051_v37 = vld [vmem:[#allocation2 + $0x30] sm:$0xff]  ;;  %v27052_v29 = vld [vmem:[#allocation2 + $0x38] sm:$0xff] }
 0xcd7   :  { %26297 = vmatmul.mubr.msk.f32.vlgmr.msra.gmra.mxu0 %vm98_vm0, %v27050_v18  ;;  %26306 = vmatprep.subr.mxu0 %v31272_v33  ;;  %v13396_v22 = vsel %vm370_vm2, %v29216_v34, 0.0  ;;  %v13389_v18 = vsel %vm370_vm2, %v29223_v8, 0.0  ;;  %v13403_v34 = vsel %vm370_vm2, %v29237_v24, 0.0 }
 0xcd8   :  { %31381 = vst [vmem:[#allocation79_spill] sm:$0xff] %v29333_v41  ;;  %31382 = vst [vmem:[#allocation80_spill] sm:$0xff] %v29336_v21  ;;  %v29342_v27 = vsub.f32 %v28629_v42, %v13443_v4  ;;  %v29345_v10 = vsub.f32 %v28623_v3, %v13445_v38  ;;  %26307 = vmatpush3.msra.mxu0 %v29333_v41  ;;  %26314 = vmatpush3.msra.mxu1 %v29336_v21  ;;  %v13375_v3 = vsel %vm370_vm2, %v29203_v32, 0.0 }
 0xcd9   :  { %26308 = vmatprep.subr.mxu0 %v31272_v33  ;;  %26315 = vmatprep.subr.mxu1 %v31272_v33  ;;  %v13382_v42 = vsel %vm370_vm2, %v29205_v31, 0.0  ;;  %v13376_v51 = vrot.slane %v13375_v3, 4  ;;  %v13397_v4 = vrot.slane %v13396_v22, 4  ;;  %v13390_v35 = vrot.slane %v13389_v18, 4 }
 0xcda   :  { %31383 = vst [vmem:[#allocation81_spill] sm:$0xff] %v29342_v27  ;;  %31384 = vst [vmem:[#allocation82_spill] sm:$0xff] %v29345_v10  ;;  %26309 = vmatpush3.msra.mxu0 %v29342_v27  ;;  %26310 = vmatprep.mubr.msk.f32.mxu0 %vm27182_vm1, %v31272_v33  ;;  %v13383_v47 = vrot.slane %v13382_v42, 4  ;;  %v13410_v31 = vsel %vm370_vm2, %v29230_v30, 0.0  ;;  %v13404_v8 = vrot.slane %v13403_v34, 4  ;;  %v13424_v30 = vsel %vm370_vm2, %v29247_v44, 0.0 }
 0xcdb   :  { %26316 = vmatpush3.msra.mxu1 %v29345_v10  ;;  %26311 = vmatmul.mubr.msk.f32.vlgmr.msra.gmra.mxu0 %vm98_vm0, %v27051_v37  ;;  %v13377_v9 = vadd.f32 %v13376_v51, %v13375_v3  ;;  %v13391_v13 = vadd.f32 %v13390_v35, %v13389_v18  ;;  %v13411_v3 = vrot.slane %v13410_v31, 4  ;;  %v13425_v24 = vrot.slane %v13424_v30, 4 }
 0xcdc   :  { %26318 = vmatmul.mubr.msk.f32.vlgmr.msra.gmra.mxu1 %vm98_vm0, %v27052_v29  ;;  %26320 = vmatprep.subr.mxu0 %v31272_v33  ;;  %v13384_v57 = vadd.f32 %v13383_v47, %v13382_v42  ;;  %v13398_v29 = vadd.f32 %v13397_v4, %v13396_v22 }
 0xcdd   :  { %26325 = vmatprep.subr.mxu1 %v31272_v33  ;;  %26322 = vmatprep.mubr.msk.f32.mxu0 %vm27182_vm1, %v31272_v33  ;;  %v13378_v38 = vrot.slane %v13377_v9, 2  ;;  %v13392_v10 = vrot.slane %v13391_v13, 2  ;;  %v13412_v27 = vadd.f32 %v13411_v3, %v13410_v31 }
 0xcde   :  { %26327 = vmatprep.mubr.msk.f32.mxu1 %vm27182_vm1, %v31272_v33  ;;  %v13385_v37 = vrot.slane %v13384_v57, 2  ;;  %v13399_v60 = vrot.slane %v13398_v29, 2 }
 0xcdf   :  { %v13379_v26 = vadd.f32 %v13378_v38, %v13377_v9  ;;  %v13417_v9 = vsel %vm370_vm2, %v29245_v54, 0.0  ;;  %v13413_v4 = vrot.slane %v13412_v27, 2  ;;  %v13405_v38 = vadd.f32 %v13404_v8, %v13403_v34 }
 0xce0   :  { %v13386_v32 = vadd.f32 %v13385_v37, %v13384_v57  ;;  %v13400_v47 = vadd.f32 %v13399_v60, %v13398_v29  ;;  %v13393_v57 = vadd.f32 %v13392_v10, %v13391_v13  ;;  %v13418_v18 = vrot.slane %v13417_v9, 4 }
 0xce1   :  { %v13380_v51 = vrot.slane %v13379_v26, 1  ;;  %v13414_v31 = vadd.f32 %v13413_v4, %v13412_v27  ;;  %v13406_v3 = vrot.slane %v13405_v38, 2  ;;  %v13426_v54 = vadd.f32 %v13425_v24, %v13424_v30 }
 0xce2   :  { %v13387_v42 = vrot.slane %v13386_v32, 1  ;;  %v13401_v35 = vrot.slane %v13400_v47, 1  ;;  %v13394_v29 = vrot.slane %v13393_v57, 1 }
 0xce3   :  { %v13381_v21 = vadd.f32 %v13380_v51, %v13379_v26  ;;  %v13419_v26 = vadd.f32 %v13418_v18, %v13417_v9  ;;  %v13407_v10 = vadd.f32 %v13406_v3, %v13405_v38  ;;  %v13480_v9 = vmul.f32 0.0001, %v29155_v50 }
 0xce4   :  { %v13388_v22 = vadd.f32 %v13387_v42, %v13386_v32  ;;  %v13402_v60 = vadd.f32 %v13401_v35, %v13400_v47  ;;  %v13395_v44 = vadd.f32 %v13394_v29, %v13393_v57  ;;  %v13415_v42 = vrot.slane %v13414_v31, 1 }
 0xce5   :  { %v13463_v37 = vmul.f32 0.0001, %v13381_v21  ;;  %v13420_v34 = vrot.slane %v13419_v26, 2  ;;  %v13427_v47 = vrot.slane %v13426_v54, 2  ;;  %v13408_v24 = vrot.slane %v13407_v10, 1 }
 0xce6   :  { %v13464_v41 = vmul.f32 0.0001, %v13388_v22  ;;  %v13466_v13 = vmul.f32 0.0001, %v13402_v60  ;;  %v13465_v35 = vmul.f32 0.0001, %v13395_v44 }
 0xce7   :  { %v29380_v51 = vsub.f32 %v28661_v59, %v13463_v37  ;;  %v13479_v59 = vmul.f32 0.0001, %v29153_v56  ;;  %v13421_v4 = vadd.f32 %v13420_v34, %v13419_v26  ;;  %v13416_v37 = vadd.f32 %v13415_v42, %v13414_v31 }
 0xce8   :  { %v29383_v32 = vsub.f32 %v28668_v0, %v13464_v41  ;;  %v29398_v30 = vsub.f32 %v28682_v53, %v13466_v13  ;;  %v13428_v60 = vadd.f32 %v13427_v47, %v13426_v54  ;;  %v29410_v53 = vsub.f32 %v28696_v40, %v13465_v35 }
 0xce9   :  { %v29387_v21 = vrot.slane %v29380_v51, %v27336_v23  ;;  %v29402_v56 = vsub.f32 %v28678_v6, %v13479_v59  ;;  %v29414_v31 = vsub.f32 %v28699_v17, %v13480_v9  ;;  %v13468_v26 = vmul.f32 0.0001, %v13416_v37 }
 0xcea   :  { %v29391_v8 = vrot.slane %v29383_v32, %v27336_v23  ;;  %v29406_v50 = vrot.slane %v29398_v30, %v27336_v23  ;;  %v13409_v6 = vadd.f32 %v13408_v24, %v13407_v10  ;;  %v13422_v54 = vrot.slane %v13421_v4, 1 }
 0xceb   :  { %v13429_v44 = vrot.slane %v13428_v60, 1  ;;  %v13482_v40 = vmul.f32 0.0001, %v29163_v61  ;;  %v29427_v10 = vrot.slane %v29410_v53, %v27336_v23  ;;  %v29432_v47 = vsub.f32 %v28715_v39, %v13468_v26 }
 0xcec   :  { %v13467_v61 = vmul.f32 0.0001, %v13409_v6  ;;  %v13481_v9 = vmul.f32 0.0001, %v29160_v5  ;;  %v13484_v37 = vmul.f32 0.0001, %v29170_v2 }
 0xced   :  { %v29443_v39 = vrot.slane %v29432_v47, %v27336_v23  ;;  %v13483_v6 = vmul.f32 0.0001, %v29165_v1 }
 0xcee   :  { %v29448_v35 = vsub.f32 %v28730_v63, %v13467_v61  ;;  %v29454_v5 = vsub.f32 %v28735_v45, %v13481_v9  ;;  %v29476_v26 = vsub.f32 %v28758_v20, %v13484_v37  ;;  %v13486_v61 = vmul.f32 0.0001, %v29181_v7  ;;  %v31387_v9 = vld [vmem:[#allocation37_spill] sm:$0xff]  ;;  %v31389_v37 = vld [vmem:[#allocation79_spill] sm:$0xff] }
 0xcef   :  { %v29495_v1 = vsub.f32 %v28776_v11, %v13483_v6  ;;  %v31385_v11 = vld [vmem:[#allocation38_spill] sm:$0xff]  ;;  %v27060_v6 = vld [vmem:[%s31083_s0 + $0x38] sm:$0xff] }
 0xcf0   :  { %v29512_v7 = vsub.f32 %v31387_v9, %v13486_v61 }
 0xcf2   :  { %31388 = vst [vmem:[#allocation37_spill] sm:$0xff] %v29512_v7 }
 0xd83   :  { %v13609_v27 = vpop.f32.mrf.mxu0 }
 0xd84   :  { %v13610_v0 = vadd.f32 %v13609_v27, %v29387_v21  ;;  %v13679_v41 = vpop.f32.mrf.mxu1  ;;  %v13423_v27 = vadd.f32 %v13422_v54, %v13421_v4 }
 0xd85   :  { %v13680_v22 = vadd.f32 %v13679_v41, %v29391_v8  ;;  %v26270_v57 = vpop.f32.mrf.mxu0  ;;  %v29437_v41 = vsub.f32 %v28719_v16, %v13482_v40 }
 0xd86   :  { %v14103_v38 = vmax.f32 %v13610_v0, 0.0  ;;  %v26277_v18 = vpop.f32.mrf.mxu1  ;;  %v13430_v0 = vadd.f32 %v13429_v44, %v13428_v60  ;;  %v13469_v4 = vmul.f32 0.0001, %v13423_v27  ;;  %v29461_v60 = vrot.slane %v29448_v35, %v27336_v23 }
 0xd87   :  { %v14104_v29 = vmax.f32 %v13680_v22, 0.0 }
 0xd88   :  { %26321 = vmatpush3.xpose.msk.msra.mxu0 %vm370_vm2, %v14103_v38  ;;  %v13470_v16 = vmul.f32 0.0001, %v13430_v0 }
 0xd89   :  { %26326 = vmatpush3.xpose.msk.msra.mxu1 %vm370_vm2, %v14104_v29  ;;  %26330 = vmatprep.subr.mxu0 %v31272_v33  ;;  %v29466_v29 = vsub.f32 %v28752_v36, %v13469_v4  ;;  %v27055_v4 = vld [vmem:[%s31083_s0 + $0x10] sm:$0xff] }
 0xd8a   :  { %v13819_v3 = vpop.f32.mrf.mxu1  ;;  %26335 = vmatprep.subr.mxu1 %v31272_v33 }
 0xd8b   :  { %v13820_v13 = vadd.f32 %v13819_v3, %v29406_v50  ;;  %26323 = vmatmul.mubr.msk.f32.vlgmr.msra.gmra.mxu0 %vm370_vm2, %v29402_v56  ;;  %v29469_v3 = vsub.f32 %v28747_v46, %v13470_v16  ;;  %v29482_v46 = vrot.slane %v29466_v29, %v27336_v23  ;;  %v27057_v16 = vld [vmem:[%s31083_s0 + $0x20] sm:$0xff] }
 0xd8c   :  { %26328 = vmatmul.mubr.msk.f32.vlgmr.msra.gmra.mxu1 %vm370_vm2, %v29414_v31  ;;  %v26291_v34 = vpop.f32.mrf.mxu1  ;;  %26332 = vmatprep.mubr.msk.f32.mxu0 %vm27182_vm1, %v31272_v33 }
 0xd8d   :  { %v14106_v17 = vmax.f32 %v13820_v13, 0.0  ;;  %26337 = vmatprep.mubr.msk.f32.mxu1 %vm27182_vm1, %v31272_v33  ;;  %v29486_v44 = vrot.slane %v29469_v3, %v27336_v23  ;;  %v13485_v34 = vmul.f32 0.0001, %v29179_v55 }
 0xd8e   :  { %v13749_v42 = vpop.f32.mrf.mxu0 }
 0xd8f   :  { %v13750_v59 = vadd.f32 %v13749_v42, %v29427_v10  ;;  %26336 = vmatpush3.xpose.msk.msra.mxu1 %vm370_vm2, %v14106_v17  ;;  %v29507_v55 = vsub.f32 %v31385_v11, %v13485_v34 }
 0xd90   :  { %v26284_v22 = vpop.f32.mrf.mxu0  ;;  %26345 = vmatprep.subr.mxu1 %v31272_v33 }
 0xd91   :  { %v14105_v57 = vmax.f32 %v13750_v59, 0.0  ;;  %31386 = vst [vmem:[#allocation38_spill] sm:$0xff] %v29507_v55  ;;  %v27053_v22 = vld [vmem:[%s31083_s0] sm:$0xff] }
 0xd92   :  { %26338 = vmatmul.mubr.msk.f32.vlgmr.msra.gmra.mxu1 %vm370_vm2, %v29437_v41 }
 0xd93   :  { %v13959_v38 = vpop.f32.mrf.mxu1  ;;  %26331 = vmatpush3.xpose.msk.msra.mxu0 %vm370_vm2, %v14105_v57  ;;  %26347 = vmatprep.mubr.msk.f32.mxu1 %vm27182_vm1, %v31272_v33  ;;  %v27054_v57 = vld [vmem:[%s31083_s0 + $0x8] sm:$0xff] }
 0xd94   :  { %v13960_v18 = vadd.f32 %v13959_v38, %v29443_v39  ;;  %26340 = vmatprep.subr.mxu0 %v31272_v33  ;;  %v27056_v38 = vld [vmem:[%s31083_s0 + $0x18] sm:$0xff] }
 0xd95   :  { %v26305_v24 = vpop.f32.mrf.mxu1 }
 0xd96   :  { %v14108_v63 = vmax.f32 %v13960_v18, 0.0  ;;  %26333 = vmatmul.mubr.msk.f32.vlgmr.msra.gmra.mxu0 %vm370_vm2, %v29454_v5  ;;  %v27058_v18 = vld [vmem:[%s31083_s0 + $0x28] sm:$0xff]  ;;  %v31390_v24 = vld [vmem:[#allocation80_spill] sm:$0xff] }
 0xd97   :  { %v13889_v45 = vpop.f32.mrf.mxu0  ;;  %26342 = vmatprep.mubr.msk.f32.mxu0 %vm27182_vm1, %v31272_v33 }
 0xd98   :  { %v13890_v2 = vadd.f32 %v13889_v45, %v29461_v60  ;;  %26346 = vmatpush3.xpose.msk.msra.mxu1 %vm370_vm2, %v14108_v63  ;;  %v31391_v63 = vld [vmem:[#allocation81_spill] sm:$0xff]  ;;  %v31392_v45 = vld [vmem:[#allocation82_spill] sm:$0xff] }
 0xd99   :  { %v26298_v54 = vpop.f32.mrf.mxu0  ;;  %26355 = vmatprep.subr.mxu1 %v31272_v33 }
 0xd9a   :  { %v14107_v36 = vmax.f32 %v13890_v2, 0.0  ;;  %v27059_v2 = vld [vmem:[%s31083_s0 + $0x30] sm:$0xff] }
 0xd9b   :  { %v14029_v13 = vpop.f32.mrf.mxu0  ;;  %26348 = vmatmul.mubr.msk.f32.vlgmr.msra.gmra.mxu1 %vm370_vm2, %v29476_v26 }
 0xd9c   :  { %v14030_v20 = vadd.f32 %v14029_v13, %v29482_v46  ;;  %v14099_v40 = vpop.f32.mrf.mxu1  ;;  %26341 = vmatpush3.xpose.msk.msra.mxu0 %vm370_vm2, %v14107_v36  ;;  %26357 = vmatprep.mubr.msk.f32.mxu1 %vm27182_vm1, %v31272_v33 }
 0xd9d   :  { %v14100_v17 = vadd.f32 %v14099_v40, %v29486_v44  ;;  %26350 = vmatprep.subr.mxu0 %v31272_v33  ;;  %v26312_v42 = vpop.f32.mrf.mxu0 }
 0xd9e   :  { %v14109_v27 = vmax.f32 %v14030_v20, 0.0  ;;  %v26319_v59 = vpop.f32.mrf.mxu1 }
 0xd9f   :  { %v14110_v0 = vmax.f32 %v14100_v17, 0.0  ;;  %26343 = vmatmul.mubr.msk.f32.vlgmr.msra.gmra.mxu0 %vm370_vm2, %v29495_v1 }
 0xda0   :  { %26351 = vmatpush3.xpose.msk.msra.mxu0 %vm370_vm2, %v14109_v27  ;;  %26352 = vmatprep.mubr.msk.f32.mxu0 %vm27182_vm1, %v31272_v33 }
 0xda1   :  { %26356 = vmatpush3.xpose.msk.msra.mxu1 %vm370_vm2, %v14110_v0  ;;  %26360 = vmatprep.subr.mxu0 %v31272_v33 }
 0xda2   :  { %26367 = vmatprep.subr.mxu1 %v31272_v33 }
 0xda3   :  { %26353 = vmatmul.mubr.msk.f32.vlgmr.msra.gmra.mxu0 %vm370_vm2, %v29507_v55 }
 0xda4   :  { %26358 = vmatmul.mubr.msk.f32.vlgmr.msra.gmra.mxu1 %vm370_vm2, %v29512_v7  ;;  %26361 = vmatpush3.msra.mxu0 %v29260_v48 }
 0xda5   :  { %26368 = vmatpush3.msra.mxu1 %v29263_v25  ;;  %26362 = vmatprep.subr.mxu0 %v31272_v33 }
 0xda6   :  { %26369 = vmatprep.subr.mxu1 %v31272_v33  ;;  %26363 = vmatpush3.msra.mxu0 %v29266_v28 }
 0xda7   :  { %26364 = vmatprep.mubr.msk.f32.mxu0 %vm27182_vm1, %v31272_v33  ;;  %26370 = vmatpush3.msra.mxu1 %v29270_v58 }
 0xda8   :  { %26371 = vmatprep.mubr.msk.f32.mxu1 %vm27182_vm1, %v31272_v33  ;;  %26365 = vmatmul.mubr.msk.f32.vlgmr.msra.gmra.mxu0 %vm98_vm0, %v27053_v22 }
 0xda9   :  { %26372 = vmatmul.mubr.msk.f32.vlgmr.msra.gmra.mxu1 %vm98_vm0, %v27054_v57  ;;  %26374 = vmatprep.subr.mxu0 %v31272_v33 }
 0xdaa   :  { %26381 = vmatprep.subr.mxu1 %v31272_v33  ;;  %26375 = vmatpush3.msra.mxu0 %v29294_v43 }
 0xdab   :  { %26382 = vmatpush3.msra.mxu1 %v29281_v14  ;;  %26376 = vmatprep.subr.mxu0 %v31272_v33 }
 0xdac   :  { %26383 = vmatprep.subr.mxu1 %v31272_v33  ;;  %26377 = vmatpush3.msra.mxu0 %v29300_v15 }
 0xdad   :  { %26378 = vmatprep.mubr.msk.f32.mxu0 %vm27182_vm1, %v31272_v33  ;;  %26384 = vmatpush3.msra.mxu1 %v29289_v19 }
 0xdae   :  { %26385 = vmatprep.mubr.msk.f32.mxu1 %vm27182_vm1, %v31272_v33  ;;  %26379 = vmatmul.mubr.msk.f32.vlgmr.msra.gmra.mxu0 %vm98_vm0, %v27055_v4 }
 0xdaf   :  { %26386 = vmatmul.mubr.msk.f32.vlgmr.msra.gmra.mxu1 %vm98_vm0, %v27056_v38  ;;  %26388 = vmatprep.subr.mxu0 %v31272_v33 }
 0xdb0   :  { %26395 = vmatprep.subr.mxu1 %v31272_v33  ;;  %26389 = vmatpush3.msra.mxu0 %v29320_v12 }
 0xdb1   :  { %26396 = vmatpush3.msra.mxu1 %v29308_v52  ;;  %26390 = vmatprep.subr.mxu0 %v31272_v33 }
 0xdb2   :  { %26397 = vmatprep.subr.mxu1 %v31272_v33  ;;  %26391 = vmatpush3.msra.mxu0 %v29326_v62 }
 0xdb3   :  { %26392 = vmatprep.mubr.msk.f32.mxu0 %vm27182_vm1, %v31272_v33  ;;  %26398 = vmatpush3.msra.mxu1 %v29315_v49 }
 0xdb4   :  { %26399 = vmatprep.mubr.msk.f32.mxu1 %vm27182_vm1, %v31272_v33  ;;  %26393 = vmatmul.mubr.msk.f32.vlgmr.msra.gmra.mxu0 %vm98_vm0, %v27057_v16 }
 0xdb5   :  { %26400 = vmatmul.mubr.msk.f32.vlgmr.msra.gmra.mxu1 %vm98_vm0, %v27058_v18  ;;  %26402 = vmatprep.subr.mxu0 %v31272_v33 }
 0xdb6   :  { %26409 = vmatprep.subr.mxu1 %v31272_v33  ;;  %26403 = vmatpush3.msra.mxu0 %v31389_v37 }
 0xdb7   :  { %26410 = vmatpush3.msra.mxu1 %v31390_v24  ;;  %26404 = vmatprep.subr.mxu0 %v31272_v33 }
 0xdb8   :  { %26411 = vmatprep.subr.mxu1 %v31272_v33  ;;  %26405 = vmatpush3.msra.mxu0 %v31391_v63 }
 0xdb9   :  { %26406 = vmatprep.mubr.msk.f32.mxu0 %vm27182_vm1, %v31272_v33  ;;  %26412 = vmatpush3.msra.mxu1 %v31392_v45 }
 0xdba   :  { %26413 = vmatprep.mubr.msk.f32.mxu1 %vm27182_vm1, %v31272_v33  ;;  %26407 = vmatmul.mubr.msk.f32.vlgmr.msra.gmra.mxu0 %vm98_vm0, %v27059_v2 }
 0xdbb   :  { %26414 = vmatmul.mubr.msk.f32.vlgmr.msra.gmra.mxu1 %vm98_vm0, %v27060_v6  ;;  %26416 = vmatprep.subr.mxu0 %v31272_v33 }
 0xdbc   :  { %26421 = vmatprep.subr.mxu1 %v31272_v33  ;;  %26418 = vmatprep.mubr.msk.f32.mxu0 %vm27182_vm1, %v31272_v33 }
 0xdbd   :  { %26423 = vmatprep.mubr.msk.f32.mxu1 %vm27182_vm1, %v31272_v33 }
 0xe4b   :  { %v29603_v54 = vpop.f32.mrf.mxu0 }
 0xe4c   :  { %31393 = vst [vmem:[#allocation79_spill] sm:$0xff] %v29603_v54  ;;  %v29605_v36 = vpop.f32.mrf.mxu1 }
 0xe4d   :  { %31394 = vst [vmem:[#allocation80_spill] sm:$0xff] %v29605_v36  ;;  %v26324_v13 = vpop.f32.mrf.mxu0 }
 0xe4e   :  { %v26329_v20 = vpop.f32.mrf.mxu1 }
 0xe52   :  { %v29607_v40 = vpop.f32.mrf.mxu1 }
 0xe53   :  { %31395 = vst [vmem:[#allocation81_spill] sm:$0xff] %v29607_v40 }
 0xe54   :  { %v26339_v34 = vpop.f32.mrf.mxu1 }
 0xe56   :  { %v29609_v17 = vpop.f32.mrf.mxu0 }
 0xe57   :  { %31396 = vst [vmem:[#allocation82_spill] sm:$0xff] %v29609_v17  ;;  %v27065_v17 = vld [vmem:[%s31084_s1 + $0x4] sm:$0x1] }
 0xe58   :  { %v26334_v42 = vpop.f32.mrf.mxu0 }
 0xe5b   :  { %v29611_v61 = vpop.f32.mrf.mxu1 }
 0xe5c   :  { %31397 = vst [vmem:[#allocation83_spill] sm:$0xff] %v29611_v61 }
 0xe5d   :  { %v26349_v27 = vpop.f32.mrf.mxu1 }
 0xe5f   :  { %v29613_v59 = vpop.f32.mrf.mxu0 }
 0xe60   :  { %31398 = vst [vmem:[#allocation84_spill] sm:$0xff] %v29613_v59 }
 0xe61   :  { %v26344_v0 = vpop.f32.mrf.mxu0 }
 0xe63   :  { %v29615_v11 = vpop.f32.mrf.mxu0 }
 0xe64   :  { %31399 = vst [vmem:[#allocation85_spill] sm:$0xff] %v29615_v11  ;;  %v29617_v9 = vpop.f32.mrf.mxu1 }
 0xe65   :  { %31400 = vst [vmem:[#allocation86_spill] sm:$0xff] %v29617_v9  ;;  %v26354_v22 = vpop.f32.mrf.mxu0 }
 0xe66   :  { %v26359_v57 = vpop.f32.mrf.mxu1 }
 0xe68   :  { %v14882_v4 = vpop.f32.mrf.mxu0 }
 0xe69   :  { %v29620_v38 = vadd.f32 %v14882_v4, %v29387_v21  ;;  %v14952_v16 = vpop.f32.mrf.mxu1 }
 0xe6a   :  { %v29623_v18 = vadd.f32 %v14952_v16, %v29391_v8  ;;  %v26366_v2 = vpop.f32.mrf.mxu0 }
 0xe6b   :  { %v15376_v6 = vmax.f32 %v29620_v38, 0.0  ;;  %v26373_v13 = vpop.f32.mrf.mxu1  ;;  %vm16592_vm13 = vcmp.gt.f32.partialorder %v29620_v38, 0.0  ;;  %v31435_v38 = vld [vmem:[#allocation24_spill] sm:$0xff] }
 0xe6c   :  { %v15377_v20 = vmax.f32 %v29623_v18, 0.0  ;;  %vm16593_vm14 = vcmp.gt.f32.partialorder %v29623_v18, 0.0  ;;  %v31436_v18 = vld [vmem:[#allocation30_spill] sm:$0xff] }
 0xe6d   :  { %26417 = vmatpush3.xpose.msk.msra.mxu0 %vm370_vm2, %v15376_v6 }
 0xe6e   :  { %v15022_v34 = vpop.f32.mrf.mxu0  ;;  %26422 = vmatpush3.xpose.msk.msra.mxu1 %vm370_vm2, %v15377_v20  ;;  %26426 = vmatprep.subr.mxu0 %v31272_v33 }
 0xe6f   :  { %v29631_v21 = vadd.f32 %v15022_v34, %v29427_v10  ;;  %v15092_v42 = vpop.f32.mrf.mxu1  ;;  %26431 = vmatprep.subr.mxu1 %v31272_v33 }
 0xe70   :  { %v29635_v8 = vadd.f32 %v15092_v42, %v29406_v50  ;;  %v26380_v27 = vpop.f32.mrf.mxu0  ;;  %26419 = vmatmul.mubr.msk.f32.vlgmr.msra.gmra.mxu0 %vm370_vm2, %v29402_v56 }
 0xe71   :  { %v31187_v0 = vmax.f32 %v29631_v21, 0.0  ;;  %v26387_v22 = vpop.f32.mrf.mxu1  ;;  %26424 = vmatmul.mubr.msk.f32.vlgmr.msra.gmra.mxu1 %vm370_vm2, %v29414_v31  ;;  %26428 = vmatprep.mubr.msk.f32.mxu0 %vm27182_vm1, %v31272_v33  ;;  %vm16594_vm7 = vcmp.gt.f32.partialorder %v29631_v21, 0.0 }
 0xe72   :  { %v31188_v10 = vmax.f32 %v29635_v8, 0.0  ;;  %26433 = vmatprep.mubr.msk.f32.mxu1 %vm27182_vm1, %v31272_v33  ;;  %vm16595_vm15 = vcmp.gt.f32.partialorder %v29635_v8, 0.0 }
 0xe73   :  { %26427 = vmatpush3.xpose.msk.msra.mxu0 %vm370_vm2, %v31187_v0 }
 0xe74   :  { %v15162_v50 = vpop.f32.mrf.mxu0  ;;  %26432 = vmatpush3.xpose.msk.msra.mxu1 %vm370_vm2, %v31188_v10  ;;  %26436 = vmatprep.subr.mxu0 %v31272_v33 }
 0xe75   :  { %v29655_v57 = vadd.f32 %v15162_v50, %v29461_v60  ;;  %v15232_v4 = vpop.f32.mrf.mxu1  ;;  %26441 = vmatprep.subr.mxu1 %v31272_v33 }
 0xe76   :  { %v29659_v16 = vadd.f32 %v15232_v4, %v29443_v39  ;;  %v26394_v2 = vpop.f32.mrf.mxu0  ;;  %26429 = vmatmul.mubr.msk.f32.vlgmr.msra.gmra.mxu0 %vm370_vm2, %v29454_v5 }
 0xe77   :  { %v31185_v13 = vmax.f32 %v29655_v57, 0.0  ;;  %v26401_v34 = vpop.f32.mrf.mxu1  ;;  %26434 = vmatmul.mubr.msk.f32.vlgmr.msra.gmra.mxu1 %vm370_vm2, %v29437_v41  ;;  %26438 = vmatprep.mubr.msk.f32.mxu0 %vm27182_vm1, %v31272_v33  ;;  %vm16596_vm9 = vcmp.gt.f32.partialorder %v29655_v57, 0.0 }
 0xe78   :  { %v31186_v60 = vmax.f32 %v29659_v16, 0.0  ;;  %26443 = vmatprep.mubr.msk.f32.mxu1 %vm27182_vm1, %v31272_v33  ;;  %v31409_v9 = vmax.f32 %v29659_v16, 0.0  ;;  %vm16597_vm8 = vcmp.gt.f32.partialorder %v29659_v16, 0.0  ;;  %v31443_v16 = vld [vmem:[#allocation27_spill] sm:$0xff] }
 0xe79   :  { %26437 = vmatpush3.xpose.msk.msra.mxu0 %vm370_vm2, %v31185_v13 }
 0xe7a   :  { %v15302_v39 = vpop.f32.mrf.mxu0  ;;  %26442 = vmatpush3.xpose.msk.msra.mxu1 %vm370_vm2, %v31186_v60  ;;  %26446 = vmatprep.subr.mxu0 %v31272_v33  ;;  %v27062_v60 = vld [vmem:[%s31084_s1 + $0x1] sm:$0x1] }
 0xe7b   :  { %v29679_v42 = vadd.f32 %v15302_v39, %v29482_v46  ;;  %v15372_v27 = vpop.f32.mrf.mxu1  ;;  %26451 = vmatprep.subr.mxu1 %v31272_v33 }
 0xe7c   :  { %v29683_v22 = vadd.f32 %v15372_v27, %v29486_v44  ;;  %26439 = vmatmul.mubr.msk.f32.vlgmr.msra.gmra.mxu0 %vm370_vm2, %v29495_v1  ;;  %v26408_v50 = vpop.f32.mrf.mxu0  ;;  %v29713_v44 = vpop.permute.xlu1 %14113 }
 0xe7d   :  { %v31184_v4 = vmax.f32 %v29679_v42, 0.0  ;;  %26444 = vmatmul.mubr.msk.f32.vlgmr.msra.gmra.mxu1 %vm370_vm2, %v29476_v26  ;;  %26448 = vmatprep.mubr.msk.f32.mxu0 %vm27182_vm1, %v31272_v33  ;;  %v26415_v46 = vpop.f32.mrf.mxu1  ;;  %31401 = vst [vmem:[#allocation87_spill] sm:$0xff] %v29713_v44  ;;  %v29717_v27 = vpop.permute.xlu0 %14118  ;;  %v31413_v54 = vmax.f32 %v29679_v42, 0.0  ;;  %vm16598_vm10 = vcmp.gt.f32.partialorder %v29679_v42, 0.0  ;;  %v31446_v42 = vld [vmem:[#allocation36_spill] sm:$0xff] }
 0xe7e   :  { %v31183_v2 = vmax.f32 %v29683_v22, 0.0  ;;  %26453 = vmatprep.mubr.msk.f32.mxu1 %vm27182_vm1, %v31272_v33  ;;  %31403 = vst [vmem:[#allocation89_spill] sm:$0xff] %v29717_v27  ;;  %vm16599_vm11 = vcmp.gt.f32.partialorder %v29683_v22, 0.0 }
 0xe7f   :  { %26447 = vmatpush3.xpose.msk.msra.mxu0 %vm370_vm2, %v31184_v4 }
 0xe80   :  { %26452 = vmatpush3.xpose.msk.msra.mxu1 %vm370_vm2, %v31183_v2  ;;  %26456 = vmatprep.subr.mxu0 %v31272_v33  ;;  %v29715_v34 = vpop.permute.xlu1 %14128  ;;  %v27061_v2 = vld [vmem:[%s31084_s1] sm:$0x1] }
 0xe81   :  { %26461 = vmatprep.subr.mxu1 %v31272_v33  ;;  %31402 = vst [vmem:[#allocation88_spill] sm:$0xff] %v29715_v34 }
 0xe82   :  { %26449 = vmatmul.mubr.msk.f32.vlgmr.msra.gmra.mxu0 %vm370_vm2, %v29507_v55 }
 0xe83   :  { %26454 = vmatmul.mubr.msk.f32.vlgmr.msra.gmra.mxu1 %vm370_vm2, %v29512_v7  ;;  %26457 = vmatpush3.msra.mxu0 %v15376_v6 }
 0xe84   :  { %26462 = vmatpush3.msra.mxu1 %v15377_v20  ;;  %26458 = vmatprep.mubr.msk.f32.mxu0 %vm27182_vm1, %v31272_v33  ;;  %v29729_v11 = vpop.permute.xlu1 %14123 }
 0xe85   :  { %26463 = vmatprep.mubr.msk.f32.mxu1 %vm27182_vm1, %v31272_v33  ;;  %26466 = vmatprep.subr.mxu0 %v31272_v33  ;;  %31404 = vst [vmem:[#allocation90_spill] sm:$0xff] %v29729_v11 }
 0xe86   :  { %26471 = vmatprep.subr.mxu1 %v31272_v33 }
 0xf30   :  { %v15453_v39 = vpop.f32.mrf.mxu0 }
 0xf31   :  { %v15454_v6 = vadd.f32 %v15453_v39, %v29713_v44  ;;  %v15526_v20 = vpop.f32.mrf.mxu1 }
 0xf32   :  { %v15527_v50 = vadd.f32 %v15526_v20, %v29717_v27  ;;  %v26420_v46 = vpop.f32.mrf.mxu0 }
 0xf33   :  { %v15968_v4 = vsub.f32 %v15454_v6, %v27061_v2  ;;  %v26425_v13 = vpop.f32.mrf.mxu1  ;;  %v31406_v6 = vmax.f32 %v29631_v21, 0.0 }
 0xf34   :  { %v15969_v0 = vsub.f32 %v15527_v50, %v27062_v60  ;;  %v27064_v50 = vld [vmem:[%s31084_s1 + $0x3] sm:$0x1] }
 0xf35   :  { %v29727_v10 = vmul.f32 0.25, %v15968_v4  ;;  %v31405_v4 = vmax.f32 %v29635_v8, 0.0 }
 0xf36   :  { %v29731_v39 = vmul.f32 0.25, %v15969_v0  ;;  %v15599_v59 = vpop.f32.mrf.mxu0  ;;  %v27063_v0 = vld [vmem:[%s31084_s1 + $0x2] sm:$0x1] }
 0xf37   :  { %v15600_v20 = vadd.f32 %v15599_v59, %v29729_v11  ;;  %v15672_v46 = vpop.f32.mrf.mxu1  ;;  %16600 = vxpose.xlu0.b32.start.end [1/1] (short) (narrow) %v29727_v10, 8  ;;  %26459 = vmatmul.mubr.msk.f32.vlgmr.msra.gmra.mxu0 %vm1624_vm3, %v29727_v10 }
 0xf38   :  { %v15673_v13 = vadd.f32 %v15672_v46, %v29715_v34  ;;  %v26430_v2 = vpop.f32.mrf.mxu0  ;;  %26464 = vmatmul.mubr.msk.f32.vlgmr.msra.gmra.mxu1 %vm1624_vm3, %v29731_v39  ;;  %16707 = vxpose.xlu1.b32.start.end [1/1] (short) (narrow) %v29731_v39, 8 }
 0xf39   :  { %v15970_v60 = vsub.f32 %v15600_v20, %v27063_v0  ;;  %v26435_v59 = vpop.f32.mrf.mxu1  ;;  %26472 = vmatpush3.msra.mxu1 %v31405_v4  ;;  %26467 = vmatpush3.msra.mxu0 %v31406_v6  ;;  %v29759_v20 = vpop.permute.xlu0 %14133 }
 0xf3a   :  { %v15971_v46 = vsub.f32 %v15673_v13, %v27064_v50  ;;  %26468 = vmatprep.mubr.msk.f32.mxu0 %vm27182_vm1, %v31272_v33  ;;  %26473 = vmatprep.mubr.msk.f32.mxu1 %vm27182_vm1, %v31272_v33  ;;  %31407 = vst [vmem:[#allocation91_spill] sm:$0xff] %v29759_v20  ;;  %v29761_v4 = vpop.permute.xlu1 %14138 }
 0xf3b   :  { %v29755_v2 = vmul.f32 0.25, %v15970_v60  ;;  %26476 = vmatprep.subr.mxu0 %v31272_v33  ;;  %26481 = vmatprep.subr.mxu1 %v31272_v33  ;;  %31408 = vst [vmem:[#allocation92_spill] sm:$0xff] %v29761_v4 }
 0xf3c   :  { %v15979_v0 = vmul.f32 0.25, %v15971_v46  ;;  %v15745_v59 = vpop.f32.mrf.mxu0 }
 0xf3d   :  { %v15746_v13 = vadd.f32 %v15745_v59, %v29759_v20  ;;  %v15818_v6 = vpop.f32.mrf.mxu1  ;;  %26469 = vmatmul.mubr.msk.f32.vlgmr.msra.gmra.mxu0 %vm1624_vm3, %v29755_v2  ;;  %v31410_v59 = vmax.f32 %v29655_v57, 0.0 }
 0xf3e   :  { %v15819_v50 = vadd.f32 %v15818_v6, %v29761_v4  ;;  %v26440_v60 = vpop.f32.mrf.mxu0  ;;  %26474 = vmatmul.mubr.msk.f32.vlgmr.msra.gmra.mxu1 %vm1624_vm3, %v15979_v0  ;;  %16921 = vxpose.xlu0.b32.start.end [1/1] (short) (narrow) %v15979_v0, 8  ;;  %v27066_v6 = vld [vmem:[%s31084_s1 + $0x5] sm:$0x1]  ;;  %v31414_v4 = vmax.f32 %v29683_v22, 0.0 }
 0xf3f   :  { %v15972_v46 = vsub.f32 %v15746_v13, %v27065_v17  ;;  %v26445_v11 = vpop.f32.mrf.mxu1  ;;  %26482 = vmatpush3.msra.mxu1 %v31409_v9  ;;  %26477 = vmatpush3.msra.mxu0 %v31410_v59  ;;  %v29784_v17 = vpop.permute.xlu0 %14143 }
 0xf40   :  { %v15973_v60 = vsub.f32 %v15819_v50, %v27066_v6  ;;  %26478 = vmatprep.mubr.msk.f32.mxu0 %vm27182_vm1, %v31272_v33  ;;  %26483 = vmatprep.mubr.msk.f32.mxu1 %vm27182_vm1, %v31272_v33  ;;  %31411 = vst [vmem:[#allocation93_spill] sm:$0xff] %v29784_v17  ;;  %v29787_v13 = vpop.permute.xlu1 %14148 }
 0xf41   :  { %v15980_v20 = vmul.f32 0.25, %v15972_v46  ;;  %26486 = vmatprep.subr.mxu0 %v31272_v33  ;;  %26491 = vmatprep.subr.mxu1 %v31272_v33  ;;  %31412 = vst [vmem:[#allocation94_spill] sm:$0xff] %v29787_v13 }
 0xf42   :  { %v15981_v11 = vmul.f32 0.25, %v15973_v60  ;;  %v15891_v9 = vpop.f32.mrf.mxu0  ;;  %16814 = vxpose.xlu0.b32.start.end [1/1] (short) (narrow) %v29755_v2, 8  ;;  %v27067_v60 = vld [vmem:[%s31084_s1 + $0x6] sm:$0x1] }
 0xf43   :  { %v15892_v50 = vadd.f32 %v15891_v9, %v29784_v17  ;;  %v15964_v59 = vpop.f32.mrf.mxu1  ;;  %26479 = vmatmul.mubr.msk.f32.vlgmr.msra.gmra.mxu0 %vm1624_vm3, %v15980_v20  ;;  %v27068_v9 = vld [vmem:[%s31084_s1 + $0x7] sm:$0x1] }
 0xf44   :  { %v15965_v6 = vadd.f32 %v15964_v59, %v29787_v13  ;;  %v26450_v46 = vpop.f32.mrf.mxu0  ;;  %26484 = vmatmul.mubr.msk.f32.vlgmr.msra.gmra.mxu1 %vm1624_vm3, %v15981_v11  ;;  %26487 = vmatpush3.msra.mxu0 %v31413_v54 }
 0xf45   :  { %v15974_v44 = vsub.f32 %v15892_v50, %v27067_v60  ;;  %v26455_v61 = vpop.f32.mrf.mxu1  ;;  %26492 = vmatpush3.msra.mxu1 %v31414_v4  ;;  %26488 = vmatprep.mubr.msk.f32.mxu0 %vm27182_vm1, %v31272_v33  ;;  %v16574_v4 = vsel %vm974_vm5, %v29755_v2, 0.0  ;;  %v16577_v50 = vsel %vm974_vm5, %v15979_v0, 0.0  ;;  %v16571_v46 = vsel %vm974_vm5, %v29731_v39, 0.0 }
 0xf46   :  { %v15975_v59 = vsub.f32 %v15965_v6, %v27068_v9  ;;  %26493 = vmatprep.mubr.msk.f32.mxu1 %vm27182_vm1, %v31272_v33  ;;  %26496 = vmatprep.subr.mxu0 %v31272_v33  ;;  %v16580_v6 = vsel %vm974_vm5, %v15980_v20, 0.0  ;;  %v16583_v9 = vsel %vm974_vm5, %v15981_v11, 0.0 }
 0xf47   :  { %v15982_v54 = vmul.f32 0.25, %v15974_v44  ;;  %26501 = vmatprep.subr.mxu1 %v31272_v33  ;;  %17135 = vxpose.xlu0.b32.start.end [1/1] (short) (narrow) %v15981_v11, 8  ;;  %v16568_v44 = vsel %vm974_vm5, %v29727_v10, 0.0 }
 0xf48   :  { %v15983_v61 = vmul.f32 0.25, %v15975_v59 }
 0xf49   :  { %17242 = vxpose.xlu1.b32.start.end [1/1] (short) (narrow) %v15982_v54, 8  ;;  %26489 = vmatmul.mubr.msk.f32.vlgmr.msra.gmra.mxu0 %vm1624_vm3, %v15982_v54  ;;  %v16586_v60 = vsel %vm974_vm5, %v15982_v54, 0.0 }
 0xf4a   :  { %26494 = vmatmul.mubr.msk.f32.vlgmr.msra.gmra.mxu1 %vm1624_vm3, %v15983_v61  ;;  %26497 = vmatpush3.msk.msra.mxu0 %vm2277_vm4, %v29402_v56  ;;  %v16589_v10 = vsel %vm974_vm5, %v15983_v61, 0.0 }
 0xf4b   :  { %26502 = vmatpush3.msk.msra.mxu1 %vm2277_vm4, %v29414_v31  ;;  %17028 = vxpose.xlu0.b32.start.end [1/1] (short) (narrow) %v15980_v20, 8 }
 0xf4c   :  { %26503 = vmatprep.mubr.msk.f32.mxu1 %vm27182_vm1, %v31272_v33  ;;  %26511 = vmatprep.subr.mxu1 %v31272_v33 }
 0xf4d   :  { %26498 = vmatprep.mubr.msk.f32.mxu0 %vm27182_vm1, %v31272_v33  ;;  %26506 = vmatprep.subr.mxu0 %v31272_v33 }
 0xf4f   :  { %17349 = vxpose.xlu0.b32.start.end [1/1] (short) (narrow) %v15983_v61, 8 }
 0xf70   :  { %16569 = vadd.xlane.f32.xlu1 %v16568_v44  ;;  %v31415_v44 = vld [vmem:[#allocation21_spill] sm:$0xff] }
 0xf74   :  { %16575 = vadd.xlane.f32.xlu1 %v16574_v4  ;;  %v31416_v4 = vld [vmem:[#allocation23_spill] sm:$0xff] }
 0xf78   :  { %16578 = vadd.xlane.f32.xlu1 %v16577_v50 }
 0xf7c   :  { %16581 = vadd.xlane.f32.xlu1 %v16580_v6  ;;  %16572 = vadd.xlane.f32.xlu0 %v16571_v46 }
 0xf80   :  { %16587 = vadd.xlane.f32.xlu1 %v16586_v60  ;;  %16584 = vadd.xlane.f32.xlu0 %v16583_v9 }
 0xf84   :  { %16590 = vadd.xlane.f32.xlu0 %v16589_v10 }
 0xfb3   :  { %v16616_v2 = vpop.trf.xlu0 }
 0xfb4   :  { %v16723_v59 = vpop.trf.xlu1  ;;  %26499 = vmatmul.mubr.msk.f32.vlgmr.msra.gmra.mxu0 %vm2273_vm6, %v16616_v2  ;;  %v31417_v2 = vld [vmem:[#allocation57_spill] sm:$0xff] }
 0xfb5   :  { %26504 = vmatmul.mubr.msk.f32.vlgmr.msra.gmra.mxu1 %vm2273_vm6, %v16723_v59  ;;  %26507 = vmatpush3.msk.msra.mxu0 %vm2277_vm4, %v29454_v5 }
 0xfb6   :  { %26512 = vmatpush3.msk.msra.mxu1 %vm2277_vm4, %v29437_v41  ;;  %26513 = vmatprep.mubr.msk.f32.mxu1 %vm27182_vm1, %v31272_v33 }
 0xfb7   :  { %26521 = vmatprep.subr.mxu1 %v31272_v33  ;;  %26508 = vmatprep.mubr.msk.f32.mxu0 %vm27182_vm1, %v31272_v33 }
 0xfb8   :  { %26516 = vmatprep.subr.mxu0 %v31272_v33 }
 0xfba   :  { %v16937_v39 = vpop.trf.xlu0 }
 0xfbb   :  { %26514 = vmatmul.mubr.msk.f32.vlgmr.msra.gmra.mxu1 %vm2273_vm6, %v16937_v39 }
 0xfbc   :  { %26522 = vmatpush3.msk.msra.mxu1 %vm2277_vm4, %v29476_v26  ;;  %26523 = vmatprep.mubr.msk.f32.mxu1 %vm27182_vm1, %v31272_v33 }
 0xfbd   :  { %26531 = vmatprep.subr.mxu1 %v31272_v33 }
 0xfbe   :  { %v16830_v20 = vpop.trf.xlu0 }
 0xfbf   :  { %26509 = vmatmul.mubr.msk.f32.vlgmr.msra.gmra.mxu0 %vm2273_vm6, %v16830_v20 }
 0xfc0   :  { %26517 = vmatpush3.msk.msra.mxu0 %vm2277_vm4, %v29495_v1  ;;  %26518 = vmatprep.mubr.msk.f32.mxu0 %vm27182_vm1, %v31272_v33 }
 0xfc1   :  { %26526 = vmatprep.subr.mxu0 %v31272_v33 }
 0xfc3   :  { %v17151_v0 = vpop.trf.xlu0 }
 0xfc4   :  { %26524 = vmatmul.mubr.msk.f32.vlgmr.msra.gmra.mxu1 %vm2273_vm6, %v17151_v0 }
 0xfc5   :  { %26532 = vmatpush3.msk.msra.mxu1 %vm2277_vm4, %v29512_v7  ;;  %26533 = vmatprep.mubr.msk.f32.mxu1 %vm27182_vm1, %v31272_v33  ;;  %v17258_v54 = vpop.trf.xlu1 }
 0xfc7   :  { %v17044_v11 = vpop.trf.xlu0 }
 0xfc8   :  { %26519 = vmatmul.mubr.msk.f32.vlgmr.msra.gmra.mxu0 %vm2273_vm6, %v17044_v11 }
 0xfc9   :  { %26527 = vmatpush3.msk.msra.mxu0 %vm2277_vm4, %v29507_v55  ;;  %26528 = vmatprep.mubr.msk.f32.mxu0 %vm27182_vm1, %v31272_v33 }
 0xfcb   :  { %v17365_v61 = vpop.trf.xlu0 }
 0xfcc   :  { %26529 = vmatmul.mubr.msk.f32.vlgmr.msra.gmra.mxu0 %vm2273_vm6, %v17258_v54  ;;  %26534 = vmatmul.mubr.msk.f32.vlgmr.msra.gmra.mxu1 %vm2273_vm6, %v17365_v61 }
 0xfcd   :  { %26538 = vmatprep.mubr.msk.f32.mxu0 %vm1624_vm3, %v31415_v44  ;;  %26543 = vmatprep.mubr.msk.f32.mxu1 %vm1624_vm3, %v31416_v4 }
 0xff7   :  { %v29872_v50 = vpop.f32.mrf.mxu0 }
 0xff8   :  { %v29874_v6 = vpop.f32.mrf.mxu1 }
 0xff9   :  { %v16570_v46 = vpop.xlane.xlu1 %16569  ;;  %v26460_v60 = vpop.f32.mrf.mxu0 }
 0xffa   :  { %v18184_v9 = vmul.f32 0.0001, %v16570_v46  ;;  %v26465_v10 = vpop.f32.mrf.mxu1  ;;  %v31419_v60 = vld [vmem:[#allocation58_spill] sm:$0xff] }
 0xffc   :  { %v29877_v59 = vsub.f32 %v31417_v2, %v18184_v9 }
 0xffd   :  { %v16576_v39 = vpop.xlane.xlu1 %16575  ;;  %v29879_v20 = vpop.f32.mrf.mxu0 }
 0xffe   :  { %31418 = vst [vmem:[#allocation57_spill] sm:$0xff] %v29877_v59  ;;  %18802 = vperm.xlu1 %26995, %v29877_v59   ;;  %v29882_v0 = vpop.f32.mrf.mxu1  ;;  %v18186_v40 = vmul.f32 0.0001, %v16576_v39  ;;  %v31421_v59 = vld [vmem:[#allocation59_spill] sm:$0xff] }
 0xfff   :  { %v26470_v11 = vpop.f32.mrf.mxu0 }
0x1000   :  { %v26475_v54 = vpop.f32.mrf.mxu1  ;;  %v29893_v11 = vsub.f32 %v31421_v59, %v18186_v40 }
0x1001   :  { %v16579_v61 = vpop.xlane.xlu1 %16578 }
0x1002   :  { %v18187_v17 = vmul.f32 0.0001, %v16579_v61  ;;  %31422 = vst [vmem:[#allocation59_spill] sm:$0xff] %v29893_v11  ;;  %v31423_v61 = vld [vmem:[#allocation60_spill] sm:$0xff] }
0x1003   :  { %v29884_v13 = vpop.f32.mrf.mxu0 }
0x1004   :  { %v29887_v46 = vsub.f32 %v31419_v60, %v18187_v17  ;;  %v29889_v10 = vpop.f32.mrf.mxu1 }
0x1005   :  { %v16582_v9 = vpop.xlane.xlu1 %16581  ;;  %v16573_v2 = vpop.xlane.xlu0 %16572 }
0x1006   :  { %31420 = vst [vmem:[#allocation58_spill] sm:$0xff] %v29887_v46  ;;  %18817 = vperm.xlu1 %26995, %v29887_v46   ;;  %v26485_v34 = vpop.f32.mrf.mxu1  ;;  %v18185_v36 = vmul.f32 0.0001, %v16573_v2  ;;  %v26480_v27 = vpop.f32.mrf.mxu0  ;;  %v18188_v54 = vmul.f32 0.0001, %v16582_v9  ;;  %v31427_v9 = vld [vmem:[#allocation62_spill] sm:$0xff] }
0x1007   :  { %v31425_v27 = vld [vmem:[#allocation61_spill] sm:$0xff] }
0x1008   :  { %v29896_v4 = vsub.f32 %v31423_v61, %v18185_v36  ;;  %v29905_v46 = vsub.f32 %v31425_v27, %v18188_v54  ;;  %v31434_v27 = vld [vmem:[#allocation28_spill] sm:$0xff] }
0x1009   :  { %v16588_v39 = vpop.xlane.xlu1 %16587  ;;  %v29898_v44 = vpop.f32.mrf.mxu0 }
0x100a   :  { %31424 = vst [vmem:[#allocation60_spill] sm:$0xff] %v29896_v4  ;;  %v29900_v17 = vpop.f32.mrf.mxu1  ;;  %18812 = vperm.xlu1 %26995, %v29893_v11   ;;  %v16585_v60 = vpop.xlane.xlu0 %16584  ;;  %18807 = vperm.xlu0 %26994, %v29896_v4   ;;  %31426 = vst [vmem:[#allocation61_spill] sm:$0xff] %v29905_v46  ;;  %v18190_v40 = vmul.f32 0.0001, %v16588_v39  ;;  %v31429_v11 = vld [vmem:[#allocation63_spill] sm:$0xff]  ;;  %v31431_v4 = vld [vmem:[#allocation64_spill] sm:$0xff] }
0x100b   :  { %v18189_v34 = vmul.f32 0.0001, %v16585_v60  ;;  %v26490_v2 = vpop.f32.mrf.mxu0 }
0x100c   :  { %v26495_v59 = vpop.f32.mrf.mxu1  ;;  %v29913_v55 = vsub.f32 %v31429_v11, %v18190_v40 }
0x100d   :  { %v29908_v36 = vsub.f32 %v31427_v9, %v18189_v34 }
0x100e   :  { %v16591_v61 = vpop.xlane.xlu0 %16590  ;;  %18822 = vperm.xlu0 %26994, %v29905_v46   ;;  %31430 = vst [vmem:[#allocation63_spill] sm:$0xff] %v29913_v55 }
0x100f   :  { %31428 = vst [vmem:[#allocation62_spill] sm:$0xff] %v29908_v36  ;;  %v18191_v7 = vmul.f32 0.0001, %v16591_v61  ;;  %18827 = vperm.xlu1 %26995, %v29908_v36   ;;  %v31437_v61 = vld [vmem:[#allocation32_spill] sm:$0xff] }
0x1011   :  { %v29916_v60 = vsub.f32 %v31431_v4, %v18191_v7  ;;  %v31433_v4 = vld [vmem:[#allocation22_spill] sm:$0xff] }
0x1012   :  { %18832 = vperm.xlu0 %26994, %v29913_v55  }
0x1013   :  { %31432 = vst [vmem:[#allocation64_spill] sm:$0xff] %v29916_v60  ;;  %18837 = vperm.xlu1 %26995, %v29916_v60  }
0x1074   :  { %v16703_v54 = vpop.f32.mrf.mxu0 }
0x1075   :  { %v29922_v39 = vsel %vm16592_vm13, %v16703_v54, 0.0  ;;  %v16810_v34 = vpop.f32.mrf.mxu1  ;;  %26536 = vmatprep.subr.msk.mxu0 %vm16592_vm13, %v16703_v54 }
0x1076   :  { %v29924_v2 = vsel %vm16593_vm14, %v16810_v34, 0.0  ;;  %26541 = vmatprep.subr.msk.mxu1 %vm16593_vm14, %v16810_v34  ;;  %26537 = vmatpush3.msk.msra.mxu0 %vm16592_vm13, %v16703_v54  ;;  %v26500_v11 = vpop.f32.mrf.mxu0 }
0x1077   :  { %v26505_v7 = vpop.f32.mrf.mxu1  ;;  %26542 = vmatpush3.msk.msra.mxu1 %vm16593_vm14, %v16810_v34  ;;  %26539 = vmatmul.mubr.msk.f32.vlgmr.msra.gmra.mxu0 %vm1624_vm3, %v31433_v4  ;;  %v31438_v34 = vld [vmem:[#allocation33_spill] sm:$0xff] }
0x1078   :  { %26544 = vmatmul.mubr.msk.f32.vlgmr.msra.gmra.mxu1 %vm1624_vm3, %v31434_v27  ;;  %26548 = vmatprep.mubr.msk.f32.mxu0 %vm1624_vm3, %v31435_v38  ;;  %v31439_v7 = vld [vmem:[#allocation25_spill] sm:$0xff] }
0x1079   :  { %26553 = vmatprep.mubr.msk.f32.mxu1 %vm1624_vm3, %v31436_v18  ;;  %v31440_v18 = vld [vmem:[#allocation26_spill] sm:$0xff] }
0x107b   :  { %v17024_v40 = vpop.f32.mrf.mxu1 }
0x107c   :  { %v29935_v59 = vsel %vm16595_vm15, %v17024_v40, 0.0  ;;  %26551 = vmatprep.subr.msk.mxu1 %vm16595_vm15, %v17024_v40 }
0x107d   :  { %26552 = vmatpush3.msk.msra.mxu1 %vm16595_vm15, %v17024_v40  ;;  %v26515_v9 = vpop.f32.mrf.mxu1 }
0x107e   :  { %26554 = vmatmul.mubr.msk.f32.vlgmr.msra.gmra.mxu1 %vm1624_vm3, %v31437_v61 }
0x107f   :  { %v16917_v54 = vpop.f32.mrf.mxu0  ;;  %26563 = vmatprep.mubr.msk.f32.mxu1 %vm1624_vm3, %v31438_v34  ;;  %v31441_v34 = vld [vmem:[#allocation34_spill] sm:$0xff] }
0x1080   :  { %v29942_v11 = vsel %vm16594_vm7, %v16917_v54, 0.0  ;;  %26546 = vmatprep.subr.msk.mxu0 %vm16594_vm7, %v16917_v54 }
0x1081   :  { %26547 = vmatpush3.msk.msra.mxu0 %vm16594_vm7, %v16917_v54  ;;  %v26510_v8 = vpop.f32.mrf.mxu0 }
0x1082   :  { %26549 = vmatmul.mubr.msk.f32.vlgmr.msra.gmra.mxu0 %vm1624_vm3, %v31439_v7  ;;  %v31442_v8 = vld [vmem:[#allocation35_spill] sm:$0xff] }
0x1083   :  { %26558 = vmatprep.mubr.msk.f32.mxu0 %vm1624_vm3, %v31440_v18 }
0x1084   :  { %v17238_v40 = vpop.f32.mrf.mxu1 }
0x1085   :  { %v29949_v9 = vsel %vm16597_vm8, %v17238_v40, 0.0  ;;  %26561 = vmatprep.subr.msk.mxu1 %vm16597_vm8, %v17238_v40 }
0x1086   :  { %26562 = vmatpush3.msk.msra.mxu1 %vm16597_vm8, %v17238_v40  ;;  %v26525_v21 = vpop.f32.mrf.mxu1 }
0x1087   :  { %26564 = vmatmul.mubr.msk.f32.vlgmr.msra.gmra.mxu1 %vm1624_vm3, %v31441_v34  ;;  %v31444_v34 = vld [vmem:[#allocation29_spill] sm:$0xff] }
0x1088   :  { %v17131_v54 = vpop.f32.mrf.mxu0  ;;  %26573 = vmatprep.mubr.msk.f32.mxu1 %vm1624_vm3, %v31442_v8 }
0x1089   :  { %v29956_v7 = vsel %vm16596_vm9, %v17131_v54, 0.0  ;;  %26556 = vmatprep.subr.msk.mxu0 %vm16596_vm9, %v17131_v54 }
0x108a   :  { %v26520_v18 = vpop.f32.mrf.mxu0  ;;  %26557 = vmatpush3.msk.msra.mxu0 %vm16596_vm9, %v17131_v54  ;;  %v31445_v54 = vld [vmem:[#allocation31_spill] sm:$0xff] }
0x108b   :  { %26559 = vmatmul.mubr.msk.f32.vlgmr.msra.gmra.mxu0 %vm1624_vm3, %v31443_v16 }
0x108c   :  { %v17345_v40 = vpop.f32.mrf.mxu0  ;;  %v17452_v21 = vpop.f32.mrf.mxu1  ;;  %26568 = vmatprep.mubr.msk.f32.mxu0 %vm1624_vm3, %v31444_v34 }
0x108d   :  { %v29964_v57 = vsel %vm16598_vm10, %v17345_v40, 0.0  ;;  %v29966_v8 = vsel %vm16599_vm11, %v17452_v21, 0.0  ;;  %26571 = vmatprep.subr.msk.mxu1 %vm16599_vm11, %v17452_v21  ;;  %26566 = vmatprep.subr.msk.mxu0 %vm16598_vm10, %v17345_v40 }
0x108e   :  { %26567 = vmatpush3.msk.msra.mxu0 %vm16598_vm10, %v17345_v40  ;;  %26572 = vmatpush3.msk.msra.mxu1 %vm16599_vm11, %v17452_v21  ;;  %v26530_v18 = vpop.f32.mrf.mxu0  ;;  %v26535_v22 = vpop.f32.mrf.mxu1 }
0x108f   :  { %26569 = vmatmul.mubr.msk.f32.vlgmr.msra.gmra.mxu0 %vm1624_vm3, %v31445_v54  ;;  %26574 = vmatmul.mubr.msk.f32.vlgmr.msra.gmra.mxu1 %vm1624_vm3, %v31446_v42 }
0x1090   :  { %26576 = vmatprep.subr.mxu0 %v31272_v33  ;;  %26583 = vmatprep.subr.mxu1 %v31272_v33 }
0x1091   :  { %26580 = vmatprep.mubr.msk.f32.mxu0 %vm27182_vm1, %v31272_v33  ;;  %26587 = vmatprep.mubr.msk.f32.mxu1 %vm27182_vm1, %v31272_v33 }
0x1137   :  { %v26540_v40 = vpop.f32.mrf.mxu0 }
0x1138   :  { %v18121_v21 = vmul.f32 0.0001, %v26540_v40  ;;  %v26545_v18 = vpop.f32.mrf.mxu1 }
0x1139   :  { %v18123_v34 = vmul.f32 0.0001, %v26545_v18  ;;  %v17530_v16 = vpop.f32.mrf.mxu0 }
0x113a   :  { %v29979_v54 = vsub.f32 %v29260_v48, %v18121_v21  ;;  %v18120_v42 = vmul.f32 0.0001, %v17530_v16  ;;  %v17605_v22 = vpop.f32.mrf.mxu1  ;;  %v27070_v16 = vld [vmem:[#allocation2 + $0x8] sm:$0xff] }
0x113b   :  { %v29982_v61 = vsub.f32 %v29263_v25, %v18123_v34  ;;  %v18122_v38 = vmul.f32 0.0001, %v17605_v22  ;;  %v27069_v34 = vld [vmem:[#allocation2] sm:$0xff] }
0x113c   :  { %v29985_v27 = vsub.f32 %v29266_v28, %v18120_v42  ;;  %26577 = vmatpush3.msra.mxu0 %v29979_v54 }
0x113d   :  { %v29989_v4 = vsub.f32 %v29270_v58, %v18122_v38  ;;  %26584 = vmatpush3.msra.mxu1 %v29982_v61  ;;  %26578 = vmatprep.subr.mxu0 %v31272_v33 }
0x113e   :  { %v26555_v48 = vpop.f32.mrf.mxu1  ;;  %26585 = vmatprep.subr.mxu1 %v31272_v33  ;;  %26579 = vmatpush3.msra.mxu0 %v29985_v27 }
0x113f   :  { %31447 = vst [vmem:[#allocation95_spill] sm:$0xff] %v29989_v4  ;;  %v18127_v25 = vmul.f32 0.0001, %v26555_v48  ;;  %26586 = vmatpush3.msra.mxu1 %v29989_v4  ;;  %26581 = vmatmul.mubr.msk.f32.vlgmr.msra.gmra.mxu0 %vm98_vm0, %v27069_v34  ;;  %v27071_v48 = vld [vmem:[#allocation2 + $0x18] sm:$0xff] }
0x1140   :  { %v17755_v28 = vpop.f32.mrf.mxu1  ;;  %26588 = vmatmul.mubr.msk.f32.vlgmr.msra.gmra.mxu1 %vm98_vm0, %v27070_v16  ;;  %26597 = vmatprep.subr.mxu1 %v31272_v33 }
0x1141   :  { %v30000_v58 = vsub.f32 %v29281_v14, %v18127_v25  ;;  %v18126_v38 = vmul.f32 0.0001, %v17755_v28  ;;  %26601 = vmatprep.mubr.msk.f32.mxu1 %vm27182_vm1, %v31272_v33  ;;  %26590 = vmatprep.subr.mxu0 %v31272_v33 }
0x1142   :  { %v26550_v42 = vpop.f32.mrf.mxu0  ;;  %26594 = vmatprep.mubr.msk.f32.mxu0 %vm27182_vm1, %v31272_v33 }
0x1143   :  { %31448 = vst [vmem:[#allocation96_spill] sm:$0xff] %v30000_v58  ;;  %v30008_v40 = vsub.f32 %v29289_v19, %v18126_v38  ;;  %v18125_v21 = vmul.f32 0.0001, %v26550_v42  ;;  %26598 = vmatpush3.msra.mxu1 %v30000_v58  ;;  %v27072_v38 = vld [vmem:[#allocation2 + $0x10] sm:$0xff] }
0x1144   :  { %v17680_v18 = vpop.f32.mrf.mxu0  ;;  %26599 = vmatprep.subr.mxu1 %v31272_v33 }
0x1145   :  { %31449 = vst [vmem:[#allocation97_spill] sm:$0xff] %v30008_v40  ;;  %v30013_v14 = vsub.f32 %v29294_v43, %v18125_v21  ;;  %v18124_v22 = vmul.f32 0.0001, %v17680_v18  ;;  %26600 = vmatpush3.msra.mxu1 %v30008_v40 }
0x1146   :  { %26602 = vmatmul.mubr.msk.f32.vlgmr.msra.gmra.mxu1 %vm98_vm0, %v27071_v48  ;;  %26611 = vmatprep.subr.mxu1 %v31272_v33 }
0x1147   :  { %31450 = vst [vmem:[#allocation98_spill] sm:$0xff] %v30013_v14  ;;  %v30019_v19 = vsub.f32 %v29300_v15, %v18124_v22  ;;  %v26565_v25 = vpop.f32.mrf.mxu1  ;;  %26591 = vmatpush3.msra.mxu0 %v30013_v14  ;;  %26615 = vmatprep.mubr.msk.f32.mxu1 %vm27182_vm1, %v31272_v33 }
0x1148   :  { %v18131_v34 = vmul.f32 0.0001, %v26565_v25  ;;  %26592 = vmatprep.subr.mxu0 %v31272_v33 }
0x1149   :  { %31451 = vst [vmem:[#allocation99_spill] sm:$0xff] %v30019_v19  ;;  %v17905_v43 = vpop.f32.mrf.mxu1  ;;  %26593 = vmatpush3.msra.mxu0 %v30019_v19 }
0x114a   :  { %v30027_v28 = vsub.f32 %v29308_v52, %v18131_v34  ;;  %v18130_v16 = vmul.f32 0.0001, %v17905_v43  ;;  %26595 = vmatmul.mubr.msk.f32.vlgmr.msra.gmra.mxu0 %vm98_vm0, %v27072_v38  ;;  %26604 = vmatprep.subr.mxu0 %v31272_v33  ;;  %v27073_v34 = vld [vmem:[#allocation2 + $0x28] sm:$0xff] }
0x114b   :  { %v26560_v15 = vpop.f32.mrf.mxu0  ;;  %26608 = vmatprep.mubr.msk.f32.mxu0 %vm27182_vm1, %v31272_v33 }
0x114c   :  { %31452 = vst [vmem:[#allocation100_spill] sm:$0xff] %v30027_v28  ;;  %v30034_v42 = vsub.f32 %v29315_v49, %v18130_v16  ;;  %v18129_v21 = vmul.f32 0.0001, %v26560_v15  ;;  %26612 = vmatpush3.msra.mxu1 %v30027_v28 }
0x114d   :  { %v17830_v18 = vpop.f32.mrf.mxu0  ;;  %26613 = vmatprep.subr.mxu1 %v31272_v33 }
0x114e   :  { %31453 = vst [vmem:[#allocation101_spill] sm:$0xff] %v30034_v42  ;;  %v30039_v52 = vsub.f32 %v29320_v12, %v18129_v21  ;;  %v18128_v22 = vmul.f32 0.0001, %v17830_v18  ;;  %26614 = vmatpush3.msra.mxu1 %v30034_v42 }
0x114f   :  { %v26570_v48 = vpop.f32.mrf.mxu0  ;;  %v26575_v25 = vpop.f32.mrf.mxu1  ;;  %26616 = vmatmul.mubr.msk.f32.vlgmr.msra.gmra.mxu1 %vm98_vm0, %v27073_v34  ;;  %26625 = vmatprep.subr.mxu1 %v31272_v33 }
0x1150   :  { %31454 = vst [vmem:[#allocation102_spill] sm:$0xff] %v30039_v52  ;;  %v30045_v49 = vsub.f32 %v29326_v62, %v18128_v22  ;;  %v18133_v43 = vmul.f32 0.0001, %v26570_v48  ;;  %v18135_v16 = vmul.f32 0.0001, %v26575_v25  ;;  %26605 = vmatpush3.msra.mxu0 %v30039_v52  ;;  %26629 = vmatprep.mubr.msk.f32.mxu1 %vm27182_vm1, %v31272_v33  ;;  %v27074_v22 = vld [vmem:[#allocation2 + $0x20] sm:$0xff] }
0x1151   :  { %v17980_v12 = vpop.f32.mrf.mxu0  ;;  %v18055_v38 = vpop.f32.mrf.mxu1  ;;  %26606 = vmatprep.subr.mxu0 %v31272_v33 }
0x1152   :  { %31455 = vst [vmem:[#allocation103_spill] sm:$0xff] %v30045_v49  ;;  %v30052_v15 = vsub.f32 %v31389_v37, %v18133_v43  ;;  %v30055_v21 = vsub.f32 %v31390_v24, %v18135_v16  ;;  %v18132_v18 = vmul.f32 0.0001, %v17980_v12  ;;  %v18134_v62 = vmul.f32 0.0001, %v18055_v38  ;;  %26607 = vmatpush3.msra.mxu0 %v30045_v49  ;;  %v27075_v37 = vld [vmem:[#allocation2 + $0x30] sm:$0xff] }
0x1153   :  { %26609 = vmatmul.mubr.msk.f32.vlgmr.msra.gmra.mxu0 %vm98_vm0, %v27074_v22  ;;  %26618 = vmatprep.subr.mxu0 %v31272_v33  ;;  %v27076_v24 = vld [vmem:[#allocation2 + $0x38] sm:$0xff]  ;;  %v18085_v12 = vsel %vm370_vm2, %v29935_v59, 0.0  ;;  %v18078_v22 = vsel %vm370_vm2, %v29942_v11, 0.0  ;;  %v18092_v59 = vsel %vm370_vm2, %v29956_v7, 0.0 }
0x1154   :  { %31456 = vst [vmem:[#allocation104_spill] sm:$0xff] %v30052_v15  ;;  %31457 = vst [vmem:[#allocation105_spill] sm:$0xff] %v30055_v21  ;;  %v30061_v48 = vsub.f32 %v31391_v63, %v18132_v18  ;;  %v30064_v25 = vsub.f32 %v31392_v45, %v18134_v62  ;;  %26619 = vmatpush3.msra.mxu0 %v30052_v15  ;;  %26626 = vmatpush3.msra.mxu1 %v30055_v21  ;;  %v18064_v63 = vsel %vm370_vm2, %v29922_v39, 0.0 }
0x1155   :  { %26620 = vmatprep.subr.mxu0 %v31272_v33  ;;  %26627 = vmatprep.subr.mxu1 %v31272_v33  ;;  %v18071_v45 = vsel %vm370_vm2, %v29924_v2, 0.0  ;;  %v18065_v34 = vrot.slane %v18064_v63, 4  ;;  %v18086_v18 = vrot.slane %v18085_v12, 4  ;;  %v18079_v55 = vrot.slane %v18078_v22, 4 }
0x1156   :  { %31458 = vst [vmem:[#allocation106_spill] sm:$0xff] %v30061_v48  ;;  %31459 = vst [vmem:[#allocation107_spill] sm:$0xff] %v30064_v25  ;;  %26621 = vmatpush3.msra.mxu0 %v30061_v48  ;;  %26622 = vmatprep.mubr.msk.f32.mxu0 %vm27182_vm1, %v31272_v33  ;;  %v18072_v43 = vrot.slane %v18071_v45, 4  ;;  %v18099_v2 = vsel %vm370_vm2, %v29949_v9, 0.0  ;;  %v18093_v11 = vrot.slane %v18092_v59, 4  ;;  %v18113_v9 = vsel %vm370_vm2, %v29966_v8, 0.0 }
0x1157   :  { %26628 = vmatpush3.msra.mxu1 %v30064_v25  ;;  %26623 = vmatmul.mubr.msk.f32.vlgmr.msra.gmra.mxu0 %vm98_vm0, %v27075_v37  ;;  %v18066_v16 = vadd.f32 %v18065_v34, %v18064_v63  ;;  %v18080_v36 = vadd.f32 %v18079_v55, %v18078_v22  ;;  %v18100_v63 = vrot.slane %v18099_v2, 4  ;;  %v18114_v7 = vrot.slane %v18113_v9, 4 }
0x1158   :  { %26630 = vmatmul.mubr.msk.f32.vlgmr.msra.gmra.mxu1 %vm98_vm0, %v27076_v24  ;;  %26632 = vmatprep.subr.mxu0 %v31272_v33  ;;  %v18073_v38 = vadd.f32 %v18072_v43, %v18071_v45  ;;  %v18087_v24 = vadd.f32 %v18086_v18, %v18085_v12 }
0x1159   :  { %26637 = vmatprep.subr.mxu1 %v31272_v33  ;;  %26634 = vmatprep.mubr.msk.f32.mxu0 %vm27182_vm1, %v31272_v33  ;;  %v18067_v62 = vrot.slane %v18066_v16, 2  ;;  %v18081_v25 = vrot.slane %v18080_v36, 2  ;;  %v18101_v48 = vadd.f32 %v18100_v63, %v18099_v2 }
0x115a   :  { %26639 = vmatprep.mubr.msk.f32.mxu1 %vm27182_vm1, %v31272_v33  ;;  %v18074_v37 = vrot.slane %v18073_v38, 2  ;;  %v18088_v46 = vrot.slane %v18087_v24, 2 }
0x115b   :  { %v18068_v60 = vadd.f32 %v18067_v62, %v18066_v16  ;;  %v18106_v16 = vsel %vm370_vm2, %v29964_v57, 0.0  ;;  %v18102_v18 = vrot.slane %v18101_v48, 2  ;;  %v18094_v62 = vadd.f32 %v18093_v11, %v18092_v59 }
0x115c   :  { %v18075_v39 = vadd.f32 %v18074_v37, %v18073_v38  ;;  %v18089_v43 = vadd.f32 %v18088_v46, %v18087_v24  ;;  %v18082_v38 = vadd.f32 %v18081_v25, %v18080_v36  ;;  %v18107_v22 = vrot.slane %v18106_v16, 4 }
0x115d   :  { %v18069_v34 = vrot.slane %v18068_v60, 1  ;;  %v18103_v2 = vadd.f32 %v18102_v18, %v18101_v48  ;;  %v18095_v63 = vrot.slane %v18094_v62, 2  ;;  %v18115_v57 = vadd.f32 %v18114_v7, %v18113_v9 }
0x115e   :  { %v18076_v45 = vrot.slane %v18075_v39, 1  ;;  %v18090_v55 = vrot.slane %v18089_v43, 1  ;;  %v18083_v24 = vrot.slane %v18082_v38, 1 }
0x115f   :  { %v18070_v21 = vadd.f32 %v18069_v34, %v18068_v60  ;;  %v18108_v60 = vadd.f32 %v18107_v22, %v18106_v16  ;;  %v18096_v25 = vadd.f32 %v18095_v63, %v18094_v62  ;;  %v18169_v16 = vmul.f32 0.0001, %v29874_v6 }
0x1160   :  { %v18077_v12 = vadd.f32 %v18076_v45, %v18075_v39  ;;  %v18091_v46 = vadd.f32 %v18090_v55, %v18089_v43  ;;  %v18084_v8 = vadd.f32 %v18083_v24, %v18082_v38  ;;  %v18104_v45 = vrot.slane %v18103_v2, 1 }
0x1161   :  { %v18152_v37 = vmul.f32 0.0001, %v18070_v21  ;;  %v18109_v59 = vrot.slane %v18108_v60, 2  ;;  %v18116_v43 = vrot.slane %v18115_v57, 2  ;;  %v18097_v7 = vrot.slane %v18096_v25, 1 }
0x1162   :  { %v18153_v15 = vmul.f32 0.0001, %v18077_v12  ;;  %v18155_v36 = vmul.f32 0.0001, %v18091_v46  ;;  %v18154_v55 = vmul.f32 0.0001, %v18084_v8 }
0x1163   :  { %v30099_v34 = vsub.f32 %v29380_v51, %v18152_v37  ;;  %v18168_v51 = vmul.f32 0.0001, %v29872_v50  ;;  %v18110_v18 = vadd.f32 %v18109_v59, %v18108_v60  ;;  %v18105_v37 = vadd.f32 %v18104_v45, %v18103_v2 }
0x1164   :  { %v30102_v39 = vsub.f32 %v29383_v32, %v18153_v15  ;;  %v30117_v9 = vsub.f32 %v29398_v30, %v18155_v36  ;;  %v18117_v46 = vadd.f32 %v18116_v43, %v18115_v57  ;;  %v30129_v30 = vsub.f32 %v29410_v53, %v18154_v55 }
0x1165   :  { %31460 = vst [vmem:[#allocation108_spill] sm:$0xff] %v30099_v34  ;;  %v30106_v21 = vrot.slane %v30099_v34, %v27336_v23  ;;  %v30121_v50 = vsub.f32 %v29402_v56, %v18168_v51  ;;  %v30133_v2 = vsub.f32 %v29414_v31, %v18169_v16  ;;  %v18157_v60 = vmul.f32 0.0001, %v18105_v37 }
0x1166   :  { %31461 = vst [vmem:[#allocation109_spill] sm:$0xff] %v30102_v39  ;;  %v30110_v11 = vrot.slane %v30102_v39, %v27336_v23  ;;  %31462 = vst [vmem:[#allocation110_spill] sm:$0xff] %v30117_v9  ;;  %v30125_v6 = vrot.slane %v30117_v9, %v27336_v23  ;;  %v18098_v56 = vadd.f32 %v18097_v7, %v18096_v25  ;;  %v18111_v57 = vrot.slane %v18110_v18, 1 }
0x1167   :  { %31463 = vst [vmem:[#allocation111_spill] sm:$0xff] %v30121_v50  ;;  %31464 = vst [vmem:[#allocation112_spill] sm:$0xff] %v30129_v30  ;;  %v18118_v8 = vrot.slane %v18117_v46, 1  ;;  %v18171_v53 = vmul.f32 0.0001, %v29882_v0  ;;  %v30146_v25 = vrot.slane %v30129_v30, %v27336_v23  ;;  %v30151_v43 = vsub.f32 %v29432_v47, %v18157_v60 }
0x1168   :  { %31465 = vst [vmem:[#allocation113_spill] sm:$0xff] %v30133_v2  ;;  %v18156_v0 = vmul.f32 0.0001, %v18098_v56  ;;  %v18170_v16 = vmul.f32 0.0001, %v29879_v20 }
0x1169   :  { %31466 = vst [vmem:[#allocation114_spill] sm:$0xff] %v30151_v43  ;;  %v30162_v47 = vrot.slane %v30151_v43, %v27336_v23  ;;  %v18173_v37 = vmul.f32 0.0001, %v29889_v10  ;;  %v18172_v56 = vmul.f32 0.0001, %v29884_v13 }
0x116a   :  { %v30167_v55 = vsub.f32 %v29448_v35, %v18156_v0  ;;  %v30173_v20 = vsub.f32 %v29454_v5, %v18170_v16  ;;  %v18175_v0 = vmul.f32 0.0001, %v29900_v17  ;;  %v31474_v16 = vld [vmem:[#allocation37_spill] sm:$0xff] }
0x116b   :  { %v30195_v60 = vsub.f32 %v29476_v26, %v18173_v37  ;;  %v30214_v13 = vsub.f32 %v29495_v1, %v18172_v56  ;;  %v31472_v1 = vld [vmem:[#allocation38_spill] sm:$0xff]  ;;  %v31476_v37 = vld [vmem:[#allocation104_spill] sm:$0xff] }
0x116c   :  { %31467 = vst [vmem:[#allocation115_spill] sm:$0xff] %v30167_v55  ;;  %v30231_v17 = vsub.f32 %v31474_v16, %v18175_v0  ;;  %v27084_v56 = vld [vmem:[%s31083_s0 + $0x38] sm:$0xff] }
0x116d   :  { %31470 = vst [vmem:[#allocation118_spill] sm:$0xff] %v30195_v60  ;;  %31471 = vst [vmem:[#allocation119_spill] sm:$0xff] %v30214_v13 }
0x116e   :  { %31475 = vst [vmem:[#allocation37_spill] sm:$0xff] %v30231_v17 }
0x11ff   :  { %v18298_v48 = vpop.f32.mrf.mxu0 }
0x1200   :  { %v18299_v32 = vadd.f32 %v18298_v48, %v30106_v21  ;;  %v18368_v15 = vpop.f32.mrf.mxu1  ;;  %v18112_v48 = vadd.f32 %v18111_v57, %v18110_v18 }
0x1201   :  { %v18369_v12 = vadd.f32 %v18368_v15, %v30110_v11  ;;  %v26582_v38 = vpop.f32.mrf.mxu0  ;;  %v30156_v15 = vsub.f32 %v29437_v41, %v18171_v53 }
0x1202   :  { %v18792_v62 = vmax.f32 %v18299_v32, 0.0  ;;  %v26589_v22 = vpop.f32.mrf.mxu1  ;;  %v18119_v32 = vadd.f32 %v18118_v8, %v18117_v46  ;;  %v18158_v18 = vmul.f32 0.0001, %v18112_v48  ;;  %v30180_v46 = vrot.slane %v30167_v55, %v27336_v23 }
0x1203   :  { %v18793_v24 = vmax.f32 %v18369_v12, 0.0 }
0x1204   :  { %26633 = vmatpush3.xpose.msk.msra.mxu0 %vm370_vm2, %v18792_v62  ;;  %v18159_v41 = vmul.f32 0.0001, %v18119_v32 }
0x1205   :  { %26638 = vmatpush3.xpose.msk.msra.mxu1 %vm370_vm2, %v18793_v24  ;;  %26642 = vmatprep.subr.mxu0 %v31272_v33  ;;  %v30185_v24 = vsub.f32 %v29466_v29, %v18158_v18  ;;  %v27079_v18 = vld [vmem:[%s31083_s0 + $0x10] sm:$0xff] }
0x1206   :  { %v18508_v63 = vpop.f32.mrf.mxu1  ;;  %26647 = vmatprep.subr.mxu1 %v31272_v33 }
0x1207   :  { %v18509_v36 = vadd.f32 %v18508_v63, %v30125_v6  ;;  %26635 = vmatmul.mubr.msk.f32.vlgmr.msra.gmra.mxu0 %vm370_vm2, %v30121_v50  ;;  %31468 = vst [vmem:[#allocation116_spill] sm:$0xff] %v30185_v24  ;;  %v30188_v63 = vsub.f32 %v29469_v3, %v18159_v41  ;;  %v30201_v3 = vrot.slane %v30185_v24, %v27336_v23  ;;  %v27081_v41 = vld [vmem:[%s31083_s0 + $0x20] sm:$0xff] }
0x1208   :  { %26640 = vmatmul.mubr.msk.f32.vlgmr.msra.gmra.mxu1 %vm370_vm2, %v30133_v2  ;;  %v26603_v59 = vpop.f32.mrf.mxu1  ;;  %26644 = vmatprep.mubr.msk.f32.mxu0 %vm27182_vm1, %v31272_v33 }
0x1209   :  { %v18795_v31 = vmax.f32 %v18509_v36, 0.0  ;;  %26649 = vmatprep.mubr.msk.f32.mxu1 %vm27182_vm1, %v31272_v33  ;;  %31469 = vst [vmem:[#allocation117_spill] sm:$0xff] %v30188_v63  ;;  %v30205_v8 = vrot.slane %v30188_v63, %v27336_v23  ;;  %v18174_v59 = vmul.f32 0.0001, %v29898_v44 }
0x120a   :  { %v18438_v45 = vpop.f32.mrf.mxu0 }
0x120b   :  { %v18439_v51 = vadd.f32 %v18438_v45, %v30146_v25  ;;  %26648 = vmatpush3.xpose.msk.msra.mxu1 %vm370_vm2, %v18795_v31  ;;  %v30226_v44 = vsub.f32 %v31472_v1, %v18174_v59 }
0x120c   :  { %v26596_v12 = vpop.f32.mrf.mxu0  ;;  %26657 = vmatprep.subr.mxu1 %v31272_v33 }
0x120d   :  { %v18794_v38 = vmax.f32 %v18439_v51, 0.0  ;;  %31473 = vst [vmem:[#allocation38_spill] sm:$0xff] %v30226_v44  ;;  %v27077_v12 = vld [vmem:[%s31083_s0] sm:$0xff] }
0x120e   :  { %26650 = vmatmul.mubr.msk.f32.vlgmr.msra.gmra.mxu1 %vm370_vm2, %v30156_v15 }
0x120f   :  { %v18648_v62 = vpop.f32.mrf.mxu1  ;;  %26643 = vmatpush3.xpose.msk.msra.mxu0 %vm370_vm2, %v18794_v38  ;;  %26659 = vmatprep.mubr.msk.f32.mxu1 %vm27182_vm1, %v31272_v33  ;;  %v27078_v38 = vld [vmem:[%s31083_s0 + $0x8] sm:$0xff] }
0x1210   :  { %v18649_v22 = vadd.f32 %v18648_v62, %v30162_v47  ;;  %26652 = vmatprep.subr.mxu0 %v31272_v33  ;;  %v27080_v62 = vld [vmem:[%s31083_s0 + $0x18] sm:$0xff] }
0x1211   :  { %v26617_v7 = vpop.f32.mrf.mxu1 }
0x1212   :  { %v18797_v35 = vmax.f32 %v18649_v22, 0.0  ;;  %26645 = vmatmul.mubr.msk.f32.vlgmr.msra.gmra.mxu0 %vm370_vm2, %v30173_v20  ;;  %v27082_v22 = vld [vmem:[%s31083_s0 + $0x28] sm:$0xff]  ;;  %v31477_v7 = vld [vmem:[#allocation105_spill] sm:$0xff] }
0x1213   :  { %v18578_v5 = vpop.f32.mrf.mxu0  ;;  %26654 = vmatprep.mubr.msk.f32.mxu0 %vm27182_vm1, %v31272_v33 }
0x1214   :  { %v18579_v10 = vadd.f32 %v18578_v5, %v30180_v46  ;;  %26658 = vmatpush3.xpose.msk.msra.mxu1 %vm370_vm2, %v18797_v35  ;;  %v31478_v35 = vld [vmem:[#allocation106_spill] sm:$0xff]  ;;  %v31479_v5 = vld [vmem:[#allocation107_spill] sm:$0xff] }
0x1215   :  { %v26610_v57 = vpop.f32.mrf.mxu0  ;;  %26667 = vmatprep.subr.mxu1 %v31272_v33 }
0x1216   :  { %v18796_v29 = vmax.f32 %v18579_v10, 0.0  ;;  %v27083_v10 = vld [vmem:[%s31083_s0 + $0x30] sm:$0xff] }
0x1217   :  { %v18718_v36 = vpop.f32.mrf.mxu0  ;;  %26660 = vmatmul.mubr.msk.f32.vlgmr.msra.gmra.mxu1 %vm370_vm2, %v30195_v60 }
0x1218   :  { %v18719_v26 = vadd.f32 %v18718_v36, %v30201_v3  ;;  %v18788_v53 = vpop.f32.mrf.mxu1  ;;  %26653 = vmatpush3.xpose.msk.msra.mxu0 %vm370_vm2, %v18796_v29  ;;  %26669 = vmatprep.mubr.msk.f32.mxu1 %vm27182_vm1, %v31272_v33 }
0x1219   :  { %v18789_v31 = vadd.f32 %v18788_v53, %v30205_v8  ;;  %26662 = vmatprep.subr.mxu0 %v31272_v33  ;;  %v26624_v45 = vpop.f32.mrf.mxu0 }
0x121a   :  { %v18798_v48 = vmax.f32 %v18719_v26, 0.0  ;;  %v26631_v51 = vpop.f32.mrf.mxu1 }
0x121b   :  { %v18799_v32 = vmax.f32 %v18789_v31, 0.0  ;;  %26655 = vmatmul.mubr.msk.f32.vlgmr.msra.gmra.mxu0 %vm370_vm2, %v30214_v13 }
0x121c   :  { %26663 = vmatpush3.xpose.msk.msra.mxu0 %vm370_vm2, %v18798_v48  ;;  %26664 = vmatprep.mubr.msk.f32.mxu0 %vm27182_vm1, %v31272_v33 }
0x121d   :  { %26668 = vmatpush3.xpose.msk.msra.mxu1 %vm370_vm2, %v18799_v32  ;;  %26672 = vmatprep.subr.mxu0 %v31272_v33 }
0x121e   :  { %26679 = vmatprep.subr.mxu1 %v31272_v33 }
0x121f   :  { %26665 = vmatmul.mubr.msk.f32.vlgmr.msra.gmra.mxu0 %vm370_vm2, %v30226_v44 }
0x1220   :  { %26670 = vmatmul.mubr.msk.f32.vlgmr.msra.gmra.mxu1 %vm370_vm2, %v30231_v17  ;;  %26673 = vmatpush3.msra.mxu0 %v29979_v54 }
0x1221   :  { %26680 = vmatpush3.msra.mxu1 %v29982_v61  ;;  %26674 = vmatprep.subr.mxu0 %v31272_v33 }
0x1222   :  { %26681 = vmatprep.subr.mxu1 %v31272_v33  ;;  %26675 = vmatpush3.msra.mxu0 %v29985_v27 }
0x1223   :  { %26676 = vmatprep.mubr.msk.f32.mxu0 %vm27182_vm1, %v31272_v33  ;;  %26682 = vmatpush3.msra.mxu1 %v29989_v4  ;;  %v31500_v4 = vld [vmem:[#allocation44_spill] sm:$0xff] }
0x1224   :  { %26683 = vmatprep.mubr.msk.f32.mxu1 %vm27182_vm1, %v31272_v33  ;;  %26677 = vmatmul.mubr.msk.f32.vlgmr.msra.gmra.mxu0 %vm98_vm0, %v27077_v12 }
0x1225   :  { %26684 = vmatmul.mubr.msk.f32.vlgmr.msra.gmra.mxu1 %vm98_vm0, %v27078_v38  ;;  %26686 = vmatprep.subr.mxu0 %v31272_v33 }
0x1226   :  { %26693 = vmatprep.subr.mxu1 %v31272_v33  ;;  %26687 = vmatpush3.msra.mxu0 %v30013_v14 }
0x1227   :  { %26694 = vmatpush3.msra.mxu1 %v30000_v58  ;;  %26688 = vmatprep.subr.mxu0 %v31272_v33  ;;  %v31499_v58 = vld [vmem:[#allocation52_spill] sm:$0xff] }
0x1228   :  { %26695 = vmatprep.subr.mxu1 %v31272_v33  ;;  %26689 = vmatpush3.msra.mxu0 %v30019_v19 }
0x1229   :  { %26690 = vmatprep.mubr.msk.f32.mxu0 %vm27182_vm1, %v31272_v33  ;;  %26696 = vmatpush3.msra.mxu1 %v30008_v40 }
0x122a   :  { %26697 = vmatprep.mubr.msk.f32.mxu1 %vm27182_vm1, %v31272_v33  ;;  %26691 = vmatmul.mubr.msk.f32.vlgmr.msra.gmra.mxu0 %vm98_vm0, %v27079_v18 }
0x122b   :  { %26698 = vmatmul.mubr.msk.f32.vlgmr.msra.gmra.mxu1 %vm98_vm0, %v27080_v62  ;;  %26700 = vmatprep.subr.mxu0 %v31272_v33 }
0x122c   :  { %26707 = vmatprep.subr.mxu1 %v31272_v33  ;;  %26701 = vmatpush3.msra.mxu0 %v30039_v52 }
0x122d   :  { %26708 = vmatpush3.msra.mxu1 %v30027_v28  ;;  %26702 = vmatprep.subr.mxu0 %v31272_v33 }
0x122e   :  { %26709 = vmatprep.subr.mxu1 %v31272_v33  ;;  %26703 = vmatpush3.msra.mxu0 %v30045_v49  ;;  %v30579_v49 = vld [vmem:[#allocation5 + $0x3] sm:$0x1] }
0x122f   :  { %26704 = vmatprep.mubr.msk.f32.mxu0 %vm27182_vm1, %v31272_v33  ;;  %26710 = vmatpush3.msra.mxu1 %v30034_v42 }
0x1230   :  { %26711 = vmatprep.mubr.msk.f32.mxu1 %vm27182_vm1, %v31272_v33  ;;  %26705 = vmatmul.mubr.msk.f32.vlgmr.msra.gmra.mxu0 %vm98_vm0, %v27081_v41 }
0x1231   :  { %26712 = vmatmul.mubr.msk.f32.vlgmr.msra.gmra.mxu1 %vm98_vm0, %v27082_v22  ;;  %26714 = vmatprep.subr.mxu0 %v31272_v33 }
0x1232   :  { %26721 = vmatprep.subr.mxu1 %v31272_v33  ;;  %26715 = vmatpush3.msra.mxu0 %v31476_v37 }
0x1233   :  { %26722 = vmatpush3.msra.mxu1 %v31477_v7  ;;  %26716 = vmatprep.subr.mxu0 %v31272_v33  ;;  %v31490_v7 = vld [vmem:[#allocation17_spill] sm:$0xff] }
0x1234   :  { %26723 = vmatprep.subr.mxu1 %v31272_v33  ;;  %26717 = vmatpush3.msra.mxu0 %v31478_v35  ;;  %v30561_v35 = vld [vmem:[#allocation5 + $0x2] sm:$0x1] }
0x1235   :  { %26718 = vmatprep.mubr.msk.f32.mxu0 %vm27182_vm1, %v31272_v33  ;;  %26724 = vmatpush3.msra.mxu1 %v31479_v5 }
0x1236   :  { %26725 = vmatprep.mubr.msk.f32.mxu1 %vm27182_vm1, %v31272_v33  ;;  %26719 = vmatmul.mubr.msk.f32.vlgmr.msra.gmra.mxu0 %vm98_vm0, %v27083_v10 }
0x1237   :  { %26726 = vmatmul.mubr.msk.f32.vlgmr.msra.gmra.mxu1 %vm98_vm0, %v27084_v56  ;;  %26728 = vmatprep.subr.mxu0 %v31272_v33 }
0x1238   :  { %26733 = vmatprep.subr.mxu1 %v31272_v33  ;;  %26730 = vmatprep.mubr.msk.f32.mxu0 %vm27182_vm1, %v31272_v33 }
0x1239   :  { %26735 = vmatprep.mubr.msk.f32.mxu1 %vm27182_vm1, %v31272_v33 }
0x12c7   :  { %v30322_v57 = vpop.f32.mrf.mxu0 }
0x12c8   :  { %v30324_v29 = vpop.f32.mrf.mxu1 }
0x12c9   :  { %v26636_v36 = vpop.f32.mrf.mxu0 }
0x12ca   :  { %v26641_v26 = vpop.f32.mrf.mxu1 }
0x12ce   :  { %v30326_v53 = vpop.f32.mrf.mxu1 }
0x12d0   :  { %v26651_v59 = vpop.f32.mrf.mxu1 }
0x12d2   :  { %v30328_v31 = vpop.f32.mrf.mxu0 }
0x12d4   :  { %v26646_v45 = vpop.f32.mrf.mxu0 }
0x12d7   :  { %v30330_v0 = vpop.f32.mrf.mxu1 }
0x12d9   :  { %v26661_v48 = vpop.f32.mrf.mxu1 }
0x12db   :  { %v30332_v51 = vpop.f32.mrf.mxu0 }
0x12dd   :  { %v26656_v32 = vpop.f32.mrf.mxu0 }
0x12df   :  { %v30334_v1 = vpop.f32.mrf.mxu0 }
0x12e0   :  { %v30336_v16 = vpop.f32.mrf.mxu1 }
0x12e1   :  { %v26666_v12 = vpop.f32.mrf.mxu0 }
0x12e2   :  { %v26671_v38 = vpop.f32.mrf.mxu1 }
0x12e4   :  { %v19571_v18 = vpop.f32.mrf.mxu0 }
0x12e5   :  { %v30339_v62 = vadd.f32 %v19571_v18, %v30106_v21  ;;  %v19641_v41 = vpop.f32.mrf.mxu1 }
0x12e6   :  { %v30342_v22 = vadd.f32 %v19641_v41, %v30110_v11  ;;  %v26678_v10 = vpop.f32.mrf.mxu0 }
0x12e7   :  { %v20065_v56 = vmax.f32 %v30339_v62, 0.0  ;;  %v26685_v36 = vpop.f32.mrf.mxu1  ;;  %vm21281_vm13 = vcmp.gt.f32.partialorder %v30339_v62, 0.0  ;;  %v31559_v62 = vld [vmem:[#allocation24_spill] sm:$0xff] }
0x12e8   :  { %v20066_v26 = vmax.f32 %v30342_v22, 0.0  ;;  %vm21282_vm14 = vcmp.gt.f32.partialorder %v30342_v22, 0.0  ;;  %v31560_v22 = vld [vmem:[#allocation30_spill] sm:$0xff] }
0x12e9   :  { %26729 = vmatpush3.xpose.msk.msra.mxu0 %vm370_vm2, %v20065_v56 }
0x12ea   :  { %v19711_v59 = vpop.f32.mrf.mxu0  ;;  %26734 = vmatpush3.xpose.msk.msra.mxu1 %vm370_vm2, %v20066_v26  ;;  %26738 = vmatprep.subr.mxu0 %v31272_v33 }
0x12eb   :  { %v30350_v21 = vadd.f32 %v19711_v59, %v30146_v25  ;;  %v19781_v45 = vpop.f32.mrf.mxu1  ;;  %26743 = vmatprep.subr.mxu1 %v31272_v33 }
0x12ec   :  { %v30354_v11 = vadd.f32 %v19781_v45, %v30125_v6  ;;  %v26692_v48 = vpop.f32.mrf.mxu0  ;;  %26731 = vmatmul.mubr.msk.f32.vlgmr.msra.gmra.mxu0 %vm370_vm2, %v30121_v50 }
0x12ed   :  { %v31219_v32 = vmax.f32 %v30350_v21, 0.0  ;;  %v26699_v12 = vpop.f32.mrf.mxu1  ;;  %26736 = vmatmul.mubr.msk.f32.vlgmr.msra.gmra.mxu1 %vm370_vm2, %v30133_v2  ;;  %26740 = vmatprep.mubr.msk.f32.mxu0 %vm27182_vm1, %v31272_v33  ;;  %vm21283_vm7 = vcmp.gt.f32.partialorder %v30350_v21, 0.0 }
0x12ee   :  { %v31220_v25 = vmax.f32 %v30354_v11, 0.0  ;;  %26745 = vmatprep.mubr.msk.f32.mxu1 %vm27182_vm1, %v31272_v33  ;;  %vm21284_vm15 = vcmp.gt.f32.partialorder %v30354_v11, 0.0 }
0x12ef   :  { %26739 = vmatpush3.xpose.msk.msra.mxu0 %vm370_vm2, %v31219_v32 }
0x12f0   :  { %v19851_v6 = vpop.f32.mrf.mxu0  ;;  %26744 = vmatpush3.xpose.msk.msra.mxu1 %vm370_vm2, %v31220_v25  ;;  %26748 = vmatprep.subr.mxu0 %v31272_v33 }
0x12f1   :  { %v30374_v38 = vadd.f32 %v19851_v6, %v30180_v46  ;;  %v19921_v18 = vpop.f32.mrf.mxu1  ;;  %26753 = vmatprep.subr.mxu1 %v31272_v33 }
0x12f2   :  { %v30378_v41 = vadd.f32 %v19921_v18, %v30162_v47  ;;  %v26706_v10 = vpop.f32.mrf.mxu0  ;;  %26741 = vmatmul.mubr.msk.f32.vlgmr.msra.gmra.mxu0 %vm370_vm2, %v30173_v20 }
0x12f3   :  { %v31217_v36 = vmax.f32 %v30374_v38, 0.0  ;;  %v26713_v59 = vpop.f32.mrf.mxu1  ;;  %26746 = vmatmul.mubr.msk.f32.vlgmr.msra.gmra.mxu1 %vm370_vm2, %v30156_v15  ;;  %26750 = vmatprep.mubr.msk.f32.mxu0 %vm27182_vm1, %v31272_v33  ;;  %v31483_v30 = vmax.f32 %v30374_v38, 0.0  ;;  %vm21285_vm9 = vcmp.gt.f32.partialorder %v30374_v38, 0.0 }
0x12f4   :  { %v31218_v46 = vmax.f32 %v30378_v41, 0.0  ;;  %26755 = vmatprep.mubr.msk.f32.mxu1 %vm27182_vm1, %v31272_v33  ;;  %vm21286_vm8 = vcmp.gt.f32.partialorder %v30378_v41, 0.0 }
0x12f5   :  { %26749 = vmatpush3.xpose.msk.msra.mxu0 %vm370_vm2, %v31217_v36 }
0x12f6   :  { %v19991_v47 = vpop.f32.mrf.mxu0  ;;  %26754 = vmatpush3.xpose.msk.msra.mxu1 %vm370_vm2, %v31218_v46  ;;  %26758 = vmatprep.subr.mxu0 %v31272_v33  ;;  %v27086_v46 = vld [vmem:[%s31084_s1 + $0x1] sm:$0x1] }
0x12f7   :  { %v30398_v45 = vadd.f32 %v19991_v47, %v30201_v3  ;;  %v20061_v48 = vpop.f32.mrf.mxu1  ;;  %26763 = vmatprep.subr.mxu1 %v31272_v33 }
0x12f8   :  { %v30402_v12 = vadd.f32 %v20061_v48, %v30205_v8  ;;  %26751 = vmatmul.mubr.msk.f32.vlgmr.msra.gmra.mxu0 %vm370_vm2, %v30214_v13  ;;  %v26720_v6 = vpop.f32.mrf.mxu0  ;;  %v30432_v8 = vpop.permute.xlu1 %18802 }
0x12f9   :  { %v31216_v18 = vmax.f32 %v30398_v45, 0.0  ;;  %26756 = vmatmul.mubr.msk.f32.vlgmr.msra.gmra.mxu1 %vm370_vm2, %v30195_v60  ;;  %26760 = vmatprep.mubr.msk.f32.mxu0 %vm27182_vm1, %v31272_v33  ;;  %v26727_v3 = vpop.f32.mrf.mxu1  ;;  %v30436_v48 = vpop.permute.xlu0 %18807  ;;  %v31484_v23 = vmax.f32 %v30398_v45, 0.0  ;;  %vm21287_vm10 = vcmp.gt.f32.partialorder %v30398_v45, 0.0  ;;  %v31570_v45 = vld [vmem:[#allocation36_spill] sm:$0xff] }
0x12fa   :  { %v31215_v10 = vmax.f32 %v30402_v12, 0.0  ;;  %26765 = vmatprep.mubr.msk.f32.mxu1 %vm27182_vm1, %v31272_v33  ;;  %v31485_v5 = vmax.f32 %v30402_v12, 0.0  ;;  %vm21288_vm11 = vcmp.gt.f32.partialorder %v30402_v12, 0.0 }
0x12fb   :  { %26759 = vmatpush3.xpose.msk.msra.mxu0 %vm370_vm2, %v31216_v18 }
0x12fc   :  { %26764 = vmatpush3.xpose.msk.msra.mxu1 %vm370_vm2, %v31215_v10  ;;  %26768 = vmatprep.subr.mxu0 %v31272_v33  ;;  %v30434_v59 = vpop.permute.xlu1 %18817  ;;  %v27085_v10 = vld [vmem:[%s31084_s1] sm:$0x1] }
0x12fd   :  { %26773 = vmatprep.subr.mxu1 %v31272_v33 }
0x12fe   :  { %26761 = vmatmul.mubr.msk.f32.vlgmr.msra.gmra.mxu0 %vm370_vm2, %v30226_v44 }
0x12ff   :  { %26766 = vmatmul.mubr.msk.f32.vlgmr.msra.gmra.mxu1 %vm370_vm2, %v30231_v17  ;;  %26769 = vmatpush3.msra.mxu0 %v20065_v56 }
0x1300   :  { %26774 = vmatpush3.msra.mxu1 %v20066_v26  ;;  %26770 = vmatprep.mubr.msk.f32.mxu0 %vm27182_vm1, %v31272_v33  ;;  %v30448_v63 = vpop.permute.xlu1 %18812 }
0x1301   :  { %26775 = vmatprep.mubr.msk.f32.mxu1 %vm27182_vm1, %v31272_v33  ;;  %26778 = vmatprep.subr.mxu0 %v31272_v33 }
0x1302   :  { %26783 = vmatprep.subr.mxu1 %v31272_v33 }
0x13ac   :  { %v20142_v47 = vpop.f32.mrf.mxu0 }
0x13ad   :  { %v20143_v56 = vadd.f32 %v20142_v47, %v30432_v8  ;;  %v20215_v26 = vpop.f32.mrf.mxu1 }
0x13ae   :  { %v20216_v6 = vadd.f32 %v20215_v26, %v30436_v48  ;;  %v26732_v3 = vpop.f32.mrf.mxu0 }
0x13af   :  { %v20657_v18 = vsub.f32 %v20143_v56, %v27085_v10  ;;  %v26737_v36 = vpop.f32.mrf.mxu1  ;;  %v31481_v56 = vmax.f32 %v30350_v21, 0.0 }
0x13b0   :  { %v20658_v32 = vsub.f32 %v20216_v6, %v27086_v46  ;;  %v27088_v6 = vld [vmem:[%s31084_s1 + $0x3] sm:$0x1] }
0x13b1   :  { %v30446_v25 = vmul.f32 0.25, %v20657_v18  ;;  %v31480_v18 = vmax.f32 %v30354_v11, 0.0 }
0x13b2   :  { %v30450_v47 = vmul.f32 0.25, %v20658_v32  ;;  %v20288_v24 = vpop.f32.mrf.mxu0  ;;  %v27087_v32 = vld [vmem:[%s31084_s1 + $0x2] sm:$0x1] }
0x13b3   :  { %v20289_v26 = vadd.f32 %v20288_v24, %v30448_v63  ;;  %v20361_v3 = vpop.f32.mrf.mxu1  ;;  %21289 = vxpose.xlu0.b32.start.end [1/1] (short) (narrow) %v30446_v25, 8  ;;  %26771 = vmatmul.mubr.msk.f32.vlgmr.msra.gmra.mxu0 %vm1624_vm3, %v30446_v25 }
0x13b4   :  { %v20362_v36 = vadd.f32 %v20361_v3, %v30434_v59  ;;  %v26742_v10 = vpop.f32.mrf.mxu0  ;;  %26776 = vmatmul.mubr.msk.f32.vlgmr.msra.gmra.mxu1 %vm1624_vm3, %v30450_v47  ;;  %21396 = vxpose.xlu1.b32.start.end [1/1] (short) (narrow) %v30450_v47, 8 }
0x13b5   :  { %v20659_v46 = vsub.f32 %v20289_v26, %v27087_v32  ;;  %v26747_v24 = vpop.f32.mrf.mxu1  ;;  %26784 = vmatpush3.msra.mxu1 %v31480_v18  ;;  %26779 = vmatpush3.msra.mxu0 %v31481_v56  ;;  %v30478_v26 = vpop.permute.xlu0 %18822 }
0x13b6   :  { %v20660_v3 = vsub.f32 %v20362_v36, %v27088_v6  ;;  %26780 = vmatprep.mubr.msk.f32.mxu0 %vm27182_vm1, %v31272_v33  ;;  %26785 = vmatprep.mubr.msk.f32.mxu1 %vm27182_vm1, %v31272_v33  ;;  %v30482_v18 = vpop.permute.xlu1 %18827 }
0x13b7   :  { %v30474_v10 = vmul.f32 0.25, %v20659_v46  ;;  %26788 = vmatprep.subr.mxu0 %v31272_v33  ;;  %26793 = vmatprep.subr.mxu1 %v31272_v33 }
0x13b8   :  { %v30480_v32 = vmul.f32 0.25, %v20660_v3  ;;  %v20434_v24 = vpop.f32.mrf.mxu0  ;;  %v27089_v3 = vld [vmem:[%s31084_s1 + $0x4] sm:$0x1] }
0x13b9   :  { %v20435_v36 = vadd.f32 %v20434_v24, %v30478_v26  ;;  %v20507_v56 = vpop.f32.mrf.mxu1  ;;  %26781 = vmatmul.mubr.msk.f32.vlgmr.msra.gmra.mxu0 %vm1624_vm3, %v30474_v10  ;;  %v31482_v24 = vmax.f32 %v30378_v41, 0.0  ;;  %v31567_v41 = vld [vmem:[#allocation27_spill] sm:$0xff] }
0x13ba   :  { %v20508_v46 = vadd.f32 %v20507_v56, %v30482_v18  ;;  %v26752_v6 = vpop.f32.mrf.mxu0  ;;  %26786 = vmatmul.mubr.msk.f32.vlgmr.msra.gmra.mxu1 %vm1624_vm3, %v30480_v32  ;;  %21610 = vxpose.xlu0.b32.start.end [1/1] (short) (narrow) %v30480_v32, 8  ;;  %v27090_v56 = vld [vmem:[%s31084_s1 + $0x5] sm:$0x1] }
0x13bb   :  { %v20661_v55 = vsub.f32 %v20435_v36, %v27089_v3  ;;  %v26757_v43 = vpop.f32.mrf.mxu1  ;;  %26794 = vmatpush3.msra.mxu1 %v31482_v24  ;;  %26789 = vmatpush3.msra.mxu0 %v31483_v30  ;;  %v30510_v3 = vpop.permute.xlu1 %18837 }
0x13bc   :  { %v20662_v6 = vsub.f32 %v20508_v46, %v27090_v56  ;;  %26790 = vmatprep.mubr.msk.f32.mxu0 %vm27182_vm1, %v31272_v33  ;;  %26795 = vmatprep.mubr.msk.f32.mxu1 %vm27182_vm1, %v31272_v33  ;;  %v30507_v43 = vpop.permute.xlu0 %18832 }
0x13bd   :  { %v20669_v9 = vmul.f32 0.25, %v20661_v55  ;;  %26798 = vmatprep.subr.mxu0 %v31272_v33  ;;  %26803 = vmatprep.subr.mxu1 %v31272_v33 }
0x13be   :  { %v20670_v36 = vmul.f32 0.25, %v20662_v6  ;;  %v20580_v30 = vpop.f32.mrf.mxu0  ;;  %21503 = vxpose.xlu0.b32.start.end [1/1] (short) (narrow) %v30474_v10, 8  ;;  %v27091_v6 = vld [vmem:[%s31084_s1 + $0x6] sm:$0x1] }
0x13bf   :  { %v20581_v46 = vadd.f32 %v20580_v30, %v30507_v43  ;;  %v20653_v24 = vpop.f32.mrf.mxu1  ;;  %26791 = vmatmul.mubr.msk.f32.vlgmr.msra.gmra.mxu0 %vm1624_vm3, %v20669_v9  ;;  %v27092_v30 = vld [vmem:[%s31084_s1 + $0x7] sm:$0x1]  ;;  %s27184_s1 = smov [#allocation7]  }
0x13c0   :  { %v20654_v56 = vadd.f32 %v20653_v24, %v30510_v3  ;;  %v26762_v55 = vpop.f32.mrf.mxu0  ;;  %26796 = vmatmul.mubr.msk.f32.vlgmr.msra.gmra.mxu1 %vm1624_vm3, %v20670_v36  ;;  %26799 = vmatpush3.msra.mxu0 %v31484_v23  ;;  %v21272_v52 = vsel %vm974_vm5, %v20670_v36, 0.0  ;;  %s24199_s27 = sshll.u32 %s27184_s1, 4  ;;  %s24200_s27 = int_to_ptr.vmem [resolvable:$true] %s24199_s27 }
0x13c1   :  { %v20663_v39 = vsub.f32 %v20581_v46, %v27091_v6  ;;  %v26767_v34 = vpop.f32.mrf.mxu1  ;;  %26804 = vmatpush3.msra.mxu1 %v31485_v5  ;;  %26800 = vmatprep.mubr.msk.f32.mxu0 %vm27182_vm1, %v31272_v33  ;;  %v31486_v5 = vld [vmem:[#allocation20_spill] sm:$0xff]  ;;  %v31487_v46 = vld [vmem:[#allocation13_spill] sm:$0xff]  ;;  %v21263_v6 = vsel %vm974_vm5, %v30474_v10, 0.0  ;;  %s27149_s30 = scalar_lea.vmem %s24200_s27, 128  ;;  %p27154_p11 = scmp.lt.s32.totalorder %s24200_s27, %s24200_s27 }
0x13c2   :  { %v20664_v24 = vsub.f32 %v20654_v56, %v27092_v30  ;;  %26805 = vmatprep.mubr.msk.f32.mxu1 %vm27182_vm1, %v31272_v33  ;;  %26808 = vmatprep.subr.mxu0 %v31272_v33  ;;  %v444_v56 = vadd.f32 %v31487_v46, %v31486_v5  ;;  %v30552_v55 = vld [vmem:[#allocation5] sm:$0x1]  ;;  %v736_v37 = vadd.f32 %v31490_v7, %v31486_v5  ;;  %v30567_v10 = vld [vmem:[#allocation5 + $0x1] sm:$0x1]  ;;  %p27150_p10 = scmp.ne.s32.totalorder %s24200_s27, %s27149_s30  ;;  %p27155_p12 = scmp.lt.s32.totalorder %s27149_s30, %s27149_s30 }
0x13c3   :  { %v30531_v23 = vmul.f32 0.25, %v20663_v39  ;;  %26813 = vmatprep.subr.mxu1 %v31272_v33  ;;  %21824 = vxpose.xlu0.b32.start.end [1/1] (short) (narrow) %v20670_v36, 8  ;;  %v21257_v39 = vsel %vm974_vm5, %v30446_v25, 0.0  ;;  %v30592_v36 = vld [vmem:[#allocation5 + $0x6] sm:$0x1] }
0x13c4   :  { %v20672_v34 = vmul.f32 0.25, %v20664_v24  ;;  %v958_v30 = vsub.f32 %v444_v56, %v30552_v55  ;;  %v21266_v24 = vsel %vm974_vm5, %v30480_v32, 0.0  ;;  %v21269_v56 = vsel %vm974_vm5, %v20669_v9, 0.0  ;;  %p27156_p13 = por %p27155_p12, %p27154_p11 }
0x13c5   :  { %21931 = vxpose.xlu1.b32.start.end [1/1] (short) (narrow) %v30531_v23, 8  ;;  %26801 = vmatmul.mubr.msk.f32.vlgmr.msra.gmra.mxu0 %vm1624_vm3, %v30531_v23  ;;  %v21260_v32 = vsel %vm974_vm5, %v30450_v47, 0.0 }
0x13c6   :  { %26806 = vmatmul.mubr.msk.f32.vlgmr.msra.gmra.mxu1 %vm1624_vm3, %v20672_v34  ;;  %26809 = vmatpush3.msk.msra.mxu0 %vm2277_vm4, %v30121_v50  ;;  %v966_v25 = vmul.f32 %v958_v30, %v958_v30  ;;  %p27157_p0 = pnand %p27156_p13, %p27150_p10 }
0x13c7   :  { %26814 = vmatpush3.msk.msra.mxu1 %vm2277_vm4, %v30133_v2  ;;  %21717 = vxpose.xlu0.b32.start.end [1/1] (short) (narrow) %v20669_v9, 8  ;;  %v31488_v2 = vld [vmem:[#allocation15_spill] sm:$0xff] }
0x13c8   :  { %26815 = vmatprep.mubr.msk.f32.mxu1 %vm27182_vm1, %v31272_v33  ;;  %26823 = vmatprep.subr.mxu1 %v31272_v33  ;;  %v590_v50 = vadd.f32 %v31488_v2, %v31486_v5  ;;  %v30573_v2 = vld [vmem:[#allocation5 + $0x4] sm:$0x1]  ;;  %v975_v9 = vsel %vm974_vm5, %v966_v25, 0.0  ;;  %v21278_v25 = vsel %vm974_vm5, %v20672_v34, 0.0 }
0x13c9   :  { %26810 = vmatprep.mubr.msk.f32.mxu0 %vm27182_vm1, %v31272_v33  ;;  %26818 = vmatprep.subr.mxu0 %v31272_v33  ;;  %v962_v7 = vsub.f32 %v736_v37, %v30573_v2  ;;  %v30588_v37 = vld [vmem:[#allocation5 + $0x5] sm:$0x1] }
0x13cb   :  { %22038 = vxpose.xlu0.b32.start.end [1/1] (short) (narrow) %v20672_v34, 8  ;;  %v970_v42 = vmul.f32 %v962_v7, %v962_v7  ;;  %v30597_v7 = vld [vmem:[#allocation5 + $0x7] sm:$0x1] }
0x13ec   :  { %21258 = vadd.xlane.f32.xlu1 %v21257_v39  ;;  %v31489_v39 = vld [vmem:[#allocation12_spill] sm:$0xff] }
0x13ed   :  { %v517_v46 = vadd.f32 %v31489_v39, %v31486_v5 }
0x13ef   :  { %v959_v30 = vsub.f32 %v517_v46, %v30567_v10 }
0x13f0   :  { %21264 = vadd.xlane.f32.xlu1 %v21263_v6  ;;  %v960_v6 = vsub.f32 %v590_v50, %v30561_v35 }
0x13f1   :  { %v967_v50 = vmul.f32 %v959_v30, %v959_v30 }
0x13f2   :  { %v968_v47 = vmul.f32 %v960_v6, %v960_v6 }
0x13f3   :  { %v978_v34 = vsel %vm974_vm5, %v967_v50, 0.0 }
0x13f4   :  { %21267 = vadd.xlane.f32.xlu1 %v21266_v24  ;;  %v31491_v24 = vld [vmem:[#allocation14_spill] sm:$0xff]  ;;  %v981_v19 = vsel %vm974_vm5, %v968_v47, 0.0  ;;  %v987_v47 = vsel %vm974_vm5, %v970_v42, 0.0  ;;  %v21275_v42 = vsel %vm974_vm5, %v30531_v23, 0.0 }
0x13f5   :  { %v663_v39 = vadd.f32 %v31491_v24, %v31486_v5  ;;  %v31493_v24 = vld [vmem:[#allocation19_spill] sm:$0xff] }
0x13f6   :  { %v882_v28 = vadd.f32 %v31493_v24, %v31486_v5  ;;  %v31496_v24 = vld [vmem:[#allocation42_spill] sm:$0xff] }
0x13f8   :  { %21270 = vadd.xlane.f32.xlu1 %v21269_v56  ;;  %21261 = vadd.xlane.f32.xlu0 %v21260_v32  ;;  %v961_v56 = vsub.f32 %v663_v39, %v30579_v49  ;;  %v31492_v32 = vld [vmem:[#allocation16_spill] sm:$0xff] }
0x13f9   :  { %v809_v46 = vadd.f32 %v31492_v32, %v31486_v5  ;;  %v31495_v32 = vld [vmem:[#allocation49_spill] sm:$0xff] }
0x13fa   :  { %v969_v30 = vmul.f32 %v961_v56, %v961_v56  ;;  %v4846_v14 = vadd.f32 %v31496_v24, %v31495_v32  ;;  %v4998_v32 = vadd.f32 %v31500_v4, %v31499_v58  ;;  %v31502_v24 = vld [vmem:[#allocation43_spill] sm:$0xff] }
0x13fb   :  { %v963_v39 = vsub.f32 %v809_v46, %v30588_v37 }
0x13fc   :  { %976 = vadd.xlane.f32.xlu1 %v975_v9  ;;  %21273 = vadd.xlane.f32.xlu0 %v21272_v52  ;;  %v31494_v52 = vld [vmem:[#allocation18_spill] sm:$0xff]  ;;  %v964_v9 = vsub.f32 %v882_v28, %v30592_v36  ;;  %v984_v46 = vsel %vm974_vm5, %v969_v30, 0.0  ;;  %v5381_v28 = vsub.f32 %v4846_v14, %v30552_v55 }
0x13fd   :  { %v955_v6 = vadd.f32 %v31494_v52, %v31486_v5  ;;  %v31498_v5 = vld [vmem:[#allocation41_spill] sm:$0xff]  ;;  %v971_v52 = vmul.f32 %v963_v39, %v963_v39 }
0x13fe   :  { %v972_v40 = vmul.f32 %v964_v9, %v964_v9  ;;  %v5389_v14 = vmul.f32 %v5381_v28, %v5381_v28 }
0x13ff   :  { %v990_v39 = vsel %vm974_vm5, %v971_v52, 0.0 }
0x1400   :  { %982 = vadd.xlane.f32.xlu1 %v981_v19  ;;  %21279 = vadd.xlane.f32.xlu0 %v21278_v25  ;;  %v965_v19 = vsub.f32 %v955_v6, %v30597_v7  ;;  %v31497_v25 = vld [vmem:[#allocation51_spill] sm:$0xff]  ;;  %v31501_v6 = vld [vmem:[#allocation50_spill] sm:$0xff]  ;;  %v993_v4 = vsel %vm974_vm5, %v972_v40, 0.0 }
0x1401   :  { %v4922_v56 = vadd.f32 %v31498_v5, %v31497_v25  ;;  %v31504_v25 = vld [vmem:[#allocation46_spill] sm:$0xff]  ;;  %v5383_v5 = vsub.f32 %v4998_v32, %v30561_v35 }
0x1402   :  { %v973_v9 = vmul.f32 %v965_v19, %v965_v19  ;;  %v5397_v19 = vsel %vm974_vm5, %v5389_v14, 0.0 }
0x1403   :  { %v5382_v50 = vsub.f32 %v4922_v56, %v30567_v10  ;;  %v31505_v56 = vld [vmem:[#allocation54_spill] sm:$0xff] }
0x1404   :  { %988 = vadd.xlane.f32.xlu1 %v987_v47  ;;  %979 = vadd.xlane.f32.xlu0 %v978_v34  ;;  %v5074_v47 = vadd.f32 %v31502_v24, %v31501_v6  ;;  %v31503_v34 = vld [vmem:[#allocation53_spill] sm:$0xff]  ;;  %v5391_v24 = vmul.f32 %v5383_v5, %v5383_v5  ;;  %v996_v28 = vsel %vm974_vm5, %v973_v9, 0.0 }
0x1405   :  { %v5150_v30 = vadd.f32 %v31504_v25, %v31503_v34  ;;  %v5390_v58 = vmul.f32 %v5382_v50, %v5382_v50  ;;  %v31507_v34 = vld [vmem:[#allocation55_spill] sm:$0xff] }
0x1406   :  { %v5384_v23 = vsub.f32 %v5074_v47, %v30579_v49  ;;  %v31508_v25 = vld [vmem:[#allocation47_spill] sm:$0xff]  ;;  %v5403_v14 = vsel %vm974_vm5, %v5391_v24, 0.0 }
0x1407   :  { %v5385_v6 = vsub.f32 %v5150_v30, %v30573_v2  ;;  %v5302_v52 = vadd.f32 %v31508_v25, %v31507_v34  ;;  %v5400_v47 = vsel %vm974_vm5, %v5390_v58, 0.0  ;;  %v31510_v30 = vld [vmem:[#allocation48_spill] sm:$0xff] }
0x1408   :  { %21276 = vadd.xlane.f32.xlu1 %v21275_v42  ;;  %985 = vadd.xlane.f32.xlu0 %v984_v46  ;;  %v31506_v46 = vld [vmem:[#allocation45_spill] sm:$0xff]  ;;  %v5392_v40 = vmul.f32 %v5384_v23, %v5384_v23 }
0x1409   :  { %v5226_v42 = vadd.f32 %v31506_v46, %v31505_v56  ;;  %v5393_v50 = vmul.f32 %v5385_v6, %v5385_v6  ;;  %v31511_v56 = vld [vmem:[#allocation71_spill] sm:$0xff]  ;;  %v31512_v46 = vld [vmem:[#allocation40_spill] sm:$0xff] }
0x140a   :  { %v9535_v34 = vadd.f32 %v31512_v46, %v31511_v56 }
0x140b   :  { %v5386_v32 = vsub.f32 %v5226_v42, %v30588_v37  ;;  %v5409_v23 = vsel %vm974_vm5, %v5393_v50, 0.0  ;;  %v5406_v42 = vsel %vm974_vm5, %v5392_v40, 0.0 }
0x140c   :  { %994 = vadd.xlane.f32.xlu1 %v993_v4  ;;  %991 = vadd.xlane.f32.xlu0 %v990_v39  ;;  %v5387_v39 = vsub.f32 %v5302_v52, %v30592_v36  ;;  %v31509_v4 = vld [vmem:[#allocation56_spill] sm:$0xff]  ;;  %v10070_v25 = vsub.f32 %v9535_v34, %v30552_v55  ;;  %v31513_v52 = vld [vmem:[#allocation73_spill] sm:$0xff] }
0x140d   :  { %v5378_v5 = vadd.f32 %v31510_v30, %v31509_v4  ;;  %v5394_v9 = vmul.f32 %v5386_v32, %v5386_v32 }
0x140e   :  { %v5395_v6 = vmul.f32 %v5387_v39, %v5387_v39 }
0x140f   :  { %v5388_v58 = vsub.f32 %v5378_v5, %v30597_v7  ;;  %v5412_v4 = vsel %vm974_vm5, %v5394_v9, 0.0 }
0x1410   :  { %5398 = vadd.xlane.f32.xlu1 %v5397_v19  ;;  %997 = vadd.xlane.f32.xlu0 %v996_v28  ;;  %v31514_v19 = vld [vmem:[#allocation39_spill] sm:$0xff]  ;;  %v5415_v50 = vsel %vm974_vm5, %v5395_v6, 0.0 }
0x1411   :  { %v9611_v28 = vadd.f32 %v31514_v19, %v31513_v52  ;;  %v5396_v24 = vmul.f32 %v5388_v58, %v5388_v58  ;;  %v31515_v58 = vld [vmem:[#allocation21_spill] sm:$0xff] }
0x1413   :  { %v10071_v32 = vsub.f32 %v9611_v28, %v30567_v10  ;;  %v5418_v30 = vsel %vm974_vm5, %v5396_v24, 0.0 }
0x1414   :  { %5401 = vadd.xlane.f32.xlu1 %v5400_v47  ;;  %5404 = vadd.xlane.f32.xlu0 %v5403_v14  ;;  %v10078_v47 = vmul.f32 %v10070_v25, %v10070_v25  ;;  %v31516_v25 = vld [vmem:[#allocation23_spill] sm:$0xff] }
0x1415   :  { %v10079_v40 = vmul.f32 %v10071_v32, %v10071_v32  ;;  %v31517_v32 = vld [vmem:[#allocation57_spill] sm:$0xff] }
0x1416   :  { %v10086_v39 = vsel %vm974_vm5, %v10078_v47, 0.0 }
0x1417   :  { %v10089_v5 = vsel %vm974_vm5, %v10079_v40, 0.0 }
0x1418   :  { %5410 = vadd.xlane.f32.xlu1 %v5409_v23  ;;  %5407 = vadd.xlane.f32.xlu0 %v5406_v42 }
0x141c   :  { %5416 = vadd.xlane.f32.xlu1 %v5415_v50  ;;  %5413 = vadd.xlane.f32.xlu0 %v5412_v4 }
0x1420   :  { %10087 = vadd.xlane.f32.xlu1 %v10086_v39  ;;  %5419 = vadd.xlane.f32.xlu0 %v5418_v30 }
0x1424   :  { %10090 = vadd.xlane.f32.xlu0 %v10089_v5 }
0x142f   :  { %v21305_v56 = vpop.trf.xlu0 }
0x1430   :  { %v21412_v46 = vpop.trf.xlu1  ;;  %26811 = vmatmul.mubr.msk.f32.vlgmr.msra.gmra.mxu0 %vm2273_vm6, %v21305_v56 }
0x1431   :  { %26816 = vmatmul.mubr.msk.f32.vlgmr.msra.gmra.mxu1 %vm2273_vm6, %v21412_v46  ;;  %26819 = vmatpush3.msk.msra.mxu0 %vm2277_vm4, %v30173_v20 }
0x1432   :  { %26824 = vmatpush3.msk.msra.mxu1 %vm2277_vm4, %v30156_v15  ;;  %26825 = vmatprep.mubr.msk.f32.mxu1 %vm27182_vm1, %v31272_v33 }
0x1433   :  { %26833 = vmatprep.subr.mxu1 %v31272_v33  ;;  %26820 = vmatprep.mubr.msk.f32.mxu0 %vm27182_vm1, %v31272_v33 }
0x1434   :  { %26828 = vmatprep.subr.mxu0 %v31272_v33 }
0x1436   :  { %v21626_v34 = vpop.trf.xlu0 }
0x1437   :  { %26826 = vmatmul.mubr.msk.f32.vlgmr.msra.gmra.mxu1 %vm2273_vm6, %v21626_v34 }
0x1438   :  { %26834 = vmatpush3.msk.msra.mxu1 %vm2277_vm4, %v30195_v60  ;;  %26835 = vmatprep.mubr.msk.f32.mxu1 %vm27182_vm1, %v31272_v33 }
0x1439   :  { %26843 = vmatprep.subr.mxu1 %v31272_v33 }
0x143a   :  { %v21519_v14 = vpop.trf.xlu0 }
0x143b   :  { %26821 = vmatmul.mubr.msk.f32.vlgmr.msra.gmra.mxu0 %vm2273_vm6, %v21519_v14 }
0x143c   :  { %26829 = vmatpush3.msk.msra.mxu0 %vm2277_vm4, %v30214_v13  ;;  %26830 = vmatprep.mubr.msk.f32.mxu0 %vm27182_vm1, %v31272_v33 }
0x143d   :  { %26838 = vmatprep.subr.mxu0 %v31272_v33 }
0x143f   :  { %v21840_v9 = vpop.trf.xlu0 }
0x1440   :  { %26836 = vmatmul.mubr.msk.f32.vlgmr.msra.gmra.mxu1 %vm2273_vm6, %v21840_v9  ;;  %v31519_v9 = vld [vmem:[#allocation58_spill] sm:$0xff] }
0x1441   :  { %26844 = vmatpush3.msk.msra.mxu1 %vm2277_vm4, %v30231_v17  ;;  %26845 = vmatprep.mubr.msk.f32.mxu1 %vm27182_vm1, %v31272_v33  ;;  %v21947_v42 = vpop.trf.xlu1 }
0x1443   :  { %v21733_v23 = vpop.trf.xlu0 }
0x1444   :  { %26831 = vmatmul.mubr.msk.f32.vlgmr.msra.gmra.mxu0 %vm2273_vm6, %v21733_v23 }
0x1445   :  { %26839 = vmatpush3.msk.msra.mxu0 %vm2277_vm4, %v30226_v44  ;;  %26840 = vmatprep.mubr.msk.f32.mxu0 %vm27182_vm1, %v31272_v33  ;;  %vm1007_vm4 = vcmask 0   ;;  %v31524_v44 = vld [vmem:[#allocation59_spill] sm:$0xff] }
0x1447   :  { %v22054_v6 = vpop.trf.xlu0 }
0x1448   :  { %26841 = vmatmul.mubr.msk.f32.vlgmr.msra.gmra.mxu0 %vm2273_vm6, %v21947_v42  ;;  %26846 = vmatmul.mubr.msk.f32.vlgmr.msra.gmra.mxu1 %vm2273_vm6, %v22054_v6  ;;  %vm5429_vm6 = vcmask 8200  }
0x1449   :  { %26850 = vmatprep.mubr.msk.f32.mxu0 %vm1624_vm3, %v31515_v58  ;;  %26855 = vmatprep.mubr.msk.f32.mxu1 %vm1624_vm3, %v31516_v25 }
0x1473   :  { %v30689_v52 = vpop.f32.mrf.mxu0 }
0x1474   :  { %v30691_v19 = vpop.f32.mrf.mxu1 }
0x1475   :  { %v21259_v28 = vpop.xlane.xlu1 %21258  ;;  %v26772_v4 = vpop.f32.mrf.mxu0 }
0x1476   :  { %v22873_v24 = vmul.f32 0.0001, %v21259_v28  ;;  %v26777_v47 = vpop.f32.mrf.mxu1 }
0x1477   :  { %v31521_v47 = vld [vmem:[#allocation60_spill] sm:$0xff] }
0x1478   :  { %v22881_v50 = vsub.f32 %v31517_v32, %v22873_v24 }
0x1479   :  { %v21265_v40 = vpop.xlane.xlu1 %21264  ;;  %v30694_v39 = vpop.f32.mrf.mxu0 }
0x147a   :  { %23491 = vperm.xlu0 %26994, %v22881_v50   ;;  %v30696_v30 = vpop.f32.mrf.mxu1  ;;  %v22875_v24 = vmul.f32 0.0001, %v21265_v40  ;;  %v31525_v40 = vld [vmem:[#allocation62_spill] sm:$0xff] }
0x147b   :  { %v26782_v5 = vpop.f32.mrf.mxu0 }
0x147c   :  { %v26787_v56 = vpop.f32.mrf.mxu1  ;;  %v22883_v13 = vsub.f32 %v31524_v44, %v22875_v24 }
0x147d   :  { %v21268_v46 = vpop.xlane.xlu1 %21267 }
0x147e   :  { %v22876_v34 = vmul.f32 0.0001, %v21268_v46 }
0x147f   :  { %v30698_v14 = vpop.f32.mrf.mxu0 }
0x1480   :  { %31518 = vst [vmem:[#allocation20_spill] sm:$0xff] %v30698_v14  ;;  %v22884_v23 = vsub.f32 %v31519_v9, %v22876_v34  ;;  %v30701_v42 = vpop.f32.mrf.mxu1 }
0x1481   :  { %31520 = vst [vmem:[#allocation13_spill] sm:$0xff] %v30701_v42  ;;  %v21271_v6 = vpop.xlane.xlu1 %21270  ;;  %v21262_v58 = vpop.xlane.xlu0 %21261 }
0x1482   :  { %23506 = vperm.xlu0 %26994, %v22884_v23   ;;  %v26797_v25 = vpop.f32.mrf.mxu1  ;;  %v22874_v28 = vmul.f32 0.0001, %v21262_v58  ;;  %v26792_v4 = vpop.f32.mrf.mxu0  ;;  %v22877_v23 = vmul.f32 0.0001, %v21271_v6 }
0x1484   :  { %v22882_v32 = vsub.f32 %v31521_v47, %v22874_v28 }
0x1485   :  { %v977_v50 = vpop.xlane.xlu1 %976  ;;  %v30704_v5 = vpop.f32.mrf.mxu0 }
0x1486   :  { %31522 = vst [vmem:[#allocation15_spill] sm:$0xff] %v30704_v5  ;;  %v30706_v56 = vpop.f32.mrf.mxu1  ;;  %v999_v46 = vmul.f32 0.125, %v977_v50  ;;  %v21274_v17 = vpop.xlane.xlu0 %21273  ;;  %23496 = vperm.xlu1 %26995, %v22882_v32  }
0x1487   :  { %31523 = vst [vmem:[#allocation12_spill] sm:$0xff] %v30706_v56  ;;  %v22878_v34 = vmul.f32 0.0001, %v21274_v17  ;;  %v26802_v9 = vpop.f32.mrf.mxu0  ;;  %v31526_v56 = vld [vmem:[#allocation61_spill] sm:$0xff]  ;;  %v31527_v17 = vld [vmem:[#allocation64_spill] sm:$0xff] }
0x1488   :  { %1008 = vst.msk [vmem:[#allocation7] sm:$0x1] %vm1007_vm4, %v999_v46  ;;  %v26807_v58 = vpop.f32.mrf.mxu1  ;;  %v22885_v50 = vsub.f32 %v31526_v56, %v22877_v23 }
0x1489   :  { %v22886_v25 = vsub.f32 %v31525_v40, %v22878_v34  ;;  %v983_v28 = vpop.xlane.xlu1 %982  ;;  %v31528_v40 = vld [vmem:[#allocation63_spill] sm:$0xff] }
0x148a   :  { %v1001_v4 = vmul.f32 0.125, %v983_v28  ;;  %v21280_v47 = vpop.xlane.xlu0 %21279  ;;  %23501 = vperm.xlu1 %26995, %v22883_v13  }
0x148b   :  { %v22880_v5 = vmul.f32 0.0001, %v21280_v47  ;;  %23516 = vperm.xlu0 %26994, %v22886_v25  }
0x148c   :  { %1010 = vst.msk [vmem:[#allocation7 + $0x2] sm:$0x1] %vm1007_vm4, %v1001_v4 }
0x148d   :  { %v22888_v32 = vsub.f32 %v31527_v17, %v22880_v5  ;;  %v989_v9 = vpop.xlane.xlu1 %988 }
0x148e   :  { %v1003_v44 = vmul.f32 0.125, %v989_v9  ;;  %v980_v6 = vpop.xlane.xlu0 %979  ;;  %23511 = vperm.xlu1 %26995, %v22885_v50  }
0x148f   :  { %v1000_v24 = vmul.f32 0.125, %v980_v6  ;;  %23526 = vperm.xlu0 %26994, %v22888_v32  }
0x1490   :  { %1012 = vst.msk [vmem:[#allocation7 + $0x4] sm:$0x1] %vm1007_vm4, %v1003_v44 }
0x1491   :  { %1009 = vst.msk [vmem:[#allocation7 + $0x1] sm:$0x1] %vm1007_vm4, %v1000_v24  ;;  %v21277_v46 = vpop.xlane.xlu1 %21276  ;;  %v31529_v24 = vld [vmem:[#allocation72_spill] sm:$0xff] }
0x1492   :  { %v22879_v13 = vmul.f32 0.0001, %v21277_v46  ;;  %v986_v34 = vpop.xlane.xlu0 %985  ;;  %v31530_v46 = vld [vmem:[#allocation65_spill] sm:$0xff] }
0x1493   :  { %v1002_v58 = vmul.f32 0.125, %v986_v34 }
0x1494   :  { %v22887_v56 = vsub.f32 %v31528_v40, %v22879_v13  ;;  %v9763_v13 = vadd.f32 %v31530_v46, %v31529_v24 }
0x1495   :  { %1011 = vst.msk [vmem:[#allocation7 + $0x3] sm:$0x1] %vm1007_vm4, %v1002_v58  ;;  %v995_v23 = vpop.xlane.xlu1 %994 }
0x1496   :  { %v1005_v5 = vmul.f32 0.125, %v995_v23  ;;  %23521 = vperm.xlu1 %26995, %v22887_v56   ;;  %v992_v25 = vpop.xlane.xlu0 %991  ;;  %v10073_v23 = vsub.f32 %v9763_v13, %v30579_v49 }
0x1497   :  { %v1004_v28 = vmul.f32 0.125, %v992_v25  ;;  %v31532_v25 = vld [vmem:[#allocation67_spill] sm:$0xff] }
0x1498   :  { %1014 = vst.msk [vmem:[#allocation7 + $0x6] sm:$0x1] %vm1007_vm4, %v1005_v5  ;;  %v31531_v5 = vld [vmem:[#allocation76_spill] sm:$0xff] }
0x1499   :  { %1013 = vst.msk [vmem:[#allocation7 + $0x5] sm:$0x1] %vm1007_vm4, %v1004_v28  ;;  %v5399_v4 = vpop.xlane.xlu1 %5398  ;;  %v9915_v28 = vadd.f32 %v31532_v25, %v31531_v5 }
0x149a   :  { %v5421_v47 = vmul.f32 0.125, %v5399_v4  ;;  %v998_v50 = vpop.xlane.xlu0 %997 }
0x149b   :  { %v1006_v17 = vmul.f32 0.125, %v998_v50 }
0x149c   :  { %5430 = vst.msk [vmem:[#allocation7] sm:$0x1] %vm5429_vm6, %v5421_v47 }
0x149d   :  { %1015 = vst.msk [vmem:[#allocation7 + $0x7] sm:$0x1] %vm1007_vm4, %v1006_v17  ;;  %v5402_v32 = vpop.xlane.xlu1 %5401  ;;  %vm19496_vm4 = vcmask 32800  }
0x149e   :  { %v5422_v9 = vmul.f32 0.125, %v5402_v32  ;;  %v5405_v44 = vpop.xlane.xlu0 %5404  ;;  %v10081_v32 = vmul.f32 %v10073_v23, %v10073_v23 }
0x149f   :  { %v5423_v6 = vmul.f32 0.125, %v5405_v44  ;;  %v31533_v44 = vld [vmem:[#allocation78_spill] sm:$0xff] }
0x14a0   :  { %5431 = vst.msk [vmem:[#allocation7 + $0x1] sm:$0x1] %vm5429_vm6, %v5422_v9  ;;  %v10075_v9 = vsub.f32 %v9915_v28, %v30588_v37  ;;  %v31538_v28 = vld [vmem:[#allocation80_spill] sm:$0xff] }
0x14a1   :  { %5432 = vst.msk [vmem:[#allocation7 + $0x2] sm:$0x1] %vm5429_vm6, %v5423_v6  ;;  %v5411_v34 = vpop.xlane.xlu1 %5410  ;;  %v31534_v6 = vld [vmem:[#allocation69_spill] sm:$0xff] }
0x14a2   :  { %v5425_v58 = vmul.f32 0.125, %v5411_v34  ;;  %v5408_v40 = vpop.xlane.xlu0 %5407  ;;  %v10067_v24 = vadd.f32 %v31534_v6, %v31533_v44  ;;  %v10083_v25 = vmul.f32 %v10075_v9, %v10075_v9 }
0x14a3   :  { %v5424_v56 = vmul.f32 0.125, %v5408_v40  ;;  %v31535_v40 = vld [vmem:[#allocation74_spill] sm:$0xff] }
0x14a4   :  { %5434 = vst.msk [vmem:[#allocation7 + $0x4] sm:$0x1] %vm5429_vm6, %v5425_v58  ;;  %v10077_v23 = vsub.f32 %v10067_v24, %v30597_v7  ;;  %v31542_v24 = vld [vmem:[#allocation81_spill] sm:$0xff] }
0x14a5   :  { %5433 = vst.msk [vmem:[#allocation7 + $0x3] sm:$0x1] %vm5429_vm6, %v5424_v56  ;;  %v5417_v4 = vpop.xlane.xlu1 %5416  ;;  %v31536_v56 = vld [vmem:[#allocation66_spill] sm:$0xff] }
0x14a6   :  { %v5427_v47 = vmul.f32 0.125, %v5417_v4  ;;  %v5414_v50 = vpop.xlane.xlu0 %5413  ;;  %v9687_v5 = vadd.f32 %v31536_v56, %v31535_v40  ;;  %v31537_v4 = vld [vmem:[#allocation89_spill] sm:$0xff]  ;;  %v10085_v56 = vmul.f32 %v10077_v23, %v10077_v23  ;;  %v31545_v23 = vld [vmem:[#allocation92_spill] sm:$0xff] }
0x14a7   :  { %v5426_v17 = vmul.f32 0.125, %v5414_v50  ;;  %v10095_v50 = vsel %vm974_vm5, %v10081_v32, 0.0 }
0x14a8   :  { %5436 = vst.msk [vmem:[#allocation7 + $0x6] sm:$0x1] %vm5429_vm6, %v5427_v47  ;;  %v14300_v47 = vadd.f32 %v31538_v28, %v31537_v4  ;;  %v10072_v6 = vsub.f32 %v9687_v5, %v30561_v35  ;;  %v31543_v28 = vld [vmem:[#allocation77_spill] sm:$0xff]  ;;  %v10107_v60 = vsel %vm974_vm5, %v10085_v56, 0.0 }
0x14a9   :  { %5435 = vst.msk [vmem:[#allocation7 + $0x5] sm:$0x1] %vm5429_vm6, %v5426_v17  ;;  %v10088_v46 = vpop.xlane.xlu1 %10087 }
0x14aa   :  { %v10110_v13 = vmul.f32 0.125, %v10088_v46  ;;  %v5420_v34 = vpop.xlane.xlu0 %5419  ;;  %v31539_v46 = vld [vmem:[#allocation75_spill] sm:$0xff]  ;;  %v14760_v9 = vsub.f32 %v14300_v47, %v30567_v10  ;;  %v10080_v32 = vmul.f32 %v10072_v6, %v10072_v6 }
0x14ab   :  { %v5428_v58 = vmul.f32 0.125, %v5420_v34  ;;  %v31540_v34 = vld [vmem:[#allocation68_spill] sm:$0xff] }
0x14ac   :  { %10119 = vst.msk [vmem:[#allocation7] sm:$0x1] %vm10118_vm12, %v10110_v13  ;;  %v9839_v40 = vadd.f32 %v31540_v34, %v31539_v46  ;;  %v31541_v13 = vld [vmem:[#allocation88_spill] sm:$0xff]  ;;  %v31546_v34 = vld [vmem:[#allocation83_spill] sm:$0xff] }
0x14ad   :  { %5437 = vst.msk [vmem:[#allocation7 + $0x7] sm:$0x1] %vm5429_vm6, %v5428_v58  ;;  %v14452_v14 = vadd.f32 %v31542_v24, %v31541_v13  ;;  %v10101_v58 = vsel %vm974_vm5, %v10083_v25, 0.0  ;;  %v14604_v47 = vadd.f32 %v31546_v34, %v31545_v23  ;;  %v31547_v25 = vld [vmem:[#allocation87_spill] sm:$0xff] }
0x14ae   :  { %v10091_v17 = vpop.xlane.xlu0 %10090  ;;  %10096 = vadd.xlane.f32.xlu0 %v10095_v50  ;;  %v10074_v4 = vsub.f32 %v9839_v40, %v30573_v2  ;;  %v31544_v50 = vld [vmem:[#allocation70_spill] sm:$0xff]  ;;  %v31548_v24 = vld [vmem:[#allocation79_spill] sm:$0xff]  ;;  %v10092_v40 = vsel %vm974_vm5, %v10080_v32, 0.0 }
0x14af   :  { %v10111_v44 = vmul.f32 0.125, %v10091_v17  ;;  %v9991_v5 = vadd.f32 %v31544_v50, %v31543_v28  ;;  %v14768_v17 = vmul.f32 %v14760_v9, %v14760_v9  ;;  %v14762_v46 = vsub.f32 %v14452_v14, %v30579_v49  ;;  %v31549_v9 = vld [vmem:[#allocation94_spill] sm:$0xff] }
0x14b0   :  { %v10082_v13 = vmul.f32 %v10074_v4, %v10074_v4  ;;  %v14224_v6 = vadd.f32 %v31548_v24, %v31547_v25  ;;  %v14764_v28 = vsub.f32 %v14604_v47, %v30588_v37  ;;  %v31550_v50 = vld [vmem:[#allocation86_spill] sm:$0xff]  ;;  %v31554_v24 = vld [vmem:[#allocation84_spill] sm:$0xff] }
0x14b1   :  { %10120 = vst.msk [vmem:[#allocation7 + $0x1] sm:$0x1] %vm10118_vm12, %v10111_v44  ;;  %v10076_v44 = vsub.f32 %v9991_v5, %v30592_v36  ;;  %v14756_v14 = vadd.f32 %v31550_v50, %v31549_v9  ;;  %v14778_v42 = vsel %vm974_vm5, %v14768_v17, 0.0  ;;  %v31551_v4 = vld [vmem:[#allocation90_spill] sm:$0xff]  ;;  %v31555_v50 = vld [vmem:[#allocation93_spill] sm:$0xff] }
0x14b2   :  { %10102 = vadd.xlane.f32.xlu0 %v10101_v58  ;;  %v14770_v58 = vmul.f32 %v14762_v46, %v14762_v46  ;;  %v31552_v5 = vld [vmem:[#allocation82_spill] sm:$0xff]  ;;  %v10098_v34 = vsel %vm974_vm5, %v10082_v13, 0.0  ;;  %v14772_v25 = vmul.f32 %v14764_v28, %v14764_v28  ;;  %v18989_v46 = vadd.f32 %v30324_v29, %v30436_v48 }
0x14b3   :  { %v10084_v56 = vmul.f32 %v10076_v44, %v10076_v44  ;;  %v14376_v23 = vadd.f32 %v31552_v5, %v31551_v4  ;;  %v14766_v32 = vsub.f32 %v14756_v14, %v30597_v7  ;;  %v31553_v44 = vld [vmem:[#allocation91_spill] sm:$0xff]  ;;  %v19141_v28 = vadd.f32 %v30326_v53, %v30434_v59  ;;  %v31556_v14 = vld [vmem:[#allocation85_spill] sm:$0xff] }
0x14b4   :  { %v14784_v47 = vsel %vm974_vm5, %v14770_v58, 0.0  ;;  %v19449_v13 = vsub.f32 %v18989_v46, %v30567_v10  ;;  %v14790_v29 = vsel %vm974_vm5, %v14772_v25, 0.0  ;;  %v19293_v10 = vadd.f32 %v30330_v0, %v30482_v18 }
0x14b5   :  { %v14774_v9 = vmul.f32 %v14766_v32, %v14766_v32 }
0x14b6   :  { %10108 = vadd.xlane.f32.xlu0 %v10107_v60  ;;  %v14759_v60 = vsub.f32 %v14224_v6, %v30552_v55  ;;  %v14528_v6 = vadd.f32 %v31554_v24, %v31553_v44  ;;  %v19457_v5 = vmul.f32 %v19449_v13, %v19449_v13  ;;  %v19453_v46 = vsub.f32 %v19293_v10, %v30588_v37 }
0x14b7   :  { %v14796_v53 = vsel %vm974_vm5, %v14774_v9, 0.0 }
0x14b8   :  { %v14767_v17 = vmul.f32 %v14759_v60, %v14759_v60  ;;  %v14763_v58 = vsub.f32 %v14528_v6, %v30573_v2  ;;  %v14680_v60 = vadd.f32 %v31556_v14, %v31555_v50  ;;  %v19467_v0 = vsel %vm974_vm5, %v19457_v5, 0.0  ;;  %v31557_v50 = vld [vmem:[#allocation22_spill] sm:$0xff]  ;;  %v31558_v14 = vld [vmem:[#allocation28_spill] sm:$0xff] }
0x14ba   :  { %10093 = vadd.xlane.f32.xlu1 %v10092_v40  ;;  %14779 = vadd.xlane.f32.xlu0 %v14778_v42  ;;  %v14761_v42 = vsub.f32 %v14376_v23, %v30561_v35  ;;  %v10104_v40 = vsel %vm974_vm5, %v10084_v56, 0.0  ;;  %v14775_v4 = vsel %vm974_vm5, %v14767_v17, 0.0  ;;  %v19451_v56 = vsub.f32 %v19141_v28, %v30579_v49 }
0x14bb   :  { %v14771_v59 = vmul.f32 %v14763_v58, %v14763_v58  ;;  %v14765_v23 = vsub.f32 %v14680_v60, %v30592_v36  ;;  %v19445_v49 = vadd.f32 %v30336_v16, %v30510_v3 }
0x14bc   :  { %v14769_v48 = vmul.f32 %v14761_v42, %v14761_v42  ;;  %v19459_v32 = vmul.f32 %v19451_v56, %v19451_v56  ;;  %v31561_v56 = vld [vmem:[#allocation32_spill] sm:$0xff] }
0x14bd   :  { %v14773_v18 = vmul.f32 %v14765_v23, %v14765_v23  ;;  %v14787_v17 = vsel %vm974_vm5, %v14771_v59, 0.0  ;;  %v19455_v42 = vsub.f32 %v19445_v49, %v30597_v7  ;;  %v31563_v23 = vld [vmem:[#allocation25_spill] sm:$0xff] }
0x14be   :  { %10099 = vadd.xlane.f32.xlu1 %v10098_v34  ;;  %14785 = vadd.xlane.f32.xlu0 %v14784_v47  ;;  %v18913_v34 = vadd.f32 %v30322_v57, %v30432_v8  ;;  %v14781_v25 = vsel %vm974_vm5, %v14769_v48, 0.0  ;;  %v19065_v57 = vadd.f32 %v30328_v31, %v30448_v63  ;;  %v19461_v8 = vmul.f32 %v19453_v46, %v19453_v46  ;;  %v31565_v46 = vld [vmem:[#allocation34_spill] sm:$0xff] }
0x14bf   :  { %v19473_v37 = vsel %vm974_vm5, %v19459_v32, 0.0  ;;  %v14793_v3 = vsel %vm974_vm5, %v14773_v18, 0.0  ;;  %v19463_v24 = vmul.f32 %v19455_v42, %v19455_v42 }
0x14c0   :  { %v19448_v47 = vsub.f32 %v18913_v34, %v30552_v55  ;;  %v19450_v44 = vsub.f32 %v19065_v57, %v30561_v35  ;;  %v19217_v55 = vadd.f32 %v30332_v51, %v30478_v26  ;;  %v19479_v6 = vsel %vm974_vm5, %v19461_v8, 0.0  ;;  %v31564_v34 = vld [vmem:[#allocation26_spill] sm:$0xff]  ;;  %v31568_v8 = vld [vmem:[#allocation29_spill] sm:$0xff] }
0x14c1   :  { %v19485_v9 = vsel %vm974_vm5, %v19463_v24, 0.0 }
0x14c2   :  { %10105 = vadd.xlane.f32.xlu1 %v10104_v40  ;;  %14791 = vadd.xlane.f32.xlu0 %v14790_v29  ;;  %v19456_v16 = vmul.f32 %v19448_v47, %v19448_v47  ;;  %v19458_v31 = vmul.f32 %v19450_v44, %v19450_v44  ;;  %v19452_v7 = vsub.f32 %v19217_v55, %v30573_v2 }
0x14c3   :  { %v19369_v40 = vadd.f32 %v30334_v1, %v30507_v43 }
0x14c4   :  { %v19464_v63 = vsel %vm974_vm5, %v19456_v16, 0.0  ;;  %v19460_v35 = vmul.f32 %v19452_v7, %v19452_v7  ;;  %v19470_v26 = vsel %vm974_vm5, %v19458_v31, 0.0  ;;  %v31569_v16 = vld [vmem:[#allocation31_spill] sm:$0xff] }
0x14c5   :  { %v19454_v51 = vsub.f32 %v19369_v40, %v30592_v36 }
0x14c6   :  { %14776 = vadd.xlane.f32.xlu1 %v14775_v4  ;;  %14797 = vadd.xlane.f32.xlu0 %v14796_v53  ;;  %v19476_v28 = vsel %vm974_vm5, %v19460_v35, 0.0  ;;  %v31562_v53 = vld [vmem:[#allocation33_spill] sm:$0xff] }
0x14c7   :  { %v19462_v13 = vmul.f32 %v19454_v51, %v19454_v51 }
0x14c9   :  { %v19482_v29 = vsel %vm974_vm5, %v19462_v13, 0.0 }
0x14ca   :  { %14782 = vadd.xlane.f32.xlu1 %v14781_v25  ;;  %19468 = vadd.xlane.f32.xlu0 %v19467_v0  ;;  %v31566_v0 = vld [vmem:[#allocation35_spill] sm:$0xff] }
0x14ce   :  { %14788 = vadd.xlane.f32.xlu1 %v14787_v17  ;;  %19474 = vadd.xlane.f32.xlu0 %v19473_v37 }
0x14d2   :  { %14794 = vadd.xlane.f32.xlu1 %v14793_v3  ;;  %19480 = vadd.xlane.f32.xlu0 %v19479_v6 }
0x14d6   :  { %19465 = vadd.xlane.f32.xlu1 %v19464_v63  ;;  %19486 = vadd.xlane.f32.xlu0 %v19485_v9 }
0x14da   :  { %19471 = vadd.xlane.f32.xlu1 %v19470_v26 }
0x14de   :  { %19477 = vadd.xlane.f32.xlu1 %v19476_v28 }
0x14e2   :  { %19483 = vadd.xlane.f32.xlu1 %v19482_v29 }
0x14f0   :  { %v21392_v1 = vpop.f32.mrf.mxu0 }
0x14f1   :  { %v30821_v43 = vsel %vm21281_vm13, %v21392_v1, 0.0  ;;  %v21499_v2 = vpop.f32.mrf.mxu1  ;;  %26848 = vmatprep.subr.msk.mxu0 %vm21281_vm13, %v21392_v1 }
0x14f2   :  { %v30823_v36 = vsel %vm21282_vm14, %v21499_v2, 0.0  ;;  %26853 = vmatprep.subr.msk.mxu1 %vm21282_vm14, %v21499_v2  ;;  %26849 = vmatpush3.msk.msra.mxu0 %vm21281_vm13, %v21392_v1  ;;  %v26812_v48 = vpop.f32.mrf.mxu0 }
0x14f3   :  { %v26817_v58 = vpop.f32.mrf.mxu1  ;;  %26854 = vmatpush3.msk.msra.mxu1 %vm21282_vm14, %v21499_v2  ;;  %26851 = vmatmul.mubr.msk.f32.vlgmr.msra.gmra.mxu0 %vm1624_vm3, %v31557_v50 }
0x14f4   :  { %26856 = vmatmul.mubr.msk.f32.vlgmr.msra.gmra.mxu1 %vm1624_vm3, %v31558_v14  ;;  %26860 = vmatprep.mubr.msk.f32.mxu0 %vm1624_vm3, %v31559_v62 }
0x14f5   :  { %26865 = vmatprep.mubr.msk.f32.mxu1 %vm1624_vm3, %v31560_v22  ;;  %v30877_v3 = vpop.permute.xlu0 %23491 }
0x14f7   :  { %v21713_v60 = vpop.f32.mrf.mxu1 }
0x14f8   :  { %v30834_v4 = vsel %vm21284_vm15, %v21713_v60, 0.0  ;;  %26863 = vmatprep.subr.msk.mxu1 %vm21284_vm15, %v21713_v60 }
0x14f9   :  { %26864 = vmatpush3.msk.msra.mxu1 %vm21284_vm15, %v21713_v60  ;;  %v26827_v5 = vpop.f32.mrf.mxu1 }
0x14fa   :  { %26866 = vmatmul.mubr.msk.f32.vlgmr.msra.gmra.mxu1 %vm1624_vm3, %v31561_v56 }
0x14fb   :  { %v21606_v10 = vpop.f32.mrf.mxu0  ;;  %26875 = vmatprep.mubr.msk.f32.mxu1 %vm1624_vm3, %v31562_v53 }
0x14fc   :  { %v30841_v59 = vsel %vm21283_vm7, %v21606_v10, 0.0  ;;  %26858 = vmatprep.subr.msk.mxu0 %vm21283_vm7, %v21606_v10 }
0x14fd   :  { %26859 = vmatpush3.msk.msra.mxu0 %vm21283_vm7, %v21606_v10  ;;  %v26822_v11 = vpop.f32.mrf.mxu0  ;;  %v30879_v44 = vpop.permute.xlu0 %23506 }
0x14fe   :  { %26861 = vmatmul.mubr.msk.f32.vlgmr.msra.gmra.mxu0 %vm1624_vm3, %v31563_v23 }
0x14ff   :  { %26870 = vmatprep.mubr.msk.f32.mxu0 %vm1624_vm3, %v31564_v34 }
0x1500   :  { %v21927_v25 = vpop.f32.mrf.mxu1 }
0x1501   :  { %v30848_v32 = vsel %vm21286_vm8, %v21927_v25, 0.0  ;;  %26873 = vmatprep.subr.msk.mxu1 %vm21286_vm8, %v21927_v25  ;;  %v30883_v24 = vpop.permute.xlu1 %23496 }
0x1502   :  { %26874 = vmatpush3.msk.msra.mxu1 %vm21286_vm8, %v21927_v25  ;;  %v26837_v21 = vpop.f32.mrf.mxu1 }
0x1503   :  { %26876 = vmatmul.mubr.msk.f32.vlgmr.msra.gmra.mxu1 %vm1624_vm3, %v31565_v46 }
0x1504   :  { %v21820_v49 = vpop.f32.mrf.mxu0  ;;  %26885 = vmatprep.mubr.msk.f32.mxu1 %vm1624_vm3, %v31566_v0 }
0x1505   :  { %v30855_v18 = vsel %vm21285_vm9, %v21820_v49, 0.0  ;;  %26868 = vmatprep.subr.msk.mxu0 %vm21285_vm9, %v21820_v49  ;;  %v30887_v63 = vpop.permute.xlu1 %23501 }
0x1506   :  { %v26832_v47 = vpop.f32.mrf.mxu0  ;;  %26869 = vmatpush3.msk.msra.mxu0 %vm21285_vm9, %v21820_v49  ;;  %v30881_v55 = vpop.permute.xlu0 %23516 }
0x1507   :  { %26871 = vmatmul.mubr.msk.f32.vlgmr.msra.gmra.mxu0 %vm1624_vm3, %v31567_v41 }
0x1508   :  { %v22034_v17 = vpop.f32.mrf.mxu0  ;;  %v22141_v57 = vpop.f32.mrf.mxu1  ;;  %26880 = vmatprep.mubr.msk.f32.mxu0 %vm1624_vm3, %v31568_v8 }
0x1509   :  { %v30863_v38 = vsel %vm21287_vm10, %v22034_v17, 0.0  ;;  %v30865_v42 = vsel %vm21288_vm11, %v22141_v57, 0.0  ;;  %26883 = vmatprep.subr.msk.mxu1 %vm21288_vm11, %v22141_v57  ;;  %26878 = vmatprep.subr.msk.mxu0 %vm21287_vm10, %v22034_v17  ;;  %v30890_v40 = vpop.permute.xlu1 %23511 }
0x150a   :  { %26879 = vmatpush3.msk.msra.mxu0 %vm21287_vm10, %v22034_v17  ;;  %26884 = vmatpush3.msk.msra.mxu1 %vm21288_vm11, %v22141_v57  ;;  %v26842_v37 = vpop.f32.mrf.mxu0  ;;  %v26847_v12 = vpop.f32.mrf.mxu1 }
0x150b   :  { %26881 = vmatmul.mubr.msk.f32.vlgmr.msra.gmra.mxu0 %vm1624_vm3, %v31569_v16  ;;  %26886 = vmatmul.mubr.msk.f32.vlgmr.msra.gmra.mxu1 %vm1624_vm3, %v31570_v45  ;;  %v30885_v6 = vpop.permute.xlu0 %23526  ;;  %vm14807_vm3 = vcmask 24600  }
0x150c   :  { %26888 = vmatprep.subr.mxu0 %v31272_v33  ;;  %26895 = vmatprep.subr.mxu1 %v31272_v33 }
0x150d   :  { %26892 = vmatprep.mubr.msk.f32.mxu0 %vm27182_vm1, %v31272_v33  ;;  %26899 = vmatprep.mubr.msk.f32.mxu1 %vm27182_vm1, %v31272_v33 }
0x1511   :  { %v30893_v51 = vpop.permute.xlu1 %23521 }
0x1537   :  { %v10097_v31 = vpop.xlane.xlu0 %10096 }
0x1538   :  { %v10113_v7 = vmul.f32 0.125, %v10097_v31 }
0x153a   :  { %10122 = vst.msk [vmem:[#allocation7 + $0x3] sm:$0x1] %vm10118_vm12, %v10113_v7 }
0x153b   :  { %v10103_v9 = vpop.xlane.xlu0 %10102 }
0x153c   :  { %v10115_v35 = vmul.f32 0.125, %v10103_v9 }
0x153e   :  { %10124 = vst.msk [vmem:[#allocation7 + $0x5] sm:$0x1] %vm10118_vm12, %v10115_v35 }
0x153f   :  { %v10109_v26 = vpop.xlane.xlu0 %10108 }
0x1540   :  { %v10117_v13 = vmul.f32 0.125, %v10109_v26 }
0x1542   :  { %10126 = vst.msk [vmem:[#allocation7 + $0x7] sm:$0x1] %vm10118_vm12, %v10117_v13 }
0x1543   :  { %v10094_v28 = vpop.xlane.xlu1 %10093  ;;  %v14780_v29 = vpop.xlane.xlu0 %14779 }
0x1544   :  { %v10112_v1 = vmul.f32 0.125, %v10094_v28  ;;  %v14800_v2 = vmul.f32 0.125, %v14780_v29 }
0x1546   :  { %10121 = vst.msk [vmem:[#allocation7 + $0x2] sm:$0x1] %vm10118_vm12, %v10112_v1 }
0x1547   :  { %14809 = vst.msk [vmem:[#allocation7 + $0x1] sm:$0x1] %vm14807_vm3, %v14800_v2  ;;  %v10100_v48 = vpop.xlane.xlu1 %10099  ;;  %v14786_v58 = vpop.xlane.xlu0 %14785 }
0x1548   :  { %v10114_v50 = vmul.f32 0.125, %v10100_v48  ;;  %v14802_v14 = vmul.f32 0.125, %v14786_v58 }
0x154a   :  { %10123 = vst.msk [vmem:[#allocation7 + $0x4] sm:$0x1] %vm10118_vm12, %v10114_v50 }
0x154b   :  { %14811 = vst.msk [vmem:[#allocation7 + $0x3] sm:$0x1] %vm14807_vm3, %v14802_v14  ;;  %v10106_v62 = vpop.xlane.xlu1 %10105  ;;  %v14792_v22 = vpop.xlane.xlu0 %14791 }
0x154c   :  { %v10116_v60 = vmul.f32 0.125, %v10106_v62  ;;  %v14804_v5 = vmul.f32 0.125, %v14792_v22 }
0x154e   :  { %10125 = vst.msk [vmem:[#allocation7 + $0x6] sm:$0x1] %vm10118_vm12, %v10116_v60 }
0x154f   :  { %14813 = vst.msk [vmem:[#allocation7 + $0x5] sm:$0x1] %vm14807_vm3, %v14804_v5  ;;  %v14777_v56 = vpop.xlane.xlu1 %14776  ;;  %v14798_v10 = vpop.xlane.xlu0 %14797  ;;  %v31571_v5 = vld [vmem:[#allocation95_spill] sm:$0xff] }
0x1550   :  { %v14799_v53 = vmul.f32 0.125, %v14777_v56  ;;  %v14806_v11 = vmul.f32 0.125, %v14798_v10 }
0x1552   :  { %14808 = vst.msk [vmem:[#allocation7] sm:$0x1] %vm14807_vm3, %v14799_v53  ;;  %14815 = vst.msk [vmem:[#allocation7 + $0x7] sm:$0x1] %vm14807_vm3, %v14806_v11 }
0x1553   :  { %v14783_v23 = vpop.xlane.xlu1 %14782  ;;  %v19469_v34 = vpop.xlane.xlu0 %19468 }
0x1554   :  { %v14801_v25 = vmul.f32 0.125, %v14783_v23  ;;  %v19489_v21 = vmul.f32 0.125, %v19469_v34 }
0x1556   :  { %14810 = vst.msk [vmem:[#allocation7 + $0x2] sm:$0x1] %vm14807_vm3, %v14801_v25 }
0x1557   :  { %19498 = vst.msk [vmem:[#allocation7 + $0x1] sm:$0x1] %vm19496_vm4, %v19489_v21  ;;  %v14789_v46 = vpop.xlane.xlu1 %14788  ;;  %v19475_v49 = vpop.xlane.xlu0 %19474  ;;  %v31573_v21 = vld [vmem:[#allocation97_spill] sm:$0xff] }
0x1558   :  { %v14803_v0 = vmul.f32 0.125, %v14789_v46  ;;  %v19491_v47 = vmul.f32 0.125, %v19475_v49 }
0x155a   :  { %14812 = vst.msk [vmem:[#allocation7 + $0x4] sm:$0x1] %vm14807_vm3, %v14803_v0 }
0x155b   :  { %19500 = vst.msk [vmem:[#allocation7 + $0x3] sm:$0x1] %vm19496_vm4, %v19491_v47  ;;  %v14795_v41 = vpop.xlane.xlu1 %14794  ;;  %v19481_v17 = vpop.xlane.xlu0 %19480  ;;  %v31574_v47 = vld [vmem:[#allocation98_spill] sm:$0xff] }
0x155c   :  { %v14805_v57 = vmul.f32 0.125, %v14795_v41  ;;  %v19493_v8 = vmul.f32 0.125, %v19481_v17 }
0x155e   :  { %14814 = vst.msk [vmem:[#allocation7 + $0x6] sm:$0x1] %vm14807_vm3, %v14805_v57  ;;  %v27095_v57 = vld [vmem:[#allocation2 + $0x18] sm:$0xff] }
0x155f   :  { %19502 = vst.msk [vmem:[#allocation7 + $0x5] sm:$0x1] %vm19496_vm4, %v19493_v8  ;;  %v19466_v37 = vpop.xlane.xlu1 %19465  ;;  %v19487_v16 = vpop.xlane.xlu0 %19486  ;;  %v31575_v8 = vld [vmem:[#allocation99_spill] sm:$0xff] }
0x1560   :  { %v19488_v45 = vmul.f32 0.125, %v19466_v37  ;;  %v19495_v12 = vmul.f32 0.125, %v19487_v16 }
0x1562   :  { %19497 = vst.msk [vmem:[#allocation7] sm:$0x1] %vm19496_vm4, %v19488_v45  ;;  %19504 = vst.msk [vmem:[#allocation7 + $0x7] sm:$0x1] %vm19496_vm4, %v19495_v12 }
0x1563   :  { %v19472_v31 = vpop.xlane.xlu1 %19471 }
0x1564   :  { %v19490_v7 = vmul.f32 0.125, %v19472_v31  ;;  %v31576_v31 = vld [vmem:[#allocation100_spill] sm:$0xff] }
0x1566   :  { %19499 = vst.msk [vmem:[#allocation7 + $0x2] sm:$0x1] %vm19496_vm4, %v19490_v7 }
0x1567   :  { %v19478_v9 = vpop.xlane.xlu1 %19477 }
0x1568   :  { %v19492_v35 = vmul.f32 0.125, %v19478_v9 }
0x156a   :  { %19501 = vst.msk [vmem:[#allocation7 + $0x4] sm:$0x1] %vm19496_vm4, %v19492_v35  ;;  %v27096_v35 = vld [vmem:[#allocation2 + $0x10] sm:$0xff] }
0x156b   :  { %v19484_v26 = vpop.xlane.xlu1 %19483 }
0x156c   :  { %v19494_v13 = vmul.f32 0.125, %v19484_v26 }
0x156e   :  { %19503 = vst.msk [vmem:[#allocation7 + $0x6] sm:$0x1] %vm19496_vm4, %v19494_v13  ;;  %v31577_v13 = vld [vmem:[#allocation101_spill] sm:$0xff] }
0x15b3   :  { %v26852_v28 = vpop.f32.mrf.mxu0 }
0x15b4   :  { %v22810_v29 = vmul.f32 0.0001, %v26852_v28  ;;  %v26857_v1 = vpop.f32.mrf.mxu1 }
0x15b5   :  { %v22812_v2 = vmul.f32 0.0001, %v26857_v1  ;;  %v22219_v48 = vpop.f32.mrf.mxu0 }
0x15b6   :  { %v22826_v58 = vsub.f32 %v29979_v54, %v22810_v29  ;;  %v22809_v50 = vmul.f32 0.0001, %v22219_v48  ;;  %v22294_v14 = vpop.f32.mrf.mxu1  ;;  %v27093_v54 = vld [vmem:[#allocation2] sm:$0xff] }
0x15b7   :  { %v22828_v62 = vsub.f32 %v29982_v61, %v22812_v2  ;;  %v22811_v22 = vmul.f32 0.0001, %v22294_v14  ;;  %v27094_v61 = vld [vmem:[#allocation2 + $0x8] sm:$0xff] }
0x15b8   :  { %v22825_v60 = vsub.f32 %v29985_v27, %v22809_v50  ;;  %26889 = vmatpush3.msra.mxu0 %v22826_v58  ;;  %v31572_v27 = vld [vmem:[#allocation96_spill] sm:$0xff]  ;;  %v31578_v2 = vld [vmem:[#allocation102_spill] sm:$0xff] }
0x15b9   :  { %v22827_v56 = vsub.f32 %v31571_v5, %v22811_v22  ;;  %26896 = vmatpush3.msra.mxu1 %v22828_v62  ;;  %26890 = vmatprep.subr.mxu0 %v31272_v33  ;;  %v27097_v62 = vld [vmem:[#allocation2 + $0x28] sm:$0xff]  ;;  %v31579_v22 = vld [vmem:[#allocation103_spill] sm:$0xff] }
0x15ba   :  { %v26867_v10 = vpop.f32.mrf.mxu1  ;;  %26897 = vmatprep.subr.mxu1 %v31272_v33  ;;  %26891 = vmatpush3.msra.mxu0 %v22825_v60 }
0x15bb   :  { %v22816_v53 = vmul.f32 0.0001, %v26867_v10  ;;  %26898 = vmatpush3.msra.mxu1 %v22827_v56  ;;  %26893 = vmatmul.mubr.msk.f32.vlgmr.msra.gmra.mxu0 %vm98_vm0, %v27093_v54  ;;  %v31580_v54 = vld [vmem:[#allocation104_spill] sm:$0xff] }
0x15bc   :  { %v22444_v11 = vpop.f32.mrf.mxu1  ;;  %26900 = vmatmul.mubr.msk.f32.vlgmr.msra.gmra.mxu1 %vm98_vm0, %v27094_v61  ;;  %26909 = vmatprep.subr.mxu1 %v31272_v33  ;;  %v31581_v61 = vld [vmem:[#allocation105_spill] sm:$0xff] }
0x15bd   :  { %v22832_v23 = vsub.f32 %v31572_v27, %v22816_v53  ;;  %v22815_v34 = vmul.f32 0.0001, %v22444_v11  ;;  %26913 = vmatprep.mubr.msk.f32.mxu1 %vm27182_vm1, %v31272_v33  ;;  %26902 = vmatprep.subr.mxu0 %v31272_v33 }
0x15be   :  { %v26862_v25 = vpop.f32.mrf.mxu0  ;;  %26906 = vmatprep.mubr.msk.f32.mxu0 %vm27182_vm1, %v31272_v33 }
0x15bf   :  { %v22831_v46 = vsub.f32 %v31573_v21, %v22815_v34  ;;  %v22814_v49 = vmul.f32 0.0001, %v26862_v25  ;;  %26910 = vmatpush3.msra.mxu1 %v22832_v23  ;;  %v27098_v25 = vld [vmem:[#allocation2 + $0x20] sm:$0xff]  ;;  %v31582_v21 = vld [vmem:[#allocation106_spill] sm:$0xff] }
0x15c0   :  { %v22369_v0 = vpop.f32.mrf.mxu0  ;;  %26911 = vmatprep.subr.mxu1 %v31272_v33 }
0x15c1   :  { %v22830_v41 = vsub.f32 %v31574_v47, %v22814_v49  ;;  %v22813_v17 = vmul.f32 0.0001, %v22369_v0  ;;  %26912 = vmatpush3.msra.mxu1 %v22831_v46  ;;  %v31583_v49 = vld [vmem:[#allocation107_spill] sm:$0xff] }
0x15c2   :  { %26914 = vmatmul.mubr.msk.f32.vlgmr.msra.gmra.mxu1 %vm98_vm0, %v27095_v57  ;;  %26923 = vmatprep.subr.mxu1 %v31272_v33  ;;  %v27099_v47 = vld [vmem:[#allocation2 + $0x30] sm:$0xff]  ;;  %v22760_v57 = vsel %vm370_vm2, %v30823_v36, 0.0  ;;  %v22788_v36 = vsel %vm370_vm2, %v30848_v32, 0.0  ;;  %v22802_v32 = vsel %vm370_vm2, %v30865_v42, 0.0 }
0x15c3   :  { %v22829_v37 = vsub.f32 %v31575_v8, %v22813_v17  ;;  %v26877_v16 = vpop.f32.mrf.mxu1  ;;  %26903 = vmatpush3.msra.mxu0 %v22830_v41  ;;  %26927 = vmatprep.mubr.msk.f32.mxu1 %vm27182_vm1, %v31272_v33  ;;  %v27100_v41 = vld [vmem:[#allocation2 + $0x38] sm:$0xff]  ;;  %v22753_v17 = vsel %vm370_vm2, %v30821_v43, 0.0 }
0x15c4   :  { %v22820_v45 = vmul.f32 0.0001, %v26877_v16  ;;  %26904 = vmatprep.subr.mxu0 %v31272_v33  ;;  %v22754_v8 = vrot.slane %v22753_v17, 4 }
0x15c5   :  { %v22594_v12 = vpop.f32.mrf.mxu1  ;;  %26905 = vmatpush3.msra.mxu0 %v22829_v37  ;;  %v22761_v37 = vrot.slane %v22760_v57, 4 }
0x15c6   :  { %v22836_v7 = vsub.f32 %v31576_v31, %v22820_v45  ;;  %v22819_v9 = vmul.f32 0.0001, %v22594_v12  ;;  %26907 = vmatmul.mubr.msk.f32.vlgmr.msra.gmra.mxu0 %vm98_vm0, %v27096_v35  ;;  %26916 = vmatprep.subr.mxu0 %v31272_v33  ;;  %v22755_v16 = vadd.f32 %v22754_v8, %v22753_v17  ;;  %v22774_v45 = vsel %vm370_vm2, %v30834_v4, 0.0 }
0x15c7   :  { %v26872_v26 = vpop.f32.mrf.mxu0  ;;  %26920 = vmatprep.mubr.msk.f32.mxu0 %vm27182_vm1, %v31272_v33  ;;  %v22762_v12 = vadd.f32 %v22761_v37, %v22760_v57  ;;  %v22775_v31 = vrot.slane %v22774_v45, 4  ;;  %v22781_v4 = vsel %vm370_vm2, %v30855_v18, 0.0  ;;  %v22803_v18 = vrot.slane %v22802_v32, 4  ;;  %v31586_v37 = vld [vmem:[#allocation11_spill] sm:$0xff] }
0x15c8   :  { %v22835_v28 = vsub.f32 %v31577_v13, %v22819_v9  ;;  %v22818_v29 = vmul.f32 0.0001, %v26872_v26  ;;  %26924 = vmatpush3.msra.mxu1 %v22836_v7  ;;  %v22756_v7 = vrot.slane %v22755_v16, 2  ;;  %v22767_v9 = vsel %vm370_vm2, %v30841_v59, 0.0 }
0x15c9   :  { %v22519_v1 = vpop.f32.mrf.mxu0  ;;  %26925 = vmatprep.subr.mxu1 %v31272_v33  ;;  %v22763_v35 = vrot.slane %v22762_v12, 2  ;;  %v22776_v26 = vadd.f32 %v22775_v31, %v22774_v45  ;;  %v22768_v13 = vrot.slane %v22767_v9, 4  ;;  %v22782_v59 = vrot.slane %v22781_v4, 4 }
0x15ca   :  { %v22834_v48 = vsub.f32 %v31578_v2, %v22818_v29  ;;  %v22817_v58 = vmul.f32 0.0001, %v22519_v1  ;;  %26926 = vmatpush3.msra.mxu1 %v22835_v28  ;;  %v22757_v28 = vadd.f32 %v22756_v7, %v22755_v16  ;;  %v22789_v2 = vrot.slane %v22788_v36, 4 }
0x15cb   :  { %v26882_v50 = vpop.f32.mrf.mxu0  ;;  %v26887_v14 = vpop.f32.mrf.mxu1  ;;  %26928 = vmatmul.mubr.msk.f32.vlgmr.msra.gmra.mxu1 %vm98_vm0, %v27097_v62  ;;  %26937 = vmatprep.subr.mxu1 %v31272_v33  ;;  %v22764_v43 = vadd.f32 %v22763_v35, %v22762_v12  ;;  %v22777_v29 = vrot.slane %v22776_v26, 2  ;;  %v22769_v1 = vadd.f32 %v22768_v13, %v22767_v9  ;;  %v22857_v9 = vmul.f32 0.0001, %v30689_v52 }
0x15cc   :  { %v22833_v60 = vsub.f32 %v31579_v22, %v22817_v58  ;;  %v22822_v5 = vmul.f32 0.0001, %v26882_v50  ;;  %v22824_v56 = vmul.f32 0.0001, %v26887_v14  ;;  %26917 = vmatpush3.msra.mxu0 %v22834_v48  ;;  %26941 = vmatprep.mubr.msk.f32.mxu1 %vm27182_vm1, %v31272_v33  ;;  %v22758_v48 = vrot.slane %v22757_v28, 1 }
0x15cd   :  { %v22669_v10 = vpop.f32.mrf.mxu0  ;;  %v22744_v53 = vpop.f32.mrf.mxu1  ;;  %26918 = vmatprep.subr.mxu0 %v31272_v33  ;;  %v22765_v58 = vrot.slane %v22764_v43, 1  ;;  %v22778_v50 = vadd.f32 %v22777_v29, %v22776_v26  ;;  %v22770_v14 = vrot.slane %v22769_v1, 2  ;;  %v22790_v62 = vadd.f32 %v22789_v2, %v22788_v36 }
0x15ce   :  { %v22838_v11 = vsub.f32 %v31580_v54, %v22822_v5  ;;  %v22840_v27 = vsub.f32 %v31581_v61, %v22824_v56  ;;  %v22821_v23 = vmul.f32 0.0001, %v22669_v10  ;;  %v22823_v34 = vmul.f32 0.0001, %v22744_v53  ;;  %26919 = vmatpush3.msra.mxu0 %v22833_v60 }
0x15cf   :  { %26921 = vmatmul.mubr.msk.f32.vlgmr.msra.gmra.mxu0 %vm98_vm0, %v27098_v25  ;;  %26930 = vmatprep.subr.mxu0 %v31272_v33  ;;  %v22759_v22 = vadd.f32 %v22758_v48, %v22757_v28  ;;  %v22795_v60 = vsel %vm370_vm2, %v30863_v38, 0.0  ;;  %v22766_v5 = vadd.f32 %v22765_v58, %v22764_v43  ;;  %v22771_v56 = vadd.f32 %v22770_v14, %v22769_v1  ;;  %v31587_v43 = vld [vmem:[#allocation110_spill] sm:$0xff] }
0x15d0   :  { %v22837_v46 = vsub.f32 %v31582_v21, %v22821_v23  ;;  %v22839_v0 = vsub.f32 %v31583_v49, %v22823_v34  ;;  %26931 = vmatpush3.msra.mxu0 %v22838_v11  ;;  %26938 = vmatpush3.msra.mxu1 %v22840_v27  ;;  %v22779_v10 = vrot.slane %v22778_v50, 1  ;;  %v22791_v53 = vrot.slane %v22790_v62, 2  ;;  %v31584_v49 = vld [vmem:[#allocation108_spill] sm:$0xff] }
0x15d1   :  { %26932 = vmatprep.subr.mxu0 %v31272_v33  ;;  %26939 = vmatprep.subr.mxu1 %v31272_v33  ;;  %v22783_v54 = vadd.f32 %v22782_v59, %v22781_v4  ;;  %v22796_v11 = vrot.slane %v22795_v60, 4  ;;  %v22841_v61 = vmul.f32 0.0001, %v22759_v22  ;;  %v22842_v27 = vmul.f32 0.0001, %v22766_v5  ;;  %v31588_v59 = vld [vmem:[#allocation111_spill] sm:$0xff] }
0x15d2   :  { %26933 = vmatpush3.msra.mxu0 %v22837_v46  ;;  %26934 = vmatprep.mubr.msk.f32.mxu0 %vm27182_vm1, %v31272_v33  ;;  %v22780_v23 = vadd.f32 %v22779_v10, %v22778_v50  ;;  %v22772_v34 = vrot.slane %v22771_v56, 1  ;;  %v22792_v25 = vadd.f32 %v22791_v53, %v22790_v62  ;;  %v22804_v38 = vadd.f32 %v22803_v18, %v22802_v32  ;;  %v31590_v5 = vld [vmem:[#allocation113_spill] sm:$0xff] }
0x15d3   :  { %26940 = vmatpush3.msra.mxu1 %v22839_v0  ;;  %26935 = vmatmul.mubr.msk.f32.vlgmr.msra.gmra.mxu0 %vm98_vm0, %v27099_v47  ;;  %v22784_v21 = vrot.slane %v22783_v54, 2  ;;  %v22797_v46 = vadd.f32 %v22796_v11, %v22795_v60  ;;  %v22849_v0 = vsub.f32 %v31584_v49, %v22841_v61  ;;  %v31585_v47 = vld [vmem:[#allocation109_spill] sm:$0xff]  ;;  %v22858_v13 = vmul.f32 0.0001, %v30691_v19  ;;  %v31589_v19 = vld [vmem:[#allocation112_spill] sm:$0xff] }
0x15d4   :  { %26942 = vmatmul.mubr.msk.f32.vlgmr.msra.gmra.mxu1 %vm98_vm0, %v27100_v41  ;;  %26944 = vmatprep.subr.mxu0 %v31272_v33  ;;  %v22850_v41 = vsub.f32 %v31585_v47, %v22842_v27  ;;  %v22844_v17 = vmul.f32 0.0001, %v22780_v23  ;;  %v22773_v42 = vadd.f32 %v22772_v34, %v22771_v56  ;;  %v22793_v45 = vrot.slane %v22792_v25, 1 }
0x15d5   :  { %26949 = vmatprep.subr.mxu1 %v31272_v33  ;;  %26946 = vmatprep.mubr.msk.f32.mxu0 %vm27182_vm1, %v31272_v33  ;;  %v22785_v57 = vadd.f32 %v22784_v21, %v22783_v54  ;;  %v22798_v8 = vrot.slane %v22797_v46, 2  ;;  %v22892_v16 = vrot.slane %v22849_v0, %v31586_v37  ;;  %v22805_v12 = vrot.slane %v22804_v38, 2  ;;  %v31591_v21 = vld [vmem:[#allocation114_spill] sm:$0xff] }
0x15d6   :  { %26951 = vmatprep.mubr.msk.f32.mxu1 %vm27182_vm1, %v31272_v33  ;;  %v22896_v7 = vrot.slane %v22850_v41, %v31586_v37  ;;  %v22852_v36 = vsub.f32 %v31587_v43, %v22844_v17  ;;  %v22843_v1 = vmul.f32 0.0001, %v22773_v42  ;;  %v22794_v58 = vadd.f32 %v22793_v45, %v22792_v25 }
0x15d7   :  { %v22799_v2 = vadd.f32 %v22798_v8, %v22797_v46  ;;  %v22786_v50 = vrot.slane %v22785_v57, 1  ;;  %v22806_v14 = vadd.f32 %v22805_v12, %v22804_v38  ;;  %v22865_v52 = vsub.f32 %v31588_v59, %v22857_v9  ;;  %v31592_v8 = vld [vmem:[#allocation115_spill] sm:$0xff] }
0x15d8   :  { %v22904_v22 = vrot.slane %v22852_v36, %v31586_v37  ;;  %v22851_v60 = vsub.f32 %v31589_v19, %v22843_v1  ;;  %v22866_v32 = vsub.f32 %v31590_v5, %v22858_v13  ;;  %v22846_v10 = vmul.f32 0.0001, %v22794_v58 }
0x15d9   :  { %v22787_v53 = vadd.f32 %v22786_v50, %v22785_v57  ;;  %v22800_v54 = vrot.slane %v22799_v2, 1  ;;  %v22807_v61 = vrot.slane %v22806_v14, 1  ;;  %v22860_v18 = vmul.f32 0.0001, %v30696_v30 }
0x15da   :  { %v22900_v34 = vrot.slane %v22851_v60, %v31586_v37  ;;  %v22854_v46 = vsub.f32 %v31591_v21, %v22846_v10  ;;  %v22859_v41 = vmul.f32 0.0001, %v30694_v39  ;;  %v31598_v60 = vld [vmem:[#allocation119_spill] sm:$0xff]  ;;  %vm24185_vm0 = vcmask 41000  }
0x15db   :  { %v22845_v49 = vmul.f32 0.0001, %v22787_v53  ;;  %v22801_v0 = vadd.f32 %v22800_v54, %v22799_v2  ;;  %v22808_v30 = vadd.f32 %v22807_v61, %v22806_v14  ;;  %v22868_v47 = vsub.f32 %v30156_v15, %v22860_v18  ;;  %v31596_v2 = vld [vmem:[#allocation118_spill] sm:$0xff]  ;;  %v31600_v54 = vld [vmem:[#allocation12_spill] sm:$0xff] }
0x15dc   :  { %v22912_v57 = vrot.slane %v22854_v46, %v31586_v37  ;;  %v22867_v39 = vsub.f32 %v30173_v20, %v22859_v41  ;;  %v27102_v41 = vld [vmem:[#allocation5 + $0x1] sm:$0x1] }
0x15dd   :  { %v22847_v45 = vmul.f32 0.0001, %v22801_v0  ;;  %v22848_v15 = vmul.f32 0.0001, %v22808_v30  ;;  %v27101_v30 = vld [vmem:[#allocation5] sm:$0x1] }
0x167b   :  { %v22987_v31 = vpop.f32.mrf.mxu0 }
0x167c   :  { %v22988_v35 = vadd.f32 %v22987_v31, %v22892_v16  ;;  %v23057_v26 = vpop.f32.mrf.mxu1  ;;  %v22853_v16 = vsub.f32 %v31592_v8, %v22845_v49 }
0x167d   :  { %v23058_v28 = vadd.f32 %v23057_v26, %v22896_v7  ;;  %v26894_v29 = vpop.f32.mrf.mxu0  ;;  %v31593_v7 = vld [vmem:[#allocation13_spill] sm:$0xff] }
0x167e   :  { %v23481_v48 = vmax.f32 %v22988_v35, 0.0  ;;  %v26901_v4 = vpop.f32.mrf.mxu1  ;;  %v22862_v9 = vmul.f32 0.0001, %v31593_v7  ;;  %v22908_v13 = vrot.slane %v22853_v16, %v31586_v37  ;;  %v31595_v29 = vld [vmem:[#allocation117_spill] sm:$0xff] }
0x167f   :  { %v23482_v62 = vmax.f32 %v23058_v28, 0.0  ;;  %v31594_v28 = vld [vmem:[#allocation116_spill] sm:$0xff]  ;;  %v22856_v1 = vsub.f32 %v31595_v29, %v22848_v15  ;;  %v27103_v15 = vld [vmem:[#allocation5 + $0x3] sm:$0x1] }
0x1680   :  { %26945 = vmatpush3.xpose.msk.msra.mxu0 %vm370_vm2, %v23481_v48  ;;  %v22855_v43 = vsub.f32 %v31594_v28, %v22847_v45  ;;  %v22870_v48 = vsub.f32 %v31596_v2, %v22862_v9  ;;  %v31597_v4 = vld [vmem:[#allocation20_spill] sm:$0xff] }
0x1681   :  { %26950 = vmatpush3.xpose.msk.msra.mxu1 %vm370_vm2, %v23482_v62  ;;  %26954 = vmatprep.subr.mxu0 %v31272_v33  ;;  %v22861_v58 = vmul.f32 0.0001, %v31597_v4 }
0x1682   :  { %v23197_v56 = vpop.f32.mrf.mxu1  ;;  %26959 = vmatprep.subr.mxu1 %v31272_v33  ;;  %v22916_v62 = vrot.slane %v22855_v43, %v31586_v37 }
0x1683   :  { %v23198_v11 = vadd.f32 %v23197_v56, %v22904_v22  ;;  %26947 = vmatmul.mubr.msk.f32.vlgmr.msra.gmra.mxu0 %vm370_vm2, %v22865_v52  ;;  %v22920_v52 = vrot.slane %v22856_v1, %v31586_v37  ;;  %v22869_v5 = vsub.f32 %v31598_v60, %v22861_v58  ;;  %v27105_v1 = vld [vmem:[#allocation5 + $0x5] sm:$0x1]  ;;  %v27106_v58 = vld [vmem:[#allocation5 + $0x4] sm:$0x1]  ;;  %v27107_v60 = vld [vmem:[#allocation5 + $0x6] sm:$0x1] }
0x1684   :  { %26952 = vmatmul.mubr.msk.f32.vlgmr.msra.gmra.mxu1 %vm370_vm2, %v22866_v32  ;;  %v26915_v27 = vpop.f32.mrf.mxu1  ;;  %26956 = vmatprep.mubr.msk.f32.mxu0 %vm27182_vm1, %v31272_v33  ;;  %v31599_v32 = vld [vmem:[#allocation15_spill] sm:$0xff] }
0x1685   :  { %v23484_v23 = vmax.f32 %v23198_v11, 0.0  ;;  %26961 = vmatprep.mubr.msk.f32.mxu1 %vm27182_vm1, %v31272_v33  ;;  %v22863_v56 = vmul.f32 0.0001, %v31599_v32  ;;  %v22864_v11 = vmul.f32 0.0001, %v31600_v54  ;;  %v31601_v27 = vld [vmem:[#allocation38_spill] sm:$0xff] }
0x1686   :  { %v23127_v25 = vpop.f32.mrf.mxu0 }
0x1687   :  { %v23128_v38 = vadd.f32 %v23127_v25, %v22900_v34  ;;  %26960 = vmatpush3.xpose.msk.msra.mxu1 %vm370_vm2, %v23484_v23  ;;  %v22871_v23 = vsub.f32 %v31601_v27, %v22863_v56  ;;  %v31602_v34 = vld [vmem:[#allocation37_spill] sm:$0xff] }
0x1688   :  { %v26908_v17 = vpop.f32.mrf.mxu0  ;;  %26969 = vmatprep.subr.mxu1 %v31272_v33  ;;  %v22872_v25 = vsub.f32 %v31602_v34, %v22864_v11 }
0x1689   :  { %v23483_v42 = vmax.f32 %v23128_v38, 0.0 }
0x168a   :  { %26962 = vmatmul.mubr.msk.f32.vlgmr.msra.gmra.mxu1 %vm370_vm2, %v22868_v47 }
0x168b   :  { %v23337_v12 = vpop.f32.mrf.mxu1  ;;  %26955 = vmatpush3.xpose.msk.msra.mxu0 %vm370_vm2, %v23483_v42  ;;  %26971 = vmatprep.mubr.msk.f32.mxu1 %vm27182_vm1, %v31272_v33 }
0x168c   :  { %v23338_v31 = vadd.f32 %v23337_v12, %v22912_v57  ;;  %26964 = vmatprep.subr.mxu0 %v31272_v33 }
0x168d   :  { %v26929_v35 = vpop.f32.mrf.mxu1 }
0x168e   :  { %v23486_v26 = vmax.f32 %v23338_v31, 0.0  ;;  %26957 = vmatmul.mubr.msk.f32.vlgmr.msra.gmra.mxu0 %vm370_vm2, %v22867_v39  ;;  %v27104_v35 = vld [vmem:[#allocation5 + $0x2] sm:$0x1] }
0x168f   :  { %v23267_v36 = vpop.f32.mrf.mxu0  ;;  %26966 = vmatprep.mubr.msk.f32.mxu0 %vm27182_vm1, %v31272_v33 }
0x1690   :  { %v23268_v20 = vadd.f32 %v23267_v36, %v22908_v13  ;;  %26970 = vmatpush3.xpose.msk.msra.mxu1 %vm370_vm2, %v23486_v26 }
0x1691   :  { %v26922_v50 = vpop.f32.mrf.mxu0  ;;  %26979 = vmatprep.subr.mxu1 %v31272_v33 }
0x1692   :  { %v23485_v14 = vmax.f32 %v23268_v20, 0.0 }
0x1693   :  { %v23407_v59 = vpop.f32.mrf.mxu0  ;;  %26972 = vmatmul.mubr.msk.f32.vlgmr.msra.gmra.mxu1 %vm370_vm2, %v22870_v48 }
0x1694   :  { %v23408_v22 = vadd.f32 %v23407_v59, %v22916_v62  ;;  %v23477_v19 = vpop.f32.mrf.mxu1  ;;  %26965 = vmatpush3.xpose.msk.msra.mxu0 %vm370_vm2, %v23485_v14  ;;  %26981 = vmatprep.mubr.msk.f32.mxu1 %vm27182_vm1, %v31272_v33 }
0x1695   :  { %v23478_v10 = vadd.f32 %v23477_v19, %v22920_v52  ;;  %26974 = vmatprep.subr.mxu0 %v31272_v33  ;;  %v26936_v53 = vpop.f32.mrf.mxu0 }
0x1696   :  { %v23487_v37 = vmax.f32 %v23408_v22, 0.0  ;;  %v26943_v61 = vpop.f32.mrf.mxu1 }
0x1697   :  { %v23488_v18 = vmax.f32 %v23478_v10, 0.0  ;;  %26967 = vmatmul.mubr.msk.f32.vlgmr.msra.gmra.mxu0 %vm370_vm2, %v22869_v5 }
0x1698   :  { %26975 = vmatpush3.xpose.msk.msra.mxu0 %vm370_vm2, %v23487_v37  ;;  %26976 = vmatprep.mubr.msk.f32.mxu0 %vm27182_vm1, %v31272_v33 }
0x1699   :  { %26980 = vmatpush3.xpose.msk.msra.mxu1 %vm370_vm2, %v23488_v18 }
0x169b   :  { %26977 = vmatmul.mubr.msk.f32.vlgmr.msra.gmra.mxu0 %vm370_vm2, %v22871_v23 }
0x169c   :  { %26982 = vmatmul.mubr.msk.f32.vlgmr.msra.gmra.mxu1 %vm370_vm2, %v22872_v25 }
0x1743   :  { %v23601_v21 = vpop.f32.mrf.mxu0 }
0x1744   :  { %v23602_v46 = vadd.f32 %v23601_v21, %v30877_v3  ;;  %v23677_v49 = vpop.f32.mrf.mxu1 }
0x1745   :  { %v23678_v0 = vadd.f32 %v23677_v49, %v30883_v24  ;;  %v26948_v38 = vpop.f32.mrf.mxu0 }
0x1746   :  { %v24137_v47 = vsub.f32 %v23602_v46, %v27101_v30  ;;  %v26953_v33 = vpop.f32.mrf.mxu1 }
0x1747   :  { %v24138_v17 = vsub.f32 %v23678_v0, %v27102_v41 }
0x1748   :  { %v24145_v42 = vmul.f32 %v24137_v47, %v24137_v47 }
0x1749   :  { %v24146_v57 = vmul.f32 %v24138_v17, %v24138_v17 }
0x174a   :  { %v23829_v8 = vpop.f32.mrf.mxu1  ;;  %v24153_v16 = vsel %vm974_vm5, %v24145_v42, 0.0 }
0x174b   :  { %v23830_v45 = vadd.f32 %v23829_v8, %v30879_v44  ;;  %v24156_v12 = vsel %vm974_vm5, %v24146_v57, 0.0  ;;  %24154 = vadd.xlane.f32.xlu1 %v24153_v16 }
0x174c   :  { %v26963_v3 = vpop.f32.mrf.mxu1  ;;  %24157 = vadd.xlane.f32.xlu0 %v24156_v12 }
0x174d   :  { %v24140_v24 = vsub.f32 %v23830_v45, %v27103_v15 }
0x174e   :  { %v23753_v39 = vpop.f32.mrf.mxu0 }
0x174f   :  { %v24148_v31 = vmul.f32 %v24140_v24, %v24140_v24  ;;  %v23754_v7 = vadd.f32 %v23753_v39, %v30887_v63 }
0x1750   :  { %v26958_v9 = vpop.f32.mrf.mxu0 }
0x1751   :  { %v24139_v26 = vsub.f32 %v23754_v7, %v27104_v35  ;;  %v24162_v13 = vsel %vm974_vm5, %v24148_v31, 0.0 }
0x1752   :  { %24163 = vadd.xlane.f32.xlu0 %v24162_v13 }
0x1753   :  { %v24147_v28 = vmul.f32 %v24139_v26, %v24139_v26  ;;  %v23981_v43 = vpop.f32.mrf.mxu1 }
0x1754   :  { %v23982_v44 = vadd.f32 %v23981_v43, %v30881_v55 }
0x1755   :  { %v26973_v36 = vpop.f32.mrf.mxu1  ;;  %v24159_v29 = vsel %vm974_vm5, %v24147_v28, 0.0 }
0x1756   :  { %v24142_v20 = vsub.f32 %v23982_v44, %v27105_v1  ;;  %24160 = vadd.xlane.f32.xlu1 %v24159_v29 }
0x1757   :  { %v23905_v2 = vpop.f32.mrf.mxu0 }
0x1758   :  { %v24150_v48 = vmul.f32 %v24142_v20, %v24142_v20  ;;  %v23906_v63 = vadd.f32 %v23905_v2, %v30890_v40  ;;  %v27108_v40 = vld [vmem:[#allocation5 + $0x7] sm:$0x1] }
0x1759   :  { %v26968_v4 = vpop.f32.mrf.mxu0 }
0x175a   :  { %v24141_v50 = vsub.f32 %v23906_v63, %v27106_v58  ;;  %v24168_v14 = vsel %vm974_vm5, %v24150_v48, 0.0 }
0x175b   :  { %24169 = vadd.xlane.f32.xlu0 %v24168_v14  ;;  %v24057_v62 = vpop.f32.mrf.mxu0 }
0x175c   :  { %v24149_v59 = vmul.f32 %v24141_v50, %v24141_v50  ;;  %v24133_v52 = vpop.f32.mrf.mxu1  ;;  %v24058_v55 = vadd.f32 %v24057_v62, %v30893_v51 }
0x175d   :  { %v24134_v22 = vadd.f32 %v24133_v52, %v30885_v6  ;;  %v26978_v19 = vpop.f32.mrf.mxu0 }
0x175e   :  { %v24143_v5 = vsub.f32 %v24058_v55, %v27107_v60  ;;  %v26983_v32 = vpop.f32.mrf.mxu1  ;;  %v24165_v56 = vsel %vm974_vm5, %v24149_v59, 0.0 }
0x175f   :  { %v24144_v10 = vsub.f32 %v24134_v22, %v27108_v40  ;;  %24166 = vadd.xlane.f32.xlu1 %v24165_v56 }
0x1760   :  { %v24151_v53 = vmul.f32 %v24143_v5, %v24143_v5 }
0x1761   :  { %v24152_v54 = vmul.f32 %v24144_v10, %v24144_v10 }
0x1762   :  { %v24171_v11 = vsel %vm974_vm5, %v24151_v53, 0.0 }
0x1763   :  { %v24174_v37 = vsel %vm974_vm5, %v24152_v54, 0.0  ;;  %24172 = vadd.xlane.f32.xlu1 %v24171_v11 }
0x1764   :  { %24175 = vadd.xlane.f32.xlu0 %v24174_v37 }
0x17d4   :  { %v24155_v51 = vpop.xlane.xlu1 %24154 }
0x17d5   :  { %v24158_v6 = vpop.xlane.xlu0 %24157  ;;  %v24177_v61 = vmul.f32 0.125, %v24155_v51 }
0x17d6   :  { %v24178_v18 = vmul.f32 0.125, %v24158_v6 }
0x17d7   :  { %24186 = vst.msk [vmem:[#allocation7] sm:$0x1] %vm24185_vm0, %v24177_v61 }
0x17d8   :  { %24187 = vst.msk [vmem:[#allocation7 + $0x1] sm:$0x1] %vm24185_vm0, %v24178_v18 }
0x17db   :  { %v24164_v27 = vpop.xlane.xlu0 %24163 }
0x17dc   :  { %v24180_v23 = vmul.f32 0.125, %v24164_v27 }
0x17de   :  { %24189 = vst.msk [vmem:[#allocation7 + $0x3] sm:$0x1] %vm24185_vm0, %v24180_v23 }
0x17df   :  { %v24161_v34 = vpop.xlane.xlu1 %24160 }
0x17e0   :  { %v24179_v25 = vmul.f32 0.125, %v24161_v34 }
0x17e2   :  { %24188 = vst.msk [vmem:[#allocation7 + $0x2] sm:$0x1] %vm24185_vm0, %v24179_v25 }
0x17e4   :  { %v24170_v21 = vpop.xlane.xlu0 %24169 }
0x17e5   :  { %v24182_v46 = vmul.f32 0.125, %v24170_v21 }
0x17e7   :  { %24191 = vst.msk [vmem:[#allocation7 + $0x5] sm:$0x1] %vm24185_vm0, %v24182_v46 }
0x17e8   :  { %v24167_v49 = vpop.xlane.xlu1 %24166 }
0x17e9   :  { %v24181_v0 = vmul.f32 0.125, %v24167_v49 }
0x17eb   :  { %24190 = vst.msk [vmem:[#allocation7 + $0x4] sm:$0x1] %vm24185_vm0, %v24181_v0 }
0x17ec   :  { %v24173_v38 = vpop.xlane.xlu1 %24172 }
0x17ed   :  { %v24176_v30 = vpop.xlane.xlu0 %24175  ;;  %v24183_v47 = vmul.f32 0.125, %v24173_v38 }
0x17ee   :  { %v24184_v33 = vmul.f32 0.125, %v24176_v30 }
0x17ef   :  { %24192 = vst.msk [vmem:[#allocation7 + $0x6] sm:$0x1] %vm24185_vm0, %v24183_v47 }
0x17f0   :  { %24193 = vst.msk [vmem:[#allocation7 + $0x7] sm:$0x1] %vm24185_vm0, %v24184_v33 }
0x17f1   :  { %27160 = shalt.err (!%p27157_p0)
}
0x17f2   :  { %24205 = dma.vmem_to_hbm [thread:$0]  %s24200_s27, 128, %s31088_s5, [#allocation4], %s27179_s28, %s27179_s28, %s27180_s29  }
0x17f3   :  { %27173 = dma.done.wait [#allocation4], 128  }
0x17f4   :  { %27174 = vsyncadd [#allocation4], 4294967168 }
0x17f5   :  { %24209 = vsyncpa [#allocation3], 1 }
0x17f6   :  { %24210 = vsyncpa [#allocation6], 1 }
0x17f7   :  { %24211 = vsyncpa [#allocation4], 1 }

</bundles_post_ra>
